<compile_context>
chip_gen: v6e
topology: v6e:2x2x1
jax: 0.10.0
libtpu: 0.0.40
codegen_flags: <defaults>
</compile_context>

<pallas_src>
import functools
import math

import numpy as np
import jax
import jax.numpy as jnp
from jax.experimental import pallas as pl
from jax.experimental.pallas import tpu as pltpu


# ---------------------------------------------------------------------------
# helpers
# ---------------------------------------------------------------------------
def _tile_and_pad(dim, target, aligns):
    """Pick a tile for `dim`; return (tile, padded_dim) with padded_dim % tile == 0.

    Preference order: full dim (if <= target); largest divisor of dim that is a
    multiple of aligns[0] (MXU-friendly 256 on lane dims), then aligns[1], ...;
    otherwise an aligned tile of ~target with zero padding.  Never falls back to
    an oversized full-dimension block (VMEM hazard, notably on v7x's 64 MiB).
    """
    if dim <= target:
        return dim, dim
    for a in aligns:
        t = (target // a) * a
        while t >= a:
            if dim % t == 0:
                return t, dim
            t -= a
    a = aligns[0]
    t = max((target // a) * a, a)
    padded = ((dim + t - 1) // t) * t
    return t, padded


def _erf_approx(x):
    # Abramowitz & Stegun 7.1.26, max abs error ~1.5e-7 (matches erf-GELU to f32
    # noise).  Only exp / mul / add / where -> lowers cleanly on Mosaic (EUP + VPU).
    a1, a2, a3, a4, a5 = 0.254829592, -0.284496736, 1.421413741, -1.453152027, 1.061405429
    p = 0.3275911
    z = jnp.abs(x)
    t = 1.0 / (1.0 + p * z)
    poly = ((((a5 * t + a4) * t + a3) * t + a2) * t + a1) * t
    y = 1.0 - poly * jnp.exp(-z * z)
    return jnp.where(x >= 0, y, -y)


def _gelu_exact(x):
    return 0.5 * x * (1.0 + _erf_approx(x * 0.7071067811865476))


def _adaptive_pool_matrix(in_size, out_size):
    """P (out_size, in_size): exact nn.AdaptiveAvgPool1d averaging operator."""
    P = np.zeros((out_size, in_size), dtype=np.float32)
    for o in range(out_size):
        s = (o * in_size) // out_size
        e = -((-(o + 1) * in_size) // out_size)  # ceil
        P[o, s:e] = 1.0 / (e - s)
    return P


def _nbytes(a):
    return int(np.prod(a.shape)) * jnp.dtype(a.dtype).itemsize


_VMEM_LIMIT = 48 * 1024 * 1024  # fits comfortably under v7x's 64 MiB physical VMEM


# ---------------------------------------------------------------------------
# K1: Linear + exact GELU (bf16 operands, f32 accumulation, bf16 output)
# ---------------------------------------------------------------------------
def _linear_kernel(x_ref, w_ref, b_ref, o_ref, acc_ref, *, apply_gelu):
    k = pl.program_id(2)

    @pl.when(k == 0)
    def _():
        acc_ref[...] = jnp.zeros_like(acc_ref)

    acc_ref[...] += jnp.dot(x_ref[...], w_ref[...],
                            preferred_element_type=jnp.float32)

    @pl.when(k == pl.num_programs(2) - 1)
    def _():
        y = acc_ref[...] + b_ref[...].astype(jnp.float32)
        if apply_gelu:
            y = _gelu_exact(y)
        o_ref[...] = y.astype(o_ref.dtype)


def _linear(x, w, b, *, tk, tn, apply_gelu, out_dtype, tm_target=2304):
    M, K = x.shape
    _, N_ = w.shape

    tm, Mp = _tile_and_pad(M, tm_target, (16,))   # 16: bf16 sublane min tile
    if Mp != M:
        x = jnp.pad(x, ((0, Mp - M), (0, 0)))

    grid = (Mp // tm, N_ // tn, K // tk)
    cost = pl.CostEstimate(
        flops=2 * Mp * K * N_,
        transcendentals=(Mp * N_) if apply_gelu else 0,
        bytes_accessed=_nbytes(x) * (N_ // tn) + _nbytes(w) * (Mp // tm)
        + Mp * N_ * jnp.dtype(out_dtype).itemsize,
    )

    out = pl.pallas_call(
        functools.partial(_linear_kernel, apply_gelu=apply_gelu),
        out_shape=jax.ShapeDtypeStruct((Mp, N_), out_dtype),
        grid_spec=pltpu.PrefetchScalarGridSpec(
            num_scalar_prefetch=0,
            grid=grid,
            in_specs=[
                pl.BlockSpec((tm, tk), lambda i, j, k: (i, k)),
                pl.BlockSpec((tk, tn), lambda i, j, k: (k, j)),
                pl.BlockSpec((1, tn), lambda i, j, k: (0, j)),
            ],
            out_specs=pl.BlockSpec((tm, tn), lambda i, j, k: (i, j)),
            scratch_shapes=[pltpu.VMEM((tm, tn), jnp.float32)],
        ),
        compiler_params=pltpu.CompilerParams(
            dimension_semantics=("parallel", "parallel", "arbitrary"),
            vmem_limit_bytes=_VMEM_LIMIT),
        cost_estimate=cost,
    )(x, w, b)

    if Mp != M:
        out = out[:M]
    return out


# ---------------------------------------------------------------------------
# K2: Linear (bf16 operands, f32 acc) fused with adaptive avg-pool + depthwise
#     3x3 conv + conv-bias + residual in the epilogue (f32).
# ---------------------------------------------------------------------------
def _linear_pool_peg_kernel(h_ref, w_ref, b_ref, q_ref, a_ref, wdw_ref, bdw_ref,
                            o_ref, acc_ref, *, out_tokens):
    k = pl.program_id(2)

    @pl.when(k == 0)
    def _():
        acc_ref[...] = jnp.zeros_like(acc_ref)

    acc_ref[...] += jnp.dot(h_ref[...], w_ref[...],
                            preferred_element_type=jnp.float32)

    @pl.when(k == pl.num_programs(2) - 1)
    def _():
        y = acc_ref[...] + b_ref[...].astype(jnp.float32)             # (576, tn) f32
        pooled = jnp.dot(q_ref[...], y,
                         preferred_element_type=jnp.float32)          # (144, tn)
        # All 9 zero-padded-shift operators applied in ONE matmul (K=144, M=1296),
        # then scaled per-channel on the VPU -> no 144x144 micro-matmuls.
        shifted = jnp.dot(a_ref[...], pooled,
                          preferred_element_type=jnp.float32)         # (1296, tn)
        out = pooled + bdw_ref[...].astype(jnp.float32)               # residual + bias
        for t in range(9):
            w_t = wdw_ref[t:t + 1, :].astype(jnp.float32)             # (1, tn)
            out = out + w_t * shifted[t * out_tokens:(t + 1) * out_tokens, :]
        o_ref[...] = out.astype(o_ref.dtype)


def _linear_pool_peg(h, w, b, Q, A, w_dw, b_dw, *, batch, n_tokens, out_tokens,
                     tk, tn, out_dtype):
    M, K = h.shape            # M = batch * n_tokens, K = ouc (padded)
    N_ = w.shape[1]
    grid = (batch, N_ // tn, K // tk)

    cost = pl.CostEstimate(
        flops=2 * M * K * N_
        + 2 * batch * N_ * (out_tokens * n_tokens + 9 * out_tokens * out_tokens),
        transcendentals=0,
        bytes_accessed=_nbytes(h) * (N_ // tn) + _nbytes(w) * batch
        + _nbytes(Q) + _nbytes(A)
        + batch * out_tokens * N_ * jnp.dtype(out_dtype).itemsize,
    )

    return pl.pallas_call(
        functools.partial(_linear_pool_peg_kernel, out_tokens=out_tokens),
        out_shape=jax.ShapeDtypeStruct((batch * out_tokens, N_), out_dtype),
        grid_spec=pltpu.PrefetchScalarGridSpec(
            num_scalar_prefetch=0,
            grid=grid,
            in_specs=[
                pl.BlockSpec((n_tokens, tk), lambda i, j, k: (i, k)),
                pl.BlockSpec((tk, tn), lambda i, j, k: (k, j)),
                pl.BlockSpec((1, tn), lambda i, j, k: (0, j)),
                pl.BlockSpec((out_tokens, n_tokens), lambda i, j, k: (0, 0)),
                pl.BlockSpec((9 * out_tokens, out_tokens), lambda i, j, k: (0, 0)),
                pl.BlockSpec((9, tn), lambda i, j, k: (0, j)),
                pl.BlockSpec((1, tn), lambda i, j, k: (0, j)),
            ],
            out_specs=pl.BlockSpec((out_tokens, tn), lambda i, j, k: (i, j)),
            scratch_shapes=[pltpu.VMEM((n_tokens, tn), jnp.float32)],
        ),
        compiler_params=pltpu.CompilerParams(
            dimension_semantics=("parallel", "parallel", "arbitrary"),
            vmem_limit_bytes=_VMEM_LIMIT),
        cost_estimate=cost,
    )(h, w, b, Q, A, w_dw, b_dw)


# ---------------------------------------------------------------------------
# full projector
# ---------------------------------------------------------------------------
def ldpnetv2_projector(x, params, *, pool_hw=12, use_bf16=True):
    """x: (B, N, inc) with N = h*h  ->  (B, pool_hw*pool_hw, ouc)."""
    B, N, inc = x.shape
    h = int(round(math.sqrt(N)))
    assert h * h == N, "token count must be a perfect square"
    ouc = params["w1"].shape[1]
    out_tokens = pool_hw * pool_hw
    out_dtype = x.dtype
    cdt = jnp.bfloat16 if use_bf16 else x.dtype

    # --- tile / pad channel dims (256-aligned preferred, 128 fallback, then pad) ---
    t_inc, inc_p = _tile_and_pad(inc, 512, (256, 128))
    t_ouc, ouc_p = _tile_and_pad(ouc, 512, (256, 128))

    w1, b1 = params["w1"], params["b1"]
    w2, b2 = params["w2"], params["b2"]
    w_dw = params["w_dw"].reshape(9, ouc)
    b_dw = params["b_dw"]

    if inc_p != inc:
        x = jnp.pad(x, ((0, 0), (0, 0), (0, inc_p - inc)))
        w1 = jnp.pad(w1, ((0, inc_p - inc), (0, 0)))
    if ouc_p != ouc:
        w1 = jnp.pad(w1, ((0, 0), (0, ouc_p - ouc)))
        b1 = jnp.pad(b1, (0, ouc_p - ouc))
        w2 = jnp.pad(w2, ((0, ouc_p - ouc), (0, ouc_p - ouc)))
        b2 = jnp.pad(b2, (0, ouc_p - ouc))
        w_dw = jnp.pad(w_dw, ((0, 0), (0, ouc_p - ouc)))
        b_dw = jnp.pad(b_dw, (0, ouc_p - ouc))

    # --- K1: FeatureIRLayer first half (Linear + GELU), bf16 intermediate ---
    x2 = x.reshape(B * N, inc_p).astype(cdt)
    hbuf = _linear(x2, w1.astype(cdt), b1.reshape(1, ouc_p).astype(jnp.float32),
                   tk=t_inc, tn=t_ouc, apply_gelu=True, out_dtype=cdt)

    # --- host-precomputed pool / shift operators (static shapes) ---
    P = _adaptive_pool_matrix(h, pool_hw)                              # (12, h)
    Q = jnp.asarray(np.kron(P, P), dtype=jnp.float32)                  # (144, h*h)
    A = jnp.asarray(np.concatenate(
        [np.kron(np.eye(pool_hw, k=dy - 1, dtype=np.float32),
                 np.eye(pool_hw, k=dx - 1, dtype=np.float32))
         for dy in range(3) for dx in range(3)], axis=0),
        dtype=jnp.float32)                                             # (9*144, 144)

    # --- K2: second Linear fused with TokenDownLayer + PosInjectLayer ---
    out2 = _linear_pool_peg(
        hbuf, w2.astype(cdt), b2.reshape(1, ouc_p).astype(jnp.float32),
        Q, A, w_dw.astype(jnp.float32), b_dw.reshape(1, ouc_p).astype(jnp.float32),
        batch=B, n_tokens=N, out_tokens=out_tokens,
        tk=t_ouc, tn=t_ouc, out_dtype=out_dtype)                       # (B*144, ouc_p)

    out = out2.reshape(B, out_tokens, ouc_p)
    if ouc_p != ouc:
        out = out[..., :ouc]
    return out


# ---------------------------------------------------------------------------
# pure-JAX reference (mirrors the PyTorch module) for validation
# ---------------------------------------------------------------------------
def _reference(x, params, pool_hw=12):
    B, N, _ = x.shape
    h = int(round(math.sqrt(N)))
    C = params["w1"].shape[1]
    with jax.default_matmul_precision("highest"):
        y = jax.nn.gelu(x @ params["w1"] + params["b1"], approximate=False)
        y = y @ params["w2"] + params["b2"]                          # (B, N, C)
        yr = jnp.transpose(y, (0, 2, 1)).reshape(B, C, h, h)
        P = jnp.asarray(_adaptive_pool_matrix(h, pool_hw))
        pooled = jnp.einsum("pi,bcij,qj->bcpq", P, yr, P)            # (B, C, 12, 12)
    pad = jnp.pad(pooled, ((0, 0), (0, 0), (1, 1), (1, 1)))
    conv = jnp.zeros_like(pooled)
    for dy in range(3):
        for dx in range(3):
            conv = conv + params["w_dw"][dy, dx][None, :, None, None] * \
                   pad[:, :, dy:dy + pool_hw, dx:dx + pool_hw]
    out = conv + params["b_dw"][None, :, None, None] + pooled
    return jnp.transpose(out.reshape(B, C, pool_hw * pool_hw), (0, 2, 1))


if __name__ == "__main__":
    key = jax.random.PRNGKey(0)
    B, h, inc, ouc = 2, 24, 32, 64          # small but shape-consistent (N = 24*24 = 576)
    N = h * h
    ks = jax.random.split(key, 7)

    x = jax.random.normal(ks[0], (B, N, inc), dtype=jnp.float32)
    params = {
        "w1": jax.random.normal(ks[1], (inc, ouc), jnp.float32) * (1.0 / math.sqrt(inc)),
        "b1": jax.random.normal(ks[2], (ouc,), jnp.float32) * 0.1,
        "w2": jax.random.normal(ks[3], (ouc, ouc), jnp.float32) * (1.0 / math.sqrt(ouc)),
        "b2": jax.random.normal(ks[4], (ouc,), jnp.float32) * 0.1,
        "w_dw": jax.random.normal(ks[5], (3, 3, ouc), jnp.float32) * 0.1,
        "b_dw": jax.random.normal(ks[6], (ouc,), jnp.float32) * 0.1,
    }

    out = ldpnetv2_projector(x, params)
    out = jax.block_until_ready(out)

    ref = _reference(x, params)
    assert out.shape == (B, 144, ouc) and out.dtype == x.dtype
    max_err = float(jnp.max(jnp.abs(out - ref)))
    scale = max(1.0, float(jnp.max(jnp.abs(ref))))
    # bf16 MXU operands with f32 accumulation -> relative tolerance vs exact-f32 ref
    assert max_err < 4e-2 * scale, f"max abs err {max_err} (ref scale {scale})"

    print("KERNEL_OK")
</pallas_src>

<mosaic_0001>
module attributes {stable_mosaic.version = 11 : i64} {
  func.func @_linear_kernel(%arg0: i32, %arg1: i32, %arg2: i32, %arg3: memref<1152x32xbf16, #tpu.memory_space<vmem>>, %arg4: memref<32x64xbf16, #tpu.memory_space<vmem>>, %arg5: memref<1x64xf32, #tpu.memory_space<vmem>>, %arg6: memref<1152x64xbf16, #tpu.memory_space<vmem>>, %arg7: memref<1152x64xf32, #tpu.memory_space<vmem>>) attributes {dimension_semantics = [#tpu.dimension_semantics<parallel>, #tpu.dimension_semantics<parallel>, #tpu.dimension_semantics<arbitrary>], iteration_bounds = array<i64: 1, 1, 1>, scalar_prefetch = 0 : i64, scratch_operands = 1 : i64, tpu.core_type = #tpu.core_type<tc>, window_params = [{transform_indices = @transform_0, window_bounds = array<i64: 1152, 32>}, {transform_indices = @transform_1, window_bounds = array<i64: 32, 64>}, {transform_indices = @transform_2, window_bounds = array<i64: 1, 64>}, {transform_indices = @transform_3, window_bounds = array<i64: 1152, 64>}]} {
    %c0_i32 = arith.constant 0 : i32
    %0 = arith.cmpi eq, %arg2, %c0_i32 : i32
    %1 = arith.extui %0 : i1 to i32
    %c0_i32_0 = arith.constant 0 : i32
    %2 = arith.cmpi ne, %1, %c0_i32_0 : i32
    scf.if %2 {
      %cst_10 = arith.constant 0.000000e+00 : f32
      %12 = vector.broadcast %cst_10 : f32 to vector<1152x64xf32>
      %c0_11 = arith.constant 0 : index
      %c0_12 = arith.constant 0 : index
      %13 = vector.load %arg7[%c0_11, %c0_12] : memref<1152x64xf32, #tpu.memory_space<vmem>>, vector<1152x64xf32>
      tpu.vector_store %arg7[%c0_11, %c0_12], %12 {strides = array<i32>} : memref<1152x64xf32, #tpu.memory_space<vmem>>, vector<1152x64xf32>,
    } else {
    }
    %c0 = arith.constant 0 : index
    %c0_1 = arith.constant 0 : index
    %3 = vector.load %arg7[%c0, %c0_1] : memref<1152x64xf32, #tpu.memory_space<vmem>>, vector<1152x64xf32>
    %c0_2 = arith.constant 0 : index
    %c0_3 = arith.constant 0 : index
    %4 = vector.load %arg3[%c0_2, %c0_3] : memref<1152x32xbf16, #tpu.memory_space<vmem>>, vector<1152x32xbf16>
    %c0_4 = arith.constant 0 : index
    %c0_5 = arith.constant 0 : index
    %5 = vector.load %arg4[%c0_4, %c0_5] : memref<32x64xbf16, #tpu.memory_space<vmem>>, vector<32x64xbf16>
    %cst = arith.constant dense<0.000000e+00> : vector<1152x64xf32>
    %6 = tpu.matmul %4, %5, %cst {dimension_numbers = #tpu.dot_dimension_numbers<[1], [0], [0], [1], [0, 0, 1, 1], [], []>} : vector<1152x32xbf16>, vector<32x64xbf16>, vector<1152x64xf32> -> vector<1152x64xf32>
    %7 = arith.addf %3, %6 : vector<1152x64xf32>
    %c0_6 = arith.constant 0 : index
    %c0_7 = arith.constant 0 : index
    %8 = vector.load %arg7[%c0_6, %c0_7] : memref<1152x64xf32, #tpu.memory_space<vmem>>, vector<1152x64xf32>
    tpu.vector_store %arg7[%c0_6, %c0_7], %7 {strides = array<i32>} : memref<1152x64xf32, #tpu.memory_space<vmem>>, vector<1152x64xf32>,
    %c0_i32_8 = arith.constant 0 : i32
    %9 = arith.cmpi eq, %arg2, %c0_i32_8 : i32
    %10 = arith.extui %9 : i1 to i32
    %c0_i32_9 = arith.constant 0 : i32
    %11 = arith.cmpi ne, %10, %c0_i32_9 : i32
    scf.if %11 {
      %c0_10 = arith.constant 0 : index
      %c0_11 = arith.constant 0 : index
      %12 = vector.load %arg7[%c0_10, %c0_11] : memref<1152x64xf32, #tpu.memory_space<vmem>>, vector<1152x64xf32>
      %c0_12 = arith.constant 0 : index
      %c0_13 = arith.constant 0 : index
      %13 = vector.load %arg5[%c0_12, %c0_13] : memref<1x64xf32, #tpu.memory_space<vmem>>, vector<1x64xf32>
      %14 = vector.broadcast %13 : vector<1x64xf32> to vector<1152x64xf32>
      %15 = arith.addf %12, %14 : vector<1152x64xf32>
      %cst_14 = arith.constant 5.000000e-01 : f32
      %16 = vector.broadcast %cst_14 : f32 to vector<1152x64xf32>
      %17 = arith.mulf %16, %15 : vector<1152x64xf32>
      %cst_15 = arith.constant 0.707106769 : f32
      %18 = vector.broadcast %cst_15 : f32 to vector<1152x64xf32>
      %19 = arith.mulf %15, %18 : vector<1152x64xf32>
      %20 = math.absf %19 : vector<1152x64xf32>
      %cst_16 = arith.constant 0.327591091 : f32
      %21 = vector.broadcast %cst_16 : f32 to vector<1152x64xf32>
      %22 = arith.mulf %21, %20 : vector<1152x64xf32>
      %cst_17 = arith.constant 1.000000e+00 : f32
      %23 = vector.broadcast %cst_17 : f32 to vector<1152x64xf32>
      %24 = arith.addf %23, %22 : vector<1152x64xf32>
      %cst_18 = arith.constant 1.000000e+00 : f32
      %25 = vector.broadcast %cst_18 : f32 to vector<1152x64xf32>
      %26 = arith.divf %25, %24 : vector<1152x64xf32>
      %cst_19 = arith.constant 1.06140542 : f32
      %27 = vector.broadcast %cst_19 : f32 to vector<1152x64xf32>
      %28 = arith.mulf %27, %26 : vector<1152x64xf32>
      %cst_20 = arith.constant -1.45315206 : f32
      %29 = vector.broadcast %cst_20 : f32 to vector<1152x64xf32>
      %30 = arith.addf %28, %29 : vector<1152x64xf32>
      %31 = arith.mulf %30, %26 : vector<1152x64xf32>
      %cst_21 = arith.constant 1.42141378 : f32
      %32 = vector.broadcast %cst_21 : f32 to vector<1152x64xf32>
      %33 = arith.addf %31, %32 : vector<1152x64xf32>
      %34 = arith.mulf %33, %26 : vector<1152x64xf32>
      %cst_22 = arith.constant -0.284496725 : f32
      %35 = vector.broadcast %cst_22 : f32 to vector<1152x64xf32>
      %36 = arith.addf %34, %35 : vector<1152x64xf32>
      %37 = arith.mulf %36, %26 : vector<1152x64xf32>
      %cst_23 = arith.constant 0.254829586 : f32
      %38 = vector.broadcast %cst_23 : f32 to vector<1152x64xf32>
      %39 = arith.addf %37, %38 : vector<1152x64xf32>
      %40 = arith.mulf %39, %26 : vector<1152x64xf32>
      %cst_24 = arith.constant 0.000000e+00 : f32
      %41 = vector.broadcast %cst_24 : f32 to vector<1152x64xf32>
      %42 = arith.subf %41, %20 : vector<1152x64xf32>
      %43 = arith.mulf %42, %20 : vector<1152x64xf32>
      %44 = math.exp %43 : vector<1152x64xf32>
      %45 = arith.mulf %40, %44 : vector<1152x64xf32>
      %cst_25 = arith.constant 1.000000e+00 : f32
      %46 = vector.broadcast %cst_25 : f32 to vector<1152x64xf32>
      %47 = arith.subf %46, %45 : vector<1152x64xf32>
      %cst_26 = arith.constant 0.000000e+00 : f32
      %48 = vector.broadcast %cst_26 : f32 to vector<1152x64xf32>
      %49 = arith.cmpf oge, %19, %48 : vector<1152x64xf32>
      %cst_27 = arith.constant 0.000000e+00 : f32
      %50 = vector.broadcast %cst_27 : f32 to vector<1152x64xf32>
      %51 = arith.subf %50, %47 : vector<1152x64xf32>
      %52 = arith.select %49, %47, %51 : vector<1152x64xi1>, vector<1152x64xf32>
      %cst_28 = arith.constant 1.000000e+00 : f32
      %53 = vector.broadcast %cst_28 : f32 to vector<1152x64xf32>
      %54 = arith.addf %53, %52 : vector<1152x64xf32>
      %55 = arith.mulf %17, %54 : vector<1152x64xf32>
      %56 = arith.truncf %55 : vector<1152x64xf32> to vector<1152x64xbf16>
      %c0_29 = arith.constant 0 : index
      %c0_30 = arith.constant 0 : index
      %57 = vector.load %arg6[%c0_29, %c0_30] : memref<1152x64xbf16, #tpu.memory_space<vmem>>, vector<1152x64xbf16>
      tpu.vector_store %arg6[%c0_29, %c0_30], %56 {strides = array<i32>} : memref<1152x64xbf16, #tpu.memory_space<vmem>>, vector<1152x64xbf16>,
    } else {
    }
    return
  }
  func.func @transform_0(%arg0: i32, %arg1: i32, %arg2: i32) -> (i32, i32) {
    %c0_i32 = arith.constant 0 : i32
    return %arg0, %arg2 : i32, i32
  }
  func.func @transform_1(%arg0: i32, %arg1: i32, %arg2: i32) -> (i32, i32) {
    %c0_i32 = arith.constant 0 : i32
    return %arg2, %arg1 : i32, i32
  }
  func.func @transform_2(%arg0: i32, %arg1: i32, %arg2: i32) -> (i32, i32) {
    %c0_i32 = arith.constant 0 : i32
    %c0_i32_0 = arith.constant 0 : i32
    return %c0_i32, %arg1 : i32, i32
  }
  func.func @transform_3(%arg0: i32, %arg1: i32, %arg2: i32) -> (i32, i32) {
    %c0_i32 = arith.constant 0 : i32
    return %arg0, %arg1 : i32, i32
  }
}

</mosaic_0001>

<bundles_post_ra>
// kernel: tpu_custom_call.1
= control target key start
LH: loop header
LB: loop body
LE: loop exit
PB: predicated region body
PF: predicated region fallthrough
CT: control target
= control target key end

     0   :  { %vm828_vm0 = vcmask 261120   ;;  %vm19_vm1 = vcmask 523264   ;;  %v8175_v13 = vmov 0.0   ;;  %vm6705_vm5 = vcmask 519168   ;;  %s12753_s1 = inlined_call_operand.vmem [shape: bf16[32,64], index: 1, kind: input, shape index: {}]   ;;  %s12754_s0 = inlined_call_operand.vmem [shape: bf16[1152,32], index: 0, kind: input, shape index: {}]   ;;  %s12755_s2 = inlined_call_operand.vmem [shape: f32[1,64], index: 2, kind: input, shape index: {}]   ;;  %s12756_s3 = inlined_call_operand.vmem [shape: bf16[1152,64], index: 3, kind: output, shape index: {}]  }
   0x1   :  { %v7516_v0 = vld [vmem:[%s12753_s1 + $0x8] sm:$0xff]   ;;  %v7517_v1 = vld [vmem:[%s12753_s1] sm:$0xff]   ;;  %v7522_v6 = vld [vmem:[%s12754_s0 + $0x10] sm:$0xff]   ;;  %22 = vst.msk [vmem:[#allocation2 + $0x10] sm:$0xff] %vm19_vm1, %v8175_v13 }
   0x2   :  { %7363 = vmatprep.subr.bf16.mxu0 %v7516_v0  ;;  %7511 = vmatprep.subr.bf16.mxu1 %v7516_v0  ;;  %v7518_v2 = vld [vmem:[%s12754_s0] sm:$0xff]   ;;  %v7520_v4 = vld [vmem:[%s12754_s0 + $0x8] sm:$0xff]   ;;  %v7523_v7 = vld [vmem:[%s12754_s0 + $0x130] sm:$0xff]   ;;  %20 = vst.msk [vmem:[#allocation2] sm:$0xff] %vm19_vm1, %v8175_v13 }
   0x3   :  { %7364 = vmatpush3.bf16.msra.mxu0 %v7516_v0  ;;  %7513 = vmatpush3.bf16.msra.mxu1 %v7516_v0  ;;  %v7519_v3 = vld [vmem:[%s12754_s0 + $0x120] sm:$0xff]   ;;  %v7521_v5 = vld [vmem:[%s12754_s0 + $0x128] sm:$0xff]   ;;  %v7524_v8 = vld [vmem:[%s12754_s0 + $0x18] sm:$0xff]   ;;  %21 = vst.msk [vmem:[#allocation2 + $0x8] sm:$0xff] %vm19_vm1, %v8175_v13 }
   0x4   :  { %7365 = vmatprep.subr.bf16.mxu0 %v7517_v1  ;;  %7512 = vmatprep.subr.bf16.mxu1 %v7517_v1  ;;  %v7525_v9 = vld [vmem:[%s12754_s0 + $0x138] sm:$0xff]   ;;  %v7526_v10 = vld [vmem:[%s12754_s0 + $0x20] sm:$0xff]   ;;  %v8245_v12 = vld [vmem:[%s12754_s0 + $0x28] sm:$0xff]   ;;  %23 = vst.msk [vmem:[#allocation2 + $0x18] sm:$0xff] %vm19_vm1, %v8175_v13 }
   0x5   :  { %7367 = vmatprep.mubr.msk.bf16.mxu0 %vm828_vm0, %v7518_v2  ;;  %7439 = vmatprep.mubr.msk.bf16.mxu1 %vm828_vm0, %v7519_v3  ;;  %v7527_v11 = vld [vmem:[%s12754_s0 + $0x140] sm:$0xff]   ;;  %24 = vst.msk [vmem:[#allocation2 + $0x20] sm:$0xff] %vm19_vm1, %v8175_v13  ;;  %25 = vst.msk [vmem:[#allocation2 + $0x28] sm:$0xff] %vm19_vm1, %v8175_v13  ;;  %v7529_v14 = vld [vmem:[%s12754_s0 + $0x148] sm:$0xff]  }
   0x6   :  { %26 = vst.msk [vmem:[#allocation2 + $0x30] sm:$0xff] %vm19_vm1, %v8175_v13  ;;  %27 = vst.msk [vmem:[#allocation2 + $0x38] sm:$0xff] %vm19_vm1, %v8175_v13  ;;  %v7530_v15 = vld [vmem:[%s12754_s0 + $0x30] sm:$0xff]   ;;  %v7532_v17 = vld [vmem:[%s12754_s0 + $0x38] sm:$0xff]  }
   0x7   :  { %7366 = vmatpush3.bf16.msra.mxu0 %v7517_v1  ;;  %7514 = vmatpush3.bf16.msra.mxu1 %v7517_v1  ;;  %28 = vst.msk [vmem:[#allocation2 + $0x40] sm:$0xff] %vm19_vm1, %v8175_v13  ;;  %29 = vst.msk [vmem:[#allocation2 + $0x48] sm:$0xff] %vm19_vm1, %v8175_v13  ;;  %v7531_v16 = vld [vmem:[%s12754_s0 + $0x150] sm:$0xff]   ;;  %v7533_v18 = vld [vmem:[%s12754_s0 + $0x158] sm:$0xff]  }
   0x8   :  { %30 = vst.msk [vmem:[#allocation2 + $0x50] sm:$0xff] %vm19_vm1, %v8175_v13  ;;  %31 = vst.msk [vmem:[#allocation2 + $0x58] sm:$0xff] %vm19_vm1, %v8175_v13  ;;  %v7534_v19 = vld [vmem:[%s12754_s0 + $0x40] sm:$0xff]   ;;  %v7536_v21 = vld [vmem:[%s12754_s0 + $0x48] sm:$0xff]  }
   0x9   :  { %32 = vst.msk [vmem:[#allocation2 + $0x60] sm:$0xff] %vm19_vm1, %v8175_v13  ;;  %33 = vst.msk [vmem:[#allocation2 + $0x68] sm:$0xff] %vm19_vm1, %v8175_v13  ;;  %v7535_v20 = vld [vmem:[%s12754_s0 + $0x160] sm:$0xff]   ;;  %v7537_v22 = vld [vmem:[%s12754_s0 + $0x168] sm:$0xff]  }
   0xa   :  { %7368 = vmatmul.mubr.msk.bf16.vlgmr.msra.gmra.mxu0 %vm828_vm0, %v7520_v4  ;;  %7440 = vmatmul.mubr.msk.bf16.vlgmr.msra.gmra.mxu1 %vm828_vm0, %v7521_v5  ;;  %34 = vst.msk [vmem:[#allocation2 + $0x70] sm:$0xff] %vm19_vm1, %v8175_v13  ;;  %35 = vst.msk [vmem:[#allocation2 + $0x78] sm:$0xff] %vm19_vm1, %v8175_v13  ;;  %v7538_v23 = vld [vmem:[%s12754_s0 + $0x50] sm:$0xff]   ;;  %v7540_v25 = vld [vmem:[%s12754_s0 + $0x58] sm:$0xff]  }
   0xb   :  { %7371 = vmatprep.mubr.msk.bf16.mxu0 %vm828_vm0, %v7522_v6  ;;  %7443 = vmatprep.mubr.msk.bf16.mxu1 %vm828_vm0, %v7523_v7  ;;  %36 = vst.msk [vmem:[#allocation2 + $0x80] sm:$0xff] %vm19_vm1, %v8175_v13  ;;  %37 = vst.msk [vmem:[#allocation2 + $0x88] sm:$0xff] %vm19_vm1, %v8175_v13  ;;  %v7539_v24 = vld [vmem:[%s12754_s0 + $0x170] sm:$0xff]   ;;  %v7541_v26 = vld [vmem:[%s12754_s0 + $0x178] sm:$0xff]  }
   0xc   :  { %38 = vst.msk [vmem:[#allocation2 + $0x90] sm:$0xff] %vm19_vm1, %v8175_v13  ;;  %39 = vst.msk [vmem:[#allocation2 + $0x98] sm:$0xff] %vm19_vm1, %v8175_v13  ;;  %v7542_v27 = vld [vmem:[%s12754_s0 + $0x60] sm:$0xff]   ;;  %v7544_v29 = vld [vmem:[%s12754_s0 + $0x68] sm:$0xff]  }
   0xd   :  { %40 = vst.msk [vmem:[#allocation2 + $0xa0] sm:$0xff] %vm19_vm1, %v8175_v13  ;;  %41 = vst.msk [vmem:[#allocation2 + $0xa8] sm:$0xff] %vm19_vm1, %v8175_v13  ;;  %v7543_v28 = vld [vmem:[%s12754_s0 + $0x180] sm:$0xff]   ;;  %v7545_v30 = vld [vmem:[%s12754_s0 + $0x188] sm:$0xff]  }
   0xe   :  { %42 = vst.msk [vmem:[#allocation2 + $0xb0] sm:$0xff] %vm19_vm1, %v8175_v13  ;;  %43 = vst.msk [vmem:[#allocation2 + $0xb8] sm:$0xff] %vm19_vm1, %v8175_v13  ;;  %v7546_v31 = vld [vmem:[%s12754_s0 + $0x70] sm:$0xff]   ;;  %v7548_v33 = vld [vmem:[%s12754_s0 + $0x78] sm:$0xff]  }
   0xf   :  { %44 = vst.msk [vmem:[#allocation2 + $0xc0] sm:$0xff] %vm19_vm1, %v8175_v13  ;;  %45 = vst.msk [vmem:[#allocation2 + $0xc8] sm:$0xff] %vm19_vm1, %v8175_v13  ;;  %v7547_v32 = vld [vmem:[%s12754_s0 + $0x190] sm:$0xff]   ;;  %v7549_v34 = vld [vmem:[%s12754_s0 + $0x198] sm:$0xff]  }
  0x10   :  { %46 = vst.msk [vmem:[#allocation2 + $0xd0] sm:$0xff] %vm19_vm1, %v8175_v13  ;;  %47 = vst.msk [vmem:[#allocation2 + $0xd8] sm:$0xff] %vm19_vm1, %v8175_v13  ;;  %v7550_v35 = vld [vmem:[%s12754_s0 + $0x80] sm:$0xff]   ;;  %v7552_v37 = vld [vmem:[%s12754_s0 + $0x88] sm:$0xff]  }
  0x11   :  { %48 = vst.msk [vmem:[#allocation2 + $0xe0] sm:$0xff] %vm19_vm1, %v8175_v13  ;;  %49 = vst.msk [vmem:[#allocation2 + $0xe8] sm:$0xff] %vm19_vm1, %v8175_v13  ;;  %v7551_v36 = vld [vmem:[%s12754_s0 + $0x1a0] sm:$0xff]   ;;  %v7553_v38 = vld [vmem:[%s12754_s0 + $0x1a8] sm:$0xff]  }
  0x12   :  { %7372 = vmatmul.mubr.msk.bf16.gmra.mxu0 %vm828_vm0, %v7524_v8  ;;  %7444 = vmatmul.mubr.msk.bf16.gmra.mxu1 %vm828_vm0, %v7525_v9  ;;  %50 = vst.msk [vmem:[#allocation2 + $0xf0] sm:$0xff] %vm19_vm1, %v8175_v13  ;;  %51 = vst.msk [vmem:[#allocation2 + $0xf8] sm:$0xff] %vm19_vm1, %v8175_v13  ;;  %v7554_v39 = vld [vmem:[%s12754_s0 + $0x90] sm:$0xff]   ;;  %v7556_v41 = vld [vmem:[%s12754_s0 + $0x98] sm:$0xff]  }
  0x13   :  { %7375 = vmatprep.mubr.msk.bf16.mxu0 %vm828_vm0, %v7526_v10  ;;  %7447 = vmatprep.mubr.msk.bf16.mxu1 %vm828_vm0, %v7527_v11  ;;  %52 = vst.msk [vmem:[#allocation2 + $0x100] sm:$0xff] %vm19_vm1, %v8175_v13  ;;  %53 = vst.msk [vmem:[#allocation2 + $0x108] sm:$0xff] %vm19_vm1, %v8175_v13  ;;  %v7555_v40 = vld [vmem:[%s12754_s0 + $0x1b0] sm:$0xff]   ;;  %v7557_v42 = vld [vmem:[%s12754_s0 + $0x1b8] sm:$0xff]  }
  0x14   :  { %54 = vst.msk [vmem:[#allocation2 + $0x110] sm:$0xff] %vm19_vm1, %v8175_v13  ;;  %55 = vst.msk [vmem:[#allocation2 + $0x118] sm:$0xff] %vm19_vm1, %v8175_v13  ;;  %v7558_v43 = vld [vmem:[%s12754_s0 + $0xa0] sm:$0xff]   ;;  %v7560_v45 = vld [vmem:[%s12754_s0 + $0xa8] sm:$0xff]  }
  0x15   :  { %56 = vst.msk [vmem:[#allocation2 + $0x120] sm:$0xff] %vm19_vm1, %v8175_v13  ;;  %57 = vst.msk [vmem:[#allocation2 + $0x128] sm:$0xff] %vm19_vm1, %v8175_v13  ;;  %v7559_v44 = vld [vmem:[%s12754_s0 + $0x1c0] sm:$0xff]   ;;  %v7561_v46 = vld [vmem:[%s12754_s0 + $0x1c8] sm:$0xff]  }
  0x16   :  { %58 = vst.msk [vmem:[#allocation2 + $0x130] sm:$0xff] %vm19_vm1, %v8175_v13  ;;  %59 = vst.msk [vmem:[#allocation2 + $0x138] sm:$0xff] %vm19_vm1, %v8175_v13  ;;  %v7562_v47 = vld [vmem:[%s12754_s0 + $0xb0] sm:$0xff]   ;;  %v7564_v49 = vld [vmem:[%s12754_s0 + $0xb8] sm:$0xff]  }
  0x17   :  { %60 = vst.msk [vmem:[#allocation2 + $0x140] sm:$0xff] %vm19_vm1, %v8175_v13  ;;  %61 = vst.msk [vmem:[#allocation2 + $0x148] sm:$0xff] %vm19_vm1, %v8175_v13  ;;  %v7563_v48 = vld [vmem:[%s12754_s0 + $0x1d0] sm:$0xff]   ;;  %v7565_v50 = vld [vmem:[%s12754_s0 + $0x1d8] sm:$0xff]  }
  0x18   :  { %62 = vst.msk [vmem:[#allocation2 + $0x150] sm:$0xff] %vm19_vm1, %v8175_v13  ;;  %63 = vst.msk [vmem:[#allocation2 + $0x158] sm:$0xff] %vm19_vm1, %v8175_v13  ;;  %v7566_v51 = vld [vmem:[%s12754_s0 + $0xc0] sm:$0xff]   ;;  %v7568_v53 = vld [vmem:[%s12754_s0 + $0xc8] sm:$0xff]  }
  0x19   :  { %64 = vst.msk [vmem:[#allocation2 + $0x160] sm:$0xff] %vm19_vm1, %v8175_v13  ;;  %65 = vst.msk [vmem:[#allocation2 + $0x168] sm:$0xff] %vm19_vm1, %v8175_v13  ;;  %v7567_v52 = vld [vmem:[%s12754_s0 + $0x1e0] sm:$0xff]   ;;  %v7569_v54 = vld [vmem:[%s12754_s0 + $0x1e8] sm:$0xff]  }
  0x1a   :  { %66 = vst.msk [vmem:[#allocation2 + $0x170] sm:$0xff] %vm19_vm1, %v8175_v13  ;;  %67 = vst.msk [vmem:[#allocation2 + $0x178] sm:$0xff] %vm19_vm1, %v8175_v13  ;;  %7376 = vmatmul.mubr.msk.bf16.gmra.mxu0 %vm828_vm0, %v8245_v12  ;;  %7448 = vmatmul.mubr.msk.bf16.gmra.mxu1 %vm828_vm0, %v7529_v14  ;;  %v7570_v55 = vld [vmem:[%s12754_s0 + $0xd0] sm:$0xff]   ;;  %v7572_v57 = vld [vmem:[%s12754_s0 + $0xd8] sm:$0xff]  }
  0x1b   :  { %68 = vst.msk [vmem:[#allocation2 + $0x180] sm:$0xff] %vm19_vm1, %v8175_v13  ;;  %69 = vst.msk [vmem:[#allocation2 + $0x188] sm:$0xff] %vm19_vm1, %v8175_v13  ;;  %7379 = vmatprep.mubr.msk.bf16.mxu0 %vm828_vm0, %v7530_v15  ;;  %7451 = vmatprep.mubr.msk.bf16.mxu1 %vm828_vm0, %v7531_v16  ;;  %v7571_v56 = vld [vmem:[%s12754_s0 + $0x1f0] sm:$0xff]   ;;  %v7573_v58 = vld [vmem:[%s12754_s0 + $0x1f8] sm:$0xff]  }
  0x1c   :  { %70 = vst.msk [vmem:[#allocation2 + $0x190] sm:$0xff] %vm19_vm1, %v8175_v13  ;;  %71 = vst.msk [vmem:[#allocation2 + $0x198] sm:$0xff] %vm19_vm1, %v8175_v13  ;;  %v7574_v59 = vld [vmem:[%s12754_s0 + $0xe0] sm:$0xff]   ;;  %v7576_v61 = vld [vmem:[%s12754_s0 + $0xe8] sm:$0xff]  }
  0x1d   :  { %72 = vst.msk [vmem:[#allocation2 + $0x1a0] sm:$0xff] %vm19_vm1, %v8175_v13  ;;  %73 = vst.msk [vmem:[#allocation2 + $0x1a8] sm:$0xff] %vm19_vm1, %v8175_v13  ;;  %v7575_v60 = vld [vmem:[%s12754_s0 + $0x200] sm:$0xff]   ;;  %v7577_v62 = vld [vmem:[%s12754_s0 + $0x208] sm:$0xff]  }
  0x1e   :  { %74 = vst.msk [vmem:[#allocation2 + $0x1b0] sm:$0xff] %vm19_vm1, %v8175_v13  ;;  %75 = vst.msk [vmem:[#allocation2 + $0x1b8] sm:$0xff] %vm19_vm1, %v8175_v13  ;;  %v7578_v63 = vld [vmem:[%s12754_s0 + $0xf0] sm:$0xff]   ;;  %v7580_v1 = vld [vmem:[%s12754_s0 + $0xf8] sm:$0xff]  }
  0x1f   :  { %76 = vst.msk [vmem:[#allocation2 + $0x1c0] sm:$0xff] %vm19_vm1, %v8175_v13  ;;  %77 = vst.msk [vmem:[#allocation2 + $0x1c8] sm:$0xff] %vm19_vm1, %v8175_v13  ;;  %v7579_v0 = vld [vmem:[%s12754_s0 + $0x210] sm:$0xff]   ;;  %v7581_v2 = vld [vmem:[%s12754_s0 + $0x218] sm:$0xff]  }
  0x20   :  { %78 = vst.msk [vmem:[#allocation2 + $0x1d0] sm:$0xff] %vm19_vm1, %v8175_v13  ;;  %79 = vst.msk [vmem:[#allocation2 + $0x1d8] sm:$0xff] %vm19_vm1, %v8175_v13  ;;  %v7582_v3 = vld [vmem:[%s12754_s0 + $0x100] sm:$0xff]   ;;  %v7584_v5 = vld [vmem:[%s12754_s0 + $0x108] sm:$0xff]  }
  0x21   :  { %80 = vst.msk [vmem:[#allocation2 + $0x1e0] sm:$0xff] %vm19_vm1, %v8175_v13  ;;  %81 = vst.msk [vmem:[#allocation2 + $0x1e8] sm:$0xff] %vm19_vm1, %v8175_v13  ;;  %v7583_v4 = vld [vmem:[%s12754_s0 + $0x220] sm:$0xff]   ;;  %v7585_v6 = vld [vmem:[%s12754_s0 + $0x228] sm:$0xff]  }
  0x22   :  { %82 = vst.msk [vmem:[#allocation2 + $0x1f0] sm:$0xff] %vm19_vm1, %v8175_v13  ;;  %83 = vst.msk [vmem:[#allocation2 + $0x1f8] sm:$0xff] %vm19_vm1, %v8175_v13  ;;  %7380 = vmatmul.mubr.msk.bf16.gmra.mxu0 %vm828_vm0, %v7532_v17  ;;  %7452 = vmatmul.mubr.msk.bf16.gmra.mxu1 %vm828_vm0, %v7533_v18  ;;  %v7586_v7 = vld [vmem:[%s12754_s0 + $0x110] sm:$0xff]   ;;  %v7588_v9 = vld [vmem:[%s12754_s0 + $0x118] sm:$0xff]  }
  0x23   :  { %84 = vst.msk [vmem:[#allocation2 + $0x200] sm:$0xff] %vm19_vm1, %v8175_v13  ;;  %85 = vst.msk [vmem:[#allocation2 + $0x208] sm:$0xff] %vm19_vm1, %v8175_v13  ;;  %7383 = vmatprep.mubr.msk.bf16.mxu0 %vm828_vm0, %v7534_v19  ;;  %7455 = vmatprep.mubr.msk.bf16.mxu1 %vm828_vm0, %v7535_v20  ;;  %v7587_v8 = vld [vmem:[%s12754_s0 + $0x230] sm:$0xff]   ;;  %v7589_v10 = vld [vmem:[%s12754_s0 + $0x238] sm:$0xff]  }
  0x24   :  { %86 = vst.msk [vmem:[#allocation2 + $0x210] sm:$0xff] %vm19_vm1, %v8175_v13  ;;  %87 = vst.msk [vmem:[#allocation2 + $0x218] sm:$0xff] %vm19_vm1, %v8175_v13  ;;  %v166_v11 = vld [vmem:[#allocation2 + $0x10] sm:$0xff]  ;;  %v164_v15 = vld [vmem:[#allocation2] sm:$0xff] }
  0x25   :  { %88 = vst.msk [vmem:[#allocation2 + $0x220] sm:$0xff] %vm19_vm1, %v8175_v13  ;;  %89 = vst.msk [vmem:[#allocation2 + $0x228] sm:$0xff] %vm19_vm1, %v8175_v13 }
  0x26   :  { %90 = vst.msk [vmem:[#allocation2 + $0x230] sm:$0xff] %vm19_vm1, %v8175_v13  ;;  %91 = vst.msk [vmem:[#allocation2 + $0x238] sm:$0xff] %vm19_vm1, %v8175_v13 }
  0x27   :  { %92 = vst.msk [vmem:[#allocation2 + $0x240] sm:$0xff] %vm19_vm1, %v8175_v13  ;;  %93 = vst.msk [vmem:[#allocation2 + $0x248] sm:$0xff] %vm19_vm1, %v8175_v13 }
  0x28   :  { %94 = vst.msk [vmem:[#allocation2 + $0x250] sm:$0xff] %vm19_vm1, %v8175_v13  ;;  %95 = vst.msk [vmem:[#allocation2 + $0x258] sm:$0xff] %vm19_vm1, %v8175_v13 }
  0x29   :  { %96 = vst.msk [vmem:[#allocation2 + $0x260] sm:$0xff] %vm19_vm1, %v8175_v13  ;;  %97 = vst.msk [vmem:[#allocation2 + $0x268] sm:$0xff] %vm19_vm1, %v8175_v13 }
  0x2a   :  { %98 = vst.msk [vmem:[#allocation2 + $0x270] sm:$0xff] %vm19_vm1, %v8175_v13  ;;  %99 = vst.msk [vmem:[#allocation2 + $0x278] sm:$0xff] %vm19_vm1, %v8175_v13  ;;  %7384 = vmatmul.mubr.msk.bf16.gmra.mxu0 %vm828_vm0, %v7536_v21  ;;  %7456 = vmatmul.mubr.msk.bf16.gmra.mxu1 %vm828_vm0, %v7537_v22  ;;  %v167_v21 = vld [vmem:[#allocation2 + $0x18] sm:$0xff] }
  0x2b   :  { %100 = vst.msk [vmem:[#allocation2 + $0x280] sm:$0xff] %vm19_vm1, %v8175_v13  ;;  %101 = vst.msk [vmem:[#allocation2 + $0x288] sm:$0xff] %vm19_vm1, %v8175_v13  ;;  %7387 = vmatprep.mubr.msk.bf16.mxu0 %vm828_vm0, %v7538_v23  ;;  %7459 = vmatprep.mubr.msk.bf16.mxu1 %vm828_vm0, %v7539_v24 }
  0x2c   :  { %102 = vst.msk [vmem:[#allocation2 + $0x290] sm:$0xff] %vm19_vm1, %v8175_v13  ;;  %103 = vst.msk [vmem:[#allocation2 + $0x298] sm:$0xff] %vm19_vm1, %v8175_v13 }
  0x2d   :  { %104 = vst.msk [vmem:[#allocation2 + $0x2a0] sm:$0xff] %vm19_vm1, %v8175_v13  ;;  %105 = vst.msk [vmem:[#allocation2 + $0x2a8] sm:$0xff] %vm19_vm1, %v8175_v13 }
  0x2e   :  { %106 = vst.msk [vmem:[#allocation2 + $0x2b0] sm:$0xff] %vm19_vm1, %v8175_v13  ;;  %107 = vst.msk [vmem:[#allocation2 + $0x2b8] sm:$0xff] %vm19_vm1, %v8175_v13  ;;  %v236_v16 = vld [vmem:[#allocation2 + $0x240] sm:$0xff] }
  0x2f   :  { %108 = vst.msk [vmem:[#allocation2 + $0x2c0] sm:$0xff] %vm19_vm1, %v8175_v13  ;;  %109 = vst.msk [vmem:[#allocation2 + $0x2c8] sm:$0xff] %vm19_vm1, %v8175_v13  ;;  %v238_v12 = vld [vmem:[#allocation2 + $0x250] sm:$0xff]  ;;  %v239_v22 = vld [vmem:[#allocation2 + $0x258] sm:$0xff] }
  0x30   :  { %110 = vst.msk [vmem:[#allocation2 + $0x2d0] sm:$0xff] %vm19_vm1, %v8175_v13  ;;  %111 = vst.msk [vmem:[#allocation2 + $0x2d8] sm:$0xff] %vm19_vm1, %v8175_v13 }
  0x31   :  { %112 = vst.msk [vmem:[#allocation2 + $0x2e0] sm:$0xff] %vm19_vm1, %v8175_v13  ;;  %113 = vst.msk [vmem:[#allocation2 + $0x2e8] sm:$0xff] %vm19_vm1, %v8175_v13 }
  0x32   :  { %114 = vst.msk [vmem:[#allocation2 + $0x2f0] sm:$0xff] %vm19_vm1, %v8175_v13  ;;  %115 = vst.msk [vmem:[#allocation2 + $0x2f8] sm:$0xff] %vm19_vm1, %v8175_v13  ;;  %7388 = vmatmul.mubr.msk.bf16.gmra.mxu0 %vm828_vm0, %v7540_v25  ;;  %7460 = vmatmul.mubr.msk.bf16.gmra.mxu1 %vm828_vm0, %v7541_v26 }
  0x33   :  { %116 = vst.msk [vmem:[#allocation2 + $0x300] sm:$0xff] %vm19_vm1, %v8175_v13  ;;  %117 = vst.msk [vmem:[#allocation2 + $0x308] sm:$0xff] %vm19_vm1, %v8175_v13  ;;  %7391 = vmatprep.mubr.msk.bf16.mxu0 %vm828_vm0, %v7542_v27  ;;  %7463 = vmatprep.mubr.msk.bf16.mxu1 %vm828_vm0, %v7543_v28  ;;  %v165_v27 = vld [vmem:[#allocation2 + $0x8] sm:$0xff] }
  0x34   :  { %118 = vst.msk [vmem:[#allocation2 + $0x310] sm:$0xff] %vm19_vm1, %v8175_v13  ;;  %119 = vst.msk [vmem:[#allocation2 + $0x318] sm:$0xff] %vm19_vm1, %v8175_v13  ;;  %v237_v28 = vld [vmem:[#allocation2 + $0x248] sm:$0xff] }
  0x35   :  { %120 = vst.msk [vmem:[#allocation2 + $0x320] sm:$0xff] %vm19_vm1, %v8175_v13  ;;  %121 = vst.msk [vmem:[#allocation2 + $0x328] sm:$0xff] %vm19_vm1, %v8175_v13 }
  0x36   :  { %122 = vst.msk [vmem:[#allocation2 + $0x330] sm:$0xff] %vm19_vm1, %v8175_v13  ;;  %123 = vst.msk [vmem:[#allocation2 + $0x338] sm:$0xff] %vm19_vm1, %v8175_v13 }
  0x37   :  { %124 = vst.msk [vmem:[#allocation2 + $0x340] sm:$0xff] %vm19_vm1, %v8175_v13  ;;  %125 = vst.msk [vmem:[#allocation2 + $0x348] sm:$0xff] %vm19_vm1, %v8175_v13 }
  0x38   :  { %126 = vst.msk [vmem:[#allocation2 + $0x350] sm:$0xff] %vm19_vm1, %v8175_v13  ;;  %127 = vst.msk [vmem:[#allocation2 + $0x358] sm:$0xff] %vm19_vm1, %v8175_v13 }
  0x39   :  { %128 = vst.msk [vmem:[#allocation2 + $0x360] sm:$0xff] %vm19_vm1, %v8175_v13  ;;  %129 = vst.msk [vmem:[#allocation2 + $0x368] sm:$0xff] %vm19_vm1, %v8175_v13 }
  0x3a   :  { %130 = vst.msk [vmem:[#allocation2 + $0x370] sm:$0xff] %vm19_vm1, %v8175_v13  ;;  %131 = vst.msk [vmem:[#allocation2 + $0x378] sm:$0xff] %vm19_vm1, %v8175_v13  ;;  %7392 = vmatmul.mubr.msk.bf16.gmra.mxu0 %vm828_vm0, %v7544_v29  ;;  %7464 = vmatmul.mubr.msk.bf16.gmra.mxu1 %vm828_vm0, %v7545_v30 }
  0x3b   :  { %132 = vst.msk [vmem:[#allocation2 + $0x380] sm:$0xff] %vm19_vm1, %v8175_v13  ;;  %133 = vst.msk [vmem:[#allocation2 + $0x388] sm:$0xff] %vm19_vm1, %v8175_v13  ;;  %7395 = vmatprep.mubr.msk.bf16.mxu0 %vm828_vm0, %v7546_v31  ;;  %7467 = vmatprep.mubr.msk.bf16.mxu1 %vm828_vm0, %v7547_v32 }
  0x3c   :  { %134 = vst.msk [vmem:[#allocation2 + $0x390] sm:$0xff] %vm19_vm1, %v8175_v13  ;;  %135 = vst.msk [vmem:[#allocation2 + $0x398] sm:$0xff] %vm19_vm1, %v8175_v13 }
  0x3d   :  { %136 = vst.msk [vmem:[#allocation2 + $0x3a0] sm:$0xff] %vm19_vm1, %v8175_v13  ;;  %137 = vst.msk [vmem:[#allocation2 + $0x3a8] sm:$0xff] %vm19_vm1, %v8175_v13 }
  0x3e   :  { %138 = vst.msk [vmem:[#allocation2 + $0x3b0] sm:$0xff] %vm19_vm1, %v8175_v13  ;;  %139 = vst.msk [vmem:[#allocation2 + $0x3b8] sm:$0xff] %vm19_vm1, %v8175_v13 }
  0x3f   :  { %140 = vst.msk [vmem:[#allocation2 + $0x3c0] sm:$0xff] %vm19_vm1, %v8175_v13  ;;  %141 = vst.msk [vmem:[#allocation2 + $0x3c8] sm:$0xff] %vm19_vm1, %v8175_v13 }
  0x40   :  { %142 = vst.msk [vmem:[#allocation2 + $0x3d0] sm:$0xff] %vm19_vm1, %v8175_v13  ;;  %143 = vst.msk [vmem:[#allocation2 + $0x3d8] sm:$0xff] %vm19_vm1, %v8175_v13 }
  0x41   :  { %144 = vst.msk [vmem:[#allocation2 + $0x3e0] sm:$0xff] %vm19_vm1, %v8175_v13  ;;  %145 = vst.msk [vmem:[#allocation2 + $0x3e8] sm:$0xff] %vm19_vm1, %v8175_v13 }
  0x42   :  { %146 = vst.msk [vmem:[#allocation2 + $0x3f0] sm:$0xff] %vm19_vm1, %v8175_v13  ;;  %147 = vst.msk [vmem:[#allocation2 + $0x3f8] sm:$0xff] %vm19_vm1, %v8175_v13  ;;  %7396 = vmatmul.mubr.msk.bf16.gmra.mxu0 %vm828_vm0, %v7548_v33  ;;  %7468 = vmatmul.mubr.msk.bf16.gmra.mxu1 %vm828_vm0, %v7549_v34  ;;  %v170_v33 = vld [vmem:[#allocation2 + $0x30] sm:$0xff] }
  0x43   :  { %148 = vst.msk [vmem:[#allocation2 + $0x400] sm:$0xff] %vm19_vm1, %v8175_v13  ;;  %149 = vst.msk [vmem:[#allocation2 + $0x408] sm:$0xff] %vm19_vm1, %v8175_v13  ;;  %7399 = vmatprep.mubr.msk.bf16.mxu0 %vm828_vm0, %v7550_v35  ;;  %7471 = vmatprep.mubr.msk.bf16.mxu1 %vm828_vm0, %v7551_v36  ;;  %v242_v34 = vld [vmem:[#allocation2 + $0x270] sm:$0xff] }
  0x44   :  { %150 = vst.msk [vmem:[#allocation2 + $0x410] sm:$0xff] %vm19_vm1, %v8175_v13  ;;  %151 = vst.msk [vmem:[#allocation2 + $0x418] sm:$0xff] %vm19_vm1, %v8175_v13 }
  0x45   :  { %152 = vst.msk [vmem:[#allocation2 + $0x420] sm:$0xff] %vm19_vm1, %v8175_v13  ;;  %153 = vst.msk [vmem:[#allocation2 + $0x428] sm:$0xff] %vm19_vm1, %v8175_v13 }
  0x46   :  { %154 = vst.msk [vmem:[#allocation2 + $0x430] sm:$0xff] %vm19_vm1, %v8175_v13  ;;  %155 = vst.msk [vmem:[#allocation2 + $0x438] sm:$0xff] %vm19_vm1, %v8175_v13 }
  0x47   :  { %156 = vst.msk [vmem:[#allocation2 + $0x440] sm:$0xff] %vm19_vm1, %v8175_v13  ;;  %157 = vst.msk [vmem:[#allocation2 + $0x448] sm:$0xff] %vm19_vm1, %v8175_v13 }
  0x48   :  { %158 = vst.msk [vmem:[#allocation2 + $0x450] sm:$0xff] %vm19_vm1, %v8175_v13  ;;  %159 = vst.msk [vmem:[#allocation2 + $0x458] sm:$0xff] %vm19_vm1, %v8175_v13 }
  0x49   :  { %160 = vst.msk [vmem:[#allocation2 + $0x460] sm:$0xff] %vm19_vm1, %v8175_v13  ;;  %161 = vst.msk [vmem:[#allocation2 + $0x468] sm:$0xff] %vm19_vm1, %v8175_v13 }
  0x4a   :  { %162 = vst.msk [vmem:[#allocation2 + $0x470] sm:$0xff] %vm19_vm1, %v8175_v13  ;;  %163 = vst.msk [vmem:[#allocation2 + $0x478] sm:$0xff] %vm19_vm1, %v8175_v13  ;;  %7400 = vmatmul.mubr.msk.bf16.gmra.mxu0 %vm828_vm0, %v7552_v37  ;;  %7472 = vmatmul.mubr.msk.bf16.gmra.mxu1 %vm828_vm0, %v7553_v38  ;;  %v8790_v37 = vld [vmem:[%s12755_s2] ss:$0 sm:$0xff] }
  0x4b   :  { %7403 = vmatprep.mubr.msk.bf16.mxu0 %vm828_vm0, %v7554_v39  ;;  %7475 = vmatprep.mubr.msk.bf16.mxu1 %vm828_vm0, %v7555_v40  ;;  %v168_v40 = vld [vmem:[#allocation2 + $0x20] sm:$0xff] }
  0x52   :  { %7404 = vmatmul.mubr.msk.bf16.gmra.mxu0 %vm828_vm0, %v7556_v41  ;;  %7476 = vmatmul.mubr.msk.bf16.gmra.mxu1 %vm828_vm0, %v7557_v42  ;;  %v240_v41 = vld [vmem:[#allocation2 + $0x260] sm:$0xff] }
  0x53   :  { %7407 = vmatprep.mubr.msk.bf16.mxu0 %vm828_vm0, %v7558_v43  ;;  %7479 = vmatprep.mubr.msk.bf16.mxu1 %vm828_vm0, %v7559_v44 }
  0x5a   :  { %7408 = vmatmul.mubr.msk.bf16.gmra.mxu0 %vm828_vm0, %v7560_v45  ;;  %7480 = vmatmul.mubr.msk.bf16.gmra.mxu1 %vm828_vm0, %v7561_v46 }
  0x5b   :  { %7411 = vmatprep.mubr.msk.bf16.mxu0 %vm828_vm0, %v7562_v47  ;;  %7483 = vmatprep.mubr.msk.bf16.mxu1 %vm828_vm0, %v7563_v48 }
  0x62   :  { %7412 = vmatmul.mubr.msk.bf16.gmra.mxu0 %vm828_vm0, %v7564_v49  ;;  %7484 = vmatmul.mubr.msk.bf16.gmra.mxu1 %vm828_vm0, %v7565_v50 }
  0x63   :  { %7415 = vmatprep.mubr.msk.bf16.mxu0 %vm828_vm0, %v7566_v51  ;;  %7487 = vmatprep.mubr.msk.bf16.mxu1 %vm828_vm0, %v7567_v52  ;;  %v171_v52 = vld [vmem:[#allocation2 + $0x38] sm:$0xff] }
  0x6a   :  { %7416 = vmatmul.mubr.msk.bf16.gmra.mxu0 %vm828_vm0, %v7568_v53  ;;  %7488 = vmatmul.mubr.msk.bf16.gmra.mxu1 %vm828_vm0, %v7569_v54  ;;  %v243_v53 = vld [vmem:[#allocation2 + $0x278] sm:$0xff] }
  0x6b   :  { %7419 = vmatprep.mubr.msk.bf16.mxu0 %vm828_vm0, %v7570_v55  ;;  %7491 = vmatprep.mubr.msk.bf16.mxu1 %vm828_vm0, %v7571_v56 }
  0x72   :  { %7420 = vmatmul.mubr.msk.bf16.gmra.mxu0 %vm828_vm0, %v7572_v57  ;;  %7492 = vmatmul.mubr.msk.bf16.gmra.mxu1 %vm828_vm0, %v7573_v58 }
  0x73   :  { %7423 = vmatprep.mubr.msk.bf16.mxu0 %vm828_vm0, %v7574_v59  ;;  %7495 = vmatprep.mubr.msk.bf16.mxu1 %vm828_vm0, %v7575_v60 }
  0x7a   :  { %7424 = vmatmul.mubr.msk.bf16.gmra.mxu0 %vm828_vm0, %v7576_v61  ;;  %7496 = vmatmul.mubr.msk.bf16.gmra.mxu1 %vm828_vm0, %v7577_v62 }
  0x7b   :  { %7427 = vmatprep.mubr.msk.bf16.mxu0 %vm828_vm0, %v7578_v63  ;;  %7499 = vmatprep.mubr.msk.bf16.mxu1 %vm828_vm0, %v7579_v0 }
  0x82   :  { %7428 = vmatmul.mubr.msk.bf16.gmra.mxu0 %vm828_vm0, %v7580_v1  ;;  %7500 = vmatmul.mubr.msk.bf16.gmra.mxu1 %vm828_vm0, %v7581_v2 }
  0x83   :  { %7431 = vmatprep.mubr.msk.bf16.mxu0 %vm828_vm0, %v7582_v3  ;;  %7503 = vmatprep.mubr.msk.bf16.mxu1 %vm828_vm0, %v7583_v4 }
  0x8a   :  { %7432 = vmatmul.mubr.msk.bf16.gmra.mxu0 %vm828_vm0, %v7584_v5  ;;  %7504 = vmatmul.mubr.msk.bf16.gmra.mxu1 %vm828_vm0, %v7585_v6 }
  0x8b   :  { %7435 = vmatprep.mubr.msk.bf16.mxu0 %vm828_vm0, %v7586_v7  ;;  %7507 = vmatprep.mubr.msk.bf16.mxu1 %vm828_vm0, %v7587_v8 }
  0x92   :  { %7436 = vmatmul.mubr.msk.bf16.gmra.mxu0 %vm828_vm0, %v7588_v9  ;;  %7508 = vmatmul.mubr.msk.bf16.gmra.mxu1 %vm828_vm0, %v7589_v10 }
  0xca   :  { %v7369_v13 = vpop.f32.mrf.mxu0  ;;  %v7441_v14 = vpop.f32.mrf.mxu1 }
  0xcb   :  { %v1656_v17 = vadd.f32 %v7369_v13, %v166_v11  ;;  %v1728_v18 = vadd.f32 %v7441_v14, %v238_v12 }
  0xcc   :  { %v1079_v19 = vpop.f32.mrf.mxu0  ;;  %v1367_v20 = vpop.f32.mrf.mxu1 }
  0xcd   :  { %1801 = vst.msk [vmem:[#allocation2 + $0x10] sm:$0xff] %vm19_vm1, %v1656_v17  ;;  %1873 = vst.msk [vmem:[#allocation2 + $0x250] sm:$0xff] %vm19_vm1, %v1728_v18  ;;  %v1654_v23 = vadd.f32 %v1079_v19, %v164_v15  ;;  %v1726_v24 = vadd.f32 %v1367_v20, %v236_v16 }
  0xce   :  { %v7370_v25 = vpop.f32.mrf.mxu0  ;;  %v7442_v26 = vpop.f32.mrf.mxu1 }
  0xcf   :  { %1799 = vst.msk [vmem:[#allocation2] sm:$0xff] %vm19_vm1, %v1654_v23  ;;  %1871 = vst.msk [vmem:[#allocation2 + $0x240] sm:$0xff] %vm19_vm1, %v1726_v24  ;;  %v1657_v29 = vadd.f32 %v7370_v25, %v167_v21  ;;  %v1729_v30 = vadd.f32 %v7442_v26, %v239_v22 }
  0xd0   :  { %v1082_v31 = vpop.f32.mrf.mxu0  ;;  %v1370_v32 = vpop.f32.mrf.mxu1 }
  0xd1   :  { %1802 = vst.msk [vmem:[#allocation2 + $0x18] sm:$0xff] %vm19_vm1, %v1657_v29  ;;  %1874 = vst.msk [vmem:[#allocation2 + $0x258] sm:$0xff] %vm19_vm1, %v1729_v30  ;;  %v1655_v35 = vadd.f32 %v1082_v31, %v165_v27  ;;  %v1727_v36 = vadd.f32 %v1370_v32, %v237_v28 }
  0xd2   :  { %v7373_v38 = vpop.f32.mrf.mxu0  ;;  %v7445_v39 = vpop.f32.mrf.mxu1 }
  0xd3   :  { %1800 = vst.msk [vmem:[#allocation2 + $0x8] sm:$0xff] %vm19_vm1, %v1655_v35  ;;  %1872 = vst.msk [vmem:[#allocation2 + $0x248] sm:$0xff] %vm19_vm1, %v1727_v36  ;;  %v1660_v42 = vadd.f32 %v7373_v38, %v170_v33  ;;  %v1732_v43 = vadd.f32 %v7445_v39, %v242_v34 }
  0xd4   :  { %v1948_v44 = vld [vmem:[#allocation2 + $0x10] sm:$0xff]  ;;  %v1095_v46 = vpop.f32.mrf.mxu0  ;;  %v1383_v47 = vpop.f32.mrf.mxu1 }
  0xd5   :  { %v2020_v45 = vld [vmem:[#allocation2 + $0x250] sm:$0xff]  ;;  %v2099_v48 = vadd.f32 %v8790_v37, %v1948_v44  ;;  %1805 = vst.msk [vmem:[#allocation2 + $0x30] sm:$0xff] %vm19_vm1, %v1660_v42  ;;  %1877 = vst.msk [vmem:[#allocation2 + $0x270] sm:$0xff] %vm19_vm1, %v1732_v43  ;;  %v1658_v50 = vadd.f32 %v1095_v46, %v168_v40  ;;  %v1730_v51 = vadd.f32 %v1383_v47, %v240_v41 }
  0xd6   :  { %v2171_v49 = vadd.f32 %v8790_v37, %v2020_v45  ;;  %v1946_v54 = vld [vmem:[#allocation2] sm:$0xff]  ;;  %v7374_v56 = vpop.f32.mrf.mxu0  ;;  %v7446_v57 = vpop.f32.mrf.mxu1 }
  0xd7   :  { %v2018_v55 = vld [vmem:[#allocation2 + $0x240] sm:$0xff]  ;;  %v8798_v58 = vmul.f32 0.70710677, %v2099_v48  ;;  %1803 = vst.msk [vmem:[#allocation2 + $0x20] sm:$0xff] %vm19_vm1, %v1658_v50  ;;  %1875 = vst.msk [vmem:[#allocation2 + $0x260] sm:$0xff] %vm19_vm1, %v1730_v51  ;;  %v2097_v60 = vadd.f32 %v8790_v37, %v1946_v54  ;;  %v1661_v62 = vadd.f32 %v7374_v56, %v171_v52  ;;  %v1733_v63 = vadd.f32 %v7446_v57, %v243_v53 }
  0xd8   :  { %v8800_v59 = vmul.f32 0.70710677, %v2171_v49  ;;  %v8806_v61 = vadd.f32 %v8790_v37, %v2018_v55  ;;  %v1949_v10 = vld [vmem:[#allocation2 + $0x18] sm:$0xff]  ;;  %v8825_v32 = vmul.f32 0.5, %v2099_v48  ;;  %v8827_v33 = vmul.f32 0.5, %v2171_v49 }
  0xd9   :  { %v2531_v0 = vand.u32 2147483647, %v8798_v58  ;;  %v8810_v2 = vmul.f32 0.70710677, %v2097_v60  ;;  %1806 = vst.msk [vmem:[#allocation2 + $0x38] sm:$0xff] %vm19_vm1, %v1661_v62  ;;  %1878 = vst.msk [vmem:[#allocation2 + $0x278] sm:$0xff] %vm19_vm1, %v1733_v63  ;;  %v2100_v18 = vadd.f32 %v8790_v37, %v1949_v10 }
  0xda   :  { %v2603_v1 = vand.u32 2147483647, %v8800_v59  ;;  %v8813_v3 = vmul.f32 0.70710677, %v8806_v61  ;;  %v2021_v19 = vld [vmem:[#allocation2 + $0x258] sm:$0xff]  ;;  %v1947_v20 = vld [vmem:[#allocation2 + $0x8] sm:$0xff] }
  0xdb   :  { %v2675_v4 = vmul.f32 0.3275911, %v2531_v0  ;;  %v4547_v5 = vsub.f32 0.0, %v2531_v0  ;;  %v2529_v8 = vand.u32 2147483647, %v8810_v2  ;;  %v2172_v26 = vadd.f32 %v8790_v37, %v2021_v19  ;;  %v2019_v31 = vld [vmem:[#allocation2 + $0x248] sm:$0xff] }
  0xdc   :  { %v2747_v6 = vmul.f32 0.3275911, %v2603_v1  ;;  %v4619_v7 = vsub.f32 0.0, %v2603_v1  ;;  %v2601_v9 = vand.u32 2147483647, %v8813_v3  ;;  %v2098_v27 = vadd.f32 %v8790_v37, %v1947_v20  ;;  %v1952_v50 = vld [vmem:[#allocation2 + $0x30] sm:$0xff] }
  0xdd   :  { %v2819_v11 = vadd.f32 1.0, %v2675_v4  ;;  %v2673_v13 = vmul.f32 0.3275911, %v2529_v8  ;;  %v4545_v14 = vsub.f32 0.0, %v2529_v8  ;;  %v4691_v16 = vmul.f32 %v4547_v5, %v2531_v0  ;;  %v2024_v5 = vld [vmem:[#allocation2 + $0x270] sm:$0xff] }
  0xde   :  { %v2891_v12 = vadd.f32 1.0, %v2747_v6  ;;  %v2745_v15 = vmul.f32 0.3275911, %v2601_v9  ;;  %v4617_v17 = vsub.f32 0.0, %v2601_v9  ;;  %v4763_v21 = vmul.f32 %v4619_v7, %v2603_v1 }
  0xdf   :  { %7590 = vrcp.f32 %v2819_v11  ;;  %v2817_v22 = vadd.f32 1.0, %v2673_v13  ;;  %v8820_v24 = vmul.f32 0.70710677, %v2100_v18  ;;  %v4689_v25 = vmul.f32 %v4545_v14, %v2529_v8 }
  0xe0   :  { %7592 = vrcp.f32 %v2891_v12  ;;  %v2889_v23 = vadd.f32 1.0, %v2745_v15  ;;  %v4837_v28 = vmul.f32 1.442695, %v4691_v16  ;;  %v4761_v29 = vmul.f32 %v4617_v17, %v2601_v9 }
  0xe1   :  { %7594 = vrcp.f32 %v2817_v22  ;;  %v2532_v30 = vand.u32 2147483647, %v8820_v24  ;;  %v4981_v34 = vmul.f32 1.442695, %v4763_v21  ;;  %v8829_v35 = vmul.f32 0.70710677, %v2172_v26 }
  0xe2   :  { %7596 = vrcp.f32 %v2889_v23  ;;  %v8831_v39 = vmul.f32 0.70710677, %v2098_v27  ;;  %v8833_v40 = vmul.f32 0.5, %v2097_v60  ;;  %v4833_v41 = vmul.f32 1.442695, %v4689_v25  ;;  %v1950_v25 = vld [vmem:[#allocation2 + $0x20] sm:$0xff] }
  0xe3   :  { %v2676_v36 = vmul.f32 0.3275911, %v2532_v30  ;;  %v4548_v38 = vsub.f32 0.0, %v2532_v30  ;;  %v2604_v42 = vand.u32 2147483647, %v8829_v35  ;;  %v8837_v43 = vadd.f32 %v8790_v37, %v2019_v31 }
  0xe4   :  { %7598 = vpow2.f32 %v4837_v28  ;;  %v4977_v44 = vmul.f32 1.442695, %v4761_v29  ;;  %v2530_v46 = vand.u32 2147483647, %v8831_v39  ;;  %v8845_v62 = vadd.f32 %v8790_v37, %v1952_v50 }
  0xe5   :  { %v2820_v45 = vadd.f32 1.0, %v2676_v36  ;;  %7600 = vpow2.f32 %v4981_v34  ;;  %v2748_v47 = vmul.f32 0.3275911, %v2604_v42  ;;  %v4620_v48 = vsub.f32 0.0, %v2604_v42 }
  0xe6   :  { %v8841_v49 = vmul.f32 0.70710677, %v8837_v43  ;;  %v4692_v51 = vmul.f32 %v4548_v38, %v2532_v30  ;;  %v2674_v52 = vmul.f32 0.3275911, %v2530_v46  ;;  %v4546_v53 = vsub.f32 0.0, %v2530_v46 }
  0xe7   :  { %7602 = vrcp.f32 %v2820_v45  ;;  %v2892_v54 = vadd.f32 1.0, %v2748_v47  ;;  %v4764_v55 = vmul.f32 %v4620_v48, %v2604_v42  ;;  %v8850_v0 = vmul.f32 0.5, %v8806_v61 }
  0xe8   :  { %7604 = vpow2.f32 %v4833_v41  ;;  %v2602_v56 = vand.u32 2147483647, %v8841_v49  ;;  %v2818_v57 = vadd.f32 1.0, %v2674_v52  ;;  %v4690_v60 = vmul.f32 %v4546_v53, %v2530_v46 }
  0xe9   :  { %7606 = vpow2.f32 %v4977_v44  ;;  %v8855_v8 = vmul.f32 0.5, %v2100_v18  ;;  %v4839_v9 = vmul.f32 1.442695, %v4692_v51  ;;  %v4983_v11 = vmul.f32 1.442695, %v4764_v55 }
  0xea   :  { %7608 = vrcp.f32 %v2892_v54  ;;  %v2746_v1 = vmul.f32 0.3275911, %v2602_v56  ;;  %v4618_v4 = vsub.f32 0.0, %v2602_v56  ;;  %v4835_v61 = vmul.f32 1.442695, %v4690_v60 }
  0xeb   :  { %7610 = vrcp.f32 %v2818_v57  ;;  %v8859_v15 = vmul.f32 0.70710677, %v8845_v62  ;;  %v8862_v16 = vadd.f32 %v8790_v37, %v2024_v5  ;;  %v8866_v18 = vmul.f32 0.5, %v2172_v26 }
  0xec   :  { %v8847_v63 = vpop.eup %7590  ;;  %v2890_v12 = vadd.f32 1.0, %v2746_v1  ;;  %v4762_v13 = vmul.f32 %v4618_v4, %v2602_v56  ;;  %v8868_v20 = vmul.f32 0.5, %v2098_v27  ;;  %v8881_v44 = vadd.f32 %v8790_v37, %v1950_v25 }
  0xed   :  { %v8852_v6 = vpop.eup %7592  ;;  %v3251_v7 = vmul.f32 1.0614054, %v8847_v63  ;;  %v2535_v23 = vand.u32 2147483647, %v8859_v15  ;;  %v8877_v26 = vmul.f32 0.70710677, %v8862_v16 }
  0xee   :  { %v3323_v10 = vmul.f32 1.0614054, %v8852_v6  ;;  %v8864_v17 = vpop.eup %7594  ;;  %7612 = vrcp.f32 %v2890_v12  ;;  %v4979_v30 = vmul.f32 1.442695, %v4762_v13  ;;  %vm5411_vm2 = vcmp.ge.f32.partialorder %v8798_v58, 0.0 }
  0xef   :  { %v3395_v14 = vadd.f32 -1.4531521, %v3251_v7  ;;  %v3249_v22 = vmul.f32 1.0614054, %v8864_v17  ;;  %7614 = vpow2.f32 %v4839_v9  ;;  %v8873_v28 = vpop.eup %7596  ;;  %v2679_v41 = vmul.f32 0.3275911, %v2535_v23 }
  0xf0   :  { %v3467_v19 = vadd.f32 -1.4531521, %v3323_v10  ;;  %7616 = vpow2.f32 %v4983_v11  ;;  %v3321_v34 = vmul.f32 1.0614054, %v8873_v28  ;;  %v4551_v42 = vsub.f32 0.0, %v2535_v23 }
  0xf1   :  { %v3539_v21 = vmul.f32 %v8847_v63, %v3395_v14  ;;  %v3393_v31 = vadd.f32 -1.4531521, %v3249_v22  ;;  %7618 = vpow2.f32 %v4835_v61  ;;  %v7599_v36 = vpop.eup %7598  ;;  %v8886_v50 = vand.u32 2147483647, %v8877_v26 }
  0xf2   :  { %v3611_v29 = vmul.f32 %v8852_v6, %v3467_v19  ;;  %v7601_v45 = vpop.eup %7600  ;;  %v3465_v48 = vadd.f32 -1.4531521, %v3321_v34  ;;  %7620 = vpow2.f32 %v4979_v30  ;;  %v2823_v53 = vadd.f32 1.0, %v2679_v41 }
  0xf3   :  { %v3683_v27 = vadd.f32 1.4214138, %v3539_v21  ;;  %v3537_v47 = vmul.f32 %v8864_v17, %v3393_v31  ;;  %v4695_v54 = vmul.f32 %v4551_v42, %v2535_v23  ;;  %v2751_v9 = vmul.f32 0.3275911, %v8886_v50 }
  0xf4   :  { %v3755_v38 = vadd.f32 1.4214138, %v3611_v29  ;;  %v8888_v51 = vpop.eup %7602  ;;  %v3609_v60 = vmul.f32 %v8873_v28, %v3465_v48  ;;  %7622 = vrcp.f32 %v2823_v53  ;;  %vm5483_vm3 = vcmp.ge.f32.partialorder %v8800_v59, 0.0 }
  0xf5   :  { %v3827_v46 = vmul.f32 %v8847_v63, %v3683_v27  ;;  %v8891_v55 = vpop.eup %7604  ;;  %v3681_v57 = vadd.f32 1.4214138, %v3537_v47  ;;  %v3252_v1 = vmul.f32 1.0614054, %v8888_v51  ;;  %v4845_v7 = vmul.f32 1.442695, %v4695_v54 }
  0xf6   :  { %v3899_v52 = vmul.f32 %v8852_v6, %v3755_v38  ;;  %v8895_v4 = vpop.eup %7606  ;;  %v3753_v13 = vadd.f32 1.4214138, %v3609_v60  ;;  %v2895_v22 = vadd.f32 1.0, %v2751_v9  ;;  %vm5409_vm4 = vcmp.ge.f32.partialorder %v8810_v2, 0.0 }
  0xf7   :  { %v3971_v56 = vadd.f32 -0.28449672, %v3827_v46  ;;  %v8898_v10 = vpop.eup %7608  ;;  %v3825_v12 = vmul.f32 %v8864_v17, %v3681_v57  ;;  %v3396_v14 = vadd.f32 -1.4531521, %v3252_v1  ;;  %7624 = vpow2.f32 %v4845_v7 }
  0xf8   :  { %v4043_v5 = vadd.f32 -0.28449672, %v3899_v52  ;;  %v8902_v61 = vpop.eup %7610  ;;  %v3324_v21 = vmul.f32 1.0614054, %v8898_v10  ;;  %v3897_v29 = vmul.f32 %v8873_v28, %v3753_v13  ;;  %7626 = vrcp.f32 %v2895_v22 }
  0xf9   :  { %v4115_v11 = vmul.f32 %v8847_v63, %v3971_v56  ;;  %v3969_v25 = vadd.f32 -0.28449672, %v3825_v12  ;;  %v3540_v30 = vmul.f32 %v8888_v51, %v3396_v14  ;;  %v3250_v34 = vmul.f32 1.0614054, %v8902_v61 }
  0xfa   :  { %v4187_v19 = vmul.f32 %v8852_v6, %v4043_v5  ;;  %v3468_v31 = vadd.f32 -1.4531521, %v3324_v21  ;;  %v4041_v46 = vadd.f32 -0.28449672, %v3897_v29  ;;  %vm5481_vm6 = vcmp.ge.f32.partialorder %v8813_v3, 0.0 }
  0xfb   :  { %v4259_v23 = vadd.f32 0.2548296, %v4115_v11  ;;  %v8910_v38 = vpop.eup %7612  ;;  %v4113_v42 = vmul.f32 %v8864_v17, %v3969_v25  ;;  %v3684_v47 = vadd.f32 1.4214138, %v3540_v30  ;;  %v3394_v54 = vadd.f32 -1.4531521, %v3250_v34 }
  0xfc   :  { %v4331_v27 = vadd.f32 0.2548296, %v4187_v19  ;;  %v7615_v48 = vpop.eup %7614  ;;  %v3612_v53 = vmul.f32 %v8898_v10, %v3468_v31  ;;  %v3322_v56 = vmul.f32 1.0614054, %v8910_v38  ;;  %vm5412_vm7 = vcmp.ge.f32.partialorder %v8820_v24, 0.0 }
  0xfd   :  { %v4403_v41 = vmul.f32 %v8847_v63, %v4259_v23  ;;  %v8918_v57 = vpop.eup %7616  ;;  %v4257_v1 = vadd.f32 0.2548296, %v4113_v42  ;;  %v4185_v63 = vmul.f32 %v8873_v28, %v4041_v46  ;;  %v3828_v5 = vmul.f32 %v8888_v51, %v3684_v47 }
  0xfe   :  { %v4475_v52 = vmul.f32 %v8852_v6, %v4331_v27  ;;  %v8922_v7 = vpop.eup %7618  ;;  %v3756_v11 = vadd.f32 1.4214138, %v3612_v53  ;;  %v3538_v6 = vmul.f32 %v8902_v61, %v3394_v54  ;;  %v3466_v12 = vadd.f32 -1.4531521, %v3322_v56 }
  0xff   :  { %v5123_v60 = vmul.f32 %v7599_v36, %v4403_v41  ;;  %v4401_v14 = vmul.f32 %v8864_v17, %v4257_v1  ;;  %v4329_v19 = vadd.f32 0.2548296, %v4185_v63  ;;  %v3972_v36 = vadd.f32 -0.28449672, %v3828_v5  ;;  %v8930_v25 = vpop.eup %7620 }
 0x100   :  { %v5195_v9 = vmul.f32 %v7601_v45, %v4475_v52  ;;  %v3900_v22 = vmul.f32 %v8898_v10, %v3756_v11  ;;  %v3682_v23 = vadd.f32 1.4214138, %v3538_v6  ;;  %v3610_v45 = vmul.f32 %v8910_v38, %v3466_v12 }
 0x101   :  { %v5267_v13 = vsub.f32 1.0, %v5123_v60  ;;  %v5121_v30 = vmul.f32 %v8891_v55, %v4401_v14  ;;  %v4473_v27 = vmul.f32 %v8873_v28, %v4329_v19  ;;  %v4116_v31 = vmul.f32 %v8888_v51, %v3972_v36  ;;  %v8936_v46 = vpop.eup %7622 }
 0x102   :  { %v5339_v21 = vsub.f32 1.0, %v5195_v9  ;;  %v4044_v34 = vadd.f32 -0.28449672, %v3900_v22  ;;  %v3826_v41 = vmul.f32 %v8902_v61, %v3682_v23  ;;  %v3754_v42 = vadd.f32 1.4214138, %v3610_v45 }
 0x103   :  { %v5555_v29 = vsub.f32 0.0, %v5267_v13  ;;  %v5265_v52 = vsub.f32 1.0, %v5121_v30  ;;  %v5193_v53 = vmul.f32 %v8895_v4, %v4473_v27  ;;  %v4260_v54 = vadd.f32 0.2548296, %v4116_v31 }
 0x104   :  { %v5627_v17 = vsub.f32 0.0, %v5339_v21  ;;  %v4188_v55 = vmul.f32 %v8898_v10, %v4044_v34  ;;  %v3970_v60 = vadd.f32 -0.28449672, %v3826_v41  ;;  %v8945_v1 = vpop.eup %7624  ;;  %v3898_v59 = vmul.f32 %v8910_v38, %v3754_v42 }
 0x105   :  { %v5699_v47 = vsel %vm5411_vm2, %v5267_v13, %v5555_v29  ;;  %v5553_v5 = vsub.f32 0.0, %v5265_v52  ;;  %v5337_v9 = vsub.f32 1.0, %v5193_v53  ;;  %v4404_v58 = vmul.f32 %v8888_v51, %v4260_v54  ;;  %v8951_v12 = vpop.eup %7626 }
 0x106   :  { %v5843_v56 = vadd.f32 1.0, %v5699_v47  ;;  %v5771_v28 = vsel %vm5483_vm3, %v5339_v21, %v5627_v17  ;;  %v4332_v4 = vadd.f32 0.2548296, %v4188_v55  ;;  %v4114_v6 = vmul.f32 %v8902_v61, %v3970_v60 }
 0x107   :  { %v5915_v63 = vadd.f32 1.0, %v5771_v28  ;;  %v5697_v14 = vsel %vm5409_vm4, %v5265_v52, %v5553_v5  ;;  %v5625_v19 = vsub.f32 0.0, %v5337_v9  ;;  %v5124_v36 = vmul.f32 %v7615_v48, %v4404_v58 }
 0x108   :  { %v5987_v11 = vmul.f32 %v5843_v56, %v8825_v32  ;;  %vm5484_vm8 = vcmp.ge.f32.partialorder %v8829_v35, 0.0  ;;  %v5841_v51 = vadd.f32 1.0, %v5697_v14  ;;  %v4476_v32 = vmul.f32 %v8898_v10, %v4332_v4  ;;  %v1098_v35 = vpop.f32.mrf.mxu0 }
 0x109   :  { %v6059_v13 = vmul.f32 %v5915_v63, %v8827_v33  ;;  %v4258_v22 = vadd.f32 0.2548296, %v4114_v6  ;;  %v5769_v45 = vsel %vm5481_vm6, %v5337_v9, %v5625_v19  ;;  %v5268_v29 = vsub.f32 1.0, %v5124_v36  ;;  %v2022_v6 = vld [vmem:[#allocation2 + $0x260] sm:$0xff]  ;;  %v1386_v19 = vpop.f32.mrf.mxu1 }
 0x10a   :  { %v7147_v21 = vpack.c.bf16 %v5987_v11, %v5987_v11  ;;  %vm5410_vm9 = vcmp.ge.f32.partialorder %v8831_v39, 0.0  ;;  %v4042_v33 = vadd.f32 -0.28449672, %v3898_v59  ;;  %v5985_v2 = vmul.f32 %v5841_v51, %v8833_v40 }
 0x10b   :  { %v7219_v23 = vpack.c.bf16 %v6059_v13, %v6059_v13  ;;  %v5913_v48 = vadd.f32 1.0, %v5769_v45  ;;  %v5196_v30 = vmul.f32 %v8918_v57, %v4476_v32  ;;  %v4402_v10 = vmul.f32 %v8902_v61, %v4258_v22 }
 0x10c   :  { %6708 = vst.msk [vmem:[%s12756_s3 + $0x8] sm:$0xf] %vm6705_vm5, %v7147_v21  ;;  %v5556_v3 = vsub.f32 0.0, %v5268_v29  ;;  %v4186_v27 = vmul.f32 %v8910_v38, %v4042_v33  ;;  %v3255_v31 = vmul.f32 1.0614054, %v8936_v46  ;;  %v7145_v34 = vpack.c.bf16 %v5985_v2, %v5985_v2 }
 0x10d   :  { %6780 = vst.msk [vmem:[%s12756_s3 + $0x128] sm:$0xf] %vm6705_vm5, %v7219_v23  ;;  %v3327_v17 = vmul.f32 1.0614054, %v8951_v12  ;;  %v6057_v40 = vmul.f32 %v5913_v48, %v8850_v0  ;;  %v5340_v41 = vsub.f32 1.0, %v5196_v30  ;;  %v5122_v57 = vmul.f32 %v8922_v7, %v4402_v10  ;;  %v1953_v48 = vld [vmem:[#allocation2 + $0x38] sm:$0xff]  ;;  %v7377_v30 = vpop.f32.mrf.mxu0  ;;  %v7449_v10 = vpop.f32.mrf.mxu1 }
 0x10e   :  { %v5700_v61 = vsel %vm5412_vm7, %v5268_v29, %v5556_v3  ;;  %v4330_v42 = vadd.f32 0.2548296, %v4186_v27  ;;  %v3399_v47 = vadd.f32 -1.4531521, %v3255_v31  ;;  %6706 = vst.msk [vmem:[%s12756_s3] sm:$0xf] %vm6705_vm5, %v7145_v34  ;;  %v9013_v22 = vadd.f32 %v8790_v37, %v2022_v6 }
 0x10f   :  { %v3471_v52 = vadd.f32 -1.4531521, %v3327_v17  ;;  %v7217_v53 = vpack.c.bf16 %v6057_v40, %v6057_v40  ;;  %v5844_v54 = vadd.f32 1.0, %v5700_v61  ;;  %v5628_v56 = vsub.f32 0.0, %v5340_v41 }
 0x110   :  { %v5266_v28 = vsub.f32 1.0, %v5122_v57  ;;  %v4474_v0 = vmul.f32 %v8910_v38, %v4330_v42  ;;  %v3543_v55 = vmul.f32 %v8936_v46, %v3399_v47  ;;  %v4623_v24 = vsub.f32 0.0, %v8886_v50  ;;  %v1399_v47 = vpop.f32.mrf.mxu1 }
 0x111   :  { %v3615_v7 = vmul.f32 %v8951_v12, %v3471_v52  ;;  %6778 = vst.msk [vmem:[%s12756_s3 + $0x120] sm:$0xf] %vm6705_vm5, %v7217_v53  ;;  %v5988_v60 = vmul.f32 %v5844_v54, %v8855_v8  ;;  %v5772_v63 = vsel %vm5484_vm8, %v5340_v41, %v5628_v56  ;;  %v8995_v9 = vmul.f32 0.70710677, %v8881_v44  ;;  %v169_v54 = vld [vmem:[#allocation2 + $0x28] sm:$0xff] }
 0x112   :  { %v5554_v5 = vsub.f32 0.0, %v5266_v28  ;;  %v5916_v38 = vadd.f32 1.0, %v5772_v63  ;;  %v5194_v58 = vmul.f32 %v8930_v25, %v4474_v0  ;;  %v3687_v11 = vadd.f32 1.4214138, %v3543_v55  ;;  %v241_v56 = vld [vmem:[#allocation2 + $0x268] sm:$0xff] }
 0x113   :  { %v3759_v4 = vadd.f32 1.4214138, %v3615_v7  ;;  %v7148_v59 = vpack.c.bf16 %v5988_v60, %v5988_v60  ;;  %v4767_v14 = vmul.f32 %v4623_v24, %v8886_v50  ;;  %v9002_v8 = vand.u32 2147483647, %v8995_v9 }
 0x114   :  { %v5698_v13 = vsel %vm5410_vm9, %v5266_v28, %v5554_v5  ;;  %v6060_v36 = vmul.f32 %v5916_v38, %v8866_v18  ;;  %v5338_v51 = vsub.f32 1.0, %v5194_v58  ;;  %v3831_v25 = vmul.f32 %v8936_v46, %v3687_v11 }
 0x115   :  { %v5842_v21 = vadd.f32 1.0, %v5698_v13  ;;  %6709 = vst.msk [vmem:[%s12756_s3 + $0xc] sm:$0xf] %vm6705_vm5, %v7148_v59  ;;  %v3903_v39 = vmul.f32 %v8951_v12, %v3759_v4  ;;  %v4989_v32 = vmul.f32 1.442695, %v4767_v14  ;;  %vm5482_vm10 = vcmp.ge.f32.partialorder %v8841_v49, 0.0 }
 0x116   :  { %v2677_v50 = vmul.f32 0.3275911, %v9002_v8  ;;  %v7220_v23 = vpack.c.bf16 %v6060_v36, %v6060_v36  ;;  %v5626_v45 = vsub.f32 0.0, %v5338_v51  ;;  %v3975_v29 = vadd.f32 -0.28449672, %v3831_v25  ;;  %v246_v14 = vld [vmem:[#allocation2 + $0x290] sm:$0xff] }
 0x117   :  { %v5986_v18 = vmul.f32 %v5842_v21, %v8868_v20  ;;  %v4047_v33 = vadd.f32 -0.28449672, %v3903_v39  ;;  %7628 = vpow2.f32 %v4989_v32  ;;  %v2025_v20 = vld [vmem:[#allocation2 + $0x278] sm:$0xff]  ;;  %v2314_v17 = vmul.f32 0.5, %v8837_v43  ;;  %v1111_v43 = vpop.f32.mrf.mxu0 }
 0x118   :  { %v2821_v2 = vadd.f32 1.0, %v2677_v50  ;;  %6781 = vst.msk [vmem:[%s12756_s3 + $0x12c] sm:$0xf] %vm6705_vm5, %v7220_v23  ;;  %v5770_v27 = vsel %vm5482_vm10, %v5338_v51, %v5626_v45  ;;  %v4119_v31 = vmul.f32 %v8936_v46, %v3975_v29  ;;  %v9029_v41 = vmul.f32 0.70710677, %v9013_v22  ;;  %v244_v23 = vld [vmem:[#allocation2 + $0x280] sm:$0xff] }
 0x119   :  { %v7146_v3 = vpack.c.bf16 %v5986_v18, %v5986_v18  ;;  %v5914_v34 = vadd.f32 1.0, %v5770_v27  ;;  %v4191_v49 = vmul.f32 %v8951_v12, %v4047_v33  ;;  %v9032_v57 = vadd.f32 %v8790_v37, %v1953_v48  ;;  %v7378_v11 = vpop.f32.mrf.mxu0  ;;  %v175_v18 = vld [vmem:[#allocation2 + $0x58] sm:$0xff]  ;;  %v173_v27 = vld [vmem:[#allocation2 + $0x48] sm:$0xff] }
 0x11a   :  { %7630 = vrcp.f32 %v2821_v2  ;;  %v4263_v40 = vadd.f32 0.2548296, %v4119_v31  ;;  %v9035_v42 = vadd.f32 %v8790_v37, %v2025_v20  ;;  %v9039_v53 = vand.u32 2147483647, %v9029_v41  ;;  %v245_v31 = vld [vmem:[#allocation2 + $0x288] sm:$0xff] }
 0x11b   :  { %6707 = vst.msk [vmem:[%s12756_s3 + $0x4] sm:$0xf] %vm6705_vm5, %v7146_v3  ;;  %v6058_v61 = vmul.f32 %v5914_v34, %v2314_v17  ;;  %v4335_v0 = vadd.f32 0.2548296, %v4191_v49  ;;  %v9042_v55 = vmul.f32 0.70710677, %v9032_v57  ;;  %v1659_v38 = vadd.f32 %v1098_v35, %v169_v54  ;;  %v1114_v45 = vpop.f32.mrf.mxu0 }
 0x11c   :  { %v4407_v52 = vmul.f32 %v8936_v46, %v4263_v40  ;;  %v4549_v24 = vsub.f32 0.0, %v9002_v8  ;;  %v2749_v60 = vmul.f32 0.3275911, %v9039_v53  ;;  %v9048_v63 = vmul.f32 0.70710677, %v9035_v42  ;;  %v174_v46 = vld [vmem:[#allocation2 + $0x50] sm:$0xff] }
 0x11d   :  { %v7218_v28 = vpack.c.bf16 %v6058_v61, %v6058_v61  ;;  %v9055_v5 = vand.u32 2147483647, %v9042_v55  ;;  %v1731_v58 = vadd.f32 %v1386_v19, %v241_v56  ;;  %v2247_v4 = vmul.f32 0.5, %v8845_v62  ;;  %1804 = vst.msk [vmem:[#allocation2 + $0x28] sm:$0xff] %vm19_vm1, %v1659_v38  ;;  %v172_v19 = vld [vmem:[#allocation2 + $0x40] sm:$0xff]  ;;  %v250_v54 = vld [vmem:[#allocation2 + $0x2b0] sm:$0xff] }
 0x11e   :  { %v5127_v7 = vmul.f32 %v8945_v1, %v4407_v52  ;;  %v7450_v1 = vpop.f32.mrf.mxu1  ;;  %v2893_v59 = vadd.f32 1.0, %v2749_v60  ;;  %v9059_v13 = vand.u32 2147483647, %v9048_v63  ;;  %vm5415_vm11 = vcmp.ge.f32.partialorder %v8859_v15, 0.0  ;;  %v7381_v52 = vpop.f32.mrf.mxu0 }
 0x11f   :  { %6779 = vst.msk [vmem:[%s12756_s3 + $0x124] sm:$0xf] %vm6705_vm5, %v7218_v28  ;;  %v4479_v36 = vmul.f32 %v8951_v12, %v4335_v0  ;;  %v2680_v21 = vmul.f32 0.3275911, %v9055_v5  ;;  %v1664_v35 = vadd.f32 %v7377_v30, %v174_v46  ;;  %v4693_v62 = vmul.f32 %v4549_v24, %v9002_v8 }
 0x120   :  { %v5271_v6 = vsub.f32 1.0, %v5127_v7  ;;  %1876 = vst.msk [vmem:[#allocation2 + $0x268] sm:$0xff] %vm19_vm1, %v1731_v58  ;;  %7632 = vrcp.f32 %v2893_v59  ;;  %v2752_v25 = vmul.f32 0.3275911, %v9059_v13  ;;  %v9069_v39 = vmul.f32 0.5, %v8862_v16  ;;  %v1402_v29 = vpop.f32.mrf.mxu1 }
 0x121   :  { %v4621_v32 = vsub.f32 0.0, %v9039_v53  ;;  %v2824_v12 = vadd.f32 1.0, %v2680_v21  ;;  %1809 = vst.msk [vmem:[#allocation2 + $0x50] sm:$0xff] %vm19_vm1, %v1664_v35  ;;  %v1736_v50 = vadd.f32 %v7449_v10, %v246_v14  ;;  %vm5487_vm12 = vcmp.ge.f32.partialorder %v8877_v26, 0.0  ;;  %v247_v10 = vld [vmem:[#allocation2 + $0x298] sm:$0xff] }
 0x122   :  { %v5559_v51 = vsub.f32 0.0, %v5271_v6  ;;  %v2896_v2 = vadd.f32 1.0, %v2752_v25  ;;  %v1662_v48 = vadd.f32 %v1111_v43, %v172_v19  ;;  %v9077_v3 = vmul.f32 0.5, %v8881_v44  ;;  %v178_v43 = vld [vmem:[#allocation2 + $0x70] sm:$0xff]  ;;  %v7453_v56 = vpop.f32.mrf.mxu1 }
 0x123   :  { %7634 = vrcp.f32 %v2824_v12  ;;  %1881 = vst.msk [vmem:[#allocation2 + $0x290] sm:$0xff] %vm19_vm1, %v1736_v50  ;;  %v4841_v17 = vmul.f32 1.442695, %v4693_v62  ;;  %v1734_v15 = vadd.f32 %v1399_v47, %v244_v23  ;;  %v1665_v34 = vadd.f32 %v7378_v11, %v175_v18 }
 0x124   :  { %v7629_v33 = vpop.eup %7628  ;;  %v5703_v8 = vsel %vm5415_vm11, %v5271_v6, %v5559_v51  ;;  %7636 = vrcp.f32 %v2896_v2  ;;  %1807 = vst.msk [vmem:[#allocation2 + $0x40] sm:$0xff] %vm19_vm1, %v1662_v48  ;;  %v4765_v44 = vmul.f32 %v4621_v32, %v9039_v53  ;;  %v4552_v28 = vsub.f32 0.0, %v9055_v5  ;;  %v1951_v0 = vld [vmem:[#allocation2 + $0x28] sm:$0xff] }
 0x125   :  { %v5847_v16 = vadd.f32 1.0, %v5703_v8  ;;  %v5199_v30 = vmul.f32 %v7629_v33, %v4479_v36  ;;  %1879 = vst.msk [vmem:[#allocation2 + $0x280] sm:$0xff] %vm19_vm1, %v1734_v15  ;;  %1810 = vst.msk [vmem:[#allocation2 + $0x58] sm:$0xff] %vm19_vm1, %v1665_v34  ;;  %v1737_v47 = vadd.f32 %v7450_v1, %v247_v10  ;;  %v1663_v24 = vadd.f32 %v1114_v45, %v173_v27 }
 0x126   :  { %v1735_v60 = vadd.f32 %v1402_v29, %v245_v31  ;;  %v9089_v53 = vadd.f32 %v8790_v37, %v1951_v0  ;;  %v4624_v11 = vsub.f32 0.0, %v9059_v13  ;;  %v1668_v1 = vadd.f32 %v7381_v52, %v178_v43 }
 0x127   :  { %v9080_v20 = vpop.eup %7630  ;;  %v5991_v49 = vmul.f32 %v5847_v16, %v2247_v4  ;;  %v5343_v40 = vsub.f32 1.0, %v5199_v30  ;;  %v2023_v7 = vld [vmem:[#allocation2 + $0x268] sm:$0xff]  ;;  %1882 = vst.msk [vmem:[#allocation2 + $0x298] sm:$0xff] %vm19_vm1, %v1737_v47  ;;  %1808 = vst.msk [vmem:[#allocation2 + $0x48] sm:$0xff] %vm19_vm1, %v1663_v24  ;;  %v1740_v59 = vadd.f32 %v7453_v56, %v250_v54  ;;  %7638 = vpow2.f32 %v4841_v17 }
 0x128   :  { %v3253_v61 = vmul.f32 1.0614054, %v9080_v20  ;;  %v9093_v4 = vadd.f32 %v8790_v37, %v2023_v7  ;;  %v1956_v6 = vld [vmem:[#allocation2 + $0x50] sm:$0xff]  ;;  %1880 = vst.msk [vmem:[#allocation2 + $0x288] sm:$0xff] %vm19_vm1, %v1735_v60  ;;  %v9106_v21 = vmul.f32 0.70710677, %v9089_v53  ;;  %v4696_v19 = vmul.f32 %v4552_v28, %v9055_v5 }
 0x129   :  { %v7151_v46 = vpack.c.bf16 %v5991_v49, %v5991_v49  ;;  %v5631_v38 = vsub.f32 0.0, %v5343_v40  ;;  %v9113_v62 = vadd.f32 %v8790_v37, %v1956_v6  ;;  %1813 = vst.msk [vmem:[#allocation2 + $0x70] sm:$0xff] %vm19_vm1, %v1668_v1  ;;  %1885 = vst.msk [vmem:[#allocation2 + $0x2b0] sm:$0xff] %vm19_vm1, %v1740_v59  ;;  %v4985_v25 = vmul.f32 1.442695, %v4765_v44 }
 0x12a   :  { %v3397_v58 = vadd.f32 -1.4531521, %v3253_v61  ;;  %v9110_v51 = vmul.f32 0.70710677, %v9093_v4  ;;  %v2534_v32 = vand.u32 2147483647, %v9106_v21  ;;  %v4768_v5 = vmul.f32 %v4624_v11, %v9059_v13 }
 0x12b   :  { %6712 = vst.msk [vmem:[%s12756_s3 + $0x18] sm:$0xf] %vm6705_vm5, %v7151_v46  ;;  %v5775_v14 = vsel %vm5487_vm12, %v5343_v40, %v5631_v38  ;;  %v9120_v50 = vmul.f32 0.5, %v9013_v22  ;;  %v9128_v29 = vmul.f32 0.5, %v9032_v57  ;;  %v9131_v8 = vmul.f32 0.70710677, %v9113_v62 }
 0x12c   :  { %v3541_v36 = vmul.f32 %v9080_v20, %v3397_v58  ;;  %v5919_v35 = vadd.f32 1.0, %v5775_v14  ;;  %v2606_v23 = vand.u32 2147483647, %v9110_v51  ;;  %v2678_v33 = vmul.f32 0.3275911, %v2534_v32  ;;  %v2028_v10 = vld [vmem:[#allocation2 + $0x290] sm:$0xff] }
 0x12d   :  { %v9124_v18 = vpop.eup %7632  ;;  %v4847_v22 = vmul.f32 1.442695, %v4696_v19  ;;  %7640 = vpow2.f32 %v4985_v25  ;;  %v9135_v30 = vand.u32 2147483647, %v9131_v8  ;;  %v4991_v31 = vmul.f32 1.442695, %v4768_v5 }
 0x12e   :  { %v3685_v26 = vadd.f32 1.4214138, %v3541_v36  ;;  %v6063_v12 = vmul.f32 %v5919_v35, %v9069_v39  ;;  %v3325_v39 = vmul.f32 1.0614054, %v9124_v18  ;;  %v2750_v48 = vmul.f32 0.3275911, %v2606_v23 }
 0x12f   :  { %v2822_v13 = vadd.f32 1.0, %v2678_v33  ;;  %v4550_v17 = vsub.f32 0.0, %v2534_v32  ;;  %v4622_v61 = vsub.f32 0.0, %v2606_v23  ;;  %v9150_v52 = vadd.f32 %v8790_v37, %v2028_v10  ;;  %v1954_v58 = vld [vmem:[#allocation2 + $0x40] sm:$0xff] }
 0x130   :  { %v3829_v45 = vmul.f32 %v9080_v20, %v3685_v26  ;;  %v7223_v2 = vpack.c.bf16 %v6063_v12, %v6063_v12  ;;  %v9137_v27 = vpop.eup %7634  ;;  %v3469_v57 = vadd.f32 -1.4531521, %v3325_v39  ;;  %v2894_v15 = vadd.f32 1.0, %v2750_v48 }
 0x131   :  { %v9143_v34 = vpop.eup %7636  ;;  %v3256_v40 = vmul.f32 1.0614054, %v9137_v27  ;;  %7642 = vrcp.f32 %v2822_v13  ;;  %v2683_v28 = vmul.f32 0.3275911, %v9135_v30  ;;  %vm5413_vm13 = vcmp.ge.f32.partialorder %v8995_v9, 0.0 }
 0x132   :  { %v3973_v16 = vadd.f32 -0.28449672, %v3829_v45  ;;  %6784 = vst.msk [vmem:[%s12756_s3 + $0x138] sm:$0xf] %vm6705_vm5, %v7223_v2  ;;  %v3613_v44 = vmul.f32 %v9124_v18, %v3469_v57  ;;  %v3328_v43 = vmul.f32 1.0614054, %v9143_v34  ;;  %7644 = vrcp.f32 %v2894_v15 }
 0x133   :  { %v3400_v56 = vadd.f32 -1.4531521, %v3256_v40  ;;  %7646 = vpow2.f32 %v4847_v22  ;;  %v4694_v47 = vmul.f32 %v4550_v17, %v2534_v32  ;;  %v4766_v46 = vmul.f32 %v4622_v61, %v2606_v23 }
 0x134   :  { %v4117_v49 = vmul.f32 %v9080_v20, %v3973_v16  ;;  %v3757_v0 = vadd.f32 1.4214138, %v3613_v44  ;;  %v3472_v7 = vadd.f32 -1.4531521, %v3328_v43  ;;  %v2827_v38 = vadd.f32 1.0, %v2683_v28  ;;  %v7639_v11 = vpop.eup %7638 }
 0x135   :  { %v3544_v60 = vmul.f32 %v9137_v27, %v3400_v56  ;;  %7648 = vpow2.f32 %v4991_v31  ;;  %v9159_v59 = vmul.f32 0.70710677, %v9150_v52  ;;  %v9162_v35 = vmul.f32 0.5, %v9035_v42 }
 0x136   :  { %v4261_v54 = vadd.f32 0.2548296, %v4117_v49  ;;  %v3901_v6 = vmul.f32 %v9124_v18, %v3757_v0  ;;  %v3616_v1 = vmul.f32 %v9143_v34, %v3472_v7  ;;  %7650 = vrcp.f32 %v2827_v38 }
 0x137   :  { %v3688_v36 = vadd.f32 1.4214138, %v3544_v60  ;;  %v4843_v26 = vmul.f32 1.442695, %v4694_v47  ;;  %v9165_v25 = vadd.f32 %v8790_v37, %v1954_v58  ;;  %v4987_v5 = vmul.f32 1.442695, %v4766_v46 }
 0x138   :  { %v4405_v24 = vmul.f32 %v9080_v20, %v4261_v54  ;;  %v4045_v20 = vadd.f32 -0.28449672, %v3901_v6  ;;  %v3760_v19 = vadd.f32 1.4214138, %v3616_v1  ;;  %v9169_v23 = vand.u32 2147483647, %v9159_v59 }
 0x139   :  { %v3832_v12 = vmul.f32 %v9137_v27, %v3688_v36  ;;  %v9174_v42 = vmul.f32 0.5, %v9089_v53  ;;  %v9177_v2 = vmul.f32 0.5, %v9093_v4  ;;  %v4555_v22 = vsub.f32 0.0, %v9135_v30 }
 0x13a   :  { %v5125_v14 = vmul.f32 %v7639_v11, %v4405_v24  ;;  %v4189_v45 = vmul.f32 %v9124_v18, %v4045_v20  ;;  %v3904_v33 = vmul.f32 %v9143_v34, %v3760_v19  ;;  %v2755_v48 = vmul.f32 0.3275911, %v9169_v23  ;;  %v7641_v16 = vpop.eup %7640 }
 0x13b   :  { %v3976_v37 = vadd.f32 -0.28449672, %v3832_v12  ;;  %7652 = vpow2.f32 %v4843_v26  ;;  %v9182_v57 = vmul.f32 0.70710677, %v9165_v25  ;;  %vm5485_vm14 = vcmp.ge.f32.partialorder %v9029_v41, 0.0 }
 0x13c   :  { %v5269_v32 = vsub.f32 1.0, %v5125_v14  ;;  %v4333_v13 = vadd.f32 0.2548296, %v4189_v45  ;;  %v4048_v10 = vadd.f32 -0.28449672, %v3904_v33  ;;  %7654 = vpow2.f32 %v4987_v5 }
 0x13d   :  { %v4120_v4 = vmul.f32 %v9137_v27, %v3976_v37  ;;  %v2899_v31 = vadd.f32 1.0, %v2755_v48  ;;  %v9193_v61 = vand.u32 2147483647, %v9182_v57  ;;  %v4699_v54 = vmul.f32 %v4555_v22, %v9135_v30  ;;  %v2026_v30 = vld [vmem:[#allocation2 + $0x280] sm:$0xff] }
 0x13e   :  { %v5557_v39 = vsub.f32 0.0, %v5269_v32  ;;  %v9188_v17 = vpop.eup %7642  ;;  %v4477_v49 = vmul.f32 %v9124_v18, %v4333_v13  ;;  %v4192_v40 = vmul.f32 %v9143_v34, %v4048_v10  ;;  %vm5416_vm15 = vcmp.ge.f32.partialorder %v9042_v55, 0.0 }
 0x13f   :  { %v9195_v44 = vpop.eup %7644  ;;  %v4264_v9 = vadd.f32 0.2548296, %v4120_v4  ;;  %v3254_v43 = vmul.f32 1.0614054, %v9188_v17  ;;  %7656 = vrcp.f32 %v2899_v31  ;;  %vm5488_vm0 = vcmp.ge.f32.partialorder %v9048_v63, 0.0 }
 0x140   :  { %v5701_v53 = vsel %vm5413_vm13, %v5269_v32, %v5557_v39  ;;  %v5197_v28 = vmul.f32 %v7641_v16, %v4477_v49  ;;  %v4336_v0 = vadd.f32 0.2548296, %v4192_v40  ;;  %v3326_v18 = vmul.f32 1.0614054, %v9195_v44  ;;  %v7647_v7 = vpop.eup %7646  ;;  %v1957_v39 = vld [vmem:[#allocation2 + $0x58] sm:$0xff] }
 0x141   :  { %v5845_v15 = vadd.f32 1.0, %v5701_v53  ;;  %v4408_v47 = vmul.f32 %v9137_v27, %v4264_v9  ;;  %v3398_v24 = vadd.f32 -1.4531521, %v3254_v43  ;;  %v4627_v60 = vsub.f32 0.0, %v9169_v23 }
 0x142   :  { %v2681_v46 = vmul.f32 0.3275911, %v9193_v61  ;;  %v5341_v58 = vsub.f32 1.0, %v5197_v28  ;;  %v3470_v11 = vadd.f32 -1.4531521, %v3326_v18  ;;  %v7649_v6 = vpop.eup %7648  ;;  %vm5414_vm2 = vcmp.ge.f32.partialorder %v9106_v21, 0.0 }
 0x143   :  { %v5989_v56 = vmul.f32 %v5845_v15, %v9077_v3  ;;  %v4480_v3 = vmul.f32 %v9143_v34, %v4336_v0  ;;  %v5128_v1 = vmul.f32 %v7647_v7, %v4408_v47  ;;  %v3542_v14 = vmul.f32 %v9188_v17, %v3398_v24  ;;  %v9208_v27 = vpop.eup %7650  ;;  %v9218_v34 = vld [vmem:[%s12755_s2] ss:$0 sm:$0xff] }
 0x144   :  { %v4853_v36 = vmul.f32 1.442695, %v4699_v54  ;;  %v2825_v20 = vadd.f32 1.0, %v2681_v46  ;;  %v5629_v19 = vsub.f32 0.0, %v5341_v58  ;;  %v3614_v32 = vmul.f32 %v9195_v44, %v3470_v11 }
 0x145   :  { %v7149_v38 = vpack.c.bf16 %v5989_v56, %v5989_v56  ;;  %v5200_v26 = vmul.f32 %v7649_v6, %v4480_v3  ;;  %v9221_v12 = vadd.f32 %v9218_v34, %v2026_v30  ;;  %v5272_v5 = vsub.f32 1.0, %v5128_v1 }
 0x146   :  { %v3686_v45 = vadd.f32 1.4214138, %v3542_v14  ;;  %v3259_v33 = vmul.f32 1.0614054, %v9208_v27  ;;  %7658 = vrcp.f32 %v2825_v20  ;;  %v5773_v37 = vsel %vm5485_vm14, %v5341_v58, %v5629_v19 }
 0x147   :  { %6710 = vst.msk [vmem:[%s12756_s3 + $0x10] sm:$0xf] %vm6705_vm5, %v7149_v38  ;;  %v5344_v22 = vsub.f32 1.0, %v5200_v26  ;;  %v3758_v48 = vadd.f32 1.4214138, %v3614_v32  ;;  %v4771_v16 = vmul.f32 %v4627_v60, %v9169_v23  ;;  %v5917_v13 = vadd.f32 1.0, %v5773_v37 }
 0x148   :  { %v5560_v10 = vsub.f32 0.0, %v5272_v5  ;;  %v3830_v53 = vmul.f32 %v9188_v17, %v3686_v45  ;;  %v3403_v4 = vadd.f32 -1.4531521, %v3259_v33  ;;  %7660 = vpow2.f32 %v4853_v36  ;;  %v7653_v40 = vpop.eup %7652 }
 0x149   :  { %v5632_v31 = vsub.f32 0.0, %v5344_v22  ;;  %v3902_v15 = vmul.f32 %v9195_v44, %v3758_v48  ;;  %v9230_v49 = vadd.f32 %v9218_v34, %v1957_v39  ;;  %v6061_v41 = vmul.f32 %v5917_v13, %v9120_v50  ;;  %v7655_v54 = vpop.eup %7654  ;;  %v2029_v13 = vld [vmem:[#allocation2 + $0x298] sm:$0xff] }
 0x14a   :  { %v5704_v9 = vsel %vm5416_vm15, %v5272_v5, %v5560_v10  ;;  %v3974_v43 = vadd.f32 -0.28449672, %v3830_v53  ;;  %v3547_v23 = vmul.f32 %v9208_v27, %v3403_v4  ;;  %v4997_v18 = vmul.f32 1.442695, %v4771_v16 }
 0x14b   :  { %v5848_v56 = vadd.f32 1.0, %v5704_v9  ;;  %v5776_v28 = vsel %vm5488_vm0, %v5344_v22, %v5632_v31  ;;  %v4046_v0 = vadd.f32 -0.28449672, %v3902_v15  ;;  %v7221_v7 = vpack.c.bf16 %v6061_v41, %v6061_v41 }
 0x14c   :  { %v5920_v47 = vadd.f32 1.0, %v5776_v28  ;;  %v4118_v24 = vmul.f32 %v9188_v17, %v3974_v43  ;;  %v3691_v60 = vadd.f32 1.4214138, %v3547_v23  ;;  %v9239_v46 = vpop.eup %7656  ;;  %v4553_v30 = vsub.f32 0.0, %v9193_v61 }
 0x14d   :  { %v5992_v55 = vmul.f32 %v5848_v56, %v9128_v29  ;;  %v4190_v50 = vmul.f32 %v9195_v44, %v4046_v0  ;;  %v9245_v38 = vmul.f32 0.70710677, %v9221_v12  ;;  %6782 = vst.msk [vmem:[%s12756_s3 + $0x130] sm:$0xf] %vm6705_vm5, %v7221_v7  ;;  %v3331_v11 = vmul.f32 1.0614054, %v9239_v46 }
 0x14e   :  { %v6064_v63 = vmul.f32 %v5920_v47, %v9162_v35  ;;  %v4262_v58 = vadd.f32 0.2548296, %v4118_v24  ;;  %v3835_v3 = vmul.f32 %v9208_v27, %v3691_v60  ;;  %v4697_v26 = vmul.f32 %v4553_v30, %v9193_v61  ;;  %v1955_v30 = vld [vmem:[#allocation2 + $0x48] sm:$0xff] }
 0x14f   :  { %v7152_v29 = vpack.c.bf16 %v5992_v55, %v5992_v55  ;;  %v4334_v6 = vadd.f32 0.2548296, %v4190_v50  ;;  %v2609_v1 = vand.u32 2147483647, %v9245_v38  ;;  %v3475_v19 = vadd.f32 -1.4531521, %v3331_v11 }
 0x150   :  { %v7224_v14 = vpack.c.bf16 %v6064_v63, %v6064_v63  ;;  %v4406_v36 = vmul.f32 %v9188_v17, %v4262_v58  ;;  %v3979_v20 = vadd.f32 -0.28449672, %v3835_v3  ;;  %v9264_v5 = vmul.f32 0.70710677, %v9230_v49 }
 0x151   :  { %6713 = vst.msk [vmem:[%s12756_s3 + $0x1c] sm:$0xf] %vm6705_vm5, %v7152_v29  ;;  %v4478_v35 = vmul.f32 %v9195_v44, %v4334_v6  ;;  %v2753_v32 = vmul.f32 0.3275911, %v2609_v1  ;;  %v3619_v33 = vmul.f32 %v9239_v46, %v3475_v19  ;;  %7662 = vpow2.f32 %v4997_v18 }
 0x152   :  { %6785 = vst.msk [vmem:[%s12756_s3 + $0x13c] sm:$0xf] %vm6705_vm5, %v7224_v14  ;;  %v5126_v17 = vmul.f32 %v7653_v40, %v4406_v36  ;;  %v4123_v45 = vmul.f32 %v9208_v27, %v3979_v20  ;;  %vm5486_vm3 = vcmp.ge.f32.partialorder %v9110_v51, 0.0  ;;  %v2540_v37 = vand.u32 2147483647, %v9264_v5 }
 0x153   :  { %v9272_v39 = vpop.eup %7658  ;;  %v5198_v44 = vmul.f32 %v7655_v54, %v4478_v35  ;;  %v2897_v61 = vadd.f32 1.0, %v2753_v32  ;;  %v3763_v16 = vadd.f32 1.4214138, %v3619_v33  ;;  %v4849_v4 = vmul.f32 1.442695, %v4697_v26 }
 0x154   :  { %v5270_v22 = vsub.f32 1.0, %v5126_v17  ;;  %v4267_v48 = vadd.f32 0.2548296, %v4123_v45  ;;  %v3257_v53 = vmul.f32 1.0614054, %v9272_v39  ;;  %v4625_v54 = vsub.f32 0.0, %v2609_v1 }
 0x155   :  { %v5342_v10 = vsub.f32 1.0, %v5198_v44  ;;  %7664 = vrcp.f32 %v2897_v61  ;;  %v7661_v31 = vpop.eup %7660  ;;  %v3907_v41 = vmul.f32 %v9239_v46, %v3763_v16  ;;  %v2684_v9 = vmul.f32 0.3275911, %v2540_v37  ;;  %v2027_v17 = vld [vmem:[#allocation2 + $0x288] sm:$0xff] }
 0x156   :  { %v5558_v15 = vsub.f32 0.0, %v5270_v22  ;;  %v4411_v40 = vmul.f32 %v9208_v27, %v4267_v48  ;;  %v3401_v23 = vadd.f32 -1.4531521, %v3257_v53  ;;  %v9280_v56 = vadd.f32 %v9218_v34, %v2029_v13 }
 0x157   :  { %v5630_v43 = vsub.f32 0.0, %v5342_v10  ;;  %v4051_v18 = vadd.f32 -0.28449672, %v3907_v41  ;;  %v2828_v7 = vadd.f32 1.0, %v2684_v9  ;;  %7666 = vpow2.f32 %v4849_v4 }
 0x158   :  { %v5702_v28 = vsel %vm5414_vm2, %v5270_v22, %v5558_v15  ;;  %v5131_v0 = vmul.f32 %v7661_v31, %v4411_v40  ;;  %v3545_v27 = vmul.f32 %v9272_v39, %v3401_v23  ;;  %vm5419_vm4 = vcmp.ge.f32.partialorder %v9131_v8, 0.0  ;;  %v1960_v23 = vld [vmem:[#allocation2 + $0x70] sm:$0xff] }
 0x159   :  { %v5846_v47 = vadd.f32 1.0, %v5702_v28  ;;  %v5774_v24 = vsel %vm5486_vm3, %v5342_v10, %v5630_v43  ;;  %v4195_v50 = vmul.f32 %v9239_v46, %v4051_v18  ;;  %7668 = vrcp.f32 %v2828_v7 }
 0x15a   :  { %v5918_v60 = vadd.f32 1.0, %v5774_v24  ;;  %v5275_v55 = vsub.f32 1.0, %v5131_v0  ;;  %v3689_v21 = vadd.f32 1.4214138, %v3545_v27  ;;  %v4769_v58 = vmul.f32 %v4625_v54, %v2609_v1 }
 0x15b   :  { %v5990_v63 = vmul.f32 %v5846_v47, %v9174_v42  ;;  %v4339_v51 = vadd.f32 0.2548296, %v4195_v50  ;;  %v9292_v29 = vmul.f32 0.70710677, %v9280_v56  ;;  %v4556_v36 = vsub.f32 0.0, %v2540_v37 }
 0x15c   :  { %v6062_v3 = vmul.f32 %v5918_v60, %v9177_v2  ;;  %v5563_v11 = vsub.f32 0.0, %v5275_v55  ;;  %v3833_v14 = vmul.f32 %v9272_v39, %v3689_v21  ;;  %v9296_v20 = vadd.f32 %v9218_v34, %v1955_v30  ;;  %v176_v21 = vld [vmem:[#allocation2 + $0x60] sm:$0xff] }
 0x15d   :  { %v7150_v6 = vpack.c.bf16 %v5990_v63, %v5990_v63  ;;  %v4483_v8 = vmul.f32 %v9239_v46, %v4339_v51  ;;  %v2612_v1 = vand.u32 2147483647, %v9292_v29  ;;  %v2251_v2 = vmul.f32 0.5, %v9113_v62  ;;  %v1127_v51 = vpop.f32.mrf.mxu0 }
 0x15e   :  { %v7222_v19 = vpack.c.bf16 %v6062_v3, %v6062_v3  ;;  %v5707_v42 = vsel %vm5419_vm4, %v5275_v55, %v5563_v11  ;;  %v7663_v35 = vpop.eup %7662  ;;  %v3977_v32 = vadd.f32 -0.28449672, %v3833_v14  ;;  %v9310_v33 = vmul.f32 0.70710677, %v9296_v20  ;;  %v2032_v11 = vld [vmem:[#allocation2 + $0x2b0] sm:$0xff] }
 0x15f   :  { %6711 = vst.msk [vmem:[%s12756_s3 + $0x14] sm:$0xf] %vm6705_vm5, %v7150_v6  ;;  %v5851_v26 = vadd.f32 1.0, %v5707_v42  ;;  %v5203_v45 = vmul.f32 %v7663_v35, %v4483_v8  ;;  %v2756_v46 = vmul.f32 0.3275911, %v2612_v1  ;;  %v4700_v48 = vmul.f32 %v4556_v36, %v2540_v37 }
 0x160   :  { %6783 = vst.msk [vmem:[%s12756_s3 + $0x134] sm:$0xf] %vm6705_vm5, %v7222_v19  ;;  %v4121_v61 = vmul.f32 %v9272_v39, %v3977_v32  ;;  %v4993_v22 = vmul.f32 1.442695, %v4769_v58  ;;  %v9316_v10 = vand.u32 2147483647, %v9310_v33  ;;  %v9319_v53 = vadd.f32 %v9218_v34, %v2027_v17 }
 0x161   :  { %v5995_v44 = vmul.f32 %v5851_v26, %v2251_v2  ;;  %v5347_v62 = vsub.f32 1.0, %v5203_v45  ;;  %v2900_v13 = vadd.f32 1.0, %v2756_v46  ;;  %v2323_v40 = vmul.f32 0.5, %v9150_v52 }
 0x162   :  { %v9313_v16 = vpop.eup %7664  ;;  %v4265_v31 = vadd.f32 0.2548296, %v4121_v61  ;;  %v2682_v37 = vmul.f32 0.3275911, %v9316_v10  ;;  %vm5491_vm6 = vcmp.ge.f32.partialorder %v9159_v59, 0.0  ;;  %v4628_v60 = vsub.f32 0.0, %v2612_v1  ;;  %v1415_v61 = vpop.f32.mrf.mxu1 }
 0x163   :  { %v7155_v4 = vpack.c.bf16 %v5995_v44, %v5995_v44  ;;  %v3329_v15 = vmul.f32 1.0614054, %v9313_v16  ;;  %v5635_v41 = vsub.f32 0.0, %v5347_v62  ;;  %7670 = vrcp.f32 %v2900_v13  ;;  %v248_v44 = vld [vmem:[#allocation2 + $0x2a0] sm:$0xff] }
 0x164   :  { %v4409_v9 = vmul.f32 %v9272_v39, %v4265_v31  ;;  %7672 = vpow2.f32 %v4993_v22  ;;  %v7667_v54 = vpop.eup %7666  ;;  %v4855_v0 = vmul.f32 1.442695, %v4700_v48  ;;  %v2826_v52 = vadd.f32 1.0, %v2682_v37 }
 0x165   :  { %6716 = vst.msk [vmem:[%s12756_s3 + $0x28] sm:$0xf] %vm6705_vm5, %v7155_v4  ;;  %v3473_v43 = vadd.f32 -1.4531521, %v3329_v15  ;;  %v5779_v28 = vsel %vm5491_vm6, %v5347_v62, %v5635_v41  ;;  %v9331_v18 = vmul.f32 0.70710677, %v9319_v53  ;;  %v9341_v55 = vadd.f32 %v9218_v34, %v1960_v23 }
 0x166   :  { %v9333_v7 = vpop.eup %7668  ;;  %v5923_v47 = vadd.f32 1.0, %v5779_v28  ;;  %v5129_v24 = vmul.f32 %v7667_v54, %v4409_v9  ;;  %7674 = vrcp.f32 %v2826_v52  ;;  %vm5417_vm7 = vcmp.ge.f32.partialorder %v9182_v57, 0.0  ;;  %v179_v9 = vld [vmem:[#allocation2 + $0x78] sm:$0xff]  ;;  %v7382_v52 = vpop.f32.mrf.mxu0 }
 0x167   :  { %v3617_v27 = vmul.f32 %v9313_v16, %v3473_v43  ;;  %v3260_v59 = vmul.f32 1.0614054, %v9333_v7  ;;  %v9338_v39 = vand.u32 2147483647, %v9331_v18  ;;  %7676 = vpow2.f32 %v4855_v0 }
 0x168   :  { %v6067_v50 = vmul.f32 %v5923_v47, %v2323_v40  ;;  %v5273_v30 = vsub.f32 1.0, %v5129_v24  ;;  %v4772_v19 = vmul.f32 %v4628_v60, %v2612_v1  ;;  %v4554_v8 = vsub.f32 0.0, %v9316_v10 }
 0x169   :  { %v3761_v63 = vadd.f32 1.4214138, %v3617_v27  ;;  %v3404_v58 = vadd.f32 -1.4531521, %v3260_v59  ;;  %v2754_v3 = vmul.f32 0.3275911, %v9338_v39  ;;  %v9356_v32 = vadd.f32 %v9218_v34, %v2032_v11 }
 0x16a   :  { %v7227_v6 = vpack.c.bf16 %v6067_v50, %v6067_v50  ;;  %v5561_v14 = vsub.f32 0.0, %v5273_v30  ;;  %v9349_v2 = vmul.f32 0.70710677, %v9341_v55  ;;  %v1666_v17 = vadd.f32 %v1127_v51, %v176_v21 }
 0x16b   :  { %v3905_v36 = vmul.f32 %v9313_v16, %v3761_v63  ;;  %v3548_v42 = vmul.f32 %v9333_v7, %v3404_v58  ;;  %v2898_v35 = vadd.f32 1.0, %v2754_v3  ;;  %v2249_v1 = vmul.f32 0.5, %v9165_v25 }
 0x16c   :  { %6788 = vst.msk [vmem:[%s12756_s3 + $0x148] sm:$0xf] %vm6705_vm5, %v7227_v6  ;;  %v5705_v57 = vsel %vm5417_vm7, %v5273_v30, %v5561_v14  ;;  %v9360_v22 = vmul.f32 0.5, %v9221_v12  ;;  %v9364_v62 = vmul.f32 0.5, %v9230_v49  ;;  %v9367_v13 = vand.u32 2147483647, %v9349_v2 }
 0x16d   :  { %v4049_v26 = vadd.f32 -0.28449672, %v3905_v36  ;;  %v5849_v45 = vadd.f32 1.0, %v5705_v57  ;;  %v3692_v46 = vadd.f32 1.4214138, %v3548_v42  ;;  %7678 = vrcp.f32 %v2898_v35  ;;  %1811 = vst.msk [vmem:[#allocation2 + $0x60] sm:$0xff] %vm19_vm1, %v1666_v17  ;;  %v7454_v35 = vpop.f32.mrf.mxu1 }
 0x16e   :  { %v4999_v31 = vmul.f32 1.442695, %v4772_v19  ;;  %v9372_v15 = vmul.f32 0.70710677, %v9356_v32  ;;  %v4698_v41 = vmul.f32 %v4554_v8, %v9316_v10  ;;  %v2687_v49 = vmul.f32 0.3275911, %v9367_v13 }
 0x16f   :  { %v4193_v48 = vmul.f32 %v9313_v16, %v4049_v26  ;;  %v5993_v4 = vmul.f32 %v5849_v45, %v2249_v1  ;;  %v3836_v25 = vmul.f32 %v9333_v7, %v3692_v46  ;;  %v1738_v37 = vadd.f32 %v1415_v61, %v248_v44  ;;  %v251_v8 = vld [vmem:[#allocation2 + $0x2b8] sm:$0xff] }
 0x170   :  { %v9374_v40 = vpop.eup %7670  ;;  %vm5489_vm8 = vcmp.ge.f32.partialorder %v9245_v38, 0.0  ;;  %v2615_v0 = vand.u32 2147483647, %v9372_v15  ;;  %v9383_v24 = vmul.f32 0.5, %v9280_v56  ;;  %v4626_v10 = vsub.f32 0.0, %v9338_v39 }
 0x171   :  { %v4337_v12 = vadd.f32 0.2548296, %v4193_v48  ;;  %v7673_v43 = vpop.eup %7672  ;;  %v7153_v23 = vpack.c.bf16 %v5993_v4, %v5993_v4  ;;  %v3980_v54 = vadd.f32 -0.28449672, %v3836_v25  ;;  %v3332_v28 = vmul.f32 1.0614054, %v9374_v40 }
 0x172   :  { %v2831_v27 = vadd.f32 1.0, %v2687_v49  ;;  %1883 = vst.msk [vmem:[#allocation2 + $0x2a0] sm:$0xff] %vm19_vm1, %v1738_v37  ;;  %7680 = vpow2.f32 %v4999_v31  ;;  %v2759_v50 = vmul.f32 0.3275911, %v2615_v0  ;;  %v4851_v56 = vmul.f32 1.442695, %v4698_v41 }
 0x173   :  { %v4481_v47 = vmul.f32 %v9313_v16, %v4337_v12  ;;  %6714 = vst.msk [vmem:[%s12756_s3 + $0x20] sm:$0xf] %vm6705_vm5, %v7153_v23  ;;  %v4124_v60 = vmul.f32 %v9333_v7, %v3980_v54  ;;  %v3476_v59 = vadd.f32 -1.4531521, %v3332_v28  ;;  %v9392_v30 = vpop.eup %7674  ;;  %v1669_v63 = vadd.f32 %v7382_v52, %v179_v9 }
 0x174   :  { %7682 = vrcp.f32 %v2831_v27  ;;  %v3258_v3 = vmul.f32 1.0614054, %v9392_v30  ;;  %v2903_v11 = vadd.f32 1.0, %v2759_v50  ;;  %v1958_v51 = vld [vmem:[#allocation2 + $0x60] sm:$0xff]  ;;  %v7677_v6 = vpop.eup %7676  ;;  %vm5420_vm9 = vcmp.ge.f32.partialorder %v9264_v5, 0.0 }
 0x175   :  { %v5201_v16 = vmul.f32 %v7673_v43, %v4481_v47  ;;  %v4268_v21 = vadd.f32 0.2548296, %v4124_v60  ;;  %v3620_v58 = vmul.f32 %v9374_v40, %v3476_v59  ;;  %v4770_v36 = vmul.f32 %v4626_v10, %v9338_v39  ;;  %1814 = vst.msk [vmem:[#allocation2 + $0x78] sm:$0xff] %vm19_vm1, %v1669_v63 }
 0x176   :  { %v4559_v19 = vsub.f32 0.0, %v9367_v13  ;;  %v9400_v42 = vadd.f32 %v9218_v34, %v1958_v51  ;;  %v3402_v17 = vadd.f32 -1.4531521, %v3258_v3  ;;  %7684 = vrcp.f32 %v2903_v11 }
 0x177   :  { %v5345_v14 = vsub.f32 1.0, %v5201_v16  ;;  %v4412_v57 = vmul.f32 %v9333_v7, %v4268_v21  ;;  %v3764_v26 = vadd.f32 1.4214138, %v3620_v58  ;;  %7686 = vpow2.f32 %v4851_v56 }
 0x178   :  { %v4631_v45 = vsub.f32 0.0, %v2615_v0  ;;  %v9405_v46 = vmul.f32 0.70710677, %v9400_v42  ;;  %v3546_v61 = vmul.f32 %v9392_v30, %v3402_v17  ;;  %v1741_v4 = vadd.f32 %v7454_v35, %v251_v8 }
 0x179   :  { %v5633_v1 = vsub.f32 0.0, %v5345_v14  ;;  %v5132_v39 = vmul.f32 %v7677_v6, %v4412_v57  ;;  %v3908_v44 = vmul.f32 %v9374_v40, %v3764_v26  ;;  %v2030_v48 = vld [vmem:[#allocation2 + $0x2a0] sm:$0xff]  ;;  %v4995_v31 = vmul.f32 1.442695, %v4770_v36 }
 0x17a   :  { %v9409_v25 = vpop.eup %7678  ;;  %v4703_v12 = vmul.f32 %v4559_v19, %v9367_v13  ;;  %v9415_v41 = vand.u32 2147483647, %v9405_v46  ;;  %v3690_v43 = vadd.f32 1.4214138, %v3546_v61  ;;  %1886 = vst.msk [vmem:[#allocation2 + $0x2b8] sm:$0xff] %vm19_vm1, %v1741_v4  ;;  %v4775_v54 = vmul.f32 %v4631_v45, %v2615_v0 }
 0x17b   :  { %v5777_v7 = vsel %vm5489_vm8, %v5345_v14, %v5633_v1  ;;  %v5276_v37 = vsub.f32 1.0, %v5132_v39  ;;  %v4052_v9 = vadd.f32 -0.28449672, %v3908_v44  ;;  %v3330_v23 = vmul.f32 1.0614054, %v9409_v25 }
 0x17c   :  { %v5921_v49 = vadd.f32 1.0, %v5777_v7  ;;  %v2685_v28 = vmul.f32 0.3275911, %v9415_v41  ;;  %v9421_v38 = vadd.f32 %v9218_v34, %v2030_v48  ;;  %v3834_v10 = vmul.f32 %v9392_v30, %v3690_v43  ;;  %v1961_v63 = vld [vmem:[#allocation2 + $0x78] sm:$0xff] }
 0x17d   :  { %v5564_v13 = vsub.f32 0.0, %v5276_v37  ;;  %v4196_v47 = vmul.f32 %v9374_v40, %v4052_v9  ;;  %v3474_v27 = vadd.f32 -1.4531521, %v3330_v23  ;;  %7688 = vpow2.f32 %v4995_v31 }
 0x17e   :  { %v6065_v52 = vmul.f32 %v5921_v49, %v9360_v22  ;;  %v4861_v60 = vmul.f32 1.442695, %v4703_v12  ;;  %v2829_v59 = vadd.f32 1.0, %v2685_v28  ;;  %v3978_v56 = vadd.f32 -0.28449672, %v3834_v10 }
 0x17f   :  { %v5708_v0 = vsel %vm5420_vm9, %v5276_v37, %v5564_v13  ;;  %v4340_v16 = vadd.f32 0.2548296, %v4196_v47  ;;  %v7681_v21 = vpop.eup %7680  ;;  %vm5492_vm10 = vcmp.ge.f32.partialorder %v9292_v29, 0.0  ;;  %v9430_v22 = vmul.f32 0.5, %v9296_v20  ;;  %v1130_v29 = vpop.f32.mrf.mxu0 }
 0x180   :  { %v7225_v50 = vpack.c.bf16 %v6065_v52, %v6065_v52  ;;  %v5852_v58 = vadd.f32 1.0, %v5708_v0  ;;  %v3618_v3 = vmul.f32 %v9409_v25, %v3474_v27  ;;  %7690 = vrcp.f32 %v2829_v59 }
 0x181   :  { %v9433_v11 = vpop.eup %7682  ;;  %v4484_v5 = vmul.f32 %v9374_v40, %v4340_v16  ;;  %v4122_v51 = vmul.f32 %v9392_v30, %v3978_v56  ;;  %v5005_v6 = vmul.f32 1.442695, %v4775_v54  ;;  %v9442_v14 = vmul.f32 0.70710677, %v9421_v38 }
 0x182   :  { %6786 = vst.msk [vmem:[%s12756_s3 + $0x140] sm:$0xf] %vm6705_vm5, %v7225_v50  ;;  %v5996_v20 = vmul.f32 %v5852_v58, %v9364_v62  ;;  %v3762_v36 = vadd.f32 1.4214138, %v3618_v3  ;;  %v3263_v19 = vmul.f32 1.0614054, %v9433_v11  ;;  %v9447_v8 = vadd.f32 %v9218_v34, %v1961_v63 }
 0x183   :  { %v5204_v35 = vmul.f32 %v7681_v21, %v4484_v5  ;;  %v4266_v57 = vadd.f32 0.2548296, %v4122_v51  ;;  %7692 = vpow2.f32 %v4861_v60  ;;  %v9450_v26 = vand.u32 2147483647, %v9442_v14  ;;  %v9452_v40 = vpop.eup %7684 }
 0x184   :  { %v7156_v17 = vpack.c.bf16 %v5996_v20, %v5996_v20  ;;  %vm5418_vm11 = vcmp.ge.f32.partialorder %v9310_v33, 0.0  ;;  %v3906_v1 = vmul.f32 %v9409_v25, %v3762_v36  ;;  %v3407_v62 = vadd.f32 -1.4531521, %v3263_v19  ;;  %v7687_v39 = vpop.eup %7686  ;;  %v1418_v20 = vpop.f32.mrf.mxu1  ;;  %v177_v33 = vld [vmem:[#allocation2 + $0x68] sm:$0xff] }
 0x185   :  { %v4557_v45 = vsub.f32 0.0, %v9415_v41  ;;  %v5348_v44 = vsub.f32 1.0, %v5204_v35  ;;  %v4410_v61 = vmul.f32 %v9392_v30, %v4266_v57  ;;  %v3335_v48 = vmul.f32 1.0614054, %v9452_v40  ;;  %v2033_v57 = vld [vmem:[#allocation2 + $0x2b8] sm:$0xff] }
 0x186   :  { %v2757_v4 = vmul.f32 0.3275911, %v9450_v26  ;;  %6717 = vst.msk [vmem:[%s12756_s3 + $0x2c] sm:$0xf] %vm6705_vm5, %v7156_v17  ;;  %v4050_v7 = vadd.f32 -0.28449672, %v3906_v1  ;;  %v3551_v31 = vmul.f32 %v9433_v11, %v3407_v62  ;;  %7694 = vpow2.f32 %v5005_v6  ;;  %v7385_v62 = vpop.f32.mrf.mxu0 }
 0x187   :  { %v9466_v12 = vmul.f32 0.70710677, %v9447_v8  ;;  %v5636_v49 = vsub.f32 0.0, %v5348_v44  ;;  %v5130_v37 = vmul.f32 %v7687_v39, %v4410_v61  ;;  %v3479_v9 = vadd.f32 -1.4531521, %v3335_v48 }
 0x188   :  { %v2901_v30 = vadd.f32 1.0, %v2757_v4  ;;  %v4194_v43 = vmul.f32 %v9409_v25, %v4050_v7  ;;  %v3695_v23 = vadd.f32 1.4214138, %v3551_v31  ;;  %v4701_v54 = vmul.f32 %v4557_v45, %v9415_v41  ;;  %v249_v31 = vld [vmem:[#allocation2 + $0x2a8] sm:$0xff] }
 0x189   :  { %v9471_v28 = vand.u32 2147483647, %v9466_v12  ;;  %v5780_v52 = vsel %vm5492_vm10, %v5348_v44, %v5636_v49  ;;  %v5274_v13 = vsub.f32 1.0, %v5130_v37  ;;  %v3623_v47 = vmul.f32 %v9452_v40, %v3479_v9  ;;  %v182_v49 = vld [vmem:[#allocation2 + $0x90] sm:$0xff]  ;;  %v7457_v37 = vpop.f32.mrf.mxu1 }
 0x18a   :  { %7696 = vrcp.f32 %v2901_v30  ;;  %v5924_v10 = vadd.f32 1.0, %v5780_v52  ;;  %v9477_v27 = vmul.f32 0.5, %v9319_v53  ;;  %v4338_v60 = vadd.f32 0.2548296, %v4194_v43  ;;  %v7689_v50 = vpop.eup %7688 }
 0x18b   :  { %v3839_v59 = vmul.f32 %v9433_v11, %v3695_v23  ;;  %v5562_v0 = vsub.f32 0.0, %v5274_v13  ;;  %vm5490_vm12 = vcmp.ge.f32.partialorder %v9331_v18, 0.0  ;;  %v3767_v41 = vadd.f32 1.4214138, %v3623_v47  ;;  %v254_v23 = vld [vmem:[#allocation2 + $0x2d0] sm:$0xff] }
 0x18c   :  { %v2688_v16 = vmul.f32 0.3275911, %v9471_v28  ;;  %v6068_v56 = vmul.f32 %v5924_v10, %v9383_v24  ;;  %v4482_v63 = vmul.f32 %v9409_v25, %v4338_v60  ;;  %v4857_v58 = vmul.f32 1.442695, %v4701_v54  ;;  %v180_v10 = vld [vmem:[#allocation2 + $0x80] sm:$0xff]  ;;  %v1143_v60 = vpop.f32.mrf.mxu0 }
 0x18d   :  { %v3983_v21 = vadd.f32 -0.28449672, %v3839_v59  ;;  %v9484_v3 = vpop.eup %7690  ;;  %v5706_v53 = vsel %vm5418_vm11, %v5274_v13, %v5562_v0  ;;  %v3911_v5 = vmul.f32 %v9452_v40, %v3767_v41  ;;  %v4629_v51 = vsub.f32 0.0, %v9450_v26 }
 0x18e   :  { %v2832_v6 = vadd.f32 1.0, %v2688_v16  ;;  %v7228_v36 = vpack.c.bf16 %v6068_v56, %v6068_v56  ;;  %v5850_v19 = vadd.f32 1.0, %v5706_v53  ;;  %v5202_v35 = vmul.f32 %v7689_v50, %v4482_v63  ;;  %v252_v63 = vld [vmem:[#allocation2 + $0x2c0] sm:$0xff] }
 0x18f   :  { %v4127_v24 = vmul.f32 %v9433_v11, %v3983_v21  ;;  %v9492_v25 = vmul.f32 0.5, %v9341_v55  ;;  %v4055_v17 = vadd.f32 -0.28449672, %v3911_v5  ;;  %v3261_v1 = vmul.f32 1.0614054, %v9484_v3  ;;  %v1431_v21 = vpop.f32.mrf.mxu1 }
 0x190   :  { %7698 = vrcp.f32 %v2832_v6  ;;  %v7693_v45 = vpop.eup %7692  ;;  %6789 = vst.msk [vmem:[%s12756_s3 + $0x14c] sm:$0xf] %vm6705_vm5, %v7228_v36  ;;  %v5994_v39 = vmul.f32 %v5850_v19, %v9430_v22  ;;  %v5346_v44 = vsub.f32 1.0, %v5202_v35  ;;  %vm5423_vm13 = vcmp.ge.f32.partialorder %v9349_v2, 0.0  ;;  %v183_v19 = vld [vmem:[#allocation2 + $0x98] sm:$0xff]  ;;  %v7386_v35 = vpop.f32.mrf.mxu0 }
 0x191   :  { %v4271_v61 = vadd.f32 0.2548296, %v4127_v24  ;;  %7700 = vpow2.f32 %v4857_v58  ;;  %v4199_v55 = vmul.f32 %v9452_v40, %v4055_v17  ;;  %v3405_v48 = vadd.f32 -1.4531521, %v3261_v1 }
 0x192   :  { %v4773_v4 = vmul.f32 %v4629_v51, %v9450_v26  ;;  %v9504_v7 = vadd.f32 %v9218_v34, %v2033_v57  ;;  %v7154_v9 = vpack.c.bf16 %v5994_v39, %v5994_v39  ;;  %v5634_v30 = vsub.f32 0.0, %v5346_v44  ;;  %v255_v39 = vld [vmem:[#allocation2 + $0x2d8] sm:$0xff] }
 0x193   :  { %v4415_v22 = vmul.f32 %v9433_v11, %v4271_v61  ;;  %v1667_v43 = vadd.f32 %v1130_v29, %v177_v33  ;;  %v7695_v54 = vpop.eup %7694  ;;  %v4343_v52 = vadd.f32 0.2548296, %v4199_v55  ;;  %v3549_v13 = vmul.f32 %v9484_v3, %v3405_v48 }
 0x194   :  { %v4560_v47 = vsub.f32 0.0, %v9471_v28  ;;  %v9510_v26 = vmul.f32 0.70710677, %v9504_v7  ;;  %6715 = vst.msk [vmem:[%s12756_s3 + $0x24] sm:$0xf] %vm6705_vm5, %v7154_v9  ;;  %v5778_v11 = vsel %vm5490_vm12, %v5346_v44, %v5634_v30  ;;  %vm5495_vm14 = vcmp.ge.f32.partialorder %v9372_v15, 0.0  ;;  %v7458_v44 = vpop.f32.mrf.mxu1 }
 0x195   :  { %v5135_v59 = vmul.f32 %v7693_v45, %v4415_v22  ;;  %1812 = vst.msk [vmem:[#allocation2 + $0x68] sm:$0xff] %vm19_vm1, %v1667_v43  ;;  %v1739_v50 = vadd.f32 %v1418_v20, %v249_v31  ;;  %v1672_v0 = vadd.f32 %v7385_v62, %v182_v49  ;;  %v5922_v41 = vadd.f32 1.0, %v5778_v11 }
 0x196   :  { %v4487_v16 = vmul.f32 %v9452_v40, %v4343_v52  ;;  %v3693_v29 = vadd.f32 1.4214138, %v3549_v13  ;;  %v9522_v56 = vand.u32 2147483647, %v9510_v26  ;;  %v5001_v53 = vmul.f32 1.442695, %v4773_v4 }
 0x197   :  { %v9524_v58 = vpop.eup %7696  ;;  %v5279_v18 = vsub.f32 1.0, %v5135_v59  ;;  %1884 = vst.msk [vmem:[#allocation2 + $0x2a8] sm:$0xff] %vm19_vm1, %v1739_v50  ;;  %1817 = vst.msk [vmem:[#allocation2 + $0x90] sm:$0xff] %vm19_vm1, %v1672_v0  ;;  %v1744_v5 = vadd.f32 %v7457_v37, %v254_v23  ;;  %v1670_v51 = vadd.f32 %v1143_v60, %v180_v10  ;;  %v6066_v6 = vmul.f32 %v5922_v41, %v9477_v27 }
 0x198   :  { %v5207_v20 = vmul.f32 %v7695_v54, %v4487_v16  ;;  %v3837_v40 = vmul.f32 %v9484_v3, %v3693_v29  ;;  %v3333_v36 = vmul.f32 1.0614054, %v9524_v58  ;;  %v4704_v57 = vmul.f32 %v4560_v47, %v9471_v28 }
 0x199   :  { %v5567_v24 = vsub.f32 0.0, %v5279_v18  ;;  %v2760_v17 = vmul.f32 0.3275911, %v9522_v56  ;;  %1889 = vst.msk [vmem:[#allocation2 + $0x2d0] sm:$0xff] %vm19_vm1, %v1744_v5  ;;  %1815 = vst.msk [vmem:[#allocation2 + $0x80] sm:$0xff] %vm19_vm1, %v1670_v51  ;;  %v1742_v1 = vadd.f32 %v1431_v21, %v252_v63  ;;  %v7226_v33 = vpack.c.bf16 %v6066_v6, %v6066_v6 }
 0x19a   :  { %v5351_v62 = vsub.f32 1.0, %v5207_v20  ;;  %v3981_v27 = vadd.f32 -0.28449672, %v3837_v40  ;;  %v3477_v45 = vadd.f32 -1.4531521, %v3333_v36  ;;  %7702 = vpow2.f32 %v5001_v53 }
 0x19b   :  { %v5711_v61 = vsel %vm5423_vm13, %v5279_v18, %v5567_v24  ;;  %v2904_v55 = vadd.f32 1.0, %v2760_v17  ;;  %1887 = vst.msk [vmem:[#allocation2 + $0x2c0] sm:$0xff] %vm19_vm1, %v1742_v1  ;;  %v1673_v28 = vadd.f32 %v7386_v35, %v183_v19  ;;  %v4863_v2 = vmul.f32 1.442695, %v4704_v57 }
 0x19c   :  { %6787 = vst.msk [vmem:[%s12756_s3 + $0x144] sm:$0xf] %vm6705_vm5, %v7226_v33  ;;  %v5855_v48 = vadd.f32 1.0, %v5711_v61  ;;  %v5639_v4 = vsub.f32 0.0, %v5351_v62  ;;  %v4125_v31 = vmul.f32 %v9484_v3, %v3981_v27  ;;  %v3621_v49 = vmul.f32 %v9524_v58, %v3477_v45  ;;  %v1959_v37 = vld [vmem:[#allocation2 + $0x68] sm:$0xff] }
 0x19d   :  { %v9544_v9 = vpop.eup %7698  ;;  %7704 = vrcp.f32 %v2904_v55  ;;  %v9547_v30 = vadd.f32 %v9218_v34, %v1959_v37  ;;  %1818 = vst.msk [vmem:[#allocation2 + $0x98] sm:$0xff] %vm19_vm1, %v1673_v28  ;;  %v1745_v22 = vadd.f32 %v7458_v44, %v255_v39  ;;  %v2327_v10 = vmul.f32 0.5, %v9356_v32 }
 0x19e   :  { %v7701_v43 = vpop.eup %7700  ;;  %v5999_v23 = vmul.f32 %v5855_v48, %v9492_v25  ;;  %v5783_v54 = vsel %vm5495_vm14, %v5351_v62, %v5639_v4  ;;  %v4269_v52 = vadd.f32 0.2548296, %v4125_v31  ;;  %v3765_v13 = vadd.f32 1.4214138, %v3621_v49  ;;  %v2031_v47 = vld [vmem:[#allocation2 + $0x2a8] sm:$0xff]  ;;  %v1964_v41 = vld [vmem:[#allocation2 + $0x90] sm:$0xff] }
 0x19f   :  { %v5927_v60 = vadd.f32 1.0, %v5783_v54  ;;  %v3264_v11 = vmul.f32 1.0614054, %v9544_v9  ;;  %v4632_v59 = vsub.f32 0.0, %v9522_v56  ;;  %1890 = vst.msk [vmem:[#allocation2 + $0x2d8] sm:$0xff] %vm19_vm1, %v1745_v22  ;;  %v9563_v32 = vadd.f32 %v9218_v34, %v2031_v47 }
 0x1a0   :  { %v7159_v50 = vpack.c.bf16 %v5999_v23, %v5999_v23  ;;  %v4413_v0 = vmul.f32 %v9484_v3, %v4269_v52  ;;  %v3909_v25 = vmul.f32 %v9524_v58, %v3765_v13  ;;  %v9560_v15 = vmul.f32 0.70710677, %v9547_v30  ;;  %v2036_v49 = vld [vmem:[#allocation2 + $0x2d0] sm:$0xff] }
 0x1a1   :  { %v6071_v16 = vmul.f32 %v5927_v60, %v2327_v10  ;;  %v3408_v29 = vadd.f32 -1.4531521, %v3264_v11  ;;  %7706 = vpow2.f32 %v4863_v2  ;;  %v9572_v5 = vmul.f32 0.70710677, %v9563_v32 }
 0x1a2   :  { %6720 = vst.msk [vmem:[%s12756_s3 + $0x38] sm:$0xf] %vm6705_vm5, %v7159_v50  ;;  %v5133_v63 = vmul.f32 %v7701_v43, %v4413_v0  ;;  %v4053_v21 = vadd.f32 -0.28449672, %v3909_v25  ;;  %v2542_v3 = vand.u32 2147483647, %v9560_v15  ;;  %v9575_v51 = vadd.f32 %v9218_v34, %v1964_v41 }
 0x1a3   :  { %v7231_v18 = vpack.c.bf16 %v6071_v16, %v6071_v16  ;;  %v3552_v53 = vmul.f32 %v9544_v9, %v3408_v29  ;;  %v4776_v40 = vmul.f32 %v4632_v59, %v9522_v56  ;;  %v2253_v19 = vmul.f32 0.5, %v9400_v42  ;;  %v9628_v16 = vld [vmem:[%s12755_s2] ss:$0 sm:$0xff] }
 0x1a4   :  { %v5277_v6 = vsub.f32 1.0, %v5133_v63  ;;  %v4197_v20 = vmul.f32 %v9524_v58, %v4053_v21  ;;  %v2686_v36 = vmul.f32 0.3275911, %v2542_v3  ;;  %v2614_v24 = vand.u32 2147483647, %v9572_v5 }
 0x1a5   :  { %6792 = vst.msk [vmem:[%s12756_s3 + $0x158] sm:$0xf] %vm6705_vm5, %v7231_v18  ;;  %v3696_v35 = vadd.f32 1.4214138, %v3552_v53  ;;  %vm5421_vm15 = vcmp.ge.f32.partialorder %v9405_v46, 0.0  ;;  %v2325_v33 = vmul.f32 0.5, %v9421_v38  ;;  %v9605_v13 = vadd.f32 %v9218_v34, %v2036_v49 }
 0x1a6   :  { %v5565_v57 = vsub.f32 0.0, %v5277_v6  ;;  %v4341_v17 = vadd.f32 0.2548296, %v4197_v20  ;;  %v2830_v1 = vadd.f32 1.0, %v2686_v36  ;;  %v2758_v62 = vmul.f32 0.3275911, %v2614_v24 }
 0x1a7   :  { %v3840_v56 = vmul.f32 %v9544_v9, %v3696_v35  ;;  %v9589_v27 = vmul.f32 0.70710677, %v9575_v51  ;;  %v7703_v45 = vpop.eup %7702  ;;  %v5007_v44 = vmul.f32 1.442695, %v4776_v40  ;;  %vm5493_vm0 = vcmp.ge.f32.partialorder %v9442_v14, 0.0  ;;  %v2034_v18 = vld [vmem:[#allocation2 + $0x2c0] sm:$0xff] }
 0x1a8   :  { %v5709_v39 = vsel %vm5421_vm15, %v5277_v6, %v5565_v57  ;;  %v4485_v42 = vmul.f32 %v9524_v58, %v4341_v17  ;;  %7708 = vrcp.f32 %v2830_v1  ;;  %v2902_v55 = vadd.f32 1.0, %v2758_v62 }
 0x1a9   :  { %v5853_v61 = vadd.f32 1.0, %v5709_v39  ;;  %v3984_v46 = vadd.f32 -0.28449672, %v3840_v56  ;;  %v9596_v48 = vmul.f32 0.5, %v9447_v8  ;;  %v9599_v4 = vmul.f32 0.5, %v9504_v7  ;;  %v1962_v7 = vld [vmem:[#allocation2 + $0x80] sm:$0xff] }
 0x1aa   :  { %v9593_v28 = vpop.eup %7704  ;;  %v5205_v38 = vmul.f32 %v7703_v45, %v4485_v42  ;;  %v2547_v31 = vand.u32 2147483647, %v9589_v27  ;;  %7710 = vrcp.f32 %v2902_v55  ;;  %v4558_v43 = vsub.f32 0.0, %v2542_v3 }
 0x1ab   :  { %v5997_v58 = vmul.f32 %v5853_v61, %v2253_v19  ;;  %v4128_v37 = vmul.f32 %v9544_v9, %v3984_v46  ;;  %v3336_v2 = vmul.f32 1.0614054, %v9593_v28  ;;  %7712 = vpow2.f32 %v5007_v44 }
 0x1ac   :  { %v5349_v22 = vsub.f32 1.0, %v5205_v38  ;;  %v2691_v23 = vmul.f32 0.3275911, %v2547_v31  ;;  %vm5424_vm2 = vcmp.ge.f32.partialorder %v9466_v12, 0.0  ;;  %v9609_v10 = vmul.f32 0.5, %v9547_v30 }
 0x1ad   :  { %v7157_v54 = vpack.c.bf16 %v5997_v58, %v5997_v58  ;;  %v4272_v52 = vadd.f32 0.2548296, %v4128_v37  ;;  %v3480_v8 = vadd.f32 -1.4531521, %v3336_v2  ;;  %v4630_v60 = vsub.f32 0.0, %v2614_v24 }
 0x1ae   :  { %v5637_v47 = vsub.f32 0.0, %v5349_v22  ;;  %v2835_v11 = vadd.f32 1.0, %v2691_v23  ;;  %v7707_v59 = vpop.eup %7706  ;;  %v9618_v0 = vmul.f32 0.5, %v9563_v32  ;;  %v9621_v25 = vmul.f32 0.70710677, %v9605_v13 }
 0x1af   :  { %6718 = vst.msk [vmem:[%s12756_s3 + $0x30] sm:$0xf] %vm6705_vm5, %v7157_v54  ;;  %v4416_v50 = vmul.f32 %v9544_v9, %v4272_v52  ;;  %v3624_v34 = vmul.f32 %v9593_v28, %v3480_v8  ;;  %v4702_v41 = vmul.f32 %v4558_v43, %v2542_v3  ;;  %v9631_v9 = vadd.f32 %v9628_v16, %v1962_v7 }
 0x1b0   :  { %v5781_v30 = vsel %vm5493_vm0, %v5349_v22, %v5637_v47  ;;  %7714 = vrcp.f32 %v2835_v11  ;;  %v2619_v21 = vand.u32 2147483647, %v9621_v25  ;;  %v4774_v53 = vmul.f32 %v4630_v60, %v2614_v24 }
 0x1b1   :  { %v5925_v29 = vadd.f32 1.0, %v5781_v30  ;;  %v5136_v63 = vmul.f32 %v7707_v59, %v4416_v50  ;;  %v3768_v32 = vadd.f32 1.4214138, %v3624_v34  ;;  %v9635_v14 = vmul.f32 0.5, %v9575_v51 }
 0x1b2   :  { %v4563_v3 = vsub.f32 0.0, %v2547_v31  ;;  %v9638_v6 = vmul.f32 0.70710677, %v9631_v9  ;;  %v2763_v19 = vmul.f32 0.3275911, %v2619_v21  ;;  %v4635_v57 = vsub.f32 0.0, %v2619_v21 }
 0x1b3   :  { %v6069_v20 = vmul.f32 %v5925_v29, %v2325_v33  ;;  %v5280_v40 = vsub.f32 1.0, %v5136_v63  ;;  %v3912_v36 = vmul.f32 %v9593_v28, %v3768_v32  ;;  %v4859_v35 = vmul.f32 1.442695, %v4702_v41 }
 0x1b4   :  { %v2545_v17 = vand.u32 2147483647, %v9638_v6  ;;  %v9643_v1 = vadd.f32 %v9628_v16, %v2034_v18  ;;  %v2907_v45 = vadd.f32 1.0, %v2763_v19  ;;  %v5003_v33 = vmul.f32 1.442695, %v4774_v53 }
 0x1b5   :  { %v9645_v24 = vpop.eup %7708  ;;  %v7229_v51 = vpack.c.bf16 %v6069_v20, %v6069_v20  ;;  %v5568_v56 = vsub.f32 0.0, %v5280_v40  ;;  %v4056_v62 = vadd.f32 -0.28449672, %v3912_v36  ;;  %v4707_v42 = vmul.f32 %v4563_v3, %v2547_v31  ;;  %v1965_v31 = vld [vmem:[#allocation2 + $0x98] sm:$0xff] }
 0x1b6   :  { %v3262_v39 = vmul.f32 1.0614054, %v9645_v24  ;;  %v2689_v44 = vmul.f32 0.3275911, %v2545_v17  ;;  %7716 = vrcp.f32 %v2907_v45  ;;  %v4779_v55 = vmul.f32 %v4635_v57, %v2619_v21 }
 0x1b7   :  { %6790 = vst.msk [vmem:[%s12756_s3 + $0x150] sm:$0xf] %vm6705_vm5, %v7229_v51  ;;  %v5712_v61 = vsel %vm5424_vm2, %v5280_v40, %v5568_v56  ;;  %v4200_v46 = vmul.f32 %v9593_v28, %v4056_v62  ;;  %v9655_v38 = vpop.eup %7710  ;;  %v4561_v2 = vsub.f32 0.0, %v2545_v17  ;;  %v9659_v54 = vmul.f32 0.70710677, %v9643_v1  ;;  %v2037_v51 = vld [vmem:[#allocation2 + $0x2d8] sm:$0xff] }
 0x1b8   :  { %v5856_v49 = vadd.f32 1.0, %v5712_v61  ;;  %v3406_v58 = vadd.f32 -1.4531521, %v3262_v39  ;;  %v2833_v37 = vadd.f32 1.0, %v2689_v44  ;;  %v7713_v22 = vpop.eup %7712  ;;  %v3334_v23 = vmul.f32 1.0614054, %v9655_v38 }
 0x1b9   :  { %v4344_v43 = vadd.f32 0.2548296, %v4200_v46  ;;  %vm5496_vm3 = vcmp.ge.f32.partialorder %v9510_v26, 0.0  ;;  %7718 = vpow2.f32 %v4859_v35  ;;  %v4869_v8 = vmul.f32 1.442695, %v4707_v42 }
 0x1ba   :  { %v6000_v12 = vmul.f32 %v5856_v49, %v9596_v48  ;;  %v3550_v52 = vmul.f32 %v9645_v24, %v3406_v58  ;;  %v3478_v47 = vadd.f32 -1.4531521, %v3334_v23  ;;  %7720 = vrcp.f32 %v2833_v37 }
 0x1bb   :  { %v4488_v7 = vmul.f32 %v9593_v28, %v4344_v43  ;;  %v9666_v60 = vadd.f32 %v9628_v16, %v1965_v31  ;;  %v5013_v50 = vmul.f32 1.442695, %v4779_v55  ;;  %v2617_v34 = vand.u32 2147483647, %v9659_v54 }
 0x1bc   :  { %v7160_v11 = vpack.c.bf16 %v6000_v12, %v6000_v12  ;;  %v3694_v59 = vadd.f32 1.4214138, %v3550_v52  ;;  %v3622_v41 = vmul.f32 %v9655_v38, %v3478_v47  ;;  %7722 = vpow2.f32 %v5003_v33 }
 0x1bd   :  { %v9669_v30 = vpop.eup %7714  ;;  %v5208_v48 = vmul.f32 %v7713_v22, %v4488_v7  ;;  %v4705_v29 = vmul.f32 %v4561_v2, %v2545_v17  ;;  %v2761_v32 = vmul.f32 0.3275911, %v2617_v34  ;;  %v4633_v21 = vsub.f32 0.0, %v2617_v34 }
 0x1be   :  { %6721 = vst.msk [vmem:[%s12756_s3 + $0x3c] sm:$0xf] %vm6705_vm5, %v7160_v11  ;;  %v3838_v28 = vmul.f32 %v9645_v24, %v3694_v59  ;;  %v3267_v63 = vmul.f32 1.0614054, %v9669_v30  ;;  %v3766_v53 = vadd.f32 1.4214138, %v3622_v41  ;;  %7724 = vpow2.f32 %v4869_v8 }
 0x1bf   :  { %v5352_v18 = vsub.f32 1.0, %v5208_v48  ;;  %v9679_v3 = vmul.f32 0.70710677, %v9666_v60  ;;  %7726 = vpow2.f32 %v5013_v50  ;;  %v2905_v36 = vadd.f32 1.0, %v2761_v32 }
 0x1c0   :  { %v3982_v20 = vadd.f32 -0.28449672, %v3838_v28  ;;  %v3411_v40 = vadd.f32 -1.4531521, %v3267_v63  ;;  %v3910_v35 = vmul.f32 %v9655_v38, %v3766_v53  ;;  %v4865_v57 = vmul.f32 1.442695, %v4705_v29 }
 0x1c1   :  { %v5640_v19 = vsub.f32 0.0, %v5352_v18  ;;  %v2548_v17 = vand.u32 2147483647, %v9679_v3  ;;  %7728 = vrcp.f32 %v2905_v36  ;;  %v4777_v45 = vmul.f32 %v4633_v21, %v2617_v34  ;;  %v253_v53 = vld [vmem:[#allocation2 + $0x2c8] sm:$0xff] }
 0x1c2   :  { %v4126_v56 = vmul.f32 %v9645_v24, %v3982_v20  ;;  %v3555_v62 = vmul.f32 %v9669_v30, %v3411_v40  ;;  %v4054_v33 = vadd.f32 -0.28449672, %v3910_v35  ;;  %v9690_v58 = vadd.f32 %v9628_v16, %v2037_v51  ;;  %v1434_v20 = vpop.f32.mrf.mxu1 }
 0x1c3   :  { %v5784_v39 = vsel %vm5496_vm3, %v5352_v18, %v5640_v19  ;;  %v2692_v42 = vmul.f32 0.3275911, %v2548_v17  ;;  %v4564_v44 = vsub.f32 0.0, %v2548_v17  ;;  %v9687_v61 = vpop.eup %7716  ;;  %vm5422_vm4 = vcmp.ge.f32.partialorder %v9560_v15, 0.0 }
 0x1c4   :  { %v5928_v46 = vadd.f32 1.0, %v5784_v39  ;;  %v4270_v55 = vadd.f32 0.2548296, %v4126_v56  ;;  %v3699_v49 = vadd.f32 1.4214138, %v3555_v62  ;;  %v4198_v37 = vmul.f32 %v9655_v38, %v4054_v33 }
 0x1c5   :  { %v3339_v2 = vmul.f32 1.0614054, %v9687_v61  ;;  %v2836_v31 = vadd.f32 1.0, %v2692_v42  ;;  %v4708_v26 = vmul.f32 %v4564_v44, %v2548_v17  ;;  %v5009_v12 = vmul.f32 1.442695, %v4777_v45 }
 0x1c6   :  { %v6072_v22 = vmul.f32 %v5928_v46, %v9599_v4  ;;  %v4414_v43 = vmul.f32 %v9645_v24, %v4270_v55  ;;  %v3843_v23 = vmul.f32 %v9669_v30, %v3699_v49  ;;  %v7719_v52 = vpop.eup %7718  ;;  %v4342_v8 = vadd.f32 0.2548296, %v4198_v37  ;;  %v181_v4 = vld [vmem:[#allocation2 + $0x88] sm:$0xff]  ;;  %v1146_v24 = vpop.f32.mrf.mxu0 }
 0x1c7   :  { %v3483_v7 = vadd.f32 -1.4531521, %v3339_v2  ;;  %7730 = vrcp.f32 %v2836_v31  ;;  %v4871_v47 = vmul.f32 1.442695, %v4708_v26  ;;  %v9698_v11 = vpop.eup %7720  ;;  %vm5494_vm6 = vcmp.ge.f32.partialorder %v9572_v5, 0.0 }
 0x1c8   :  { %v7232_v59 = vpack.c.bf16 %v6072_v22, %v6072_v22  ;;  %v5134_v50 = vmul.f32 %v7719_v52, %v4414_v43  ;;  %v3987_v34 = vadd.f32 -0.28449672, %v3843_v23  ;;  %v9702_v48 = vmul.f32 0.70710677, %v9690_v58  ;;  %v7389_v49 = vpop.f32.mrf.mxu0  ;;  %v7461_v43 = vpop.f32.mrf.mxu1 }
 0x1c9   :  { %v4486_v41 = vmul.f32 %v9655_v38, %v4342_v8  ;;  %v3627_v29 = vmul.f32 %v9687_v61, %v3483_v7  ;;  %v3265_v28 = vmul.f32 1.0614054, %v9698_v11  ;;  %7732 = vpow2.f32 %v4865_v57  ;;  %v7723_v63 = vpop.eup %7722 }
 0x1ca   :  { %6793 = vst.msk [vmem:[%s12756_s3 + $0x15c] sm:$0xf] %vm6705_vm5, %v7232_v59  ;;  %v5278_v32 = vsub.f32 1.0, %v5134_v50  ;;  %v4131_v21 = vmul.f32 %v9669_v30, %v3987_v34  ;;  %7734 = vpow2.f32 %v5009_v12  ;;  %v2620_v18 = vand.u32 2147483647, %v9702_v48  ;;  %v258_v59 = vld [vmem:[#allocation2 + $0x2f0] sm:$0xff] }
 0x1cb   :  { %v5206_v38 = vmul.f32 %v7723_v63, %v4486_v41  ;;  %v3771_v40 = vadd.f32 1.4214138, %v3627_v29  ;;  %v3409_v36 = vadd.f32 -1.4531521, %v3265_v28  ;;  %v1671_v19 = vadd.f32 %v1146_v24, %v181_v4  ;;  %v7725_v35 = vpop.eup %7724 }
 0x1cc   :  { %v5566_v57 = vsub.f32 0.0, %v5278_v32  ;;  %v4275_v17 = vadd.f32 0.2548296, %v4131_v21  ;;  %7736 = vpow2.f32 %v4871_v47  ;;  %v2764_v51 = vmul.f32 0.3275911, %v2620_v18  ;;  %v7727_v56 = vpop.eup %7726  ;;  %v9732_v21 = vpop.f32.mrf.mxu1 }
 0x1cd   :  { %v5350_v62 = vsub.f32 1.0, %v5206_v38  ;;  %vm5427_vm7 = vcmp.ge.f32.partialorder %v9589_v27, 0.0  ;;  %v3915_v45 = vmul.f32 %v9687_v61, %v3771_v40  ;;  %v3553_v39 = vmul.f32 %v9698_v11, %v3409_v36  ;;  %1816 = vst.msk [vmem:[#allocation2 + $0x88] sm:$0xff] %vm19_vm1, %v1671_v19 }
 0x1ce   :  { %v1743_v33 = vadd.f32 %v1434_v20, %v253_v53  ;;  %v5710_v42 = vsel %vm5422_vm4, %v5278_v32, %v5566_v57  ;;  %v4419_v44 = vmul.f32 %v9669_v30, %v4275_v17  ;;  %v2908_v46 = vadd.f32 1.0, %v2764_v51  ;;  %v9720_v37 = vpop.eup %7728  ;;  %v186_v30 = vld [vmem:[#allocation2 + $0xb0] sm:$0xff]  ;;  %v184_v32 = vld [vmem:[#allocation2 + $0xa0] sm:$0xff] }
 0x1cf   :  { %v4636_v55 = vsub.f32 0.0, %v2620_v18  ;;  %v5854_v2 = vadd.f32 1.0, %v5710_v42  ;;  %v5638_v31 = vsub.f32 0.0, %v5350_v62  ;;  %v4059_v26 = vadd.f32 -0.28449672, %v3915_v45 }
 0x1d0   :  { %v3697_v22 = vadd.f32 1.4214138, %v3553_v39  ;;  %1888 = vst.msk [vmem:[#allocation2 + $0x2c8] sm:$0xff] %vm19_vm1, %v1743_v33  ;;  %v5139_v23 = vmul.f32 %v7725_v35, %v4419_v44  ;;  %v9724_v12 = vmul.f32 0.5, %v9605_v13  ;;  %v3337_v15 = vmul.f32 1.0614054, %v9720_v37  ;;  %v1159_v13 = vpop.f32.mrf.mxu0 }
 0x1d1   :  { %7738 = vrcp.f32 %v2908_v46  ;;  %v5998_v52 = vmul.f32 %v5854_v2, %v9609_v10  ;;  %v5782_v8 = vsel %vm5494_vm6, %v5350_v62, %v5638_v31  ;;  %v4203_v7 = vmul.f32 %v9687_v61, %v4059_v26 }
 0x1d2   :  { %v3841_v47 = vmul.f32 %v9698_v11, %v3697_v22  ;;  %v5926_v50 = vadd.f32 1.0, %v5782_v8  ;;  %v5283_v34 = vsub.f32 1.0, %v5139_v23  ;;  %v3481_v4 = vadd.f32 -1.4531521, %v3337_v15 }
 0x1d3   :  { %v4780_v24 = vmul.f32 %v4636_v55, %v2620_v18  ;;  %v7158_v41 = vpack.c.bf16 %v5998_v52, %v5998_v52  ;;  %v4347_v29 = vadd.f32 0.2548296, %v4203_v7  ;;  %v1676_v63 = vadd.f32 %v7389_v49, %v186_v30  ;;  %v9754_v55 = vpop.f32.mrf.mxu1 }
 0x1d4   :  { %v3985_v28 = vadd.f32 -0.28449672, %v3841_v47  ;;  %v9734_v10 = vpop.eup %7730  ;;  %v6070_v5 = vmul.f32 %v5926_v50, %v9618_v0  ;;  %v5571_v53 = vsub.f32 0.0, %v5283_v34  ;;  %v3625_v20 = vmul.f32 %v9720_v37, %v3481_v4  ;;  %v1963_v38 = vld [vmem:[#allocation2 + $0x88] sm:$0xff] }
 0x1d5   :  { %v1748_v40 = vadd.f32 %v7461_v43, %v258_v59  ;;  %6719 = vst.msk [vmem:[%s12756_s3 + $0x34] sm:$0xf] %vm6705_vm5, %v7158_v41  ;;  %v4491_v18 = vmul.f32 %v9687_v61, %v4347_v29  ;;  %v3268_v19 = vmul.f32 1.0614054, %v9734_v10  ;;  %v9746_v35 = vadd.f32 %v9628_v16, %v1963_v38  ;;  %v9752_v61 = vpop.f32.mrf.mxu0 }
 0x1d6   :  { %v4129_v36 = vmul.f32 %v9698_v11, %v3985_v28  ;;  %1821 = vst.msk [vmem:[#allocation2 + $0xb0] sm:$0xff] %vm19_vm1, %v1676_v63  ;;  %v7733_v0 = vpop.eup %7732  ;;  %v7230_v57 = vpack.c.bf16 %v6070_v5, %v6070_v5  ;;  %v5715_v17 = vsel %vm5427_vm7, %v5283_v34, %v5571_v53  ;;  %v3769_v51 = vadd.f32 1.4214138, %v3625_v20  ;;  %v9778_v34 = vpop.f32.mrf.mxu1 }
 0x1d7   :  { %v2035_v62 = vld [vmem:[#allocation2 + $0x2c8] sm:$0xff]  ;;  %1893 = vst.msk [vmem:[#allocation2 + $0x2f0] sm:$0xff] %vm19_vm1, %v1748_v40  ;;  %v1674_v45 = vadd.f32 %v1159_v13, %v184_v32  ;;  %v7735_v39 = vpop.eup %7734  ;;  %v5859_v33 = vadd.f32 1.0, %v5715_v17  ;;  %v5211_v42 = vmul.f32 %v7727_v56, %v4491_v18  ;;  %v3412_v46 = vadd.f32 -1.4531521, %v3268_v19  ;;  %v9776_v8 = vpop.f32.mrf.mxu0 }
 0x1d8   :  { %v4273_v44 = vadd.f32 0.2548296, %v4129_v36  ;;  %6791 = vst.msk [vmem:[%s12756_s3 + $0x154] sm:$0xf] %vm6705_vm5, %v7230_v57  ;;  %v3913_v27 = vmul.f32 %v9720_v37, %v3769_v51  ;;  %v5015_v49 = vmul.f32 1.442695, %v4780_v24  ;;  %v9765_v31 = vadd.f32 %v9628_v16, %v2035_v62  ;;  %v9798_v36 = vpop.f32.mrf.mxu1 }
 0x1d9   :  { %v9762_v2 = vmul.f32 0.70710677, %v9746_v35  ;;  %1819 = vst.msk [vmem:[#allocation2 + $0xa0] sm:$0xff] %vm19_vm1, %v1674_v45  ;;  %v9768_v56 = vpop.eup %7736  ;;  %v6003_v26 = vmul.f32 %v5859_v33, %v9635_v14  ;;  %v5355_v22 = vsub.f32 1.0, %v5211_v42  ;;  %v3556_v23 = vmul.f32 %v9734_v10, %v3412_v46  ;;  %v9795_v53 = vpop.f32.mrf.mxu0 }
 0x1da   :  { %v4417_v43 = vmul.f32 %v9698_v11, %v4273_v44  ;;  %vm5499_vm8 = vcmp.ge.f32.partialorder %v9621_v25, 0.0  ;;  %v2257_v15 = vmul.f32 0.5, %v9631_v9  ;;  %v4057_v30 = vadd.f32 -0.28449672, %v3913_v27  ;;  %v9811_v27 = vpop.f32.mrf.mxu1 }
 0x1db   :  { %v2546_v52 = vand.u32 2147483647, %v9762_v2  ;;  %v7163_v7 = vpack.c.bf16 %v6003_v26, %v6003_v26  ;;  %v5643_v47 = vsub.f32 0.0, %v5355_v22  ;;  %v3700_v50 = vadd.f32 1.4214138, %v3556_v23  ;;  %v9809_v46 = vpop.f32.mrf.mxu0 }
 0x1dc   :  { %v5137_v59 = vmul.f32 %v7733_v0, %v4417_v43  ;;  %vm5425_vm9 = vcmp.ge.f32.partialorder %v9638_v6, 0.0  ;;  %v4201_v14 = vmul.f32 %v9720_v37, %v4057_v30  ;;  %v9783_v4 = vmul.f32 0.70710677, %v9765_v31 }
 0x1dd   :  { %v2690_v11 = vmul.f32 0.3275911, %v2546_v52  ;;  %6724 = vst.msk [vmem:[%s12756_s3 + $0x48] sm:$0xf] %vm6705_vm5, %v7163_v7  ;;  %v5787_v24 = vsel %vm5499_vm8, %v5355_v22, %v5643_v47  ;;  %v3844_v41 = vmul.f32 %v9734_v10, %v3700_v50  ;;  %7740 = vpow2.f32 %v5015_v49  ;;  %v1968_v29 = vld [vmem:[#allocation2 + $0xb0] sm:$0xff] }
 0x1de   :  { %v9785_v9 = vpop.eup %7738  ;;  %v5281_v13 = vsub.f32 1.0, %v5137_v59  ;;  %v5931_v28 = vadd.f32 1.0, %v5787_v24  ;;  %v4345_v63 = vadd.f32 0.2548296, %v4201_v14  ;;  %v4562_v40 = vsub.f32 0.0, %v2546_v52  ;;  %v2040_v22 = vld [vmem:[#allocation2 + $0x2f0] sm:$0xff]  ;;  %v9822_v14 = vpop.f32.mrf.mxu0 }
 0x1df   :  { %v3340_v32 = vmul.f32 1.0614054, %v9785_v9  ;;  %v2834_v5 = vadd.f32 1.0, %v2690_v11  ;;  %v3988_v38 = vadd.f32 -0.28449672, %v3844_v41  ;;  %v9806_v62 = vadd.f32 %v9628_v16, %v1968_v29 }
 0x1e0   :  { %v5569_v20 = vsub.f32 0.0, %v5281_v13  ;;  %v2618_v18 = vand.u32 2147483647, %v9783_v4  ;;  %v6075_v25 = vmul.f32 %v5931_v28, %v9724_v12  ;;  %v4489_v19 = vmul.f32 %v9720_v37, %v4345_v63  ;;  %v1966_v43 = vld [vmem:[#allocation2 + $0xa0] sm:$0xff] }
 0x1e1   :  { %v3484_v0 = vadd.f32 -1.4531521, %v3340_v32  ;;  %7742 = vrcp.f32 %v2834_v5  ;;  %v4132_v17 = vmul.f32 %v9734_v10, %v3988_v38  ;;  %v4706_v23 = vmul.f32 %v4562_v40, %v2546_v52  ;;  %v9832_v52 = vpop.f32.mrf.mxu1 }
 0x1e2   :  { %v5713_v57 = vsel %vm5425_vm9, %v5281_v13, %v5569_v20  ;;  %v2762_v51 = vmul.f32 0.3275911, %v2618_v18  ;;  %v7235_v45 = vpack.c.bf16 %v6075_v25, %v6075_v25  ;;  %v5209_v42 = vmul.f32 %v7735_v39, %v4489_v19  ;;  %v9845_v25 = vpop.f32.mrf.mxu0 }
 0x1e3   :  { %v5857_v33 = vadd.f32 1.0, %v5713_v57  ;;  %v3628_v44 = vmul.f32 %v9785_v9, %v3484_v0  ;;  %v4276_v12 = vadd.f32 0.2548296, %v4132_v17  ;;  %v4634_v30 = vsub.f32 0.0, %v2618_v18  ;;  %v9850_v17 = vpop.f32.mrf.mxu1 }
 0x1e4   :  { %v2906_v37 = vadd.f32 1.0, %v2762_v51  ;;  %6796 = vst.msk [vmem:[%s12756_s3 + $0x168] sm:$0xf] %vm6705_vm5, %v7235_v45  ;;  %v5353_v49 = vsub.f32 1.0, %v5209_v42  ;;  %v9820_v50 = vmul.f32 0.70710677, %v9806_v62  ;;  %v9827_v11 = vadd.f32 %v9628_v16, %v2040_v22 }
 0x1e5   :  { %v6001_v6 = vmul.f32 %v5857_v33, %v2257_v15  ;;  %v3772_v26 = vadd.f32 1.4214138, %v3628_v44  ;;  %v4420_v39 = vmul.f32 %v9734_v10, %v4276_v12  ;;  %vm5497_vm10 = vcmp.ge.f32.partialorder %v9659_v54, 0.0 }
 0x1e6   :  { %7744 = vrcp.f32 %v2906_v37  ;;  %v5641_v47 = vsub.f32 0.0, %v5353_v49  ;;  %v9830_v10 = vadd.f32 %v9628_v16, %v1966_v43  ;;  %v2329_v24 = vmul.f32 0.5, %v9643_v1  ;;  %v9865_v43 = vpop.f32.mrf.mxu1 }
 0x1e7   :  { %v7161_v7 = vpack.c.bf16 %v6001_v6, %v6001_v6  ;;  %v3916_v59 = vmul.f32 %v9785_v9, %v3772_v26  ;;  %v5140_v15 = vmul.f32 %v9768_v56, %v4420_v39  ;;  %v2551_v54 = vand.u32 2147483647, %v9820_v50  ;;  %v9859_v26 = vpop.f32.mrf.mxu0 }
 0x1e8   :  { %v5785_v13 = vsel %vm5497_vm10, %v5353_v49, %v5641_v47  ;;  %v2260_v29 = vmul.f32 0.5, %v9666_v60  ;;  %v4778_v63 = vmul.f32 %v4634_v30, %v2618_v18  ;;  %v4867_v20 = vmul.f32 1.442695, %v4706_v23 }
 0x1e9   :  { %6722 = vst.msk [vmem:[%s12756_s3 + $0x40] sm:$0xf] %vm6705_vm5, %v7161_v7  ;;  %v4060_v41 = vadd.f32 -0.28449672, %v3916_v59  ;;  %v5929_v56 = vadd.f32 1.0, %v5785_v13  ;;  %v5284_v28 = vsub.f32 1.0, %v5140_v15 }
 0x1ea   :  { %v7741_v32 = vpop.eup %7740  ;;  %v2695_v38 = vmul.f32 0.3275911, %v2551_v54  ;;  %v9843_v40 = vmul.f32 0.70710677, %v9827_v11  ;;  %v4567_v0 = vsub.f32 0.0, %v2551_v54  ;;  %vm5428_vm11 = vcmp.ge.f32.partialorder %v9679_v3, 0.0 }
 0x1eb   :  { %v4204_v5 = vmul.f32 %v9785_v9, %v4060_v41  ;;  %v6073_v1 = vmul.f32 %v5929_v56, %v2329_v24  ;;  %v5572_v19 = vsub.f32 0.0, %v5284_v28  ;;  %v9848_v57 = vmul.f32 0.70710677, %v9830_v10 }
 0x1ec   :  { %v2839_v18 = vadd.f32 1.0, %v2695_v38  ;;  %v2623_v51 = vand.u32 2147483647, %v9843_v40  ;;  %v5011_v44 = vmul.f32 1.442695, %v4778_v63  ;;  %v4711_v3 = vmul.f32 %v4567_v0, %v2551_v54  ;;  %v187_v54 = vld [vmem:[#allocation2 + $0xb8] sm:$0xff]  ;;  %v9870_v63 = vpop.f32.mrf.mxu0  ;;  %v9875_v38 = vpop.f32.mrf.mxu1 }
 0x1ed   :  { %v4348_v60 = vadd.f32 0.2548296, %v4204_v5  ;;  %v7233_v33 = vpack.c.bf16 %v6073_v1, %v6073_v1  ;;  %v5716_v42 = vsel %vm5428_vm11, %v5284_v28, %v5572_v19  ;;  %v2549_v12 = vand.u32 2147483647, %v9848_v57  ;;  %v256_v28 = vld [vmem:[#allocation2 + $0x2e0] sm:$0xff]  ;;  %v259_v5 = vld [vmem:[#allocation2 + $0x2f8] sm:$0xff] }
 0x1ee   :  { %v9854_v45 = vpop.eup %7742  ;;  %v5860_v37 = vadd.f32 1.0, %v5716_v42  ;;  %7746 = vrcp.f32 %v2839_v18  ;;  %v2767_v22 = vmul.f32 0.3275911, %v2623_v51  ;;  %v4639_v47 = vsub.f32 0.0, %v2623_v51 }
 0x1ef   :  { %v4492_v6 = vmul.f32 %v9785_v9, %v4348_v60  ;;  %v3266_v49 = vmul.f32 1.0614054, %v9854_v45  ;;  %6794 = vst.msk [vmem:[%s12756_s3 + $0x160] sm:$0xf] %vm6705_vm5, %v7233_v33  ;;  %7748 = vpow2.f32 %v4867_v20  ;;  %v2693_v7 = vmul.f32 0.3275911, %v2549_v12 }
 0x1f0   :  { %v6004_v39 = vmul.f32 %v5860_v37, %v2260_v29  ;;  %7750 = vpow2.f32 %v5011_v44  ;;  %v2911_v9 = vadd.f32 1.0, %v2767_v22  ;;  %v4565_v59 = vsub.f32 0.0, %v2549_v12  ;;  %v185_v20 = vld [vmem:[#allocation2 + $0xa8] sm:$0xff]  ;;  %v190_v44 = vld [vmem:[#allocation2 + $0xd0] sm:$0xff] }
 0x1f1   :  { %v5212_v23 = vmul.f32 %v7741_v32, %v4492_v6  ;;  %v3410_v30 = vadd.f32 -1.4531521, %v3266_v49  ;;  %v2837_v56 = vadd.f32 1.0, %v2693_v7  ;;  %v2332_v29 = vmul.f32 0.5, %v9690_v58  ;;  %v257_v58 = vld [vmem:[#allocation2 + $0x2e8] sm:$0xff]  ;;  %v262_v37 = vld [vmem:[#allocation2 + $0x310] sm:$0xff] }
 0x1f2   :  { %v7164_v24 = vpack.c.bf16 %v6004_v39, %v6004_v39  ;;  %vm5500_vm12 = vcmp.ge.f32.partialorder %v9702_v48, 0.0  ;;  %7752 = vrcp.f32 %v2911_v9  ;;  %v9881_v0 = vmul.f32 1.442695, %v4711_v3  ;;  %v188_v6 = vld [vmem:[#allocation2 + $0xc0] sm:$0xff]  ;;  %v263_v9 = vld [vmem:[#allocation2 + $0x318] sm:$0xff] }
 0x1f3   :  { %v9867_v15 = vpop.eup %7744  ;;  %v5356_v13 = vsub.f32 1.0, %v5212_v23  ;;  %v3554_v41 = vmul.f32 %v9854_v45, %v3410_v30  ;;  %7754 = vrcp.f32 %v2837_v56  ;;  %v9883_v18 = vmul.f32 %v4639_v47, %v2623_v51  ;;  %v260_v23 = vld [vmem:[#allocation2 + $0x300] sm:$0xff]  ;;  %v191_v30 = vld [vmem:[#allocation2 + $0xd8] sm:$0xff]  ;;  %v7398_v51 = vpop.f32.mrf.mxu0  ;;  %v189_v47 = vld [vmem:[#allocation2 + $0xc8] sm:$0xff] }
 0x1f4   :  { %v3338_v32 = vmul.f32 1.0614054, %v9867_v15  ;;  %6725 = vst.msk [vmem:[%s12756_s3 + $0x4c] sm:$0xf] %vm6705_vm5, %v7164_v24  ;;  %v1746_v33 = vadd.f32 %v9732_v21, %v256_v28  ;;  %v1677_v42 = vadd.f32 %v9752_v61, %v187_v54  ;;  %v9890_v39 = vmul.f32 %v4565_v59, %v2549_v12  ;;  %v261_v12 = vld [vmem:[#allocation2 + $0x308] sm:$0xff]  ;;  %v7470_v59 = vpop.f32.mrf.mxu1  ;;  %v194_v56 = vld [vmem:[#allocation2 + $0xf0] sm:$0xff] }
 0x1f5   :  { %v5644_v1 = vsub.f32 0.0, %v5356_v13  ;;  %v3698_v19 = vadd.f32 1.4214138, %v3554_v41  ;;  %v1749_v3 = vadd.f32 %v9754_v55, %v259_v5  ;;  %v1675_v61 = vadd.f32 %v9776_v8, %v185_v20  ;;  %v266_v28 = vld [vmem:[#allocation2 + $0x330] sm:$0xff]  ;;  %v192_v5 = vld [vmem:[#allocation2 + $0xe0] sm:$0xff] }
 0x1f6   :  { %v3482_v60 = vadd.f32 -1.4531521, %v3338_v32  ;;  %1891 = vst.msk [vmem:[#allocation2 + $0x2e0] sm:$0xff] %vm19_vm1, %v1746_v33  ;;  %1822 = vst.msk [vmem:[#allocation2 + $0xb8] sm:$0xff] %vm19_vm1, %v1677_v42  ;;  %v1747_v48 = vadd.f32 %v9778_v34, %v257_v58  ;;  %v1680_v55 = vadd.f32 %v9795_v53, %v190_v44  ;;  %v1678_v41 = vadd.f32 %v9809_v46, %v188_v6  ;;  %v264_v20 = vld [vmem:[#allocation2 + $0x320] sm:$0xff]  ;;  %v1482_v44 = vpop.f32.mrf.mxu1 }
 0x1f7   :  { %v5788_v49 = vsel %vm5500_vm12, %v5356_v13, %v5644_v1  ;;  %v3842_v22 = vmul.f32 %v9854_v45, %v3698_v19  ;;  %1894 = vst.msk [vmem:[#allocation2 + $0x2f8] sm:$0xff] %vm19_vm1, %v1749_v3  ;;  %v1752_v13 = vadd.f32 %v9798_v36, %v262_v37  ;;  %1820 = vst.msk [vmem:[#allocation2 + $0xa8] sm:$0xff] %vm19_vm1, %v1675_v61  ;;  %v195_v1 = vld [vmem:[#allocation2 + $0xf8] sm:$0xff]  ;;  %v193_v19 = vld [vmem:[#allocation2 + $0xe8] sm:$0xff]  ;;  %7756 = vpow2.f32 %v9881_v0 }
 0x1f8   :  { %v5932_v7 = vadd.f32 1.0, %v5788_v49  ;;  %v3626_v21 = vmul.f32 %v9867_v15, %v3482_v60  ;;  %1892 = vst.msk [vmem:[#allocation2 + $0x2e8] sm:$0xff] %vm19_vm1, %v1747_v48  ;;  %v1750_v8 = vadd.f32 %v9811_v27, %v260_v23  ;;  %v1681_v34 = vadd.f32 %v9822_v14, %v191_v30  ;;  %1825 = vst.msk [vmem:[#allocation2 + $0xd0] sm:$0xff] %vm19_vm1, %v1680_v55  ;;  %v267_v27 = vld [vmem:[#allocation2 + $0x338] sm:$0xff]  ;;  %v1194_v14 = vpop.f32.mrf.mxu0 }
 0x1f9   :  { %v3986_v24 = vadd.f32 -0.28449672, %v3842_v22  ;;  %1897 = vst.msk [vmem:[#allocation2 + $0x310] sm:$0xff] %vm19_vm1, %v1752_v13  ;;  %1823 = vst.msk [vmem:[#allocation2 + $0xc0] sm:$0xff] %vm19_vm1, %v1678_v41  ;;  %v1753_v36 = vadd.f32 %v9832_v52, %v263_v9  ;;  %v1679_v46 = vadd.f32 %v9845_v25, %v189_v47  ;;  %v1684_v42 = vadd.f32 %v9859_v26, %v194_v56  ;;  %v265_v25 = vld [vmem:[#allocation2 + $0x328] sm:$0xff] }
 0x1fa   :  { %v6076_v54 = vmul.f32 %v5932_v7, %v2332_v29  ;;  %v3770_v32 = vadd.f32 1.4214138, %v3626_v21  ;;  %v1751_v29 = vadd.f32 %v9850_v17, %v261_v12  ;;  %1895 = vst.msk [vmem:[#allocation2 + $0x300] sm:$0xff] %vm19_vm1, %v1750_v8  ;;  %1826 = vst.msk [vmem:[#allocation2 + $0xd8] sm:$0xff] %vm19_vm1, %v1681_v34  ;;  %v1756_v52 = vadd.f32 %v9865_v43, %v266_v28 }
 0x1fb   :  { %v4130_v53 = vmul.f32 %v9854_v45, %v3986_v24  ;;  %v9913_v58 = vpop.eup %7746  ;;  %1898 = vst.msk [vmem:[#allocation2 + $0x318] sm:$0xff] %vm19_vm1, %v1753_v36  ;;  %1824 = vst.msk [vmem:[#allocation2 + $0xc8] sm:$0xff] %vm19_vm1, %v1679_v46  ;;  %v1682_v49 = vadd.f32 %v9870_v63, %v192_v5  ;;  %v1754_v22 = vadd.f32 %v9875_v38, %v264_v20  ;;  %v5021_v63 = vmul.f32 1.442695, %v9883_v18  ;;  %v7401_v18 = vpop.f32.mrf.mxu0 }
 0x1fc   :  { %v7236_v60 = vpack.c.bf16 %v6076_v54, %v6076_v54  ;;  %v3914_v33 = vmul.f32 %v9867_v15, %v3770_v32  ;;  %v7749_v17 = vpop.eup %7748  ;;  %v3271_v6 = vmul.f32 1.0614054, %v9913_v58  ;;  %1896 = vst.msk [vmem:[#allocation2 + $0x308] sm:$0xff] %vm19_vm1, %v1751_v29  ;;  %1829 = vst.msk [vmem:[#allocation2 + $0xf0] sm:$0xff] %vm19_vm1, %v1684_v42  ;;  %v1685_v43 = vadd.f32 %v7398_v51, %v195_v1 }
 0x1fd   :  { %v4274_v37 = vadd.f32 0.2548296, %v4130_v53  ;;  %1901 = vst.msk [vmem:[#allocation2 + $0x330] sm:$0xff] %vm19_vm1, %v1756_v52  ;;  %v1757_v3 = vadd.f32 %v7470_v59, %v267_v27  ;;  %v1683_v23 = vadd.f32 %v1194_v14, %v193_v19  ;;  %v7751_v30 = vpop.eup %7750  ;;  %v2038_v38 = vld [vmem:[#allocation2 + $0x2e0] sm:$0xff]  ;;  %v1969_v61 = vld [vmem:[#allocation2 + $0xb8] sm:$0xff]  ;;  %1827 = vst.msk [vmem:[#allocation2 + $0xe0] sm:$0xff] %vm19_vm1, %v1682_v49  ;;  %v1755_v48 = vadd.f32 %v1482_v44, %v265_v25 }
 0x1fe   :  { %6797 = vst.msk [vmem:[%s12756_s3 + $0x16c] sm:$0xf] %vm6705_vm5, %v7236_v60  ;;  %v4058_v26 = vadd.f32 -0.28449672, %v3914_v33  ;;  %v3415_v21 = vadd.f32 -1.4531521, %v3271_v6  ;;  %v9939_v51 = vadd.f32 %v9628_v16, %v2038_v38  ;;  %v9942_v47 = vadd.f32 %v9628_v16, %v1969_v61 }
 0x1ff   :  { %v4418_v7 = vmul.f32 %v9854_v45, %v4274_v37  ;;  %1899 = vst.msk [vmem:[#allocation2 + $0x320] sm:$0xff] %vm19_vm1, %v1754_v22  ;;  %1830 = vst.msk [vmem:[#allocation2 + $0xf8] sm:$0xff] %vm19_vm1, %v1685_v43  ;;  %v198_v45 = vld [vmem:[#allocation2 + $0x110] sm:$0xff]  ;;  %v9947_v12 = vpop.eup %7752  ;;  %v4873_v0 = vmul.f32 1.442695, %v9890_v39  ;;  %v2258_v41 = vmul.f32 0.5, %v9746_v35  ;;  %7758 = vpow2.f32 %v5021_v63 }
 0x200   :  { %v4202_v9 = vmul.f32 %v9867_v15, %v4058_v26  ;;  %1902 = vst.msk [vmem:[#allocation2 + $0x338] sm:$0xff] %vm19_vm1, %v1757_v3  ;;  %1828 = vst.msk [vmem:[#allocation2 + $0xe8] sm:$0xff] %vm19_vm1, %v1683_v23  ;;  %v3559_v24 = vmul.f32 %v9913_v58, %v3415_v21  ;;  %v1688_v55 = vadd.f32 %v7401_v18, %v198_v45  ;;  %v9952_v13 = vpop.eup %7754  ;;  %vm5426_vm13 = vcmp.ge.f32.partialorder %v9762_v2, 0.0  ;;  %v2041_v34 = vld [vmem:[#allocation2 + $0x2f8] sm:$0xff]  ;;  %v1967_v18 = vld [vmem:[#allocation2 + $0xa8] sm:$0xff] }
 0x201   :  { %v5138_v59 = vmul.f32 %v7749_v17, %v4418_v7  ;;  %1900 = vst.msk [vmem:[#allocation2 + $0x328] sm:$0xff] %vm19_vm1, %v1755_v48  ;;  %v3343_v28 = vmul.f32 1.0614054, %v9947_v12  ;;  %v3269_v8 = vmul.f32 1.0614054, %v9952_v13  ;;  %7760 = vpow2.f32 %v4873_v0 }
 0x202   :  { %v4346_v56 = vadd.f32 0.2548296, %v4202_v9  ;;  %v3703_v32 = vadd.f32 1.4214138, %v3559_v24  ;;  %1833 = vst.msk [vmem:[#allocation2 + $0x110] sm:$0xff] %vm19_vm1, %v1688_v55  ;;  %v9970_v19 = vadd.f32 %v9628_v16, %v2041_v34  ;;  %vm5498_vm14 = vcmp.ge.f32.partialorder %v9783_v4, 0.0 }
 0x203   :  { %v5282_v54 = vsub.f32 1.0, %v5138_v59  ;;  %v3487_v5 = vadd.f32 -1.4531521, %v3343_v28  ;;  %v9961_v20 = vmul.f32 0.70710677, %v9939_v51  ;;  %v2330_v38 = vmul.f32 0.5, %v9765_v31 }
 0x204   :  { %v4490_v39 = vmul.f32 %v9867_v15, %v4346_v56  ;;  %v9964_v35 = vmul.f32 0.70710677, %v9942_v47  ;;  %v3847_v36 = vmul.f32 %v9913_v58, %v3703_v32  ;;  %v3413_v46 = vadd.f32 -1.4531521, %v3269_v8  ;;  %v7757_v63 = vpop.eup %7756 }
 0x205   :  { %v5570_v53 = vsub.f32 0.0, %v5282_v54  ;;  %v3631_v1 = vmul.f32 %v9947_v12, %v3487_v5  ;;  %v2621_v27 = vand.u32 2147483647, %v9961_v20  ;;  %v9996_v32 = vadd.f32 %v9628_v16, %v1967_v18 }
 0x206   :  { %v5210_v29 = vmul.f32 %v7751_v30, %v4490_v39  ;;  %v3991_v14 = vadd.f32 -0.28449672, %v3847_v36  ;;  %v3557_v60 = vmul.f32 %v9952_v13, %v3413_v46  ;;  %v9976_v33 = vand.u32 2147483647, %v9964_v35 }
 0x207   :  { %v5714_v15 = vsel %vm5426_vm13, %v5282_v54, %v5570_v53  ;;  %v3775_v25 = vadd.f32 1.4214138, %v3631_v1  ;;  %v2765_v44 = vmul.f32 0.3275911, %v2621_v27  ;;  %v9984_v30 = vmul.f32 0.70710677, %v9970_v19 }
 0x208   :  { %v5858_v42 = vadd.f32 1.0, %v5714_v15  ;;  %v5354_v52 = vsub.f32 1.0, %v5210_v29  ;;  %v4135_v17 = vmul.f32 %v9913_v58, %v3991_v14  ;;  %v3701_v37 = vadd.f32 1.4214138, %v3557_v60 }
 0x209   :  { %v2696_v6 = vmul.f32 0.3275911, %v9976_v33  ;;  %v3919_v22 = vmul.f32 %v9947_v12, %v3775_v25  ;;  %v2909_v26 = vadd.f32 1.0, %v2765_v44  ;;  %v4637_v31 = vsub.f32 0.0, %v2621_v27 }
 0x20a   :  { %v6002_v49 = vmul.f32 %v5858_v42, %v2258_v41  ;;  %v5642_v2 = vsub.f32 0.0, %v5354_v52  ;;  %v4279_v43 = vadd.f32 0.2548296, %v4135_v17  ;;  %v3845_v3 = vmul.f32 %v9952_v13, %v3701_v37 }
 0x20b   :  { %v2840_v23 = vadd.f32 1.0, %v2696_v6  ;;  %v4063_v4 = vadd.f32 -0.28449672, %v3919_v22  ;;  %7762 = vrcp.f32 %v2909_v26  ;;  %v2624_v56 = vand.u32 2147483647, %v9984_v30 }
 0x20c   :  { %v7162_v7 = vpack.c.bf16 %v6002_v49, %v6002_v49  ;;  %v5786_v21 = vsel %vm5498_vm14, %v5354_v52, %v5642_v2  ;;  %v4423_v48 = vmul.f32 %v9913_v58, %v4279_v43  ;;  %v3989_v9 = vadd.f32 -0.28449672, %v3845_v3  ;;  %v7759_v55 = vpop.eup %7758 }
 0x20d   :  { %v5930_v61 = vadd.f32 1.0, %v5786_v21  ;;  %v4207_v45 = vmul.f32 %v9947_v12, %v4063_v4  ;;  %7764 = vrcp.f32 %v2840_v23  ;;  %v2263_v34 = vmul.f32 0.5, %v9806_v62 }
 0x20e   :  { %6723 = vst.msk [vmem:[%s12756_s3 + $0x44] sm:$0xf] %vm6705_vm5, %v7162_v7  ;;  %v5143_v24 = vmul.f32 %v7757_v63, %v4423_v48  ;;  %v4133_v0 = vmul.f32 %v9952_v13, %v3989_v9  ;;  %v7761_v8 = vpop.eup %7760  ;;  %vm5431_vm15 = vcmp.ge.f32.partialorder %v9820_v50, 0.0  ;;  %v2768_v5 = vmul.f32 0.3275911, %v2624_v56  ;;  %v2044_v9 = vld [vmem:[#allocation2 + $0x310] sm:$0xff] }
 0x20f   :  { %v6074_v59 = vmul.f32 %v5930_v61, %v2330_v38  ;;  %v4351_v41 = vadd.f32 0.2548296, %v4207_v45  ;;  %v4568_v46 = vsub.f32 0.0, %v9976_v33  ;;  %v10008_v16 = vmul.f32 0.70710677, %v9996_v32 }
 0x210   :  { %v5287_v28 = vsub.f32 1.0, %v5143_v24  ;;  %v4277_v54 = vadd.f32 0.2548296, %v4133_v0  ;;  %v2335_v62 = vmul.f32 0.5, %v9827_v11  ;;  %v4781_v50 = vmul.f32 %v4637_v31, %v2621_v27  ;;  %v10018_v27 = vld [vmem:[%s12755_s2] ss:$0 sm:$0xff] }
 0x211   :  { %v7234_v58 = vpack.c.bf16 %v6074_v59, %v6074_v59  ;;  %v4495_v39 = vmul.f32 %v9947_v12, %v4351_v41  ;;  %v2912_v1 = vadd.f32 1.0, %v2768_v5  ;;  %v2039_v12 = vld [vmem:[#allocation2 + $0x2e8] sm:$0xff]  ;;  %v2261_v14 = vmul.f32 0.5, %v9830_v10  ;;  %v1970_v5 = vld [vmem:[#allocation2 + $0xc0] sm:$0xff] }
 0x212   :  { %v5575_v53 = vsub.f32 0.0, %v5287_v28  ;;  %v4421_v36 = vmul.f32 %v9952_v13, %v4277_v54  ;;  %v2550_v42 = vand.u32 2147483647, %v10008_v16  ;;  %vm5503_vm0 = vcmp.ge.f32.partialorder %v9843_v40, 0.0  ;;  %v1972_v13 = vld [vmem:[#allocation2 + $0xd0] sm:$0xff] }
 0x213   :  { %6795 = vst.msk [vmem:[%s12756_s3 + $0x164] sm:$0xf] %vm6705_vm5, %v7234_v58  ;;  %v5215_v29 = vmul.f32 %v7759_v55, %v4495_v39  ;;  %7766 = vrcp.f32 %v2912_v1  ;;  %v4712_v17 = vmul.f32 %v4568_v46, %v9976_v33  ;;  %v10021_v10 = vadd.f32 %v10018_v27, %v2039_v12 }
 0x214   :  { %v5719_v15 = vsel %vm5431_vm15, %v5287_v28, %v5575_v53  ;;  %v5141_v60 = vmul.f32 %v7761_v8, %v4421_v36  ;;  %v2694_v11 = vmul.f32 0.3275911, %v2550_v42  ;;  %vm5429_vm2 = vcmp.ge.f32.partialorder %v9848_v57, 0.0 }
 0x215   :  { %v5863_v52 = vadd.f32 1.0, %v5719_v15  ;;  %v5359_v25 = vsub.f32 1.0, %v5215_v29  ;;  %v5017_v49 = vmul.f32 1.442695, %v4781_v50  ;;  %v4640_v26 = vsub.f32 0.0, %v2624_v56 }
 0x216   :  { %v5285_v44 = vsub.f32 1.0, %v5141_v60  ;;  %v2838_v43 = vadd.f32 1.0, %v2694_v11  ;;  %v10027_v33 = vadd.f32 %v10018_v27, %v1972_v13  ;;  %v10033_v21 = vmul.f32 0.70710677, %v10021_v10 }
 0x217   :  { %v6007_v37 = vmul.f32 %v5863_v52, %v2263_v34  ;;  %v5647_v6 = vsub.f32 0.0, %v5359_v25  ;;  %v4879_v38 = vmul.f32 1.442695, %v4712_v17  ;;  %v4784_v18 = vmul.f32 %v4640_v26, %v2624_v56 }
 0x218   :  { %v10024_v2 = vpop.eup %7762  ;;  %v5573_v22 = vsub.f32 0.0, %v5285_v44  ;;  %7768 = vrcp.f32 %v2838_v43  ;;  %v4566_v59 = vsub.f32 0.0, %v2550_v42  ;;  %v2622_v24 = vand.u32 2147483647, %v10033_v21 }
 0x219   :  { %v7167_v3 = vpack.c.bf16 %v6007_v37, %v6007_v37  ;;  %v5791_v23 = vsel %vm5503_vm0, %v5359_v25, %v5647_v6  ;;  %v3341_v7 = vmul.f32 1.0614054, %v10024_v2  ;;  %7770 = vpow2.f32 %v5017_v49 }
 0x21a   :  { %v10035_v4 = vpop.eup %7764  ;;  %v5935_v57 = vadd.f32 1.0, %v5791_v23  ;;  %v5717_v63 = vsel %vm5429_vm2, %v5285_v44, %v5573_v22  ;;  %v10045_v31 = vmul.f32 0.70710677, %v10027_v33  ;;  %7772 = vpow2.f32 %v4879_v38 }
 0x21b   :  { %6728 = vst.msk [vmem:[%s12756_s3 + $0x58] sm:$0xf] %vm6705_vm5, %v7167_v3  ;;  %v5861_v61 = vadd.f32 1.0, %v5717_v63  ;;  %v3485_v48 = vadd.f32 -1.4531521, %v3341_v7  ;;  %v10048_v54 = vadd.f32 %v10018_v27, %v2044_v9  ;;  %v10057_v53 = vmul.f32 0.5, %v9939_v51 }
 0x21c   :  { %v3272_v40 = vmul.f32 1.0614054, %v10035_v4  ;;  %v6079_v45 = vmul.f32 %v5935_v57, %v2335_v62  ;;  %v2766_v28 = vmul.f32 0.3275911, %v2622_v24  ;;  %v2555_v39 = vand.u32 2147483647, %v10045_v31 }
 0x21d   :  { %v6005_v0 = vmul.f32 %v5861_v61, %v2261_v14  ;;  %v3629_v55 = vmul.f32 %v10024_v2, %v3485_v48  ;;  %v4710_v36 = vmul.f32 %v4566_v59, %v2550_v42  ;;  %v5023_v50 = vmul.f32 1.442695, %v4784_v18  ;;  %v2042_v48 = vld [vmem:[#allocation2 + $0x300] sm:$0xff] }
 0x21e   :  { %v3416_v41 = vadd.f32 -1.4531521, %v3272_v40  ;;  %v7239_v58 = vpack.c.bf16 %v6079_v45, %v6079_v45  ;;  %v2910_v46 = vadd.f32 1.0, %v2766_v28  ;;  %v2699_v1 = vmul.f32 0.3275911, %v2555_v39 }
 0x21f   :  { %v7165_v8 = vpack.c.bf16 %v6005_v0, %v6005_v0  ;;  %v3773_v34 = vadd.f32 1.4214138, %v3629_v55  ;;  %v4638_v15 = vsub.f32 0.0, %v2622_v24  ;;  %v10067_v14 = vmul.f32 0.70710677, %v10048_v54 }
 0x220   :  { %v3560_v56 = vmul.f32 %v10035_v4, %v3416_v41  ;;  %6800 = vst.msk [vmem:[%s12756_s3 + $0x178] sm:$0xf] %vm6705_vm5, %v7239_v58  ;;  %v10064_v12 = vpop.eup %7766  ;;  %7774 = vrcp.f32 %v2910_v46  ;;  %v10070_v51 = vadd.f32 %v10018_v27, %v1970_v5  ;;  %v2843_v25 = vadd.f32 1.0, %v2699_v1 }
 0x221   :  { %6726 = vst.msk [vmem:[%s12756_s3 + $0x50] sm:$0xf] %vm6705_vm5, %v7165_v8  ;;  %v3917_v62 = vmul.f32 %v10024_v2, %v3773_v34  ;;  %v3344_v52 = vmul.f32 1.0614054, %v10064_v12  ;;  %v10075_v13 = vmul.f32 0.5, %v9942_v47  ;;  %v4571_v17 = vsub.f32 0.0, %v2555_v39 }
 0x222   :  { %v3704_v29 = vadd.f32 1.4214138, %v3560_v56  ;;  %v4875_v44 = vmul.f32 1.442695, %v4710_v36  ;;  %v2627_v11 = vand.u32 2147483647, %v10067_v14  ;;  %7776 = vrcp.f32 %v2843_v25 }
 0x223   :  { %v4061_v60 = vadd.f32 -0.28449672, %v3917_v62  ;;  %v3488_v49 = vadd.f32 -1.4531521, %v3344_v52  ;;  %v10080_v22 = vmul.f32 0.5, %v9970_v19  ;;  %7778 = vpow2.f32 %v5023_v50 }
 0x224   :  { %v3848_v42 = vmul.f32 %v10035_v4, %v3704_v29  ;;  %v4782_v26 = vmul.f32 %v4638_v15, %v2622_v24  ;;  %v2771_v43 = vmul.f32 0.3275911, %v2627_v11  ;;  %v10087_v57 = vmul.f32 0.70710677, %v10070_v51 }
 0x225   :  { %v4205_v37 = vmul.f32 %v10024_v2, %v4061_v60  ;;  %v10082_v3 = vpop.eup %7768  ;;  %v3632_v7 = vmul.f32 %v10064_v12, %v3488_v49  ;;  %vm5501_vm3 = vcmp.ge.f32.partialorder %v9961_v20, 0.0  ;;  %7780 = vpow2.f32 %v4875_v44 }
 0x226   :  { %v3992_v6 = vadd.f32 -0.28449672, %v3848_v42  ;;  %v7771_v63 = vpop.eup %7770  ;;  %v3270_v38 = vmul.f32 1.0614054, %v10082_v3  ;;  %v4715_v19 = vmul.f32 %v4571_v17, %v2555_v39  ;;  %v2915_v61 = vadd.f32 1.0, %v2771_v43 }
 0x227   :  { %v4349_v23 = vadd.f32 0.2548296, %v4205_v37  ;;  %v3776_v45 = vadd.f32 1.4214138, %v3632_v7  ;;  %v2553_v18 = vand.u32 2147483647, %v10087_v57  ;;  %v7773_v55 = vpop.eup %7772  ;;  %v10101_v39 = vadd.f32 %v10018_v27, %v2042_v48 }
 0x228   :  { %v4136_v47 = vmul.f32 %v10035_v4, %v3992_v6  ;;  %vm5432_vm4 = vcmp.ge.f32.partialorder %v9964_v35, 0.0  ;;  %v10095_v59 = vmul.f32 0.5, %v9996_v32  ;;  %v3414_v24 = vadd.f32 -1.4531521, %v3270_v38 }
 0x229   :  { %v4493_v40 = vmul.f32 %v10024_v2, %v4349_v23  ;;  %v5019_v0 = vmul.f32 1.442695, %v4782_v26  ;;  %7782 = vrcp.f32 %v2915_v61  ;;  %v3920_v28 = vmul.f32 %v10064_v12, %v3776_v45 }
 0x22a   :  { %v4280_v9 = vadd.f32 0.2548296, %v4136_v47  ;;  %v2697_v8 = vmul.f32 0.3275911, %v2553_v18  ;;  %v3558_v2 = vmul.f32 %v10082_v3, %v3414_v24  ;;  %v4885_v34 = vmul.f32 1.442695, %v4715_v19 }
 0x22b   :  { %v5213_v41 = vmul.f32 %v7771_v63, %v4493_v40  ;;  %v4643_v56 = vsub.f32 0.0, %v2627_v11  ;;  %v4064_v36 = vadd.f32 -0.28449672, %v3920_v28  ;;  %7784 = vpow2.f32 %v5019_v0 }
 0x22c   :  { %v4424_v58 = vmul.f32 %v10035_v4, %v4280_v9  ;;  %v2841_v46 = vadd.f32 1.0, %v2697_v8  ;;  %v3702_v62 = vadd.f32 1.4214138, %v3558_v2  ;;  %v4569_v29 = vsub.f32 0.0, %v2553_v18 }
 0x22d   :  { %v5357_v5 = vsub.f32 1.0, %v5213_v41  ;;  %v10104_v50 = vmul.f32 0.70710677, %v10101_v39  ;;  %v10106_v4 = vpop.eup %7774  ;;  %v4208_v60 = vmul.f32 %v10064_v12, %v4064_v36  ;;  %v4787_v6 = vmul.f32 %v4643_v56, %v2627_v11 }
 0x22e   :  { %v5144_v32 = vmul.f32 %v7773_v55, %v4424_v58  ;;  %7786 = vrcp.f32 %v2841_v46  ;;  %v3846_v42 = vmul.f32 %v10082_v3, %v3702_v62  ;;  %v3342_v52 = vmul.f32 1.0614054, %v10106_v4  ;;  %v1973_v58 = vld [vmem:[#allocation2 + $0xd8] sm:$0xff] }
 0x22f   :  { %v5645_v1 = vsub.f32 0.0, %v5357_v5  ;;  %7788 = vpow2.f32 %v4885_v34  ;;  %v10112_v25 = vand.u32 2147483647, %v10104_v50  ;;  %v4352_v37 = vadd.f32 0.2548296, %v4208_v60  ;;  %v10116_v49 = vpop.eup %7776 }
 0x230   :  { %v5288_v15 = vsub.f32 1.0, %v5144_v32  ;;  %vm5504_vm6 = vcmp.ge.f32.partialorder %v9984_v30, 0.0  ;;  %v3990_v43 = vadd.f32 -0.28449672, %v3846_v42  ;;  %v3486_v23 = vadd.f32 -1.4531521, %v3342_v52  ;;  %v7779_v7 = vpop.eup %7778 }
 0x231   :  { %v5789_v44 = vsel %vm5501_vm3, %v5357_v5, %v5645_v1  ;;  %v4713_v47 = vmul.f32 %v4569_v29, %v2553_v18  ;;  %v4496_v38 = vmul.f32 %v10064_v12, %v4352_v37  ;;  %v3275_v20 = vmul.f32 1.0614054, %v10116_v49 }
 0x232   :  { %v5576_v17 = vsub.f32 0.0, %v5288_v15  ;;  %v5933_v26 = vadd.f32 1.0, %v5789_v44  ;;  %v2769_v19 = vmul.f32 0.3275911, %v10112_v25  ;;  %v4134_v48 = vmul.f32 %v10082_v3, %v3990_v43  ;;  %v7781_v9 = vpop.eup %7780 }
 0x233   :  { %v3630_v40 = vmul.f32 %v10106_v4, %v3486_v23  ;;  %v5216_v45 = vmul.f32 %v7779_v7, %v4496_v38  ;;  %v3419_v18 = vadd.f32 -1.4531521, %v3275_v20  ;;  %v5029_v24 = vmul.f32 1.442695, %v4787_v6 }
 0x234   :  { %v5720_v63 = vsel %vm5432_vm4, %v5288_v15, %v5576_v17  ;;  %v6077_v11 = vmul.f32 %v5933_v26, %v10057_v53  ;;  %v2913_v0 = vadd.f32 1.0, %v2769_v19  ;;  %v4278_v12 = vadd.f32 0.2548296, %v4134_v48  ;;  %v2045_v26 = vld [vmem:[#allocation2 + $0x318] sm:$0xff] }
 0x235   :  { %v5864_v61 = vadd.f32 1.0, %v5720_v63  ;;  %v3774_v41 = vadd.f32 1.4214138, %v3630_v40  ;;  %v5360_v8 = vsub.f32 1.0, %v5216_v45  ;;  %v3563_v53 = vmul.f32 %v10116_v49, %v3419_v18 }
 0x236   :  { %v7237_v35 = vpack.c.bf16 %v6077_v11, %v6077_v11  ;;  %v10128_v28 = vpop.eup %7782  ;;  %v4881_v2 = vmul.f32 1.442695, %v4713_v47  ;;  %7790 = vrcp.f32 %v2913_v0  ;;  %v4422_v56 = vmul.f32 %v10082_v3, %v4278_v12 }
 0x237   :  { %v6008_v55 = vmul.f32 %v5864_v61, %v10075_v13  ;;  %v3918_v13 = vmul.f32 %v10106_v4, %v3774_v41  ;;  %v3347_v5 = vmul.f32 1.0614054, %v10128_v28  ;;  %v5648_v32 = vsub.f32 0.0, %v5360_v8 }
 0x238   :  { %6798 = vst.msk [vmem:[%s12756_s3 + $0x170] sm:$0xf] %vm6705_vm5, %v7237_v35  ;;  %v3707_v36 = vadd.f32 1.4214138, %v3563_v53  ;;  %v4641_v46 = vsub.f32 0.0, %v10112_v25  ;;  %v10140_v62 = vadd.f32 %v10018_v27, %v1973_v58  ;;  %v5142_v29 = vmul.f32 %v7781_v9, %v4422_v56  ;;  %v7785_v3 = vpop.eup %7784 }
 0x239   :  { %v7168_v34 = vpack.c.bf16 %v6008_v55, %v6008_v55  ;;  %v4062_v1 = vadd.f32 -0.28449672, %v3918_v13  ;;  %v3491_v15 = vadd.f32 -1.4531521, %v3347_v5  ;;  %7792 = vpow2.f32 %v5029_v24 }
 0x23a   :  { %v5792_v60 = vsel %vm5504_vm6, %v5360_v8, %v5648_v32  ;;  %vm5430_vm7 = vcmp.ge.f32.partialorder %v10008_v16, 0.0  ;;  %v3851_v42 = vmul.f32 %v10116_v49, %v3707_v36  ;;  %7794 = vpow2.f32 %v4881_v2 }
 0x23b   :  { %6729 = vst.msk [vmem:[%s12756_s3 + $0x5c] sm:$0xf] %vm6705_vm5, %v7168_v34  ;;  %v10150_v52 = vpop.eup %7786  ;;  %v5936_v44 = vadd.f32 1.0, %v5792_v60  ;;  %v5286_v17 = vsub.f32 1.0, %v5142_v29  ;;  %v4206_v37 = vmul.f32 %v10106_v4, %v4062_v1  ;;  %v3635_v6 = vmul.f32 %v10128_v28, %v3491_v15 }
 0x23c   :  { %v7789_v43 = vpop.eup %7788  ;;  %v3995_v23 = vadd.f32 -0.28449672, %v3851_v42  ;;  %v3273_v47 = vmul.f32 1.0614054, %v10150_v52  ;;  %v4785_v30 = vmul.f32 %v4641_v46, %v10112_v25  ;;  %v10157_v7 = vmul.f32 0.70710677, %v10140_v62 }
 0x23d   :  { %v6080_v63 = vmul.f32 %v5936_v44, %v10080_v22  ;;  %v5574_v38 = vsub.f32 0.0, %v5286_v17  ;;  %v4350_v20 = vadd.f32 0.2548296, %v4206_v37  ;;  %v3779_v19 = vadd.f32 1.4214138, %v3635_v6  ;;  %v1971_v46 = vld [vmem:[#allocation2 + $0xc8] sm:$0xff] }
 0x23e   :  { %v4139_v11 = vmul.f32 %v10116_v49, %v3995_v23  ;;  %v3417_v61 = vadd.f32 -1.4531521, %v3273_v47  ;;  %v10162_v48 = vand.u32 2147483647, %v10157_v7  ;;  %v10165_v40 = vadd.f32 %v10018_v27, %v2045_v26 }
 0x23f   :  { %v7240_v9 = vpack.c.bf16 %v6080_v63, %v6080_v63  ;;  %v5718_v25 = vsel %vm5430_vm7, %v5286_v17, %v5574_v38  ;;  %v4494_v45 = vmul.f32 %v10106_v4, %v4350_v20  ;;  %v3923_v22 = vmul.f32 %v10128_v28, %v3779_v19 }
 0x240   :  { %v5862_v18 = vadd.f32 1.0, %v5718_v25  ;;  %v4283_v24 = vadd.f32 0.2548296, %v4139_v11  ;;  %v3561_v0 = vmul.f32 %v10150_v52, %v3417_v61  ;;  %v2700_v35 = vmul.f32 0.3275911, %v10162_v48 }
 0x241   :  { %6801 = vst.msk [vmem:[%s12756_s3 + $0x17c] sm:$0xf] %vm6705_vm5, %v7240_v9  ;;  %v5214_v55 = vmul.f32 %v7785_v3, %v4494_v45  ;;  %v4067_v12 = vadd.f32 -0.28449672, %v3923_v22  ;;  %v5025_v41 = vmul.f32 1.442695, %v4785_v30 }
 0x242   :  { %v6006_v16 = vmul.f32 %v5862_v18, %v10095_v59  ;;  %v4427_v4 = vmul.f32 %v10116_v49, %v4283_v24  ;;  %v3705_v58 = vadd.f32 1.4214138, %v3561_v0  ;;  %v2844_v8 = vadd.f32 1.0, %v2700_v35  ;;  %v2043_v18 = vld [vmem:[#allocation2 + $0x308] sm:$0xff] }
 0x243   :  { %v10179_v53 = vpop.eup %7790  ;;  %v2334_v2 = vmul.f32 0.5, %v10021_v10  ;;  %v5358_v34 = vsub.f32 1.0, %v5214_v55  ;;  %v4211_v56 = vmul.f32 %v10128_v28, %v4067_v12  ;;  %v10184_v13 = vmul.f32 0.70710677, %v10165_v40  ;;  %v1976_v12 = vld [vmem:[#allocation2 + $0xf0] sm:$0xff] }
 0x244   :  { %v7166_v5 = vpack.c.bf16 %v6006_v16, %v6006_v16  ;;  %v5147_v32 = vmul.f32 %v7789_v43, %v4427_v4  ;;  %v3849_v36 = vmul.f32 %v10150_v52, %v3705_v58  ;;  %v3345_v59 = vmul.f32 1.0614054, %v10179_v53 }
 0x245   :  { %vm5502_vm8 = vcmp.ge.f32.partialorder %v10033_v21, 0.0  ;;  %v5646_v49 = vsub.f32 0.0, %v5358_v34  ;;  %v4355_v29 = vadd.f32 0.2548296, %v4211_v56  ;;  %7796 = vrcp.f32 %v2844_v8 }
 0x246   :  { %v7793_v1 = vpop.eup %7792  ;;  %6727 = vst.msk [vmem:[%s12756_s3 + $0x54] sm:$0xf] %vm6705_vm5, %v7166_v5  ;;  %v5291_v10 = vsub.f32 1.0, %v5147_v32  ;;  %v3993_v15 = vadd.f32 -0.28449672, %v3849_v36  ;;  %7798 = vpow2.f32 %v5025_v41  ;;  %v10198_v21 = vadd.f32 %v10018_v27, %v1971_v46 }
 0x247   :  { %v3489_v3 = vadd.f32 -1.4531521, %v3345_v59  ;;  %v7795_v60 = vpop.eup %7794  ;;  %v5790_v42 = vsel %vm5502_vm8, %v5358_v34, %v5646_v49  ;;  %v4499_v44 = vmul.f32 %v10128_v28, %v4355_v29  ;;  %v10195_v17 = vand.u32 2147483647, %v10184_v13 }
 0x248   :  { %v5934_v37 = vadd.f32 1.0, %v5790_v42  ;;  %v5579_v6 = vsub.f32 0.0, %v5291_v10  ;;  %v4137_v26 = vmul.f32 %v10150_v52, %v3993_v15  ;;  %vm5435_vm9 = vcmp.ge.f32.partialorder %v10045_v31, 0.0 }
 0x249   :  { %v3633_v43 = vmul.f32 %v10179_v53, %v3489_v3  ;;  %v5219_v23 = vmul.f32 %v7793_v1, %v4499_v44  ;;  %v4572_v47 = vsub.f32 0.0, %v10162_v48  ;;  %v2772_v30 = vmul.f32 0.3275911, %v10195_v17 }
 0x24a   :  { %v6078_v28 = vmul.f32 %v5934_v37, %v2334_v2  ;;  %v5723_v63 = vsel %vm5435_vm9, %v5291_v10, %v5579_v6  ;;  %v4281_v38 = vadd.f32 0.2548296, %v4137_v26  ;;  %v2267_v19 = vmul.f32 0.5, %v10027_v33 }
 0x24b   :  { %v3777_v20 = vadd.f32 1.4214138, %v3633_v43  ;;  %v5867_v11 = vadd.f32 1.0, %v5723_v63  ;;  %v5363_v61 = vsub.f32 1.0, %v5219_v23  ;;  %v2916_v9 = vadd.f32 1.0, %v2772_v30  ;;  %v2048_v43 = vld [vmem:[#allocation2 + $0x330] sm:$0xff] }
 0x24c   :  { %v7238_v25 = vpack.c.bf16 %v6078_v28, %v6078_v28  ;;  %v4425_v45 = vmul.f32 %v10150_v52, %v4281_v38  ;;  %v10209_v31 = vmul.f32 0.70710677, %v10198_v21  ;;  %v4716_v35 = vmul.f32 %v4572_v47, %v10162_v48 }
 0x24d   :  { %v3921_v22 = vmul.f32 %v10179_v53, %v3777_v20  ;;  %v6011_v24 = vmul.f32 %v5867_v11, %v2267_v19  ;;  %v5651_v0 = vsub.f32 0.0, %v5363_v61  ;;  %7800 = vrcp.f32 %v2916_v9 }
 0x24e   :  { %6799 = vst.msk [vmem:[%s12756_s3 + $0x174] sm:$0xf] %vm6705_vm5, %v7238_v25  ;;  %vm5507_vm10 = vcmp.ge.f32.partialorder %v10067_v14, 0.0  ;;  %v5145_v33 = vmul.f32 %v7795_v60, %v4425_v45  ;;  %v2554_v55 = vand.u32 2147483647, %v10209_v31  ;;  %v2339_v16 = vmul.f32 0.5, %v10048_v54 }
 0x24f   :  { %v4065_v52 = vadd.f32 -0.28449672, %v3921_v22  ;;  %v7171_v41 = vpack.c.bf16 %v6011_v24, %v6011_v24  ;;  %v5795_v4 = vsel %vm5507_vm10, %v5363_v61, %v5651_v0  ;;  %v10220_v58 = vadd.f32 %v10018_v27, %v2043_v18 }
 0x250   :  { %v5939_v48 = vadd.f32 1.0, %v5795_v4  ;;  %v5289_v8 = vsub.f32 1.0, %v5145_v33  ;;  %v2698_v34 = vmul.f32 0.3275911, %v2554_v55  ;;  %v4887_v14 = vmul.f32 1.442695, %v4716_v35 }
 0x251   :  { %v4209_v2 = vmul.f32 %v10179_v53, %v4065_v52  ;;  %6732 = vst.msk [vmem:[%s12756_s3 + $0x68] sm:$0xf] %vm6705_vm5, %v7171_v41  ;;  %v10228_v56 = vmul.f32 0.70710677, %v10220_v58  ;;  %v10231_v54 = vadd.f32 %v10018_v27, %v1976_v12  ;;  %vm5433_vm11 = vcmp.ge.f32.partialorder %v10087_v57, 0.0 }
 0x252   :  { %v10233_v5 = vpop.eup %7796  ;;  %v6083_v32 = vmul.f32 %v5939_v48, %v2339_v16  ;;  %v5577_v36 = vsub.f32 0.0, %v5289_v8  ;;  %v2842_v46 = vadd.f32 1.0, %v2698_v34  ;;  %v4644_v1 = vsub.f32 0.0, %v10195_v17 }
 0x253   :  { %v4353_v59 = vadd.f32 0.2548296, %v4209_v2  ;;  %v7799_v49 = vpop.eup %7798  ;;  %v3276_v29 = vmul.f32 1.0614054, %v10233_v5  ;;  %v2626_v10 = vand.u32 2147483647, %v10228_v56  ;;  %v10253_v11 = vadd.f32 %v10018_v27, %v2048_v43 }
 0x254   :  { %v7243_v15 = vpack.c.bf16 %v6083_v32, %v6083_v32  ;;  %v5721_v3 = vsel %vm5433_vm11, %v5289_v8, %v5577_v36  ;;  %7802 = vrcp.f32 %v2842_v46  ;;  %v2265_v42 = vmul.f32 0.5, %v10070_v51 }
 0x255   :  { %v4497_v60 = vmul.f32 %v10179_v53, %v4353_v59  ;;  %v5865_v44 = vadd.f32 1.0, %v5721_v3  ;;  %v3420_v37 = vadd.f32 -1.4531521, %v3276_v29  ;;  %7804 = vpow2.f32 %v4887_v14 }
 0x256   :  { %6804 = vst.msk [vmem:[%s12756_s3 + $0x188] sm:$0xf] %vm6705_vm5, %v7243_v15  ;;  %v2770_v6 = vmul.f32 0.3275911, %v2626_v10  ;;  %v10246_v26 = vmul.f32 0.70710677, %v10231_v54  ;;  %v4788_v47 = vmul.f32 %v4644_v1, %v10195_v17 }
 0x257   :  { %v5217_v57 = vmul.f32 %v7799_v49, %v4497_v60  ;;  %v6009_v23 = vmul.f32 %v5865_v44, %v2265_v42  ;;  %v3564_v53 = vmul.f32 %v10233_v5, %v3420_v37  ;;  %v4570_v51 = vsub.f32 0.0, %v2554_v55  ;;  %v1974_v17 = vld [vmem:[#allocation2 + $0xe0] sm:$0xff] }
 0x258   :  { %v2914_v28 = vadd.f32 1.0, %v2770_v6  ;;  %v2559_v63 = vand.u32 2147483647, %v10246_v26  ;;  %v2337_v20 = vmul.f32 0.5, %v10101_v39  ;;  %vm5505_vm12 = vcmp.ge.f32.partialorder %v10104_v50, 0.0 }
 0x259   :  { %v5361_v30 = vsub.f32 1.0, %v5217_v57  ;;  %v7169_v38 = vpack.c.bf16 %v6009_v23, %v6009_v23  ;;  %v3708_v19 = vadd.f32 1.4214138, %v3564_v53  ;;  %v5031_v22 = vmul.f32 1.442695, %v4788_v47 }
 0x25a   :  { %v10255_v61 = vpop.eup %7800  ;;  %7806 = vrcp.f32 %v2914_v28  ;;  %v2703_v25 = vmul.f32 0.3275911, %v2559_v63  ;;  %v4714_v18 = vmul.f32 %v4570_v51, %v2554_v55  ;;  %v4642_v0 = vsub.f32 0.0, %v2626_v10  ;;  %v2046_v55 = vld [vmem:[#allocation2 + $0x320] sm:$0xff] }
 0x25b   :  { %v5649_v9 = vsub.f32 0.0, %v5361_v30  ;;  %6730 = vst.msk [vmem:[%s12756_s3 + $0x60] sm:$0xf] %vm6705_vm5, %v7169_v38  ;;  %v3852_v45 = vmul.f32 %v10233_v5, %v3708_v19  ;;  %v3348_v39 = vmul.f32 1.0614054, %v10255_v61  ;;  %v10268_v41 = vadd.f32 %v10018_v27, %v1974_v17 }
 0x25c   :  { %v2847_v35 = vadd.f32 1.0, %v2703_v25  ;;  %v10265_v50 = vmul.f32 0.70710677, %v10253_v11  ;;  %v10271_v16 = vmul.f32 0.5, %v10140_v62  ;;  %v4575_v4 = vsub.f32 0.0, %v2559_v63 }
 0x25d   :  { %v5793_v24 = vsel %vm5505_vm12, %v5361_v30, %v5649_v9  ;;  %v3996_v52 = vadd.f32 -0.28449672, %v3852_v45  ;;  %v3492_v12 = vadd.f32 -1.4531521, %v3348_v39  ;;  %v4883_v14 = vmul.f32 1.442695, %v4714_v18 }
 0x25e   :  { %v5937_v33 = vadd.f32 1.0, %v5793_v24  ;;  %7808 = vrcp.f32 %v2847_v35  ;;  %v2631_v48 = vand.u32 2147483647, %v10265_v50  ;;  %v4786_v32 = vmul.f32 %v4642_v0, %v2626_v10 }
 0x25f   :  { %v4140_v2 = vmul.f32 %v10233_v5, %v3996_v52  ;;  %v3636_v34 = vmul.f32 %v10255_v61, %v3492_v12  ;;  %7810 = vpow2.f32 %v5031_v22  ;;  %v10277_v59 = vmul.f32 0.70710677, %v10268_v41 }
 0x260   :  { %v6081_v8 = vmul.f32 %v5937_v33, %v2337_v20  ;;  %v2775_v36 = vmul.f32 0.3275911, %v2631_v48  ;;  %v10282_v1 = vadd.f32 %v10018_v27, %v2046_v55  ;;  %vm5436_vm13 = vcmp.ge.f32.partialorder %v10157_v7, 0.0 }
 0x261   :  { %v10279_v46 = vpop.eup %7802  ;;  %v4284_v49 = vadd.f32 0.2548296, %v4140_v2  ;;  %v3780_v29 = vadd.f32 1.4214138, %v3636_v34  ;;  %v4719_v3 = vmul.f32 %v4575_v4, %v2559_v63  ;;  %v10287_v10 = vand.u32 2147483647, %v10277_v59 }
 0x262   :  { %v7241_v62 = vpack.c.bf16 %v6081_v8, %v6081_v8  ;;  %v3274_v15 = vmul.f32 1.0614054, %v10279_v46  ;;  %v2919_v60 = vadd.f32 1.0, %v2775_v36  ;;  %v7805_v42 = vpop.eup %7804  ;;  %v10295_v37 = vmul.f32 0.5, %v10165_v40 }
 0x263   :  { %v4428_v44 = vmul.f32 %v10233_v5, %v4284_v49  ;;  %v3924_v57 = vmul.f32 %v10255_v61, %v3780_v29  ;;  %v10299_v6 = vmul.f32 0.5, %v10198_v21  ;;  %v10302_v23 = vmul.f32 0.5, %v10220_v58  ;;  %v1977_v21 = vld [vmem:[#allocation2 + $0xf8] sm:$0xff] }
 0x264   :  { %6802 = vst.msk [vmem:[%s12756_s3 + $0x180] sm:$0xf] %vm6705_vm5, %v7241_v62  ;;  %v3418_v43 = vadd.f32 -1.4531521, %v3274_v15  ;;  %7812 = vrcp.f32 %v2919_v60  ;;  %v2701_v53 = vmul.f32 0.3275911, %v10287_v10  ;;  %v10320_v18 = vadd.f32 %v10018_v27, %v1977_v21 }
 0x265   :  { %v5148_v47 = vmul.f32 %v7805_v42, %v4428_v44  ;;  %v4068_v51 = vadd.f32 -0.28449672, %v3924_v57  ;;  %v5027_v30 = vmul.f32 1.442695, %v4786_v32  ;;  %v10306_v5 = vmul.f32 0.70710677, %v10282_v1 }
 0x266   :  { %v3562_v40 = vmul.f32 %v10279_v46, %v3418_v43  ;;  %7814 = vpow2.f32 %v4883_v14  ;;  %v4893_v28 = vmul.f32 1.442695, %v4719_v3  ;;  %v2845_v63 = vadd.f32 1.0, %v2701_v53  ;;  %v2049_v43 = vld [vmem:[#allocation2 + $0x338] sm:$0xff] }
 0x267   :  { %v10309_v38 = vpop.eup %7806  ;;  %v5292_v20 = vsub.f32 1.0, %v5148_v47  ;;  %v4212_v58 = vmul.f32 %v10255_v61, %v4068_v51  ;;  %v4647_v19 = vsub.f32 0.0, %v2631_v48  ;;  %v10313_v9 = vand.u32 2147483647, %v10306_v5 }
 0x268   :  { %v3706_v25 = vadd.f32 1.4214138, %v3562_v40  ;;  %v3346_v17 = vmul.f32 1.0614054, %v10309_v38  ;;  %v10317_v45 = vmul.f32 0.5, %v10231_v54  ;;  %7816 = vrcp.f32 %v2845_v63 }
 0x269   :  { %v5580_v39 = vsub.f32 0.0, %v5292_v20  ;;  %v4356_v22 = vadd.f32 0.2548296, %v4212_v58  ;;  %7818 = vpow2.f32 %v5027_v30  ;;  %vm5508_vm14 = vcmp.ge.f32.partialorder %v10184_v13, 0.0 }
 0x26a   :  { %v3850_v24 = vmul.f32 %v10279_v46, %v3706_v25  ;;  %v3490_v0 = vadd.f32 -1.4531521, %v3346_v17  ;;  %v10325_v35 = vmul.f32 0.5, %v10253_v11  ;;  %v2773_v33 = vmul.f32 0.3275911, %v10313_v9 }
 0x26b   :  { %v10328_v52 = vpop.eup %7808  ;;  %v5724_v54 = vsel %vm5436_vm13, %v5292_v20, %v5580_v39  ;;  %v4500_v12 = vmul.f32 %v10255_v61, %v4356_v22  ;;  %7820 = vpow2.f32 %v4893_v28  ;;  %v4791_v4 = vmul.f32 %v4647_v19, %v2631_v48 }
 0x26c   :  { %v7811_v55 = vpop.eup %7810  ;;  %v5868_v8 = vadd.f32 1.0, %v5724_v54  ;;  %v3994_v2 = vadd.f32 -0.28449672, %v3850_v24  ;;  %v3634_v34 = vmul.f32 %v10309_v38, %v3490_v0  ;;  %v3279_v14 = vmul.f32 1.0614054, %v10328_v52 }
 0x26d   :  { %v5220_v11 = vmul.f32 %v7811_v55, %v4500_v12  ;;  %v4573_v32 = vsub.f32 0.0, %v10287_v10  ;;  %v2917_v36 = vadd.f32 1.0, %v2773_v33  ;;  %v10337_v62 = vmul.f32 0.70710677, %v10320_v18 }
 0x26e   :  { %v6012_v7 = vmul.f32 %v5868_v8, %v10271_v16  ;;  %v4138_v61 = vmul.f32 %v10279_v46, %v3994_v2  ;;  %v3778_v49 = vadd.f32 1.4214138, %v3634_v34  ;;  %v3423_v48 = vadd.f32 -1.4531521, %v3279_v14 }
 0x26f   :  { %v5364_v29 = vsub.f32 1.0, %v5220_v11  ;;  %v5037_v15 = vmul.f32 1.442695, %v4791_v4  ;;  %7822 = vrcp.f32 %v2917_v36  ;;  %v10342_v3 = vand.u32 2147483647, %v10337_v62 }
 0x270   :  { %v7172_v60 = vpack.c.bf16 %v6012_v7, %v6012_v7  ;;  %v4282_v42 = vadd.f32 0.2548296, %v4138_v61  ;;  %v3922_v44 = vmul.f32 %v10309_v38, %v3778_v49  ;;  %v3567_v57 = vmul.f32 %v10328_v52, %v3423_v48 }
 0x271   :  { %v10346_v53 = vpop.eup %7812  ;;  %v5652_v16 = vsub.f32 0.0, %v5364_v29  ;;  %vm5434_vm15 = vcmp.ge.f32.partialorder %v10209_v31, 0.0  ;;  %v4717_v47 = vmul.f32 %v4573_v32, %v10287_v10  ;;  %v4645_v51 = vsub.f32 0.0, %v10313_v9 }
 0x272   :  { %v2704_v30 = vmul.f32 0.3275911, %v10342_v3  ;;  %6733 = vst.msk [vmem:[%s12756_s3 + $0x6c] sm:$0xf] %vm6705_vm5, %v7172_v60  ;;  %v4426_v40 = vmul.f32 %v10279_v46, %v4282_v42  ;;  %v4066_v28 = vadd.f32 -0.28449672, %v3922_v44  ;;  %7824 = vpow2.f32 %v5037_v15 }
 0x273   :  { %v3711_v63 = vadd.f32 1.4214138, %v3567_v57  ;;  %v3351_v21 = vmul.f32 1.0614054, %v10346_v53  ;;  %v7815_v20 = vpop.eup %7814  ;;  %v5796_v58 = vsel %vm5508_vm14, %v5364_v29, %v5652_v16  ;;  %v10361_v19 = vadd.f32 %v10018_v27, %v2049_v43  ;;  %v1975_v57 = vld [vmem:[#allocation2 + $0xe8] sm:$0xff] }
 0x274   :  { %v2848_v10 = vadd.f32 1.0, %v2704_v30  ;;  %v5940_v25 = vadd.f32 1.0, %v5796_v58  ;;  %v5146_v17 = vmul.f32 %v7815_v20, %v4426_v40  ;;  %v4210_v39 = vmul.f32 %v10309_v38, %v4066_v28 }
 0x275   :  { %v3855_v22 = vmul.f32 %v10328_v52, %v3711_v63  ;;  %v10365_v46 = vpop.eup %7816  ;;  %v3495_v24 = vadd.f32 -1.4531521, %v3351_v21  ;;  %v4889_v0 = vmul.f32 1.442695, %v4717_v47  ;;  %v4789_v33 = vmul.f32 %v4645_v51, %v10313_v9 }
 0x276   :  { %7826 = vrcp.f32 %v2848_v10  ;;  %v7819_v13 = vpop.eup %7818  ;;  %v6084_v54 = vmul.f32 %v5940_v25, %v10295_v37  ;;  %v5290_v12 = vsub.f32 1.0, %v5146_v17  ;;  %v4354_v4 = vadd.f32 0.2548296, %v4210_v39 }
 0x277   :  { %v3999_v55 = vadd.f32 -0.28449672, %v3855_v22  ;;  %vm5506_vm0 = vcmp.ge.f32.partialorder %v10228_v56, 0.0  ;;  %v3639_v8 = vmul.f32 %v10346_v53, %v3495_v24  ;;  %v3277_v2 = vmul.f32 1.0614054, %v10365_v46 }
 0x278   :  { %v4576_v34 = vsub.f32 0.0, %v10342_v3  ;;  %v10374_v14 = vmul.f32 0.70710677, %v10361_v19  ;;  %v7821_v11 = vpop.eup %7820  ;;  %v7244_v9 = vpack.c.bf16 %v6084_v54, %v6084_v54  ;;  %v5578_v32 = vsub.f32 0.0, %v5290_v12 }
 0x279   :  { %v4498_v36 = vmul.f32 %v10309_v38, %v4354_v4  ;;  %v4143_v37 = vmul.f32 %v10328_v52, %v3999_v55  ;;  %v3783_v7 = vadd.f32 1.4214138, %v3639_v8  ;;  %v3421_v61 = vadd.f32 -1.4531521, %v3277_v2  ;;  %v10418_v8 = vpop.f32.mrf.mxu1 }
 0x27a   :  { %v10379_v49 = vand.u32 2147483647, %v10374_v14  ;;  %6805 = vst.msk [vmem:[%s12756_s3 + $0x18c] sm:$0xf] %vm6705_vm5, %v7244_v9  ;;  %v5722_v48 = vsel %vm5434_vm15, %v5290_v12, %v5578_v32  ;;  %7828 = vpow2.f32 %v4889_v0  ;;  %vm5439_vm2 = vcmp.ge.f32.partialorder %v10246_v26, 0.0  ;;  %v2047_v12 = vld [vmem:[#allocation2 + $0x328] sm:$0xff] }
 0x27b   :  { %v5218_v29 = vmul.f32 %v7819_v13, %v4498_v36  ;;  %v4287_v15 = vadd.f32 0.2548296, %v4143_v37  ;;  %v5866_v60 = vadd.f32 1.0, %v5722_v48  ;;  %v3927_v38 = vmul.f32 %v10346_v53, %v3783_v7  ;;  %v10433_v26 = vpop.f32.mrf.mxu1 }
 0x27c   :  { %v3565_v42 = vmul.f32 %v10365_v46, %v3421_v61  ;;  %v2776_v44 = vmul.f32 0.3275911, %v10379_v49  ;;  %v10391_v43 = vpop.eup %7822  ;;  %v5033_v31 = vmul.f32 1.442695, %v4789_v33  ;;  %v4720_v51 = vmul.f32 %v4576_v34, %v10342_v3 }
 0x27d   :  { %v5362_v16 = vsub.f32 1.0, %v5218_v29  ;;  %v4431_v47 = vmul.f32 %v10328_v52, %v4287_v15  ;;  %v6010_v30 = vmul.f32 %v5866_v60, %v10299_v6  ;;  %v4071_v40 = vadd.f32 -0.28449672, %v3927_v38  ;;  %v10431_v38 = vpop.f32.mrf.mxu0 }
 0x27e   :  { %v3709_v28 = vadd.f32 1.4214138, %v3565_v42  ;;  %v3349_v63 = vmul.f32 1.0614054, %v10391_v43  ;;  %v2920_v58 = vadd.f32 1.0, %v2776_v44  ;;  %v10398_v10 = vadd.f32 %v10018_v27, %v1975_v57 }
 0x27f   :  { %v5650_v21 = vsub.f32 0.0, %v5362_v16  ;;  %v5151_v20 = vmul.f32 %v7821_v11, %v4431_v47  ;;  %v7170_v25 = vpack.c.bf16 %v6010_v30, %v6010_v30  ;;  %v4215_v17 = vmul.f32 %v10346_v53, %v4071_v40  ;;  %v7825_v22 = vpop.eup %7824 }
 0x280   :  { %v3853_v52 = vmul.f32 %v10365_v46, %v3709_v28  ;;  %v3493_v39 = vadd.f32 -1.4531521, %v3349_v63  ;;  %v10405_v24 = vmul.f32 0.5, %v10268_v41  ;;  %7830 = vrcp.f32 %v2920_v58  ;;  %v10448_v58 = vpop.f32.mrf.mxu0 }
 0x281   :  { %v5794_v6 = vsel %vm5506_vm0, %v5362_v16, %v5650_v21  ;;  %v5295_v3 = vsub.f32 1.0, %v5151_v20  ;;  %6731 = vst.msk [vmem:[%s12756_s3 + $0x64] sm:$0xf] %vm6705_vm5, %v7170_v25  ;;  %v4359_v33 = vadd.f32 0.2548296, %v4215_v17  ;;  %vm5511_vm3 = vcmp.ge.f32.partialorder %v10265_v50, 0.0  ;;  %v10450_v25 = vpop.f32.mrf.mxu1 }
 0x282   :  { %v5938_v0 = vadd.f32 1.0, %v5794_v6  ;;  %v3997_v13 = vadd.f32 -0.28449672, %v3853_v52  ;;  %v3637_v54 = vmul.f32 %v10391_v43, %v3493_v39  ;;  %7832 = vpow2.f32 %v5033_v31 }
 0x283   :  { %v10412_v4 = vpop.eup %7826  ;;  %v5583_v56 = vsub.f32 0.0, %v5295_v3  ;;  %v4895_v41 = vmul.f32 1.442695, %v4720_v51  ;;  %v10416_v55 = vmul.f32 0.70710677, %v10398_v10  ;;  %v4503_v34 = vmul.f32 %v10346_v53, %v4359_v33 }
 0x284   :  { %v6082_v2 = vmul.f32 %v5938_v0, %v10302_v23  ;;  %v4141_v11 = vmul.f32 %v10365_v46, %v3997_v13  ;;  %v3781_v9 = vadd.f32 1.4214138, %v3637_v54  ;;  %v3280_v36 = vmul.f32 1.0614054, %v10412_v4 }
 0x285   :  { %v5727_v32 = vsel %vm5439_vm2, %v5295_v3, %v5583_v56  ;;  %v2558_v37 = vand.u32 2147483647, %v10416_v55  ;;  %v10428_v7 = vadd.f32 %v10018_v27, %v2047_v12  ;;  %v5223_v29 = vmul.f32 %v7825_v22, %v4503_v34 }
 0x286   :  { %v7242_v61 = vpack.c.bf16 %v6082_v2, %v6082_v2  ;;  %v5871_v48 = vadd.f32 1.0, %v5727_v32  ;;  %v4285_v15 = vadd.f32 0.2548296, %v4141_v11  ;;  %v3925_v23 = vmul.f32 %v10391_v43, %v3781_v9  ;;  %v10480_v11 = vpop.f32.mrf.mxu0  ;;  %v10482_v9 = vpop.f32.mrf.mxu1 }
 0x287   :  { %v3424_v53 = vadd.f32 -1.4531521, %v3280_v36  ;;  %7834 = vpow2.f32 %v4895_v41  ;;  %v2702_v60 = vmul.f32 0.3275911, %v2558_v37  ;;  %v7829_v42 = vpop.eup %7828  ;;  %v5367_v44 = vsub.f32 1.0, %v5223_v29 }
 0x288   :  { %6803 = vst.msk [vmem:[%s12756_s3 + $0x184] sm:$0xf] %vm6705_vm5, %v7242_v61  ;;  %v6015_v27 = vmul.f32 %v5871_v48, %v10317_v45  ;;  %v4429_v57 = vmul.f32 %v10365_v46, %v4285_v15  ;;  %v4648_v16 = vsub.f32 0.0, %v10379_v49  ;;  %v4069_v47 = vadd.f32 -0.28449672, %v3925_v23  ;;  %v1980_v46 = vld [vmem:[#allocation2 + $0x110] sm:$0xff] }
 0x289   :  { %v3568_v31 = vmul.f32 %v10412_v4, %v3424_v53  ;;  %v2846_v51 = vadd.f32 1.0, %v2702_v60  ;;  %v4574_v30 = vsub.f32 0.0, %v2558_v37  ;;  %v5655_v28 = vsub.f32 0.0, %v5367_v44  ;;  %v270_v48 = vld [vmem:[#allocation2 + $0x350] sm:$0xff]  ;;  %v196_v23 = vld [vmem:[#allocation2 + $0x100] sm:$0xff] }
 0x28a   :  { %v7175_v40 = vpack.c.bf16 %v6015_v27, %v6015_v27  ;;  %v5149_v63 = vmul.f32 %v7829_v42, %v4429_v57  ;;  %v10444_v21 = vmul.f32 0.70710677, %v10428_v7  ;;  %vm5437_vm4 = vcmp.ge.f32.partialorder %v10277_v59, 0.0 }
 0x28b   :  { %v4213_v45 = vmul.f32 %v10391_v43, %v4069_v47  ;;  %v3712_v20 = vadd.f32 1.4214138, %v3568_v31  ;;  %7836 = vrcp.f32 %v2846_v51  ;;  %v5799_v17 = vsel %vm5511_vm3, %v5367_v44, %v5655_v28  ;;  %v7405_v47 = vpop.f32.mrf.mxu0  ;;  %v7477_v31 = vpop.f32.mrf.mxu1 }
 0x28c   :  { %6736 = vst.msk [vmem:[%s12756_s3 + $0x78] sm:$0xf] %vm6705_vm5, %v7175_v40  ;;  %v5293_v52 = vsub.f32 1.0, %v5149_v63  ;;  %v4792_v39 = vmul.f32 %v4648_v16, %v10379_v49  ;;  %v10460_v22 = vand.u32 2147483647, %v10444_v21  ;;  %v5943_v6 = vadd.f32 1.0, %v5799_v17 }
 0x28d   :  { %v10463_v3 = vmul.f32 0.5, %v10282_v1  ;;  %v4357_v0 = vadd.f32 0.2548296, %v4213_v45  ;;  %v3856_v33 = vmul.f32 %v10412_v4, %v3712_v20  ;;  %v10466_v13 = vpop.eup %7830  ;;  %v4718_v12 = vmul.f32 %v4574_v30, %v2558_v37  ;;  %v10472_v49 = vld [vmem:[%s12755_s2] ss:$0 sm:$0xff]  ;;  %v199_v63 = vld [vmem:[#allocation2 + $0x118] sm:$0xff] }
 0x28e   :  { %v5581_v54 = vsub.f32 0.0, %v5293_v52  ;;  %v2774_v50 = vmul.f32 0.3275911, %v10460_v22  ;;  %v10475_v56 = vadd.f32 %v10472_v49, %v1980_v46  ;;  %v6087_v1 = vmul.f32 %v5943_v6, %v10325_v35  ;;  %v268_v16 = vld [vmem:[#allocation2 + $0x340] sm:$0xff]  ;;  %v271_v45 = vld [vmem:[#allocation2 + $0x358] sm:$0xff]  ;;  %v269_v6 = vld [vmem:[#allocation2 + $0x348] sm:$0xff] }
 0x28f   :  { %v4501_v41 = vmul.f32 %v10391_v43, %v4357_v0  ;;  %v4000_v2 = vadd.f32 -0.28449672, %v3856_v33  ;;  %v3352_v34 = vmul.f32 1.0614054, %v10466_v13  ;;  %v7833_v32 = vpop.eup %7832  ;;  %vm5509_vm6 = vcmp.ge.f32.partialorder %v10306_v5, 0.0  ;;  %v202_v5 = vld [vmem:[#allocation2 + $0x130] sm:$0xff] }
 0x290   :  { %v5725_v36 = vsel %vm5437_vm4, %v5293_v52, %v5581_v54  ;;  %v5039_v37 = vmul.f32 1.442695, %v4792_v39  ;;  %v2918_v61 = vadd.f32 1.0, %v2774_v50  ;;  %v7247_v29 = vpack.c.bf16 %v6087_v1, %v6087_v1  ;;  %v197_v39 = vld [vmem:[#allocation2 + $0x108] sm:$0xff]  ;;  %v1223_v54 = vpop.f32.mrf.mxu0 }
 0x291   :  { %v5869_v35 = vadd.f32 1.0, %v5725_v36  ;;  %v5221_v15 = vmul.f32 %v7833_v32, %v4501_v41  ;;  %v4144_v43 = vmul.f32 %v10412_v4, %v4000_v2  ;;  %v3496_v53 = vadd.f32 -1.4531521, %v3352_v34  ;;  %v274_v34 = vld [vmem:[#allocation2 + $0x370] sm:$0xff] }
 0x292   :  { %v4891_v60 = vmul.f32 1.442695, %v4718_v12  ;;  %7838 = vrcp.f32 %v2918_v61  ;;  %v10489_v42 = vmul.f32 0.70710677, %v10475_v56  ;;  %6808 = vst.msk [vmem:[%s12756_s3 + $0x198] sm:$0xf] %vm6705_vm5, %v7247_v29  ;;  %v1760_v57 = vadd.f32 %v10418_v8, %v270_v48  ;;  %v1511_v12 = vpop.f32.mrf.mxu1 }
 0x293   :  { %v6013_v59 = vmul.f32 %v5869_v35, %v10405_v24  ;;  %v5365_v27 = vsub.f32 1.0, %v5221_v15  ;;  %v4288_v44 = vadd.f32 0.2548296, %v4144_v43  ;;  %v10498_v30 = vmul.f32 0.5, %v10320_v18  ;;  %v272_v29 = vld [vmem:[#allocation2 + $0x360] sm:$0xff] }
 0x294   :  { %v7835_v51 = vpop.eup %7834  ;;  %v3640_v40 = vmul.f32 %v10466_v13, %v3496_v53  ;;  %7840 = vpow2.f32 %v5039_v37  ;;  %v10502_v28 = vand.u32 2147483647, %v10489_v42  ;;  %1905 = vst.msk [vmem:[#allocation2 + $0x350] sm:$0xff] %vm19_vm1, %v1760_v57  ;;  %v1686_v8 = vadd.f32 %v10431_v38, %v196_v23  ;;  %v200_v37 = vld [vmem:[#allocation2 + $0x120] sm:$0xff]  ;;  %v203_v53 = vld [vmem:[#allocation2 + $0x138] sm:$0xff] }
 0x295   :  { %v7173_v24 = vpack.c.bf16 %v6013_v59, %v6013_v59  ;;  %v5653_v20 = vsub.f32 0.0, %v5365_v27  ;;  %v4432_v46 = vmul.f32 %v10412_v4, %v4288_v44  ;;  %7842 = vpow2.f32 %v4891_v60  ;;  %v275_v60 = vld [vmem:[#allocation2 + $0x378] sm:$0xff] }
 0x296   :  { %v3784_v17 = vadd.f32 1.4214138, %v3640_v40  ;;  %v2707_v18 = vmul.f32 0.3275911, %v10502_v28  ;;  %v1758_v52 = vadd.f32 %v10433_v26, %v268_v16  ;;  %1831 = vst.msk [vmem:[#allocation2 + $0x100] sm:$0xff] %vm19_vm1, %v1686_v8  ;;  %v1689_v38 = vadd.f32 %v10448_v58, %v199_v63 }
 0x297   :  { %6734 = vst.msk [vmem:[%s12756_s3 + $0x70] sm:$0xf] %vm6705_vm5, %v7173_v24  ;;  %v5797_v4 = vsel %vm5509_vm6, %v5365_v27, %v5653_v20  ;;  %v5152_v0 = vmul.f32 %v7835_v51, %v4432_v46  ;;  %v1761_v33 = vadd.f32 %v10450_v25, %v271_v45  ;;  %v4646_v41 = vsub.f32 0.0, %v10460_v22 }
 0x298   :  { %v10518_v26 = vpop.eup %7836  ;;  %v5941_v50 = vadd.f32 1.0, %v5797_v4  ;;  %v3928_v1 = vmul.f32 %v10466_v13, %v3784_v17  ;;  %v2851_v2 = vadd.f32 1.0, %v2707_v18  ;;  %1903 = vst.msk [vmem:[#allocation2 + $0x340] sm:$0xff] %vm19_vm1, %v1758_v52  ;;  %1834 = vst.msk [vmem:[#allocation2 + $0x118] sm:$0xff] %vm19_vm1, %v1689_v38  ;;  %v1687_v58 = vadd.f32 %v10480_v11, %v197_v39  ;;  %v7406_v11 = vpop.f32.mrf.mxu0 }
 0x299   :  { %v5296_v32 = vsub.f32 1.0, %v5152_v0  ;;  %v3278_v36 = vmul.f32 1.0614054, %v10518_v26  ;;  %1906 = vst.msk [vmem:[#allocation2 + $0x358] sm:$0xff] %vm19_vm1, %v1761_v33  ;;  %v1759_v25 = vadd.f32 %v10482_v9, %v269_v6  ;;  %vm5440_vm7 = vcmp.ge.f32.partialorder %v10337_v62, 0.0  ;;  %v7478_v9 = vpop.f32.mrf.mxu1 }
 0x29a   :  { %v6085_v61 = vmul.f32 %v5941_v50, %v10463_v3  ;;  %v4072_v48 = vadd.f32 -0.28449672, %v3928_v1  ;;  %7844 = vrcp.f32 %v2851_v2  ;;  %1832 = vst.msk [vmem:[#allocation2 + $0x108] sm:$0xff] %vm19_vm1, %v1687_v58  ;;  %v1692_v43 = vadd.f32 %v7405_v47, %v202_v5 }
 0x29b   :  { %v5584_v35 = vsub.f32 0.0, %v5296_v32  ;;  %v3422_v15 = vadd.f32 -1.4531521, %v3278_v36  ;;  %1904 = vst.msk [vmem:[#allocation2 + $0x348] sm:$0xff] %vm19_vm1, %v1759_v25  ;;  %v1764_v23 = vadd.f32 %v7477_v31, %v274_v34  ;;  %v4790_v27 = vmul.f32 %v4646_v41, %v10460_v22  ;;  %v2052_v44 = vld [vmem:[#allocation2 + $0x350] sm:$0xff] }
 0x29c   :  { %v7245_v59 = vpack.c.bf16 %v6085_v61, %v6085_v61  ;;  %v4216_v3 = vmul.f32 %v10466_v13, %v4072_v48  ;;  %v1690_v57 = vadd.f32 %v1223_v54, %v200_v37  ;;  %v10538_v40 = vadd.f32 %v10472_v49, %v2052_v44  ;;  %1837 = vst.msk [vmem:[#allocation2 + $0x130] sm:$0xff] %vm19_vm1, %v1692_v43 }
 0x29d   :  { %v5728_v16 = vsel %vm5440_vm7, %v5296_v32, %v5584_v35  ;;  %v3566_v51 = vmul.f32 %v10518_v26, %v3422_v15  ;;  %1909 = vst.msk [vmem:[#allocation2 + $0x370] sm:$0xff] %vm19_vm1, %v1764_v23  ;;  %v1762_v47 = vadd.f32 %v1511_v12, %v272_v29  ;;  %v1978_v63 = vld [vmem:[#allocation2 + $0x100] sm:$0xff]  ;;  %v1693_v62 = vadd.f32 %v7406_v11, %v203_v53 }
 0x29e   :  { %6806 = vst.msk [vmem:[%s12756_s3 + $0x190] sm:$0xf] %vm6705_vm5, %v7245_v59  ;;  %v5872_v22 = vadd.f32 1.0, %v5728_v16  ;;  %v4360_v31 = vadd.f32 0.2548296, %v4216_v3  ;;  %v1765_v45 = vadd.f32 %v7478_v9, %v275_v60  ;;  %v4579_v46 = vsub.f32 0.0, %v10502_v28 }
 0x29f   :  { %1835 = vst.msk [vmem:[#allocation2 + $0x120] sm:$0xff] %vm19_vm1, %v1690_v57  ;;  %v10547_v24 = vpop.eup %7838  ;;  %v3710_v20 = vadd.f32 1.4214138, %v3566_v51  ;;  %v10551_v8 = vmul.f32 0.70710677, %v10538_v40  ;;  %v10554_v17 = vadd.f32 %v10472_v49, %v1978_v63  ;;  %v2050_v18 = vld [vmem:[#allocation2 + $0x340] sm:$0xff] }
 0x2a0   :  { %1907 = vst.msk [vmem:[#allocation2 + $0x360] sm:$0xff] %vm19_vm1, %v1762_v47  ;;  %v6016_v52 = vmul.f32 %v5872_v22, %v10498_v30  ;;  %v4504_v39 = vmul.f32 %v10466_v13, %v4360_v31  ;;  %v3350_v6 = vmul.f32 1.0614054, %v10547_v24  ;;  %v5035_v4 = vmul.f32 1.442695, %v4790_v27  ;;  %1838 = vst.msk [vmem:[#allocation2 + $0x138] sm:$0xff] %vm19_vm1, %v1693_v62 }
 0x2a1   :  { %1910 = vst.msk [vmem:[#allocation2 + $0x378] sm:$0xff] %vm19_vm1, %v1765_v45  ;;  %v7841_v0 = vpop.eup %7840  ;;  %v3854_v38 = vmul.f32 %v10518_v26, %v3710_v20  ;;  %v2635_v33 = vand.u32 2147483647, %v10551_v8  ;;  %v10565_v54 = vadd.f32 %v10472_v49, %v2050_v18  ;;  %v10568_v13 = vmul.f32 0.70710677, %v10554_v17  ;;  %v1981_v22 = vld [vmem:[#allocation2 + $0x118] sm:$0xff] }
 0x2a2   :  { %v7176_v12 = vpack.c.bf16 %v6016_v52, %v6016_v52  ;;  %v5224_v50 = vmul.f32 %v7841_v0, %v4504_v39  ;;  %v3494_v30 = vadd.f32 -1.4531521, %v3350_v6  ;;  %v7843_v1 = vpop.eup %7842  ;;  %v4723_v2 = vmul.f32 %v4579_v46, %v10502_v28  ;;  %v2053_v62 = vld [vmem:[#allocation2 + $0x358] sm:$0xff] }
 0x2a3   :  { %v3998_v41 = vadd.f32 -0.28449672, %v3854_v38  ;;  %v2779_v5 = vmul.f32 0.3275911, %v2635_v33  ;;  %7846 = vpow2.f32 %v5035_v4  ;;  %v2561_v36 = vand.u32 2147483647, %v10568_v13 }
 0x2a4   :  { %6737 = vst.msk [vmem:[%s12756_s3 + $0x7c] sm:$0xf] %vm6705_vm5, %v7176_v12  ;;  %v5368_v34 = vsub.f32 1.0, %v5224_v50  ;;  %v3638_v32 = vmul.f32 %v10547_v24, %v3494_v30  ;;  %v10579_v37 = vmul.f32 0.70710677, %v10565_v54  ;;  %vm5512_vm8 = vcmp.ge.f32.partialorder %v10374_v14, 0.0 }
 0x2a5   :  { %v4142_v58 = vmul.f32 %v10518_v26, %v3998_v41  ;;  %v2923_v25 = vadd.f32 1.0, %v2779_v5  ;;  %v2705_v48 = vmul.f32 0.3275911, %v2561_v36  ;;  %v4901_v15 = vmul.f32 1.442695, %v4723_v2 }
 0x2a6   :  { %v5656_v28 = vsub.f32 0.0, %v5368_v34  ;;  %v3782_v61 = vadd.f32 1.4214138, %v3638_v32  ;;  %v10585_v43 = vand.u32 2147483647, %v10579_v37  ;;  %v2344_v9 = vmul.f32 0.5, %v10361_v19 }
 0x2a7   :  { %v10582_v29 = vpop.eup %7844  ;;  %v4286_v35 = vadd.f32 0.2548296, %v4142_v58  ;;  %7848 = vrcp.f32 %v2923_v25  ;;  %v2849_v60 = vadd.f32 1.0, %v2705_v48  ;;  %v2270_v16 = vmul.f32 0.5, %v10398_v10 }
 0x2a8   :  { %v5800_v23 = vsel %vm5512_vm8, %v5368_v34, %v5656_v28  ;;  %v3926_v53 = vmul.f32 %v10547_v24, %v3782_v61  ;;  %v3283_v11 = vmul.f32 1.0614054, %v10582_v29  ;;  %v2777_v44 = vmul.f32 0.3275911, %v10585_v43  ;;  %v1979_v34 = vld [vmem:[#allocation2 + $0x108] sm:$0xff] }
 0x2a9   :  { %v5944_v14 = vadd.f32 1.0, %v5800_v23  ;;  %v4430_v59 = vmul.f32 %v10518_v26, %v4286_v35  ;;  %7850 = vrcp.f32 %v2849_v60  ;;  %v4651_v47 = vsub.f32 0.0, %v2635_v33 }
 0x2aa   :  { %v4070_v3 = vadd.f32 -0.28449672, %v3926_v53  ;;  %v3427_v27 = vadd.f32 -1.4531521, %v3283_v11  ;;  %7852 = vpow2.f32 %v4901_v15  ;;  %v2921_v19 = vadd.f32 1.0, %v2777_v44 }
 0x2ab   :  { %v6088_v57 = vmul.f32 %v5944_v14, %v2344_v9  ;;  %v5150_v51 = vmul.f32 %v7843_v1, %v4430_v59  ;;  %vm5438_vm9 = vcmp.ge.f32.partialorder %v10416_v55, 0.0  ;;  %v4577_v20 = vsub.f32 0.0, %v2561_v36 }
 0x2ac   :  { %v4214_v31 = vmul.f32 %v10547_v24, %v4070_v3  ;;  %v3571_v63 = vmul.f32 %v10582_v29, %v3427_v27  ;;  %7854 = vrcp.f32 %v2921_v19  ;;  %v10597_v10 = vadd.f32 %v10472_v49, %v1981_v22 }
 0x2ad   :  { %v7248_v45 = vpack.c.bf16 %v6088_v57, %v6088_v57  ;;  %v5294_v26 = vsub.f32 1.0, %v5150_v51  ;;  %v2342_v39 = vmul.f32 0.5, %v10428_v7  ;;  %v4795_v6 = vmul.f32 %v4651_v47, %v2635_v33 }
 0x2ae   :  { %v4358_v46 = vadd.f32 0.2548296, %v4214_v31  ;;  %v3715_v18 = vadd.f32 1.4214138, %v3571_v63  ;;  %v10605_v4 = vadd.f32 %v10472_v49, %v2053_v62  ;;  %vm5510_vm10 = vcmp.ge.f32.partialorder %v10444_v21, 0.0 }
 0x2af   :  { %6809 = vst.msk [vmem:[%s12756_s3 + $0x19c] sm:$0xf] %vm6705_vm5, %v7248_v45  ;;  %v5582_v52 = vsub.f32 0.0, %v5294_v26  ;;  %v10611_v12 = vmul.f32 0.70710677, %v10597_v10  ;;  %v10616_v1 = vmul.f32 0.5, %v10475_v56  ;;  %v4721_v7 = vmul.f32 %v4577_v20, %v2561_v36 }
 0x2b0   :  { %v4502_v0 = vmul.f32 %v10547_v24, %v4358_v46  ;;  %v3859_v38 = vmul.f32 %v10582_v29, %v3715_v18  ;;  %v7847_v50 = vpop.eup %7846  ;;  %v10619_v33 = vmul.f32 0.70710677, %v10605_v4  ;;  %v10623_v32 = vmul.f32 0.5, %v10538_v40 }
 0x2b1   :  { %v5726_v30 = vsel %vm5438_vm9, %v5294_v26, %v5582_v52  ;;  %v2564_v5 = vand.u32 2147483647, %v10611_v12  ;;  %v5045_v58 = vmul.f32 1.442695, %v4795_v6  ;;  %v4649_v55 = vsub.f32 0.0, %v10585_v43 }
 0x2b2   :  { %v5870_v41 = vadd.f32 1.0, %v5726_v30  ;;  %v5222_v24 = vmul.f32 %v7847_v50, %v4502_v0  ;;  %v4003_v2 = vadd.f32 -0.28449672, %v3859_v38  ;;  %v2636_v25 = vand.u32 2147483647, %v10619_v33 }
 0x2b3   :  { %v2708_v48 = vmul.f32 0.3275911, %v2564_v5  ;;  %v4897_v15 = vmul.f32 1.442695, %v4721_v7  ;;  %v10632_v53 = vadd.f32 %v10472_v49, %v1979_v34  ;;  %vm5443_vm11 = vcmp.ge.f32.partialorder %v10489_v42, 0.0 }
 0x2b4   :  { %v10627_v56 = vpop.eup %7848  ;;  %v6014_v36 = vmul.f32 %v5870_v41, %v2270_v16  ;;  %v5366_v28 = vsub.f32 1.0, %v5222_v24  ;;  %v4147_v61 = vmul.f32 %v10582_v29, %v4003_v2  ;;  %v2780_v23 = vmul.f32 0.3275911, %v2636_v25 }
 0x2b5   :  { %v3355_v35 = vmul.f32 1.0614054, %v10627_v56  ;;  %v2852_v9 = vadd.f32 1.0, %v2708_v48  ;;  %7856 = vpow2.f32 %v5045_v58  ;;  %v4793_v3 = vmul.f32 %v4649_v55, %v10585_v43  ;;  %v2051_v43 = vld [vmem:[#allocation2 + $0x348] sm:$0xff] }
 0x2b6   :  { %v7174_v40 = vpack.c.bf16 %v6014_v36, %v6014_v36  ;;  %v5654_v11 = vsub.f32 0.0, %v5366_v28  ;;  %v4291_v60 = vadd.f32 0.2548296, %v4147_v61  ;;  %v10634_v14 = vpop.eup %7850  ;;  %v2924_v27 = vadd.f32 1.0, %v2780_v23 }
 0x2b7   :  { %v3499_v59 = vadd.f32 -1.4531521, %v3355_v35  ;;  %v3281_v16 = vmul.f32 1.0614054, %v10634_v14  ;;  %7858 = vrcp.f32 %v2852_v9  ;;  %v7853_v51 = vpop.eup %7852  ;;  %v4580_v31 = vsub.f32 0.0, %v2564_v5 }
 0x2b8   :  { %6735 = vst.msk [vmem:[%s12756_s3 + $0x74] sm:$0xf] %vm6705_vm5, %v7174_v40  ;;  %v5798_v44 = vsel %vm5510_vm10, %v5366_v28, %v5654_v11  ;;  %v4435_v57 = vmul.f32 %v10582_v29, %v4291_v60  ;;  %7860 = vrcp.f32 %v2924_v27  ;;  %v10648_v62 = vmul.f32 0.70710677, %v10632_v53 }
 0x2b9   :  { %v5942_v47 = vadd.f32 1.0, %v5798_v44  ;;  %v3643_v22 = vmul.f32 %v10627_v56, %v3499_v59  ;;  %v3425_v19 = vadd.f32 -1.4531521, %v3281_v16  ;;  %7862 = vpow2.f32 %v4897_v15  ;;  %v10650_v21 = vpop.eup %7854  ;;  %v1984_v15 = vld [vmem:[#allocation2 + $0x130] sm:$0xff] }
 0x2ba   :  { %v5155_v63 = vmul.f32 %v7853_v51, %v4435_v57  ;;  %v5041_v26 = vmul.f32 1.442695, %v4793_v3  ;;  %v4652_v20 = vsub.f32 0.0, %v2636_v25  ;;  %v3353_v52 = vmul.f32 1.0614054, %v10650_v21 }
 0x2bb   :  { %v6086_v45 = vmul.f32 %v5942_v47, %v2342_v39  ;;  %v3787_v29 = vadd.f32 1.4214138, %v3643_v22  ;;  %v3569_v18 = vmul.f32 %v10634_v14, %v3425_v19  ;;  %v10655_v6 = vadd.f32 %v10472_v49, %v2051_v43 }
 0x2bc   :  { %v5299_v46 = vsub.f32 1.0, %v5155_v63  ;;  %v4724_v50 = vmul.f32 %v4580_v31, %v2564_v5  ;;  %v2562_v30 = vand.u32 2147483647, %v10648_v62  ;;  %v10660_v39 = vmul.f32 0.5, %v10554_v17 }
 0x2bd   :  { %v7246_v0 = vpack.c.bf16 %v6086_v45, %v6086_v45  ;;  %v3931_v38 = vmul.f32 %v10627_v56, %v3787_v29  ;;  %v3713_v41 = vadd.f32 1.4214138, %v3569_v18  ;;  %v3497_v24 = vadd.f32 -1.4531521, %v3353_v52  ;;  %v2056_v29 = vld [vmem:[#allocation2 + $0x370] sm:$0xff] }
 0x2be   :  { %v5587_v7 = vsub.f32 0.0, %v5299_v46  ;;  %7864 = vpow2.f32 %v5041_v26  ;;  %v4796_v34 = vmul.f32 %v4652_v20, %v2636_v25  ;;  %v2706_v58 = vmul.f32 0.3275911, %v2562_v30 }
 0x2bf   :  { %6807 = vst.msk [vmem:[%s12756_s3 + $0x194] sm:$0xf] %vm6705_vm5, %v7246_v0  ;;  %v4075_v2 = vadd.f32 -0.28449672, %v3931_v38  ;;  %v3857_v55 = vmul.f32 %v10634_v14, %v3713_v41  ;;  %v3641_v36 = vmul.f32 %v10650_v21, %v3497_v24  ;;  %v10671_v17 = vmul.f32 0.70710677, %v10655_v6 }
 0x2c0   :  { %v5731_v5 = vsel %vm5443_vm11, %v5299_v46, %v5587_v7  ;;  %v4903_v48 = vmul.f32 1.442695, %v4724_v50  ;;  %v2850_v35 = vadd.f32 1.0, %v2706_v58  ;;  %v5047_v60 = vmul.f32 1.442695, %v4796_v34 }
 0x2c1   :  { %v5875_v28 = vadd.f32 1.0, %v5731_v5  ;;  %v4219_v61 = vmul.f32 %v10627_v56, %v4075_v2  ;;  %v4001_v23 = vadd.f32 -0.28449672, %v3857_v55  ;;  %v3785_v40 = vadd.f32 1.4214138, %v3641_v36 }
 0x2c2   :  { %v2634_v25 = vand.u32 2147483647, %v10671_v17  ;;  %7866 = vrcp.f32 %v2850_v35  ;;  %v7857_v9 = vpop.eup %7856  ;;  %vm5515_vm12 = vcmp.ge.f32.partialorder %v10551_v8, 0.0  ;;  %v4578_v27 = vsub.f32 0.0, %v2562_v30 }
 0x2c3   :  { %v6019_v42 = vmul.f32 %v5875_v28, %v10616_v1  ;;  %v4363_v11 = vadd.f32 0.2548296, %v4219_v61  ;;  %v4145_v59 = vmul.f32 %v10634_v14, %v4001_v23  ;;  %v3929_v3 = vmul.f32 %v10650_v21, %v3785_v40 }
 0x2c4   :  { %v2778_v44 = vmul.f32 0.3275911, %v2634_v25  ;;  %v10679_v57 = vpop.eup %7858  ;;  %v10683_v47 = vmul.f32 0.5, %v10565_v54  ;;  %v10686_v1 = vadd.f32 %v10472_v49, %v1984_v15  ;;  %7868 = vpow2.f32 %v4903_v48 }
 0x2c5   :  { %v7179_v16 = vpack.c.bf16 %v6019_v42, %v6019_v42  ;;  %v4507_v51 = vmul.f32 %v10627_v56, %v4363_v11  ;;  %v10688_v22 = vpop.eup %7860  ;;  %v4289_v31 = vadd.f32 0.2548296, %v4145_v59  ;;  %v4073_v43 = vadd.f32 -0.28449672, %v3929_v3 }
 0x2c6   :  { %v3284_v63 = vmul.f32 1.0614054, %v10679_v57  ;;  %v7863_v19 = vpop.eup %7862  ;;  %vm5441_vm13 = vcmp.ge.f32.partialorder %v10568_v13, 0.0  ;;  %v3356_v54 = vmul.f32 1.0614054, %v10688_v22  ;;  %7870 = vpow2.f32 %v5047_v60 }
 0x2c7   :  { %6740 = vst.msk [vmem:[%s12756_s3 + $0x88] sm:$0xf] %vm6705_vm5, %v7179_v16  ;;  %v5227_v56 = vmul.f32 %v7857_v9, %v4507_v51  ;;  %v2922_v45 = vadd.f32 1.0, %v2778_v44  ;;  %v4433_v26 = vmul.f32 %v10634_v14, %v4289_v31  ;;  %v4217_v20 = vmul.f32 %v10650_v21, %v4073_v43 }
 0x2c8   :  { %v3428_v46 = vadd.f32 -1.4531521, %v3284_v63  ;;  %v4722_v18 = vmul.f32 %v4578_v27, %v2562_v30  ;;  %v3500_v0 = vadd.f32 -1.4531521, %v3356_v54  ;;  %v10700_v38 = vmul.f32 0.70710677, %v10686_v1 }
 0x2c9   :  { %v5371_v52 = vsub.f32 1.0, %v5227_v56  ;;  %7872 = vrcp.f32 %v2922_v45  ;;  %v5153_v50 = vmul.f32 %v7863_v19, %v4433_v26  ;;  %v4361_v7 = vadd.f32 0.2548296, %v4217_v20  ;;  %v1982_v45 = vld [vmem:[#allocation2 + $0x120] sm:$0xff] }
 0x2ca   :  { %v3572_v41 = vmul.f32 %v10679_v57, %v3428_v46  ;;  %v10704_v24 = vadd.f32 %v10472_v49, %v2056_v29  ;;  %v3644_v14 = vmul.f32 %v10688_v22, %v3500_v0  ;;  %v4650_v34 = vsub.f32 0.0, %v2634_v25 }
 0x2cb   :  { %v5659_v2 = vsub.f32 0.0, %v5371_v52  ;;  %v2567_v58 = vand.u32 2147483647, %v10700_v38  ;;  %v7865_v30 = vpop.eup %7864  ;;  %v5297_v5 = vsub.f32 1.0, %v5153_v50  ;;  %v4505_v55 = vmul.f32 %v10650_v21, %v4361_v7 }
 0x2cc   :  { %vm5513_vm14 = vcmp.ge.f32.partialorder %v10579_v37, 0.0  ;;  %v3716_v36 = vadd.f32 1.4214138, %v3572_v41  ;;  %v3788_v61 = vadd.f32 1.4214138, %v3644_v14  ;;  %v4794_v60 = vmul.f32 %v4650_v34, %v2634_v25 }
 0x2cd   :  { %v5803_v28 = vsel %vm5515_vm12, %v5371_v52, %v5659_v2  ;;  %v4899_v48 = vmul.f32 1.442695, %v4722_v18  ;;  %v2711_v35 = vmul.f32 0.3275911, %v2567_v58  ;;  %v5585_v23 = vsub.f32 0.0, %v5297_v5 }
 0x2ce   :  { %v5947_v15 = vadd.f32 1.0, %v5803_v28  ;;  %v5225_v40 = vmul.f32 %v7865_v30, %v4505_v55  ;;  %v3860_v42 = vmul.f32 %v10679_v57, %v3716_v36  ;;  %v3932_v11 = vmul.f32 %v10688_v22, %v3788_v61  ;;  %v2054_v28 = vld [vmem:[#allocation2 + $0x360] sm:$0xff] }
 0x2cf   :  { %v2855_v9 = vadd.f32 1.0, %v2711_v35  ;;  %v10715_v21 = vmul.f32 0.70710677, %v10704_v24  ;;  %v10717_v59 = vpop.eup %7866  ;;  %v5729_v3 = vsel %vm5441_vm13, %v5297_v5, %v5585_v23  ;;  %v5043_v46 = vmul.f32 1.442695, %v4794_v60 }
 0x2d0   :  { %v6091_v8 = vmul.f32 %v5947_v15, %v10623_v32  ;;  %v5369_v27 = vsub.f32 1.0, %v5225_v40  ;;  %v4004_v44 = vadd.f32 -0.28449672, %v3860_v42  ;;  %v5873_v16 = vadd.f32 1.0, %v5729_v3 }
 0x2d1   :  { %v4076_v51 = vadd.f32 -0.28449672, %v3932_v11  ;;  %v3282_v31 = vmul.f32 1.0614054, %v10717_v59  ;;  %7874 = vrcp.f32 %v2855_v9  ;;  %v7869_v19 = vpop.eup %7868  ;;  %v10727_v13 = vand.u32 2147483647, %v10715_v21 }
 0x2d2   :  { %v7251_v43 = vpack.c.bf16 %v6091_v8, %v6091_v8  ;;  %v5657_v25 = vsub.f32 0.0, %v5369_v27  ;;  %v4148_v63 = vmul.f32 %v10679_v57, %v4004_v44  ;;  %7876 = vpow2.f32 %v4899_v48 }
 0x2d3   :  { %v6017_v56 = vmul.f32 %v5873_v16, %v10660_v39  ;;  %v4220_v32 = vmul.f32 %v10688_v22, %v4076_v51  ;;  %v3426_v54 = vadd.f32 -1.4531521, %v3282_v31  ;;  %v7871_v29 = vpop.eup %7870  ;;  %v4583_v18 = vsub.f32 0.0, %v2567_v58 }
 0x2d4   :  { %6812 = vst.msk [vmem:[%s12756_s3 + $0x1a8] sm:$0xf] %vm6705_vm5, %v7251_v43  ;;  %v5801_v26 = vsel %vm5513_vm14, %v5369_v27, %v5657_v25  ;;  %v4292_v20 = vadd.f32 0.2548296, %v4148_v63  ;;  %v2276_v41 = vmul.f32 0.5, %v10597_v10  ;;  %v10742_v34 = vadd.f32 %v10472_v49, %v1982_v45 }
 0x2d5   :  { %v7177_v39 = vpack.c.bf16 %v6017_v56, %v6017_v56  ;;  %v5945_v52 = vadd.f32 1.0, %v5801_v26  ;;  %v4364_v0 = vadd.f32 0.2548296, %v4220_v32  ;;  %v3570_v50 = vmul.f32 %v10717_v59, %v3426_v54 }
 0x2d6   :  { %v10736_v7 = vpop.eup %7872  ;;  %v4436_v2 = vmul.f32 %v10679_v57, %v4292_v20  ;;  %v2783_v14 = vmul.f32 0.3275911, %v10727_v13  ;;  %7878 = vpow2.f32 %v5043_v46  ;;  %v4727_v57 = vmul.f32 %v4583_v18, %v2567_v58 }
 0x2d7   :  { %6738 = vst.msk [vmem:[%s12756_s3 + $0x80] sm:$0xf] %vm6705_vm5, %v7177_v39  ;;  %v6089_v37 = vmul.f32 %v5945_v52, %v10683_v47  ;;  %v4508_v30 = vmul.f32 %v10688_v22, %v4364_v0  ;;  %v3714_v5 = vadd.f32 1.4214138, %v3570_v50  ;;  %v3354_v55 = vmul.f32 1.0614054, %v10736_v7 }
 0x2d8   :  { %v5156_v10 = vmul.f32 %v7869_v19, %v4436_v2  ;;  %v2927_v36 = vadd.f32 1.0, %v2783_v14  ;;  %v2348_v40 = vmul.f32 0.5, %v10605_v4  ;;  %v10754_v47 = vmul.f32 0.70710677, %v10742_v34 }
 0x2d9   :  { %v7249_v61 = vpack.c.bf16 %v6089_v37, %v6089_v37  ;;  %v5228_v48 = vmul.f32 %v7871_v29, %v4508_v30  ;;  %v3858_v35 = vmul.f32 %v10717_v59, %v3714_v5  ;;  %v3498_v15 = vadd.f32 -1.4531521, %v3354_v55  ;;  %v1985_v37 = vld [vmem:[#allocation2 + $0x138] sm:$0xff]  ;;  %v201_v55 = vld [vmem:[#allocation2 + $0x128] sm:$0xff] }
 0x2da   :  { %v5300_v23 = vsub.f32 1.0, %v5156_v10  ;;  %7880 = vrcp.f32 %v2927_v36  ;;  %v10762_v11 = vadd.f32 %v10472_v49, %v2054_v28  ;;  %vm5444_vm15 = vcmp.ge.f32.partialorder %v10611_v12, 0.0  ;;  %v2057_v30 = vld [vmem:[#allocation2 + $0x378] sm:$0xff]  ;;  %v1226_v10 = vpop.f32.mrf.mxu0 }
 0x2db   :  { %6810 = vst.msk [vmem:[%s12756_s3 + $0x1a0] sm:$0xf] %vm6705_vm5, %v7249_v61  ;;  %v5372_v22 = vsub.f32 1.0, %v5228_v48  ;;  %v4002_v58 = vadd.f32 -0.28449672, %v3858_v35  ;;  %v3642_v42 = vmul.f32 %v10736_v7, %v3498_v15  ;;  %vm5516_vm0 = vcmp.ge.f32.partialorder %v10619_v33, 0.0 }
 0x2dc   :  { %v5588_v60 = vsub.f32 0.0, %v5300_v23  ;;  %v2565_v4 = vand.u32 2147483647, %v10754_v47  ;;  %v4909_v27 = vmul.f32 1.442695, %v4727_v57  ;;  %v4655_v51 = vsub.f32 0.0, %v10727_v13 }
 0x2dd   :  { %v5660_v9 = vsub.f32 0.0, %v5372_v22  ;;  %v4146_v8 = vmul.f32 %v10717_v59, %v4002_v58  ;;  %v3786_v3 = vadd.f32 1.4214138, %v3642_v42  ;;  %v10772_v43 = vmul.f32 0.70710677, %v10762_v11 }
 0x2de   :  { %v10768_v44 = vpop.eup %7874  ;;  %v5732_v16 = vsel %vm5444_vm15, %v5300_v23, %v5588_v60  ;;  %v2709_v31 = vmul.f32 0.3275911, %v2565_v4  ;;  %v4581_v45 = vsub.f32 0.0, %v2565_v4  ;;  %v4799_v52 = vmul.f32 %v4655_v51, %v10727_v13 }
 0x2df   :  { %v7877_v12 = vpop.eup %7876  ;;  %v5876_v25 = vadd.f32 1.0, %v5732_v16  ;;  %v5804_v63 = vsel %vm5516_vm0, %v5372_v22, %v5660_v9  ;;  %v4290_v33 = vadd.f32 0.2548296, %v4146_v8  ;;  %v3930_v19 = vmul.f32 %v10736_v7, %v3786_v3  ;;  %v273_v16 = vld [vmem:[#allocation2 + $0x368] sm:$0xff] }
 0x2e0   :  { %v5948_v56 = vadd.f32 1.0, %v5804_v63  ;;  %v3287_v32 = vmul.f32 1.0614054, %v10768_v44  ;;  %v2853_v54 = vadd.f32 1.0, %v2709_v31  ;;  %v10778_v46 = vand.u32 2147483647, %v10772_v43 }
 0x2e1   :  { %v6020_v29 = vmul.f32 %v5876_v25, %v2276_v41  ;;  %v4434_v26 = vmul.f32 %v10717_v59, %v4290_v33  ;;  %v4074_v20 = vadd.f32 -0.28449672, %v3930_v19  ;;  %v2274_v59 = vmul.f32 0.5, %v10632_v53 }
 0x2e2   :  { %v6092_v18 = vmul.f32 %v5948_v56, %v2348_v40  ;;  %v3431_v39 = vadd.f32 -1.4531521, %v3287_v32  ;;  %7882 = vrcp.f32 %v2853_v54  ;;  %v2781_v14 = vmul.f32 0.3275911, %v10778_v46 }
 0x2e3   :  { %v7180_v0 = vpack.c.bf16 %v6020_v29, %v6020_v29  ;;  %v5154_v50 = vmul.f32 %v7877_v12, %v4434_v26  ;;  %v4218_v2 = vmul.f32 %v10736_v7, %v4074_v20  ;;  %7884 = vpow2.f32 %v4909_v27  ;;  %v7879_v57 = vpop.eup %7878 }
 0x2e4   :  { %v7252_v41 = vpack.c.bf16 %v6092_v18, %v6092_v18  ;;  %v3575_v5 = vmul.f32 %v10768_v44, %v3431_v39  ;;  %v4725_v28 = vmul.f32 %v4581_v45, %v2565_v4  ;;  %v2925_v61 = vadd.f32 1.0, %v2781_v14 }
 0x2e5   :  { %6741 = vst.msk [vmem:[%s12756_s3 + $0x8c] sm:$0xf] %vm6705_vm5, %v7180_v0  ;;  %v5298_v13 = vsub.f32 1.0, %v5154_v50  ;;  %v4362_v36 = vadd.f32 0.2548296, %v4218_v2  ;;  %v10794_v35 = vadd.f32 %v10472_v49, %v1985_v37  ;;  %v10797_v15 = vadd.f32 %v10472_v49, %v2057_v30 }
 0x2e6   :  { %6813 = vst.msk [vmem:[%s12756_s3 + $0x1ac] sm:$0xf] %vm6705_vm5, %v7252_v41  ;;  %v3719_v53 = vadd.f32 1.4214138, %v3575_v5  ;;  %v5053_v48 = vmul.f32 1.442695, %v4799_v52  ;;  %7886 = vrcp.f32 %v2925_v61  ;;  %v1691_v58 = vadd.f32 %v1226_v10, %v201_v55  ;;  %v7409_v5 = vpop.f32.mrf.mxu0 }
 0x2e7   :  { %v10799_v23 = vpop.eup %7880  ;;  %v5586_v40 = vsub.f32 0.0, %v5298_v13  ;;  %v4506_v22 = vmul.f32 %v10736_v7, %v4362_v36  ;;  %vm5442_vm2 = vcmp.ge.f32.partialorder %v10648_v62, 0.0  ;;  %v2346_v42 = vmul.f32 0.5, %v10655_v6  ;;  %v1514_v7 = vpop.f32.mrf.mxu1 }
 0x2e8   :  { %v3863_v60 = vmul.f32 %v10768_v44, %v3719_v53  ;;  %v3359_v4 = vmul.f32 1.0614054, %v10799_v23  ;;  %v4905_v3 = vmul.f32 1.442695, %v4725_v28  ;;  %v10807_v27 = vmul.f32 0.70710677, %v10794_v35 }
 0x2e9   :  { %v5730_v9 = vsel %vm5442_vm2, %v5298_v13, %v5586_v40  ;;  %v5226_v8 = vmul.f32 %v7879_v57, %v4506_v22  ;;  %1836 = vst.msk [vmem:[#allocation2 + $0x128] sm:$0xff] %vm19_vm1, %v1691_v58  ;;  %7888 = vpow2.f32 %v5053_v48  ;;  %v4653_v6 = vsub.f32 0.0, %v10778_v46 }
 0x2ea   :  { %v5874_v51 = vadd.f32 1.0, %v5730_v9  ;;  %v4007_v31 = vadd.f32 -0.28449672, %v3863_v60  ;;  %v3503_v12 = vadd.f32 -1.4531521, %v3359_v4  ;;  %v1763_v32 = vadd.f32 %v1514_v7, %v273_v16  ;;  %v278_v4 = vld [vmem:[#allocation2 + $0x390] sm:$0xff] }
 0x2eb   :  { %v5370_v62 = vsub.f32 1.0, %v5226_v8  ;;  %v10812_v25 = vand.u32 2147483647, %v10807_v27  ;;  %v10815_v63 = vmul.f32 0.70710677, %v10797_v15  ;;  %vm5514_vm3 = vcmp.ge.f32.partialorder %v10671_v17, 0.0 }
 0x2ec   :  { %v6018_v33 = vmul.f32 %v5874_v51, %v2274_v59  ;;  %v4151_v19 = vmul.f32 %v10768_v44, %v4007_v31  ;;  %v3647_v56 = vmul.f32 %v10799_v23, %v3503_v12  ;;  %7890 = vpow2.f32 %v4905_v3  ;;  %1908 = vst.msk [vmem:[#allocation2 + $0x368] sm:$0xff] %vm19_vm1, %v1763_v32  ;;  %v206_v59 = vld [vmem:[#allocation2 + $0x150] sm:$0xff] }
 0x2ed   :  { %v5658_v54 = vsub.f32 0.0, %v5370_v62  ;;  %v2712_v45 = vmul.f32 0.3275911, %v10812_v25  ;;  %v10822_v29 = vand.u32 2147483647, %v10815_v63  ;;  %v4797_v0 = vmul.f32 %v4653_v6, %v10778_v46 }
 0x2ee   :  { %v7178_v26 = vpack.c.bf16 %v6018_v33, %v6018_v33  ;;  %v4295_v20 = vadd.f32 0.2548296, %v4151_v19  ;;  %v3791_v18 = vadd.f32 1.4214138, %v3647_v56  ;;  %v2279_v46 = vmul.f32 0.5, %v10686_v1  ;;  %v204_v33 = vld [vmem:[#allocation2 + $0x140] sm:$0xff]  ;;  %v1239_v19 = vpop.f32.mrf.mxu0 }
 0x2ef   :  { %v10825_v39 = vpop.eup %7882  ;;  %v5802_v52 = vsel %vm5514_vm3, %v5370_v62, %v5658_v54  ;;  %v2856_v50 = vadd.f32 1.0, %v2712_v45  ;;  %v2784_v17 = vmul.f32 0.3275911, %v10822_v29  ;;  %vm5447_vm4 = vcmp.ge.f32.partialorder %v10700_v38, 0.0 }
 0x2f0   :  { %6739 = vst.msk [vmem:[%s12756_s3 + $0x84] sm:$0xf] %vm6705_vm5, %v7178_v26  ;;  %v5946_v2 = vadd.f32 1.0, %v5802_v52  ;;  %v4439_v14 = vmul.f32 %v10768_v44, %v4295_v20  ;;  %v3935_v37 = vmul.f32 %v10799_v23, %v3791_v18  ;;  %v3285_v30 = vmul.f32 1.0614054, %v10825_v39  ;;  %v1983_v41 = vld [vmem:[#allocation2 + $0x128] sm:$0xff]  ;;  %v7885_v55 = vpop.eup %7884 }
 0x2f1   :  { %7892 = vrcp.f32 %v2856_v50  ;;  %v2928_v10 = vadd.f32 1.0, %v2784_v17  ;;  %v5049_v61 = vmul.f32 1.442695, %v4797_v0  ;;  %v4584_v44 = vsub.f32 0.0, %v10812_v25 }
 0x2f2   :  { %v6090_v57 = vmul.f32 %v5946_v2, %v2346_v42  ;;  %v5159_v13 = vmul.f32 %v7885_v55, %v4439_v14  ;;  %v4079_v36 = vadd.f32 -0.28449672, %v3935_v37  ;;  %v3429_v28 = vadd.f32 -1.4531521, %v3285_v30  ;;  %v7481_v42 = vpop.f32.mrf.mxu1 }
 0x2f3   :  { %v10840_v53 = vadd.f32 %v10472_v49, %v1983_v41  ;;  %v1696_v48 = vadd.f32 %v7409_v5, %v206_v59  ;;  %v10842_v40 = vpop.eup %7886  ;;  %v10847_v9 = vmul.f32 0.5, %v10704_v24  ;;  %v10850_v8 = vmul.f32 0.5, %v10742_v34  ;;  %v2055_v3 = vld [vmem:[#allocation2 + $0x368] sm:$0xff]  ;;  %v10861_v24 = vld [vmem:[%s12755_s2] ss:$0 sm:$0xff] }
 0x2f4   :  { %v7250_v22 = vpack.c.bf16 %v6090_v57, %v6090_v57  ;;  %v5303_v58 = vsub.f32 1.0, %v5159_v13  ;;  %v4223_v1 = vmul.f32 %v10799_v23, %v4079_v36  ;;  %v3573_v60 = vmul.f32 %v10825_v39, %v3429_v28 }
 0x2f5   :  { %v3357_v49 = vmul.f32 1.0614054, %v10842_v40  ;;  %7894 = vrcp.f32 %v2928_v10  ;;  %1841 = vst.msk [vmem:[#allocation2 + $0x150] sm:$0xff] %vm19_vm1, %v1696_v48  ;;  %v10864_v34 = vadd.f32 %v10861_v24, %v2055_v3  ;;  %vm5519_vm6 = vcmp.ge.f32.partialorder %v10715_v21, 0.0  ;;  %v10917_v21 = vpop.f32.mrf.mxu1 }
 0x2f6   :  { %6811 = vst.msk [vmem:[%s12756_s3 + $0x1a4] sm:$0xf] %vm6705_vm5, %v7250_v22  ;;  %v5591_v16 = vsub.f32 0.0, %v5303_v58  ;;  %v4367_v7 = vadd.f32 0.2548296, %v4223_v1  ;;  %v7889_v31 = vpop.eup %7888  ;;  %7896 = vpow2.f32 %v5049_v61  ;;  %v1768_v6 = vadd.f32 %v7481_v42, %v278_v4 }
 0x2f7   :  { %v3717_v51 = vadd.f32 1.4214138, %v3573_v60  ;;  %v3501_v12 = vadd.f32 -1.4531521, %v3357_v49  ;;  %v10868_v62 = vmul.f32 0.70710677, %v10840_v53  ;;  %v4728_v45 = vmul.f32 %v4584_v44, %v10812_v25 }
 0x2f8   :  { %v5735_v56 = vsel %vm5447_vm4, %v5303_v58, %v5591_v16  ;;  %v4511_v32 = vmul.f32 %v10799_v23, %v4367_v7  ;;  %v4656_v18 = vsub.f32 0.0, %v10822_v29  ;;  %1913 = vst.msk [vmem:[#allocation2 + $0x390] sm:$0xff] %vm19_vm1, %v1768_v6  ;;  %v10882_v38 = vmul.f32 0.70710677, %v10864_v34 }
 0x2f9   :  { %v3861_v54 = vmul.f32 %v10825_v39, %v3717_v51  ;;  %v5879_v26 = vadd.f32 1.0, %v5735_v56  ;;  %v3645_v20 = vmul.f32 %v10842_v40, %v3501_v12  ;;  %v10878_v52 = vand.u32 2147483647, %v10868_v62  ;;  %v7891_v17 = vpop.eup %7890 }
 0x2fa   :  { %v5231_v0 = vmul.f32 %v7889_v31, %v4511_v32  ;;  %v1694_v23 = vadd.f32 %v1239_v19, %v204_v33  ;;  %v10885_v25 = vmul.f32 0.5, %v10762_v11  ;;  %v4911_v59 = vmul.f32 1.442695, %v4728_v45  ;;  %v10922_v33 = vpop.f32.mrf.mxu0 }
 0x2fb   :  { %v4005_v50 = vadd.f32 -0.28449672, %v3861_v54  ;;  %v6023_v2 = vmul.f32 %v5879_v26, %v2279_v46  ;;  %v3789_v14 = vadd.f32 1.4214138, %v3645_v20  ;;  %v2710_v37 = vmul.f32 0.3275911, %v10878_v52 }
 0x2fc   :  { %v5375_v30 = vsub.f32 1.0, %v5231_v0  ;;  %v2638_v5 = vand.u32 2147483647, %v10882_v38  ;;  %1839 = vst.msk [vmem:[#allocation2 + $0x140] sm:$0xff] %vm19_vm1, %v1694_v23  ;;  %v4800_v57 = vmul.f32 %v4656_v18, %v10822_v29  ;;  %v10896_v28 = vmul.f32 0.5, %v10794_v35  ;;  %v1988_v22 = vld [vmem:[#allocation2 + $0x150] sm:$0xff] }
 0x2fd   :  { %v4149_v41 = vmul.f32 %v10825_v39, %v4005_v50  ;;  %v7183_v55 = vpack.c.bf16 %v6023_v2, %v6023_v2  ;;  %v3933_v10 = vmul.f32 %v10842_v40, %v3789_v14  ;;  %v2854_v46 = vadd.f32 1.0, %v2710_v37  ;;  %v10937_v2 = vpop.f32.mrf.mxu1 }
 0x2fe   :  { %v10893_v13 = vpop.eup %7892  ;;  %v5663_v11 = vsub.f32 0.0, %v5375_v30  ;;  %v2782_v61 = vmul.f32 0.3275911, %v2638_v5  ;;  %vm5445_vm7 = vcmp.ge.f32.partialorder %v10754_v47, 0.0  ;;  %v10905_v29 = vmul.f32 0.5, %v10797_v15 }
 0x2ff   :  { %v4293_v36 = vadd.f32 0.2548296, %v4149_v41  ;;  %6744 = vst.msk [vmem:[%s12756_s3 + $0x98] sm:$0xf] %vm6705_vm5, %v7183_v55  ;;  %v4077_v44 = vadd.f32 -0.28449672, %v3933_v10  ;;  %7898 = vrcp.f32 %v2854_v46  ;;  %v10915_v7 = vadd.f32 %v10861_v24, %v1988_v22  ;;  %v10955_v22 = vpop.f32.mrf.mxu1 }
 0x300   :  { %v3288_v48 = vmul.f32 1.0614054, %v10893_v13  ;;  %v5807_v35 = vsel %vm5519_vm6, %v5375_v30, %v5663_v11  ;;  %7900 = vpow2.f32 %v4911_v59  ;;  %v2926_v1 = vadd.f32 1.0, %v2782_v61  ;;  %v2060_v6 = vld [vmem:[#allocation2 + $0x390] sm:$0xff] }
 0x301   :  { %v4437_v58 = vmul.f32 %v10825_v39, %v4293_v36  ;;  %v5951_v60 = vadd.f32 1.0, %v5807_v35  ;;  %v4221_v4 = vmul.f32 %v10842_v40, %v4077_v44  ;;  %v5055_v49 = vmul.f32 1.442695, %v4800_v57 }
 0x302   :  { %v3432_v42 = vadd.f32 -1.4531521, %v3288_v48  ;;  %v10911_v3 = vpop.eup %7894  ;;  %v4582_v15 = vsub.f32 0.0, %v10878_v52  ;;  %7902 = vrcp.f32 %v2926_v1  ;;  %vm5517_vm8 = vcmp.ge.f32.partialorder %v10772_v43, 0.0 }
 0x303   :  { %v5157_v16 = vmul.f32 %v7891_v17, %v4437_v58  ;;  %v6095_v39 = vmul.f32 %v5951_v60, %v10847_v9  ;;  %v4365_v51 = vadd.f32 0.2548296, %v4221_v4  ;;  %v3360_v12 = vmul.f32 1.0614054, %v10911_v3  ;;  %v7897_v19 = vpop.eup %7896  ;;  %v1986_v37 = vld [vmem:[#allocation2 + $0x140] sm:$0xff] }
 0x304   :  { %v3576_v31 = vmul.f32 %v10893_v13, %v3432_v42  ;;  %v10926_v32 = vmul.f32 0.5, %v10840_v53  ;;  %v4654_v54 = vsub.f32 0.0, %v2638_v5  ;;  %v10929_v45 = vmul.f32 0.70710677, %v10915_v7 }
 0x305   :  { %v5301_v56 = vsub.f32 1.0, %v5157_v16  ;;  %v7255_v9 = vpack.c.bf16 %v6095_v39, %v6095_v39  ;;  %v4509_v26 = vmul.f32 %v10842_v40, %v4365_v51  ;;  %v3504_v18 = vadd.f32 -1.4531521, %v3360_v12 }
 0x306   :  { %v3720_v20 = vadd.f32 1.4214138, %v3576_v31  ;;  %v4726_v50 = vmul.f32 %v4582_v15, %v10878_v52  ;;  %v2571_v23 = vand.u32 2147483647, %v10929_v45  ;;  %v10935_v17 = vadd.f32 %v10861_v24, %v2060_v6  ;;  %v10945_v52 = vpop.f32.mrf.mxu0 }
 0x307   :  { %v5589_v0 = vsub.f32 0.0, %v5301_v56  ;;  %6816 = vst.msk [vmem:[%s12756_s3 + $0x1b8] sm:$0xf] %vm6705_vm5, %v7255_v9  ;;  %v5229_v53 = vmul.f32 %v7897_v19, %v4509_v26  ;;  %v3648_v14 = vmul.f32 %v10911_v3, %v3504_v18  ;;  %7904 = vpow2.f32 %v5055_v49  ;;  %v10969_v19 = vpop.f32.mrf.mxu1 }
 0x308   :  { %v3864_v40 = vmul.f32 %v10893_v13, %v3720_v20  ;;  %v4798_v41 = vmul.f32 %v4654_v54, %v2638_v5  ;;  %v2715_v59 = vmul.f32 0.3275911, %v2571_v23  ;;  %v4587_v55 = vsub.f32 0.0, %v2571_v23  ;;  %v10960_v1 = vpop.f32.mrf.mxu0 }
 0x309   :  { %v5733_v30 = vsel %vm5445_vm7, %v5301_v56, %v5589_v0  ;;  %v5373_v57 = vsub.f32 1.0, %v5229_v53  ;;  %v3792_v11 = vadd.f32 1.4214138, %v3648_v14  ;;  %v4907_v36 = vmul.f32 1.442695, %v4726_v50 }
 0x30a   :  { %v5877_v10 = vadd.f32 1.0, %v5733_v30  ;;  %v4008_v46 = vadd.f32 -0.28449672, %v3864_v40  ;;  %v2859_v61 = vadd.f32 1.0, %v2715_v59  ;;  %v10950_v44 = vmul.f32 0.70710677, %v10935_v17  ;;  %v10982_v20 = vpop.f32.mrf.mxu0  ;;  %v10989_v59 = vpop.f32.mrf.mxu1 }
 0x30b   :  { %v10953_v48 = vadd.f32 %v10861_v24, %v1986_v37  ;;  %v5661_v35 = vsub.f32 0.0, %v5373_v57  ;;  %v3936_v58 = vmul.f32 %v10911_v3, %v3792_v11  ;;  %v5051_v4 = vmul.f32 1.442695, %v4798_v41 }
 0x30c   :  { %v6021_v47 = vmul.f32 %v5877_v10, %v10850_v8  ;;  %v4152_v5 = vmul.f32 %v10893_v13, %v4008_v46  ;;  %v10962_v60 = vpop.eup %7898  ;;  %7906 = vrcp.f32 %v2859_v61  ;;  %v4731_v42 = vmul.f32 %v4587_v55, %v2571_v23  ;;  %v276_v46 = vld [vmem:[#allocation2 + $0x380] sm:$0xff]  ;;  %v10995_v11 = vpop.f32.mrf.mxu0 }
 0x30d   :  { %v2643_v49 = vand.u32 2147483647, %v10950_v44  ;;  %v7901_v16 = vpop.eup %7900  ;;  %v5805_v39 = vsel %vm5517_vm8, %v5373_v57, %v5661_v35  ;;  %v4080_v51 = vadd.f32 -0.28449672, %v3936_v58  ;;  %vm5448_vm9 = vcmp.ge.f32.partialorder %v10807_v27, 0.0 }
 0x30e   :  { %v7181_v15 = vpack.c.bf16 %v6021_v47, %v6021_v47  ;;  %v4296_v8 = vadd.f32 0.2548296, %v4152_v5  ;;  %v5949_v31 = vadd.f32 1.0, %v5805_v39  ;;  %v3286_v12 = vmul.f32 1.0614054, %v10962_v60  ;;  %v207_v5 = vld [vmem:[#allocation2 + $0x158] sm:$0xff] }
 0x30f   :  { %7908 = vpow2.f32 %v4907_v36  ;;  %v2787_v6 = vmul.f32 0.3275911, %v2643_v49  ;;  %v10971_v56 = vpop.eup %7902  ;;  %v4224_v54 = vmul.f32 %v10911_v3, %v4080_v51  ;;  %v4659_v9 = vsub.f32 0.0, %v2643_v49  ;;  %v205_v51 = vld [vmem:[#allocation2 + $0x148] sm:$0xff] }
 0x310   :  { %6742 = vst.msk [vmem:[%s12756_s3 + $0x90] sm:$0xf] %vm6705_vm5, %v7181_v15  ;;  %v4440_v43 = vmul.f32 %v10893_v13, %v4296_v8  ;;  %v10980_v26 = vmul.f32 0.70710677, %v10953_v48  ;;  %v6093_v18 = vmul.f32 %v5949_v31, %v10885_v25  ;;  %v3430_v0 = vadd.f32 -1.4531521, %v3286_v12  ;;  %v7486_v12 = vpop.f32.mrf.mxu1 }
 0x311   :  { %v3358_v50 = vmul.f32 1.0614054, %v10971_v56  ;;  %v2931_v23 = vadd.f32 1.0, %v2787_v6  ;;  %v4368_v40 = vadd.f32 0.2548296, %v4224_v54  ;;  %vm5520_vm10 = vcmp.ge.f32.partialorder %v10815_v63, 0.0  ;;  %v1258_v54 = vpop.f32.mrf.mxu0 }
 0x312   :  { %v5160_v53 = vmul.f32 %v7901_v16, %v4440_v43  ;;  %v4917_v14 = vmul.f32 1.442695, %v4731_v42  ;;  %v2569_v37 = vand.u32 2147483647, %v10980_v26  ;;  %v7253_v13 = vpack.c.bf16 %v6093_v18, %v6093_v18  ;;  %v279_v8 = vld [vmem:[#allocation2 + $0x398] sm:$0xff]  ;;  %v277_v31 = vld [vmem:[#allocation2 + $0x388] sm:$0xff] }
 0x313   :  { %v3574_v30 = vmul.f32 %v10962_v60, %v3430_v0  ;;  %v3502_v41 = vadd.f32 -1.4531521, %v3358_v50  ;;  %7910 = vrcp.f32 %v2931_v23  ;;  %v4512_v25 = vmul.f32 %v10911_v3, %v4368_v40  ;;  %v210_v43 = vld [vmem:[#allocation2 + $0x170] sm:$0xff]  ;;  %v209_v63 = vld [vmem:[#allocation2 + $0x168] sm:$0xff] }
 0x314   :  { %v5304_v55 = vsub.f32 1.0, %v5160_v53  ;;  %v10993_v10 = vmul.f32 0.5, %v10864_v34  ;;  %v2713_v57 = vmul.f32 0.3275911, %v2569_v37  ;;  %v7905_v36 = vpop.eup %7904  ;;  %6814 = vst.msk [vmem:[%s12756_s3 + $0x1b0] sm:$0xf] %vm6705_vm5, %v7253_v13  ;;  %7912 = vpow2.f32 %v5051_v4 }
 0x315   :  { %v3718_v61 = vadd.f32 1.4214138, %v3574_v30  ;;  %v3646_v47 = vmul.f32 %v10971_v56, %v3502_v41  ;;  %v4803_v35 = vmul.f32 %v4659_v9, %v2643_v49  ;;  %v5232_v58 = vmul.f32 %v7905_v36, %v4512_v25  ;;  %v280_v25 = vld [vmem:[#allocation2 + $0x3a0] sm:$0xff] }
 0x316   :  { %v5592_v3 = vsub.f32 0.0, %v5304_v55  ;;  %7914 = vpow2.f32 %v4917_v14  ;;  %v2857_v34 = vadd.f32 1.0, %v2713_v57  ;;  %v4585_v15 = vsub.f32 0.0, %v2569_v37  ;;  %v208_v14 = vld [vmem:[#allocation2 + $0x160] sm:$0xff]  ;;  %v211_v57 = vld [vmem:[#allocation2 + $0x178] sm:$0xff] }
 0x317   :  { %v3862_v42 = vmul.f32 %v10962_v60, %v3718_v61  ;;  %v3790_v16 = vadd.f32 1.4214138, %v3646_v47  ;;  %v1766_v39 = vadd.f32 %v10917_v21, %v276_v46  ;;  %v5376_v4 = vsub.f32 1.0, %v5232_v58  ;;  %v282_v21 = vld [vmem:[#allocation2 + $0x3b0] sm:$0xff]  ;;  %v1546_v46 = vpop.f32.mrf.mxu1  ;;  %v7417_v47 = vpop.f32.mrf.mxu0 }
 0x318   :  { %v5736_v6 = vsel %vm5448_vm9, %v5304_v55, %v5592_v3  ;;  %7916 = vrcp.f32 %v2857_v34  ;;  %v1697_v49 = vadd.f32 %v10922_v33, %v207_v5  ;;  %v11008_v50 = vmul.f32 1.442695, %v4803_v35  ;;  %v281_v34 = vld [vmem:[#allocation2 + $0x3a8] sm:$0xff] }
 0x319   :  { %v5880_v9 = vadd.f32 1.0, %v5736_v6  ;;  %v4006_v18 = vadd.f32 -0.28449672, %v3862_v42  ;;  %v3934_v0 = vmul.f32 %v10971_v56, %v3790_v16  ;;  %1911 = vst.msk [vmem:[#allocation2 + $0x380] sm:$0xff] %vm19_vm1, %v1766_v39  ;;  %v11011_v23 = vpop.eup %7906  ;;  %v5664_v53 = vsub.f32 0.0, %v5376_v4  ;;  %v7489_v6 = vpop.f32.mrf.mxu1 }
 0x31a   :  { %1842 = vst.msk [vmem:[#allocation2 + $0x158] sm:$0xff] %vm19_vm1, %v1697_v49  ;;  %v1769_v27 = vadd.f32 %v10937_v2, %v279_v8  ;;  %v1695_v33 = vadd.f32 %v10945_v52, %v205_v51  ;;  %v1767_v40 = vadd.f32 %v10955_v22, %v277_v31  ;;  %v3291_v55 = vmul.f32 1.0614054, %v11011_v23  ;;  %v283_v22 = vld [vmem:[#allocation2 + $0x3b8] sm:$0xff]  ;;  %v286_v31 = vld [vmem:[#allocation2 + $0x3d0] sm:$0xff] }
 0x31b   :  { %v6024_v13 = vmul.f32 %v5880_v9, %v10896_v28  ;;  %v4150_v30 = vmul.f32 %v10962_v60, %v4006_v18  ;;  %v4078_v41 = vadd.f32 -0.28449672, %v3934_v0  ;;  %v5808_v61 = vsel %vm5520_vm10, %v5376_v4, %v5664_v53 }
 0x31c   :  { %v7909_v36 = vpop.eup %7908  ;;  %v4729_v2 = vmul.f32 %v4585_v15, %v2569_v37  ;;  %1914 = vst.msk [vmem:[#allocation2 + $0x398] sm:$0xff] %vm19_vm1, %v1769_v27  ;;  %1840 = vst.msk [vmem:[#allocation2 + $0x148] sm:$0xff] %vm19_vm1, %v1695_v33  ;;  %v1700_v28 = vadd.f32 %v10960_v1, %v210_v43  ;;  %v1772_v52 = vadd.f32 %v10969_v19, %v282_v21  ;;  %v5952_v5 = vadd.f32 1.0, %v5808_v61  ;;  %v214_v37 = vld [vmem:[#allocation2 + $0x190] sm:$0xff]  ;;  %v212_v43 = vld [vmem:[#allocation2 + $0x180] sm:$0xff] }
 0x31d   :  { %1912 = vst.msk [vmem:[#allocation2 + $0x388] sm:$0xff] %vm19_vm1, %v1767_v40  ;;  %v7184_v35 = vpack.c.bf16 %v6024_v13, %v6024_v13  ;;  %v4294_v3 = vadd.f32 0.2548296, %v4150_v30  ;;  %v4222_v58 = vmul.f32 %v10971_v56, %v4078_v41  ;;  %vm5446_vm11 = vcmp.ge.f32.partialorder %v10868_v62, 0.0 }
 0x31e   :  { %v3435_v42 = vadd.f32 -1.4531521, %v3291_v55  ;;  %1845 = vst.msk [vmem:[#allocation2 + $0x170] sm:$0xff] %vm19_vm1, %v1700_v28  ;;  %1917 = vst.msk [vmem:[#allocation2 + $0x3b0] sm:$0xff] %vm19_vm1, %v1772_v52  ;;  %v1698_v1 = vadd.f32 %v10982_v20, %v208_v14  ;;  %v1770_v19 = vadd.f32 %v10989_v59, %v280_v25  ;;  %v1701_v16 = vadd.f32 %v10995_v11, %v211_v57 }
 0x31f   :  { %6745 = vst.msk [vmem:[%s12756_s3 + $0x9c] sm:$0xf] %vm6705_vm5, %v7184_v35  ;;  %v6096_v15 = vmul.f32 %v5952_v5, %v10905_v29  ;;  %v4438_v39 = vmul.f32 %v10962_v60, %v4294_v3  ;;  %v4366_v8 = vadd.f32 0.2548296, %v4222_v58  ;;  %v1773_v51 = vadd.f32 %v7486_v12, %v283_v22  ;;  %v1271_v60 = vpop.f32.mrf.mxu0 }
 0x320   :  { %v11040_v4 = vpop.eup %7910  ;;  %v3579_v20 = vmul.f32 %v11011_v23, %v3435_v42  ;;  %v2058_v59 = vld [vmem:[#allocation2 + $0x380] sm:$0xff]  ;;  %1843 = vst.msk [vmem:[#allocation2 + $0x160] sm:$0xff] %vm19_vm1, %v1698_v1  ;;  %1915 = vst.msk [vmem:[#allocation2 + $0x3a0] sm:$0xff] %vm19_vm1, %v1770_v19  ;;  %v1699_v11 = vadd.f32 %v1258_v54, %v209_v63  ;;  %v1771_v49 = vadd.f32 %v1546_v46, %v281_v34  ;;  %7918 = vpow2.f32 %v11008_v50 }
 0x321   :  { %1846 = vst.msk [vmem:[#allocation2 + $0x178] sm:$0xff] %vm19_vm1, %v1701_v16  ;;  %v1704_v29 = vadd.f32 %v7417_v47, %v214_v37  ;;  %v7256_v9 = vpack.c.bf16 %v6096_v15, %v6096_v15  ;;  %v5158_v12 = vmul.f32 %v7909_v36, %v4438_v39  ;;  %v4510_v18 = vmul.f32 %v10971_v56, %v4366_v8  ;;  %v1989_v21 = vld [vmem:[#allocation2 + $0x158] sm:$0xff]  ;;  %v7913_v53 = vpop.eup %7912 }
 0x322   :  { %v3363_v0 = vmul.f32 1.0614054, %v11040_v4  ;;  %1918 = vst.msk [vmem:[#allocation2 + $0x3b8] sm:$0xff] %vm19_vm1, %v1773_v51  ;;  %v3723_v27 = vadd.f32 1.4214138, %v3579_v20  ;;  %v11050_v33 = vadd.f32 %v10861_v24, %v2058_v59  ;;  %v11053_v54 = vadd.f32 %v10861_v24, %v1989_v21  ;;  %1844 = vst.msk [vmem:[#allocation2 + $0x168] sm:$0xff] %vm19_vm1, %v1699_v11 }
 0x323   :  { %1916 = vst.msk [vmem:[#allocation2 + $0x3a8] sm:$0xff] %vm19_vm1, %v1771_v49  ;;  %1849 = vst.msk [vmem:[#allocation2 + $0x190] sm:$0xff] %vm19_vm1, %v1704_v29  ;;  %v1776_v56 = vadd.f32 %v7489_v6, %v286_v31  ;;  %v7915_v40 = vpop.eup %7914  ;;  %v5302_v14 = vsub.f32 1.0, %v5158_v12  ;;  %v5230_v13 = vmul.f32 %v7913_v53, %v4510_v18  ;;  %v1702_v41 = vadd.f32 %v1271_v60, %v212_v43  ;;  %v2061_v15 = vld [vmem:[#allocation2 + $0x398] sm:$0xff] }
 0x324   :  { %6817 = vst.msk [vmem:[%s12756_s3 + $0x1bc] sm:$0xf] %vm6705_vm5, %v7256_v9  ;;  %v3507_v30 = vadd.f32 -1.4531521, %v3363_v0  ;;  %v3867_v55 = vmul.f32 %v11011_v23, %v3723_v27  ;;  %v4913_v25 = vmul.f32 1.442695, %v4729_v2 }
 0x325   :  { %v11065_v57 = vmul.f32 0.70710677, %v11050_v33  ;;  %1921 = vst.msk [vmem:[#allocation2 + $0x3d0] sm:$0xff] %vm19_vm1, %v1776_v56  ;;  %v11068_v46 = vpop.eup %7916  ;;  %v5590_v36 = vsub.f32 0.0, %v5302_v14  ;;  %v5374_v61 = vsub.f32 1.0, %v5230_v13  ;;  %1847 = vst.msk [vmem:[#allocation2 + $0x180] sm:$0xff] %vm19_vm1, %v1702_v41 }
 0x326   :  { %v3651_v28 = vmul.f32 %v11040_v4, %v3507_v30  ;;  %v11072_v52 = vmul.f32 0.70710677, %v11053_v54  ;;  %v4011_v22 = vadd.f32 -0.28449672, %v3867_v55  ;;  %v3289_v50 = vmul.f32 1.0614054, %v11068_v46 }
 0x327   :  { %v11077_v2 = vand.u32 2147483647, %v11065_v57  ;;  %v5734_v47 = vsel %vm5446_vm11, %v5302_v14, %v5590_v36  ;;  %vm5518_vm12 = vcmp.ge.f32.partialorder %v10882_v38, 0.0  ;;  %v5662_v35 = vsub.f32 0.0, %v5374_v61  ;;  %v2059_v56 = vld [vmem:[#allocation2 + $0x388] sm:$0xff] }
 0x328   :  { %v3795_v5 = vadd.f32 1.4214138, %v3651_v28  ;;  %v5878_v3 = vadd.f32 1.0, %v5734_v47  ;;  %v4155_v58 = vmul.f32 %v11011_v23, %v4011_v22  ;;  %v3433_v63 = vadd.f32 -1.4531521, %v3289_v50 }
 0x329   :  { %v2785_v34 = vmul.f32 0.3275911, %v11077_v2  ;;  %v5806_v37 = vsel %vm5518_vm12, %v5374_v61, %v5662_v35  ;;  %7920 = vpow2.f32 %v4913_v25  ;;  %v2572_v1 = vand.u32 2147483647, %v11072_v52 }
 0x32a   :  { %v3939_v42 = vmul.f32 %v11040_v4, %v3795_v5  ;;  %v6022_v19 = vmul.f32 %v5878_v3, %v10926_v32  ;;  %v5950_v62 = vadd.f32 1.0, %v5806_v37  ;;  %v4299_v16 = vadd.f32 0.2548296, %v4155_v58 }
 0x32b   :  { %v3577_v38 = vmul.f32 %v11068_v46, %v3433_v63  ;;  %v2929_v8 = vadd.f32 1.0, %v2785_v34  ;;  %v2716_v51 = vmul.f32 0.3275911, %v2572_v1  ;;  %v11092_v32 = vadd.f32 %v10861_v24, %v2061_v15 }
 0x32c   :  { %v4083_v39 = vadd.f32 -0.28449672, %v3939_v42  ;;  %v7182_v31 = vpack.c.bf16 %v6022_v19, %v6022_v19  ;;  %v6094_v6 = vmul.f32 %v5950_v62, %v10993_v10  ;;  %v4443_v20 = vmul.f32 %v11011_v23, %v4299_v16  ;;  %v1987_v10 = vld [vmem:[#allocation2 + $0x148] sm:$0xff] }
 0x32d   :  { %v3721_v59 = vadd.f32 1.4214138, %v3577_v38  ;;  %7922 = vrcp.f32 %v2929_v8  ;;  %v2860_v49 = vadd.f32 1.0, %v2716_v51  ;;  %v7919_v18 = vpop.eup %7918  ;;  %v2283_v0 = vmul.f32 0.5, %v10915_v7 }
 0x32e   :  { %v4227_v11 = vmul.f32 %v11040_v4, %v4083_v39  ;;  %6743 = vst.msk [vmem:[%s12756_s3 + $0x94] sm:$0xf] %vm6705_vm5, %v7182_v31  ;;  %v7254_v29 = vpack.c.bf16 %v6094_v6, %v6094_v6  ;;  %v5163_v43 = vmul.f32 %v7915_v40, %v4443_v20  ;;  %v11106_v53 = vmul.f32 0.70710677, %v11092_v32 }
 0x32f   :  { %v3865_v60 = vmul.f32 %v11068_v46, %v3721_v59  ;;  %7924 = vrcp.f32 %v2860_v49  ;;  %v11109_v27 = vadd.f32 %v10861_v24, %v1987_v10  ;;  %vm5451_vm13 = vcmp.ge.f32.partialorder %v10929_v45, 0.0 }
 0x330   :  { %v4371_v9 = vadd.f32 0.2548296, %v4227_v11  ;;  %6815 = vst.msk [vmem:[%s12756_s3 + $0x1b4] sm:$0xf] %vm6705_vm5, %v7254_v29  ;;  %v5307_v23 = vsub.f32 1.0, %v5163_v43  ;;  %v4657_v13 = vsub.f32 0.0, %v11077_v2  ;;  %v11120_v61 = vadd.f32 %v10861_v24, %v2059_v56 }
 0x331   :  { %v4009_v12 = vadd.f32 -0.28449672, %v3865_v60  ;;  %v2355_v30 = vmul.f32 0.5, %v10935_v17  ;;  %v4588_v7 = vsub.f32 0.0, %v2572_v1  ;;  %v11117_v36 = vmul.f32 0.70710677, %v11109_v27 }
 0x332   :  { %v4515_v21 = vmul.f32 %v11040_v4, %v4371_v9  ;;  %v5595_v40 = vsub.f32 0.0, %v5307_v23  ;;  %v2644_v4 = vand.u32 2147483647, %v11106_v53  ;;  %v2281_v22 = vmul.f32 0.5, %v10953_v48  ;;  %v2064_v60 = vld [vmem:[#allocation2 + $0x3b0] sm:$0xff]  ;;  %v1990_v56 = vld [vmem:[#allocation2 + $0x160] sm:$0xff] }
 0x333   :  { %v4153_v14 = vmul.f32 %v11068_v46, %v4009_v12  ;;  %vm5523_vm14 = vcmp.ge.f32.partialorder %v10950_v44, 0.0  ;;  %v4801_v35 = vmul.f32 %v4657_v13, %v11077_v2  ;;  %v2570_v5 = vand.u32 2147483647, %v11117_v36 }
 0x334   :  { %v5235_v41 = vmul.f32 %v7919_v18, %v4515_v21  ;;  %v5739_v55 = vsel %vm5451_vm13, %v5307_v23, %v5595_v40  ;;  %v2788_v50 = vmul.f32 0.3275911, %v2644_v4  ;;  %v4732_v63 = vmul.f32 %v4588_v7, %v2572_v1 }
 0x335   :  { %v4297_v25 = vadd.f32 0.2548296, %v4153_v14  ;;  %v5883_v45 = vadd.f32 1.0, %v5739_v55  ;;  %vm5449_vm15 = vcmp.ge.f32.partialorder %v10980_v26, 0.0  ;;  %v2714_v42 = vmul.f32 0.3275911, %v2570_v5 }
 0x336   :  { %v5379_v28 = vsub.f32 1.0, %v5235_v41  ;;  %v7921_v47 = vpop.eup %7920  ;;  %v2932_v34 = vadd.f32 1.0, %v2788_v50  ;;  %v11129_v48 = vmul.f32 0.70710677, %v11120_v61  ;;  %v4660_v44 = vsub.f32 0.0, %v2644_v4 }
 0x337   :  { %v4441_v17 = vmul.f32 %v11068_v46, %v4297_v25  ;;  %v6027_v3 = vmul.f32 %v5883_v45, %v2283_v0  ;;  %v1992_v46 = vld [vmem:[#allocation2 + $0x170] sm:$0xff]  ;;  %v5057_v15 = vmul.f32 1.442695, %v4801_v35  ;;  %v2858_v39 = vadd.f32 1.0, %v2714_v42 }
 0x338   :  { %v5667_v58 = vsub.f32 0.0, %v5379_v28  ;;  %7926 = vrcp.f32 %v2932_v34  ;;  %v4919_v8 = vmul.f32 1.442695, %v4732_v63  ;;  %v11139_v51 = vand.u32 2147483647, %v11129_v48 }
 0x339   :  { %v5161_v37 = vmul.f32 %v7921_v47, %v4441_v17  ;;  %v7187_v19 = vpack.c.bf16 %v6027_v3, %v6027_v3  ;;  %7928 = vrcp.f32 %v2858_v39  ;;  %v11142_v20 = vadd.f32 %v10861_v24, %v1992_v46 }
 0x33a   :  { %v5811_v62 = vsel %vm5523_vm14, %v5379_v28, %v5667_v58  ;;  %v11131_v16 = vpop.eup %7922  ;;  %v11147_v11 = vmul.f32 0.5, %v11050_v33  ;;  %v4804_v29 = vmul.f32 %v4660_v44, %v2644_v4  ;;  %v2786_v43 = vmul.f32 0.3275911, %v11139_v51  ;;  %v2062_v44 = vld [vmem:[#allocation2 + $0x3a0] sm:$0xff] }
 0x33b   :  { %v5955_v2 = vadd.f32 1.0, %v5811_v62  ;;  %v5305_v38 = vsub.f32 1.0, %v5161_v37  ;;  %6748 = vst.msk [vmem:[%s12756_s3 + $0xa8] sm:$0xf] %vm6705_vm5, %v7187_v19  ;;  %v3361_v1 = vmul.f32 1.0614054, %v11131_v16  ;;  %7930 = vpow2.f32 %v5057_v15 }
 0x33c   :  { %v11144_v59 = vpop.eup %7924  ;;  %v4586_v12 = vsub.f32 0.0, %v2570_v5  ;;  %v2930_v21 = vadd.f32 1.0, %v2786_v43  ;;  %7932 = vpow2.f32 %v4919_v8  ;;  %v11159_v40 = vmul.f32 0.70710677, %v11142_v20 }
 0x33d   :  { %v6099_v31 = vmul.f32 %v5955_v2, %v2355_v30  ;;  %v5593_v6 = vsub.f32 0.0, %v5305_v38  ;;  %v3505_v49 = vadd.f32 -1.4531521, %v3361_v1  ;;  %v3292_v23 = vmul.f32 1.0614054, %v11144_v59 }
 0x33e   :  { %v11162_v26 = vadd.f32 %v10861_v24, %v2064_v60  ;;  %v5063_v30 = vmul.f32 1.442695, %v4804_v29  ;;  %7934 = vrcp.f32 %v2930_v21  ;;  %v4730_v7 = vmul.f32 %v4586_v12, %v2570_v5 }
 0x33f   :  { %v7259_v10 = vpack.c.bf16 %v6099_v31, %v6099_v31  ;;  %v5737_v9 = vsel %vm5449_vm15, %v5305_v38, %v5593_v6  ;;  %v3649_v0 = vmul.f32 %v11131_v16, %v3505_v49  ;;  %v3436_v33 = vadd.f32 -1.4531521, %v3292_v23 }
 0x340   :  { %v5881_v18 = vadd.f32 1.0, %v5737_v9  ;;  %v2575_v4 = vand.u32 2147483647, %v11159_v40  ;;  %v11167_v55 = vadd.f32 %v10861_v24, %v1990_v56  ;;  %v11171_v28 = vmul.f32 0.5, %v11053_v54 }
 0x341   :  { %6820 = vst.msk [vmem:[%s12756_s3 + $0x1c8] sm:$0xf] %vm6705_vm5, %v7259_v10  ;;  %v3793_v13 = vadd.f32 1.4214138, %v3649_v0  ;;  %v3580_v41 = vmul.f32 %v11144_v59, %v3436_v33  ;;  %v11174_v50 = vmul.f32 0.70710677, %v11162_v26  ;;  %7936 = vpow2.f32 %v5063_v30 }
 0x342   :  { %v6025_v14 = vmul.f32 %v5881_v18, %v2281_v22  ;;  %v11177_v47 = vmul.f32 0.5, %v11092_v32  ;;  %v11180_v17 = vmul.f32 0.5, %v11109_v27  ;;  %v2719_v35 = vmul.f32 0.3275911, %v2575_v4 }
 0x343   :  { %v3937_v45 = vmul.f32 %v11131_v16, %v3793_v13  ;;  %v3724_v22 = vadd.f32 1.4214138, %v3580_v41  ;;  %v4658_v54 = vsub.f32 0.0, %v11139_v51  ;;  %v2647_v3 = vand.u32 2147483647, %v11174_v50 }
 0x344   :  { %v7185_v25 = vpack.c.bf16 %v6025_v14, %v6025_v14  ;;  %v4915_v63 = vmul.f32 1.442695, %v4730_v7  ;;  %v2863_v34 = vadd.f32 1.0, %v2719_v35  ;;  %v11192_v27 = vmul.f32 0.70710677, %v11167_v55 }
 0x345   :  { %v4081_v5 = vadd.f32 -0.28449672, %v3937_v45  ;;  %v11188_v58 = vpop.eup %7926  ;;  %v3868_v32 = vmul.f32 %v11144_v59, %v3724_v22  ;;  %v4591_v19 = vsub.f32 0.0, %v2575_v4  ;;  %v2791_v62 = vmul.f32 0.3275911, %v2647_v3 }
 0x346   :  { %6746 = vst.msk [vmem:[%s12756_s3 + $0xa0] sm:$0xf] %vm6705_vm5, %v7185_v25  ;;  %v3364_v42 = vmul.f32 1.0614054, %v11188_v58  ;;  %7938 = vrcp.f32 %v2863_v34  ;;  %v4663_v2 = vsub.f32 0.0, %v2647_v3  ;;  %v11197_v15 = vpop.eup %7928  ;;  %v4802_v8 = vmul.f32 %v4658_v54, %v11139_v51 }
 0x347   :  { %v4225_v37 = vmul.f32 %v11131_v16, %v4081_v5  ;;  %v4012_v46 = vadd.f32 -0.28449672, %v3868_v32  ;;  %v2573_v38 = vand.u32 2147483647, %v11192_v27  ;;  %v2935_v31 = vadd.f32 1.0, %v2791_v62 }
 0x348   :  { %v3508_v1 = vadd.f32 -1.4531521, %v3364_v42  ;;  %vm5521_vm0 = vcmp.ge.f32.partialorder %v11065_v57, 0.0  ;;  %v3290_v49 = vmul.f32 1.0614054, %v11197_v15  ;;  %v11204_v43 = vadd.f32 %v10861_v24, %v2062_v44  ;;  %v7931_v23 = vpop.eup %7930 }
 0x349   :  { %v4369_v39 = vadd.f32 0.2548296, %v4225_v37  ;;  %v4156_v6 = vmul.f32 %v11144_v59, %v4012_v46  ;;  %v2717_v29 = vmul.f32 0.3275911, %v2573_v38  ;;  %v4735_v9 = vmul.f32 %v4591_v19, %v2575_v4  ;;  %v7933_v21 = vpop.eup %7932 }
 0x34a   :  { %v3652_v10 = vmul.f32 %v11188_v58, %v3508_v1  ;;  %7940 = vrcp.f32 %v2935_v31  ;;  %v3434_v51 = vadd.f32 -1.4531521, %v3290_v49  ;;  %v4807_v18 = vmul.f32 %v4663_v2, %v2647_v3 }
 0x34b   :  { %v4513_v60 = vmul.f32 %v11131_v16, %v4369_v39  ;;  %v4300_v12 = vadd.f32 0.2548296, %v4156_v6  ;;  %v2861_v0 = vadd.f32 1.0, %v2717_v29  ;;  %vm5452_vm2 = vcmp.ge.f32.partialorder %v11072_v52, 0.0  ;;  %v11212_v13 = vpop.eup %7934  ;;  %v1993_v29 = vld [vmem:[#allocation2 + $0x178] sm:$0xff] }
 0x34c   :  { %v3796_v33 = vadd.f32 1.4214138, %v3652_v10  ;;  %7942 = vpow2.f32 %v4915_v63  ;;  %v11210_v14 = vmul.f32 0.5, %v11120_v61  ;;  %v3578_v30 = vmul.f32 %v11197_v15, %v3434_v51 }
 0x34d   :  { %v5233_v56 = vmul.f32 %v7931_v23, %v4513_v60  ;;  %v4444_v16 = vmul.f32 %v11144_v59, %v4300_v12  ;;  %v5059_v41 = vmul.f32 1.442695, %v4802_v8  ;;  %7944 = vrcp.f32 %v2861_v0 }
 0x34e   :  { %v3940_v4 = vmul.f32 %v11188_v58, %v3796_v33  ;;  %v3362_v25 = vmul.f32 1.0614054, %v11212_v13  ;;  %v4925_v45 = vmul.f32 1.442695, %v4735_v9  ;;  %v3722_v35 = vadd.f32 1.4214138, %v3578_v30  ;;  %v7937_v63 = vpop.eup %7936 }
 0x34f   :  { %v5377_v7 = vsub.f32 1.0, %v5233_v56  ;;  %v5164_v22 = vmul.f32 %v7933_v21, %v4444_v16  ;;  %v5069_v5 = vmul.f32 1.442695, %v4807_v18  ;;  %v11219_v61 = vmul.f32 0.70710677, %v11204_v43 }
 0x350   :  { %v4084_v3 = vadd.f32 -0.28449672, %v3940_v4  ;;  %v3506_v32 = vadd.f32 -1.4531521, %v3362_v25  ;;  %v4589_v59 = vsub.f32 0.0, %v2573_v38  ;;  %v3866_v37 = vmul.f32 %v11197_v15, %v3722_v35 }
 0x351   :  { %v5665_v54 = vsub.f32 0.0, %v5377_v7  ;;  %v5308_v34 = vsub.f32 1.0, %v5164_v22  ;;  %7946 = vpow2.f32 %v5059_v41  ;;  %v11223_v42 = vand.u32 2147483647, %v11219_v61 }
 0x352   :  { %v4228_v62 = vmul.f32 %v11188_v58, %v4084_v3  ;;  %v3650_v44 = vmul.f32 %v11212_v13, %v3506_v32  ;;  %7948 = vpow2.f32 %v4925_v45  ;;  %v4010_v39 = vadd.f32 -0.28449672, %v3866_v37 }
 0x353   :  { %v5809_v19 = vsel %vm5521_vm0, %v5377_v7, %v5665_v54  ;;  %v5596_v2 = vsub.f32 0.0, %v5308_v34  ;;  %v2789_v1 = vmul.f32 0.3275911, %v11223_v42  ;;  %v11230_v8 = vpop.eup %7938  ;;  %7950 = vpow2.f32 %v5069_v5 }
 0x354   :  { %v5953_v46 = vadd.f32 1.0, %v5809_v19  ;;  %v4372_v31 = vadd.f32 0.2548296, %v4228_v62  ;;  %v3794_v6 = vadd.f32 1.4214138, %v3650_v44  ;;  %v4733_v49 = vmul.f32 %v4589_v59, %v2573_v38 }
 0x355   :  { %v5740_v60 = vsel %vm5452_vm2, %v5308_v34, %v5596_v2  ;;  %vm5524_vm3 = vcmp.ge.f32.partialorder %v11106_v53, 0.0  ;;  %v4154_v10 = vmul.f32 %v11197_v15, %v4010_v39  ;;  %v3295_v9 = vmul.f32 1.0614054, %v11230_v8 }
 0x356   :  { %v6097_v57 = vmul.f32 %v5953_v46, %v11147_v11  ;;  %v5884_v23 = vadd.f32 1.0, %v5740_v60  ;;  %v4516_v12 = vmul.f32 %v11188_v58, %v4372_v31  ;;  %v3938_v51 = vmul.f32 %v11212_v13, %v3794_v6 }
 0x357   :  { %v2933_v18 = vadd.f32 1.0, %v2789_v1  ;;  %v11240_v0 = vpop.eup %7940  ;;  %v4298_v21 = vadd.f32 0.2548296, %v4154_v10  ;;  %v3439_v11 = vadd.f32 -1.4531521, %v3295_v9  ;;  %v11243_v52 = vadd.f32 %v10861_v24, %v1993_v29 }
 0x358   :  { %v7257_v38 = vpack.c.bf16 %v6097_v57, %v6097_v57  ;;  %v6028_v56 = vmul.f32 %v5884_v23, %v11171_v28  ;;  %v5236_v33 = vmul.f32 %v7937_v63, %v4516_v12  ;;  %vm5450_vm4 = vcmp.ge.f32.partialorder %v11117_v36, 0.0  ;;  %v2065_v23 = vld [vmem:[#allocation2 + $0x3b8] sm:$0xff] }
 0x359   :  { %v4082_v16 = vadd.f32 -0.28449672, %v3938_v51  ;;  %v3367_v30 = vmul.f32 1.0614054, %v11240_v0  ;;  %v7943_v58 = vpop.eup %7942  ;;  %v4442_v41 = vmul.f32 %v11197_v15, %v4298_v21  ;;  %v3583_v7 = vmul.f32 %v11230_v8, %v3439_v11 }
 0x35a   :  { %6818 = vst.msk [vmem:[%s12756_s3 + $0x1c0] sm:$0xf] %vm6705_vm5, %v7257_v38  ;;  %v4921_v24 = vmul.f32 1.442695, %v4733_v49  ;;  %7952 = vrcp.f32 %v2933_v18  ;;  %v11254_v4 = vpop.eup %7944  ;;  %v7188_v28 = vpack.c.bf16 %v6028_v56, %v6028_v56  ;;  %v5380_v25 = vsub.f32 1.0, %v5236_v33 }
 0x35b   :  { %v4226_v45 = vmul.f32 %v11212_v13, %v4082_v16  ;;  %v3511_v22 = vadd.f32 -1.4531521, %v3367_v30  ;;  %v5162_v35 = vmul.f32 %v7943_v58, %v4442_v41  ;;  %v3727_v5 = vadd.f32 1.4214138, %v3583_v7 }
 0x35c   :  { %v3293_v54 = vmul.f32 1.0614054, %v11254_v4  ;;  %v4661_v3 = vsub.f32 0.0, %v11223_v42  ;;  %6749 = vst.msk [vmem:[%s12756_s3 + $0xac] sm:$0xf] %vm6705_vm5, %v7188_v28  ;;  %v5668_v15 = vsub.f32 0.0, %v5380_v25  ;;  %7954 = vpow2.f32 %v4921_v24 }
 0x35d   :  { %v4370_v32 = vadd.f32 0.2548296, %v4226_v45  ;;  %v3655_v59 = vmul.f32 %v11240_v0, %v3511_v22  ;;  %v11265_v63 = vmul.f32 0.70710677, %v11243_v52  ;;  %v5306_v34 = vsub.f32 1.0, %v5162_v35 }
 0x35e   :  { %v3871_v37 = vmul.f32 %v11230_v8, %v3727_v5  ;;  %v3437_v19 = vadd.f32 -1.4531521, %v3293_v54  ;;  %v7947_v62 = vpop.eup %7946  ;;  %v5812_v44 = vsel %vm5524_vm3, %v5380_v25, %v5668_v15  ;;  %v4805_v10 = vmul.f32 %v4661_v3, %v11223_v42  ;;  %v11283_v42 = vld [vmem:[%s12755_s2] ss:$0 sm:$0xff]  ;;  %v1991_v25 = vld [vmem:[#allocation2 + $0x168] sm:$0xff] }
 0x35f   :  { %v4514_v46 = vmul.f32 %v11212_v13, %v4370_v32  ;;  %v3799_v2 = vadd.f32 1.4214138, %v3655_v59  ;;  %v2576_v39 = vand.u32 2147483647, %v11265_v63  ;;  %v7949_v1 = vpop.eup %7948  ;;  %v5956_v31 = vadd.f32 1.0, %v5812_v44 }
 0x360   :  { %v5594_v6 = vsub.f32 0.0, %v5306_v34  ;;  %v4015_v49 = vadd.f32 -0.28449672, %v3871_v37  ;;  %v3581_v29 = vmul.f32 %v11254_v4, %v3437_v19  ;;  %v7951_v53 = vpop.eup %7950  ;;  %vm5522_vm6 = vcmp.ge.f32.partialorder %v11129_v48, 0.0 }
 0x361   :  { %v5234_v57 = vmul.f32 %v7947_v62, %v4514_v46  ;;  %v3943_v60 = vmul.f32 %v11240_v0, %v3799_v2  ;;  %v2720_v9 = vmul.f32 0.3275911, %v2576_v39  ;;  %v6100_v12 = vmul.f32 %v5956_v31, %v11177_v47 }
 0x362   :  { %v5738_v13 = vsel %vm5450_vm4, %v5306_v34, %v5594_v6  ;;  %v4159_v51 = vmul.f32 %v11230_v8, %v4015_v49  ;;  %v3725_v18 = vadd.f32 1.4214138, %v3581_v29  ;;  %v11286_v47 = vadd.f32 %v11283_v42, %v2065_v23 }
 0x363   :  { %v5882_v38 = vadd.f32 1.0, %v5738_v13  ;;  %v5378_v21 = vsub.f32 1.0, %v5234_v57  ;;  %v4087_v11 = vadd.f32 -0.28449672, %v3943_v60  ;;  %v2864_v56 = vadd.f32 1.0, %v2720_v9  ;;  %v2063_v9 = vld [vmem:[#allocation2 + $0x3a8] sm:$0xff] }
 0x364   :  { %v7260_v33 = vpack.c.bf16 %v6100_v12, %v6100_v12  ;;  %v4303_v16 = vadd.f32 0.2548296, %v4159_v51  ;;  %v3869_v30 = vmul.f32 %v11254_v4, %v3725_v18  ;;  %v5065_v28 = vmul.f32 1.442695, %v4805_v10 }
 0x365   :  { %v6026_v36 = vmul.f32 %v5882_v38, %v11180_v17  ;;  %v5666_v58 = vsub.f32 0.0, %v5378_v21  ;;  %v4231_v41 = vmul.f32 %v11240_v0, %v4087_v11  ;;  %7956 = vrcp.f32 %v2864_v56 }
 0x366   :  { %6821 = vst.msk [vmem:[%s12756_s3 + $0x1cc] sm:$0xf] %vm6705_vm5, %v7260_v33  ;;  %v4447_v7 = vmul.f32 %v11230_v8, %v4303_v16  ;;  %v4013_v24 = vadd.f32 -0.28449672, %v3869_v30  ;;  %v4592_v5 = vsub.f32 0.0, %v2576_v39  ;;  %v2287_v48 = vmul.f32 0.5, %v11142_v20 }
 0x367   :  { %v11296_v45 = vpop.eup %7952  ;;  %v7186_v22 = vpack.c.bf16 %v6026_v36, %v6026_v36  ;;  %v5810_v17 = vsel %vm5522_vm6, %v5378_v21, %v5666_v58  ;;  %v4375_v35 = vadd.f32 0.2548296, %v4231_v41  ;;  %v11307_v59 = vmul.f32 0.70710677, %v11286_v47 }
 0x368   :  { %v5954_v54 = vadd.f32 1.0, %v5810_v17  ;;  %v5167_v3 = vmul.f32 %v7949_v1, %v4447_v7  ;;  %v4157_v15 = vmul.f32 %v11254_v4, %v4013_v24  ;;  %v3365_v32 = vmul.f32 1.0614054, %v11296_v45 }
 0x369   :  { %6747 = vst.msk [vmem:[%s12756_s3 + $0xa4] sm:$0xf] %vm6705_vm5, %v7186_v22  ;;  %v4519_v8 = vmul.f32 %v11240_v0, %v4375_v35  ;;  %v11310_v34 = vadd.f32 %v11283_v42, %v1991_v25  ;;  %v7955_v46 = vpop.eup %7954  ;;  %7958 = vpow2.f32 %v5065_v28  ;;  %v4736_v1 = vmul.f32 %v4592_v5, %v2576_v39  ;;  %v1996_v28 = vld [vmem:[#allocation2 + $0x190] sm:$0xff]  ;;  %v11339_v25 = vpop.f32.mrf.mxu1 }
 0x36a   :  { %v6098_v37 = vmul.f32 %v5954_v54, %v11210_v14  ;;  %v5311_v19 = vsub.f32 1.0, %v5167_v3  ;;  %v4301_v62 = vadd.f32 0.2548296, %v4157_v15  ;;  %v3509_v44 = vadd.f32 -1.4531521, %v3365_v32  ;;  %v11349_v15 = vpop.f32.mrf.mxu0 }
 0x36b   :  { %v5239_v2 = vmul.f32 %v7951_v53, %v4519_v8  ;;  %v11314_v31 = vand.u32 2147483647, %v11307_v59  ;;  %vm5455_vm7 = vcmp.ge.f32.partialorder %v11159_v40, 0.0  ;;  %v11321_v57 = vmul.f32 0.70710677, %v11310_v34 }
 0x36c   :  { %v7258_v20 = vpack.c.bf16 %v6098_v37, %v6098_v37  ;;  %v5599_v0 = vsub.f32 0.0, %v5311_v19  ;;  %v4445_v6 = vmul.f32 %v11254_v4, %v4301_v62  ;;  %v3653_v49 = vmul.f32 %v11296_v45, %v3509_v44 }
 0x36d   :  { %v5383_v29 = vsub.f32 1.0, %v5239_v2  ;;  %v2792_v14 = vmul.f32 0.3275911, %v11314_v31  ;;  %v2359_v60 = vmul.f32 0.5, %v11162_v26  ;;  %vm5527_vm8 = vcmp.ge.f32.partialorder %v11174_v50, 0.0  ;;  %v11365_v2 = vpop.f32.mrf.mxu1 }
 0x36e   :  { %6819 = vst.msk [vmem:[%s12756_s3 + $0x1c4] sm:$0xf] %vm6705_vm5, %v7258_v20  ;;  %v5743_v39 = vsel %vm5455_vm7, %v5311_v19, %v5599_v0  ;;  %v5165_v10 = vmul.f32 %v7955_v46, %v4445_v6  ;;  %v3797_v4 = vadd.f32 1.4214138, %v3653_v49  ;;  %v4927_v51 = vmul.f32 1.442695, %v4736_v1 }
 0x36f   :  { %v5887_v23 = vadd.f32 1.0, %v5743_v39  ;;  %v5671_v40 = vsub.f32 0.0, %v5383_v29  ;;  %v2936_v53 = vadd.f32 1.0, %v2792_v14  ;;  %v2574_v18 = vand.u32 2147483647, %v11321_v57  ;;  %v11370_v14 = vpop.f32.mrf.mxu0 }
 0x370   :  { %v5309_v12 = vsub.f32 1.0, %v5165_v10  ;;  %v3941_v13 = vmul.f32 %v11296_v45, %v3797_v4  ;;  %v11332_v11 = vadd.f32 %v11283_v42, %v2063_v9  ;;  %vm5453_vm9 = vcmp.ge.f32.partialorder %v11192_v27, 0.0  ;;  %v2068_v27 = vld [vmem:[#allocation2 + $0x3d0] sm:$0xff] }
 0x371   :  { %v6031_v38 = vmul.f32 %v5887_v23, %v2287_v48  ;;  %v5815_v21 = vsel %vm5527_vm8, %v5383_v29, %v5671_v40  ;;  %7960 = vrcp.f32 %v2936_v53  ;;  %v2718_v50 = vmul.f32 0.3275911, %v2574_v18  ;;  %v1994_v40 = vld [vmem:[#allocation2 + $0x180] sm:$0xff]  ;;  %v11384_v53 = vpop.f32.mrf.mxu1 }
 0x372   :  { %v11334_v26 = vpop.eup %7956  ;;  %v5959_v56 = vadd.f32 1.0, %v5815_v21  ;;  %v5597_v33 = vsub.f32 0.0, %v5309_v12  ;;  %v4085_v16 = vadd.f32 -0.28449672, %v3941_v13  ;;  %v2285_v22 = vmul.f32 0.5, %v11167_v55 }
 0x373   :  { %v7191_v30 = vpack.c.bf16 %v6031_v38, %v6031_v38  ;;  %v3296_v36 = vmul.f32 1.0614054, %v11334_v26  ;;  %v2862_v24 = vadd.f32 1.0, %v2718_v50  ;;  %7962 = vpow2.f32 %v4927_v51 }
 0x374   :  { %v6103_v58 = vmul.f32 %v5959_v56, %v2359_v60  ;;  %v5741_v41 = vsel %vm5453_vm9, %v5309_v12, %v5597_v33  ;;  %v4229_v7 = vmul.f32 %v11296_v45, %v4085_v16  ;;  %v11347_v3 = vmul.f32 0.70710677, %v11332_v11  ;;  %v11394_v56 = vpop.f32.mrf.mxu0 }
 0x375   :  { %6752 = vst.msk [vmem:[%s12756_s3 + $0xb8] sm:$0xf] %vm6705_vm5, %v7191_v30  ;;  %v5885_v17 = vadd.f32 1.0, %v5741_v41  ;;  %v3440_v35 = vadd.f32 -1.4531521, %v3296_v36  ;;  %7964 = vrcp.f32 %v2862_v24  ;;  %v4664_v8 = vsub.f32 0.0, %v11314_v31  ;;  %v11402_v41 = vpop.f32.mrf.mxu1 }
 0x376   :  { %v7263_v5 = vpack.c.bf16 %v6103_v58, %v6103_v58  ;;  %v4373_v54 = vadd.f32 0.2548296, %v4229_v7  ;;  %v11354_v37 = vadd.f32 %v11283_v42, %v1996_v28  ;;  %v7959_v55 = vpop.eup %7958  ;;  %v4590_v62 = vsub.f32 0.0, %v2574_v18 }
 0x377   :  { %v6029_v32 = vmul.f32 %v5885_v17, %v2285_v22  ;;  %v3584_v48 = vmul.f32 %v11334_v26, %v3440_v35  ;;  %v2646_v44 = vand.u32 2147483647, %v11347_v3  ;;  %v11363_v46 = vadd.f32 %v11283_v42, %v2068_v27 }
 0x378   :  { %6824 = vst.msk [vmem:[%s12756_s3 + $0x1d8] sm:$0xf] %vm6705_vm5, %v7263_v5  ;;  %v4517_v19 = vmul.f32 %v11296_v45, %v4373_v54  ;;  %v11368_v29 = vmul.f32 0.70710677, %v11354_v37  ;;  %v4808_v39 = vmul.f32 %v4664_v8, %v11314_v31  ;;  %v4734_v4 = vmul.f32 %v4590_v62, %v2574_v18  ;;  %v1287_v54 = vpop.f32.mrf.mxu0 }
 0x379   :  { %v7189_v1 = vpack.c.bf16 %v6029_v32, %v6029_v32  ;;  %v3728_v20 = vadd.f32 1.4214138, %v3584_v48  ;;  %v2790_v6 = vmul.f32 0.3275911, %v2646_v44  ;;  %v4662_v49 = vsub.f32 0.0, %v2646_v44 }
 0x37a   :  { %v5237_v0 = vmul.f32 %v7959_v55, %v4517_v19  ;;  %v11379_v60 = vmul.f32 0.70710677, %v11363_v46  ;;  %v11382_v23 = vand.u32 2147483647, %v11368_v29  ;;  %v2357_v12 = vmul.f32 0.5, %v11204_v43  ;;  %v284_v55 = vld [vmem:[#allocation2 + $0x3c0] sm:$0xff] }
 0x37b   :  { %6750 = vst.msk [vmem:[%s12756_s3 + $0xb0] sm:$0xf] %vm6705_vm5, %v7189_v1  ;;  %v3872_v45 = vmul.f32 %v11334_v26, %v3728_v20  ;;  %v2934_v9 = vadd.f32 1.0, %v2790_v6  ;;  %vm5525_vm10 = vcmp.ge.f32.partialorder %v11219_v61, 0.0  ;;  %v4806_v18 = vmul.f32 %v4662_v49, %v2646_v44  ;;  %v215_v44 = vld [vmem:[#allocation2 + $0x198] sm:$0xff]  ;;  %v1575_v1 = vpop.f32.mrf.mxu1 }
 0x37c   :  { %v5381_v10 = vsub.f32 1.0, %v5237_v0  ;;  %v11389_v51 = vand.u32 2147483647, %v11379_v60  ;;  %v2723_v21 = vmul.f32 0.3275911, %v11382_v23  ;;  %v11400_v58 = vadd.f32 %v11283_v42, %v1994_v40  ;;  %v287_v49 = vld [vmem:[#allocation2 + $0x3d8] sm:$0xff] }
 0x37d   :  { %v4016_v13 = vadd.f32 -0.28449672, %v3872_v45  ;;  %7966 = vrcp.f32 %v2934_v9  ;;  %v5071_v43 = vmul.f32 1.442695, %v4808_v39  ;;  %v4923_v30 = vmul.f32 1.442695, %v4734_v4  ;;  %v7422_v9 = vpop.f32.mrf.mxu0 }
 0x37e   :  { %v11391_v31 = vpop.eup %7960  ;;  %v5669_v38 = vsub.f32 0.0, %v5381_v10  ;;  %v2795_v61 = vmul.f32 0.3275911, %v11389_v51  ;;  %v2867_v36 = vadd.f32 1.0, %v2723_v21  ;;  %v11405_v24 = vmul.f32 0.5, %v11243_v52  ;;  %v285_v4 = vld [vmem:[#allocation2 + $0x3c8] sm:$0xff] }
 0x37f   :  { %v4160_v33 = vmul.f32 %v11334_v26, %v4016_v13  ;;  %v3368_v16 = vmul.f32 1.0614054, %v11391_v31  ;;  %vm5456_vm11 = vcmp.ge.f32.partialorder %v11265_v63, 0.0  ;;  %v11409_v35 = vmul.f32 0.5, %v11286_v47  ;;  %v217_v63 = vld [vmem:[#allocation2 + $0x1a8] sm:$0xff] }
 0x380   :  { %v5813_v50 = vsel %vm5525_vm10, %v5381_v10, %v5669_v38  ;;  %v7963_v17 = vpop.eup %7962  ;;  %v5067_v27 = vmul.f32 1.442695, %v4806_v18  ;;  %7968 = vrcp.f32 %v2867_v36  ;;  %v2939_v5 = vadd.f32 1.0, %v2795_v61  ;;  %v218_v18 = vld [vmem:[#allocation2 + $0x1b0] sm:$0xff] }
 0x381   :  { %v5957_v7 = vadd.f32 1.0, %v5813_v50  ;;  %v4304_v28 = vadd.f32 0.2548296, %v4160_v33  ;;  %v3512_v22 = vadd.f32 -1.4531521, %v3368_v16  ;;  %7970 = vpow2.f32 %v5071_v43  ;;  %v290_v61 = vld [vmem:[#allocation2 + $0x3f0] sm:$0xff] }
 0x382   :  { %v11411_v32 = vpop.eup %7964  ;;  %v4595_v62 = vsub.f32 0.0, %v11382_v23  ;;  %7972 = vrcp.f32 %v2939_v5  ;;  %v11418_v47 = vmul.f32 0.70710677, %v11400_v58  ;;  %v4667_v39 = vsub.f32 0.0, %v11389_v51  ;;  %v216_v50 = vld [vmem:[#allocation2 + $0x1a0] sm:$0xff]  ;;  %v1290_v5 = vpop.f32.mrf.mxu0 }
 0x383   :  { %v6101_v48 = vmul.f32 %v5957_v7, %v2357_v12  ;;  %v4448_v8 = vmul.f32 %v11334_v26, %v4304_v28  ;;  %v3656_v52 = vmul.f32 %v11391_v31, %v3512_v22  ;;  %v3294_v19 = vmul.f32 1.0614054, %v11411_v32  ;;  %v213_v26 = vld [vmem:[#allocation2 + $0x188] sm:$0xff] }
 0x384   :  { %7974 = vpow2.f32 %v4923_v30  ;;  %v11422_v10 = vand.u32 2147483647, %v11418_v47  ;;  %v1774_v13 = vadd.f32 %v11339_v25, %v284_v55  ;;  %v1705_v38 = vadd.f32 %v11349_v15, %v215_v44  ;;  %v7494_v30 = vpop.f32.mrf.mxu1 }
 0x385   :  { %v7261_v20 = vpack.c.bf16 %v6101_v48, %v6101_v48  ;;  %v5168_v0 = vmul.f32 %v7963_v17, %v4448_v8  ;;  %v3800_v6 = vadd.f32 1.4214138, %v3656_v52  ;;  %v3438_v45 = vadd.f32 -1.4531521, %v3294_v19  ;;  %v288_v17 = vld [vmem:[#allocation2 + $0x3e0] sm:$0xff]  ;;  %v291_v52 = vld [vmem:[#allocation2 + $0x3f8] sm:$0xff] }
 0x386   :  { %7976 = vpow2.f32 %v5067_v27  ;;  %v4739_v33 = vmul.f32 %v4595_v62, %v11382_v23  ;;  %v2721_v16 = vmul.f32 0.3275911, %v11422_v10  ;;  %v1777_v43 = vadd.f32 %v11365_v2, %v287_v49  ;;  %1919 = vst.msk [vmem:[#allocation2 + $0x3c0] sm:$0xff] %vm19_vm1, %v1774_v13  ;;  %1850 = vst.msk [vmem:[#allocation2 + $0x198] sm:$0xff] %vm19_vm1, %v1705_v38  ;;  %v219_v27 = vld [vmem:[#allocation2 + $0x1b8] sm:$0xff]  ;;  %v289_v62 = vld [vmem:[#allocation2 + $0x3e8] sm:$0xff]  ;;  %v1578_v44 = vpop.f32.mrf.mxu1 }
 0x387   :  { %6822 = vst.msk [vmem:[%s12756_s3 + $0x1d0] sm:$0xf] %vm6705_vm5, %v7261_v20  ;;  %v5312_v40 = vsub.f32 1.0, %v5168_v0  ;;  %v3944_v12 = vmul.f32 %v11391_v31, %v3800_v6  ;;  %v3582_v21 = vmul.f32 %v11411_v32, %v3438_v45  ;;  %v1703_v25 = vadd.f32 %v11370_v14, %v213_v26 }
 0x388   :  { %v1775_v15 = vadd.f32 %v11384_v53, %v285_v4  ;;  %v4811_v23 = vmul.f32 %v4667_v39, %v11389_v51  ;;  %v2865_v22 = vadd.f32 1.0, %v2721_v16  ;;  %1922 = vst.msk [vmem:[#allocation2 + $0x3d8] sm:$0xff] %vm19_vm1, %v1777_v43  ;;  %v1708_v2 = vadd.f32 %v11394_v56, %v218_v18  ;;  %v222_v39 = vld [vmem:[#allocation2 + $0x1d0] sm:$0xff]  ;;  %v7425_v4 = vpop.f32.mrf.mxu0 }
 0x389   :  { %v5600_v36 = vsub.f32 0.0, %v5312_v40  ;;  %v4088_v7 = vadd.f32 -0.28449672, %v3944_v12  ;;  %v3726_v28 = vadd.f32 1.4214138, %v3582_v21  ;;  %1848 = vst.msk [vmem:[#allocation2 + $0x188] sm:$0xff] %vm19_vm1, %v1703_v25  ;;  %v1780_v53 = vadd.f32 %v11402_v41, %v290_v61 }
 0x38a   :  { %v11442_v48 = vpop.eup %7966  ;;  %1920 = vst.msk [vmem:[#allocation2 + $0x3c8] sm:$0xff] %vm19_vm1, %v1775_v15  ;;  %v1706_v51 = vadd.f32 %v1287_v54, %v216_v50  ;;  %7978 = vrcp.f32 %v2865_v22  ;;  %1853 = vst.msk [vmem:[#allocation2 + $0x1b0] sm:$0xff] %vm19_vm1, %v1708_v2  ;;  %v4933_v0 = vmul.f32 1.442695, %v4739_v33  ;;  %v1778_v41 = vadd.f32 %v1575_v1, %v288_v17 }
 0x38b   :  { %v5744_v8 = vsel %vm5456_vm11, %v5312_v40, %v5600_v36  ;;  %v4232_v14 = vmul.f32 %v11391_v31, %v4088_v7  ;;  %v3870_v56 = vmul.f32 %v11411_v32, %v3726_v28  ;;  %v3366_v19 = vmul.f32 1.0614054, %v11442_v48  ;;  %1925 = vst.msk [vmem:[#allocation2 + $0x3f0] sm:$0xff] %vm19_vm1, %v1780_v53 }
 0x38c   :  { %v5888_v55 = vadd.f32 1.0, %v5744_v8  ;;  %1851 = vst.msk [vmem:[#allocation2 + $0x1a0] sm:$0xff] %vm19_vm1, %v1706_v51  ;;  %v1709_v54 = vadd.f32 %v7422_v9, %v219_v27  ;;  %vm5528_vm12 = vcmp.ge.f32.partialorder %v11307_v59, 0.0  ;;  %v1781_v45 = vadd.f32 %v7494_v30, %v291_v52  ;;  %1923 = vst.msk [vmem:[#allocation2 + $0x3e0] sm:$0xff] %vm19_vm1, %v1778_v41 }
 0x38d   :  { %v4376_v20 = vadd.f32 0.2548296, %v4232_v14  ;;  %v4014_v49 = vadd.f32 -0.28449672, %v3870_v56  ;;  %v3510_v26 = vadd.f32 -1.4531521, %v3366_v19  ;;  %v11457_v40 = vpop.eup %7968  ;;  %v1707_v1 = vadd.f32 %v1290_v5, %v217_v63 }
 0x38e   :  { %v6032_v6 = vmul.f32 %v5888_v55, %v11405_v24  ;;  %v4593_v13 = vsub.f32 0.0, %v11422_v10  ;;  %1854 = vst.msk [vmem:[#allocation2 + $0x1b8] sm:$0xff] %vm19_vm1, %v1709_v54  ;;  %v1779_v9 = vadd.f32 %v1578_v44, %v289_v62  ;;  %v7971_v24 = vpop.eup %7970  ;;  %v3299_v33 = vmul.f32 1.0614054, %v11457_v40  ;;  %v2066_v16 = vld [vmem:[#allocation2 + $0x3c0] sm:$0xff]  ;;  %v1997_v43 = vld [vmem:[#allocation2 + $0x198] sm:$0xff] }
 0x38f   :  { %v4520_v12 = vmul.f32 %v11391_v31, %v4376_v20  ;;  %v4158_v18 = vmul.f32 %v11411_v32, %v4014_v49  ;;  %v3654_v21 = vmul.f32 %v11442_v48, %v3510_v26  ;;  %1926 = vst.msk [vmem:[#allocation2 + $0x3f8] sm:$0xff] %vm19_vm1, %v1781_v45  ;;  %v11467_v31 = vpop.eup %7972  ;;  %v5077_v50 = vmul.f32 1.442695, %v4811_v23  ;;  %1852 = vst.msk [vmem:[#allocation2 + $0x1a8] sm:$0xff] %vm19_vm1, %v1707_v1 }
 0x390   :  { %v7192_v38 = vpack.c.bf16 %v6032_v6, %v6032_v6  ;;  %v11470_v30 = vadd.f32 %v11283_v42, %v2066_v16  ;;  %1924 = vst.msk [vmem:[#allocation2 + $0x3e8] sm:$0xff] %vm19_vm1, %v1779_v9  ;;  %v1712_v36 = vadd.f32 %v7425_v4, %v222_v39  ;;  %v3443_v28 = vadd.f32 -1.4531521, %v3299_v33  ;;  %v2069_v33 = vld [vmem:[#allocation2 + $0x3d8] sm:$0xff] }
 0x391   :  { %v5240_v61 = vmul.f32 %v7971_v24, %v4520_v12  ;;  %v7975_v7 = vpop.eup %7974  ;;  %v4302_v25 = vadd.f32 0.2548296, %v4158_v18  ;;  %v3798_v15 = vadd.f32 1.4214138, %v3654_v21  ;;  %v11479_v22 = vadd.f32 %v11283_v42, %v1997_v43 }
 0x392   :  { %6753 = vst.msk [vmem:[%s12756_s3 + $0xbc] sm:$0xf] %vm6705_vm5, %v7192_v38  ;;  %v3371_v17 = vmul.f32 1.0614054, %v11467_v31  ;;  %v4737_v27 = vmul.f32 %v4593_v13, %v11422_v10  ;;  %v11484_v5 = vmul.f32 0.70710677, %v11470_v30  ;;  %v3587_v53 = vmul.f32 %v11457_v40, %v3443_v28 }
 0x393   :  { %v7977_v23 = vpop.eup %7976  ;;  %v5384_v2 = vsub.f32 1.0, %v5240_v61  ;;  %1857 = vst.msk [vmem:[#allocation2 + $0x1d0] sm:$0xff] %vm19_vm1, %v1712_v36  ;;  %v4446_v8 = vmul.f32 %v11411_v32, %v4302_v25  ;;  %v3942_v14 = vmul.f32 %v11442_v48, %v3798_v15  ;;  %7980 = vpow2.f32 %v4933_v0 }
 0x394   :  { %v3515_v52 = vadd.f32 -1.4531521, %v3371_v17  ;;  %7982 = vpow2.f32 %v5077_v50  ;;  %v11491_v55 = vand.u32 2147483647, %v11484_v5  ;;  %v3731_v19 = vadd.f32 1.4214138, %v3587_v53 }
 0x395   :  { %v5672_v51 = vsub.f32 0.0, %v5384_v2  ;;  %v5166_v56 = vmul.f32 %v7975_v7, %v4446_v8  ;;  %v4086_v10 = vadd.f32 -0.28449672, %v3942_v14  ;;  %v11494_v63 = vmul.f32 0.70710677, %v11479_v22 }
 0x396   :  { %v3659_v62 = vmul.f32 %v11467_v31, %v3515_v52  ;;  %v4929_v44 = vmul.f32 1.442695, %v4737_v27  ;;  %v2793_v20 = vmul.f32 0.3275911, %v11491_v55  ;;  %v3875_v6 = vmul.f32 %v11457_v40, %v3731_v19  ;;  %v1995_v27 = vld [vmem:[#allocation2 + $0x188] sm:$0xff] }
 0x397   :  { %v5816_v32 = vsel %vm5528_vm12, %v5384_v2, %v5672_v51  ;;  %v5310_v41 = vsub.f32 1.0, %v5166_v56  ;;  %v4230_v54 = vmul.f32 %v11442_v48, %v4086_v10  ;;  %v11502_v49 = vpop.eup %7978  ;;  %v11505_v39 = vand.u32 2147483647, %v11494_v63 }
 0x398   :  { %v5960_v0 = vadd.f32 1.0, %v5816_v32  ;;  %v3803_v26 = vadd.f32 1.4214138, %v3659_v62  ;;  %v2937_v45 = vadd.f32 1.0, %v2793_v20  ;;  %v4019_v13 = vadd.f32 -0.28449672, %v3875_v6 }
 0x399   :  { %v5598_v4 = vsub.f32 0.0, %v5310_v41  ;;  %v4374_v12 = vadd.f32 0.2548296, %v4230_v54  ;;  %vm5454_vm13 = vcmp.ge.f32.partialorder %v11321_v57, 0.0  ;;  %v3297_v9 = vmul.f32 1.0614054, %v11502_v49 }
 0x39a   :  { %v6104_v59 = vmul.f32 %v5960_v0, %v11409_v35  ;;  %v3947_v1 = vmul.f32 %v11467_v31, %v3803_v26  ;;  %7984 = vrcp.f32 %v2937_v45  ;;  %v4163_v21 = vmul.f32 %v11457_v40, %v4019_v13 }
 0x39b   :  { %v5742_v38 = vsel %vm5454_vm13, %v5310_v41, %v5598_v4  ;;  %v4518_v18 = vmul.f32 %v11442_v48, %v4374_v12  ;;  %v2286_v16 = vmul.f32 0.5, %v11310_v34  ;;  %v3441_v61 = vadd.f32 -1.4531521, %v3297_v9  ;;  %v2067_v9 = vld [vmem:[#allocation2 + $0x3c8] sm:$0xff] }
 0x39c   :  { %v7264_v24 = vpack.c.bf16 %v6104_v59, %v6104_v59  ;;  %v5886_v35 = vadd.f32 1.0, %v5742_v38  ;;  %v4091_v43 = vadd.f32 -0.28449672, %v3947_v1  ;;  %v4307_v50 = vadd.f32 0.2548296, %v4163_v21 }
 0x39d   :  { %v5238_v57 = vmul.f32 %v7977_v23, %v4518_v18  ;;  %7986 = vpow2.f32 %v4929_v44  ;;  %v2724_v36 = vmul.f32 0.3275911, %v11505_v39  ;;  %v3585_v25 = vmul.f32 %v11502_v49, %v3441_v61 }
 0x39e   :  { %6825 = vst.msk [vmem:[%s12756_s3 + $0x1dc] sm:$0xf] %vm6705_vm5, %v7264_v24  ;;  %v6030_v7 = vmul.f32 %v5886_v35, %v2286_v16  ;;  %v4235_v48 = vmul.f32 %v11467_v31, %v4091_v43  ;;  %v11522_v34 = vadd.f32 %v11283_v42, %v2069_v33  ;;  %v4451_v28 = vmul.f32 %v11457_v40, %v4307_v50 }
 0x39f   :  { %v5382_v15 = vsub.f32 1.0, %v5238_v57  ;;  %v4665_v2 = vsub.f32 0.0, %v11491_v55  ;;  %v2868_v17 = vadd.f32 1.0, %v2724_v36  ;;  %v2358_v14 = vmul.f32 0.5, %v11332_v11 }
 0x3a0   :  { %v7981_v23 = vpop.eup %7980  ;;  %v7190_v8 = vpack.c.bf16 %v6030_v7, %v6030_v7  ;;  %v4379_v53 = vadd.f32 0.2548296, %v4235_v48  ;;  %v3729_v51 = vadd.f32 1.4214138, %v3585_v25  ;;  %vm5526_vm14 = vcmp.ge.f32.partialorder %v11347_v3, 0.0 }
 0x3a1   :  { %v7983_v52 = vpop.eup %7982  ;;  %v5670_v56 = vsub.f32 0.0, %v5382_v15  ;;  %v5171_v10 = vmul.f32 %v7981_v23, %v4451_v28  ;;  %7988 = vrcp.f32 %v2868_v17  ;;  %v11535_v32 = vmul.f32 0.70710677, %v11522_v34 }
 0x3a2   :  { %6751 = vst.msk [vmem:[%s12756_s3 + $0xb4] sm:$0xf] %vm6705_vm5, %v7190_v8  ;;  %v4523_v40 = vmul.f32 %v11467_v31, %v4379_v53  ;;  %v3873_v19 = vmul.f32 %v11502_v49, %v3729_v51  ;;  %v11538_v11 = vadd.f32 %v11283_v42, %v1995_v27  ;;  %v2291_v3 = vmul.f32 0.5, %v11354_v37 }
 0x3a3   :  { %v5814_v62 = vsel %vm5526_vm14, %v5382_v15, %v5670_v56  ;;  %v5315_v44 = vsub.f32 1.0, %v5171_v10  ;;  %v4809_v20 = vmul.f32 %v4665_v2, %v11491_v55  ;;  %v11543_v6 = vand.u32 2147483647, %v11535_v32  ;;  %v2000_v2 = vld [vmem:[#allocation2 + $0x1b0] sm:$0xff] }
 0x3a4   :  { %v5958_v0 = vadd.f32 1.0, %v5814_v62  ;;  %v5243_v41 = vmul.f32 %v7983_v52, %v4523_v40  ;;  %v4017_v54 = vadd.f32 -0.28449672, %v3873_v19  ;;  %vm5459_vm15 = vcmp.ge.f32.partialorder %v11368_v29, 0.0  ;;  %v2072_v10 = vld [vmem:[#allocation2 + $0x3f0] sm:$0xff] }
 0x3a5   :  { %v5603_v31 = vsub.f32 0.0, %v5315_v44  ;;  %v4596_v26 = vsub.f32 0.0, %v11505_v39  ;;  %v11548_v45 = vmul.f32 0.70710677, %v11538_v11  ;;  %v2796_v55 = vmul.f32 0.3275911, %v11543_v6 }
 0x3a6   :  { %v6102_v59 = vmul.f32 %v5958_v0, %v2358_v14  ;;  %v5387_v4 = vsub.f32 1.0, %v5243_v41  ;;  %v4161_v37 = vmul.f32 %v11502_v49, %v4017_v54  ;;  %vm5531_vm0 = vcmp.ge.f32.partialorder %v11379_v60, 0.0 }
 0x3a7   :  { %v11552_v12 = vpop.eup %7984  ;;  %v5747_v13 = vsel %vm5459_vm15, %v5315_v44, %v5603_v31  ;;  %v5073_v1 = vmul.f32 1.442695, %v4809_v20  ;;  %v11556_v29 = vand.u32 2147483647, %v11548_v45  ;;  %v4740_v16 = vmul.f32 %v4596_v26, %v11505_v39 }
 0x3a8   :  { %v7262_v24 = vpack.c.bf16 %v6102_v59, %v6102_v59  ;;  %v5891_v38 = vadd.f32 1.0, %v5747_v13  ;;  %v5675_v18 = vsub.f32 0.0, %v5387_v4  ;;  %v4305_v21 = vadd.f32 0.2548296, %v4161_v37 }
 0x3a9   :  { %v3369_v33 = vmul.f32 1.0614054, %v11552_v12  ;;  %v2940_v35 = vadd.f32 1.0, %v2796_v55  ;;  %v2722_v43 = vmul.f32 0.3275911, %v11556_v29  ;;  %v11567_v36 = vadd.f32 %v11283_v42, %v2067_v9 }
 0x3aa   :  { %v7987_v61 = vpop.eup %7986  ;;  %6823 = vst.msk [vmem:[%s12756_s3 + $0x1d4] sm:$0xf] %vm6705_vm5, %v7262_v24  ;;  %v6035_v60 = vmul.f32 %v5891_v38, %v2291_v3  ;;  %v5819_v57 = vsel %vm5531_vm0, %v5387_v4, %v5675_v18  ;;  %v4449_v50 = vmul.f32 %v11502_v49, %v4305_v21  ;;  %v2363_v7 = vmul.f32 0.5, %v11363_v46 }
 0x3ab   :  { %v5963_v48 = vadd.f32 1.0, %v5819_v57  ;;  %v3513_v39 = vadd.f32 -1.4531521, %v3369_v33  ;;  %7990 = vrcp.f32 %v2940_v35  ;;  %v2866_v28 = vadd.f32 1.0, %v2722_v43  ;;  %v1998_v35 = vld [vmem:[#allocation2 + $0x1a0] sm:$0xff] }
 0x3ac   :  { %v7195_v25 = vpack.c.bf16 %v6035_v60, %v6035_v60  ;;  %v5169_v15 = vmul.f32 %v7987_v61, %v4449_v50  ;;  %7992 = vpow2.f32 %v5073_v1  ;;  %v4935_v23 = vmul.f32 1.442695, %v4740_v16 }
 0x3ad   :  { %v6107_v17 = vmul.f32 %v5963_v48, %v2363_v7  ;;  %v3657_v27 = vmul.f32 %v11552_v12, %v3513_v39  ;;  %v4668_v49 = vsub.f32 0.0, %v11543_v6  ;;  %7994 = vrcp.f32 %v2866_v28  ;;  %v2070_v28 = vld [vmem:[#allocation2 + $0x3e0] sm:$0xff] }
 0x3ae   :  { %v11571_v8 = vpop.eup %7988  ;;  %6756 = vst.msk [vmem:[%s12756_s3 + $0xc8] sm:$0xf] %vm6705_vm5, %v7195_v25  ;;  %v5313_v46 = vsub.f32 1.0, %v5169_v15  ;;  %v11579_v14 = vmul.f32 0.70710677, %v11567_v36  ;;  %v11583_v56 = vadd.f32 %v11283_v42, %v2000_v2  ;;  %v2289_v40 = vmul.f32 0.5, %v11400_v58 }
 0x3af   :  { %v7267_v53 = vpack.c.bf16 %v6107_v17, %v6107_v17  ;;  %v3801_v51 = vadd.f32 1.4214138, %v3657_v27  ;;  %v3300_v52 = vmul.f32 1.0614054, %v11571_v8  ;;  %vm5457_vm2 = vcmp.ge.f32.partialorder %v11418_v47, 0.0 }
 0x3b0   :  { %v5601_v19 = vsub.f32 0.0, %v5313_v46  ;;  %v2650_v62 = vand.u32 2147483647, %v11579_v14  ;;  %7996 = vpow2.f32 %v4935_v23  ;;  %v11594_v20 = vmul.f32 0.70710677, %v11583_v56 }
 0x3b1   :  { %6828 = vst.msk [vmem:[%s12756_s3 + $0x1e8] sm:$0xf] %vm6705_vm5, %v7267_v53  ;;  %v3945_v3 = vmul.f32 %v11552_v12, %v3801_v51  ;;  %v3444_v44 = vadd.f32 -1.4531521, %v3300_v52  ;;  %v4812_v58 = vmul.f32 %v4668_v49, %v11543_v6  ;;  %v11598_v47 = vadd.f32 %v11283_v42, %v2072_v10 }
 0x3b2   :  { %v5745_v0 = vsel %vm5457_vm2, %v5313_v46, %v5601_v19  ;;  %v2794_v41 = vmul.f32 0.3275911, %v2650_v62  ;;  %v11602_v59 = vand.u32 2147483647, %v11594_v20  ;;  %v11605_v4 = vmul.f32 0.5, %v11470_v30 }
 0x3b3   :  { %v5889_v54 = vadd.f32 1.0, %v5745_v0  ;;  %v4089_v31 = vadd.f32 -0.28449672, %v3945_v3  ;;  %v3588_v26 = vmul.f32 %v11571_v8, %v3444_v44  ;;  %v11608_v37 = vmul.f32 0.5, %v11479_v22 }
 0x3b4   :  { %v4594_v55 = vsub.f32 0.0, %v11556_v29  ;;  %v2938_v6 = vadd.f32 1.0, %v2794_v41  ;;  %v2727_v24 = vmul.f32 0.3275911, %v11602_v59  ;;  %v5079_v38 = vmul.f32 1.442695, %v4812_v58 }
 0x3b5   :  { %v6033_v13 = vmul.f32 %v5889_v54, %v2289_v40  ;;  %v4233_v1 = vmul.f32 %v11552_v12, %v4089_v31  ;;  %v3732_v9 = vadd.f32 1.4214138, %v3588_v26  ;;  %v4666_v18 = vsub.f32 0.0, %v2650_v62 }
 0x3b6   :  { %7998 = vrcp.f32 %v2938_v6  ;;  %v11614_v21 = vmul.f32 0.70710677, %v11598_v47  ;;  %v2871_v16 = vadd.f32 1.0, %v2727_v24  ;;  %vm5529_vm3 = vcmp.ge.f32.partialorder %v11484_v5, 0.0 }
 0x3b7   :  { %v7193_v30 = vpack.c.bf16 %v6033_v13, %v6033_v13  ;;  %v4377_v33 = vadd.f32 0.2548296, %v4233_v1  ;;  %v3876_v22 = vmul.f32 %v11571_v8, %v3732_v9  ;;  %v11621_v61 = vmul.f32 0.5, %v11522_v34 }
 0x3b8   :  { %v11617_v43 = vpop.eup %7990  ;;  %v4738_v60 = vmul.f32 %v4594_v55, %v11556_v29  ;;  %v2655_v57 = vand.u32 2147483647, %v11614_v21  ;;  %8000 = vrcp.f32 %v2871_v16  ;;  %v11632_v25 = vmul.f32 0.5, %v11538_v11 }
 0x3b9   :  { %6754 = vst.msk [vmem:[%s12756_s3 + $0xc0] sm:$0xf] %vm6705_vm5, %v7193_v30  ;;  %v4521_v50 = vmul.f32 %v11552_v12, %v4377_v33  ;;  %v4020_v7 = vadd.f32 -0.28449672, %v3876_v22  ;;  %v3372_v48 = vmul.f32 1.0614054, %v11617_v43  ;;  %v7993_v39 = vpop.eup %7992  ;;  %v4810_v34 = vmul.f32 %v4666_v18, %v2650_v62 }
 0x3ba   :  { %v2799_v15 = vmul.f32 0.3275911, %v2655_v57  ;;  %v11635_v29 = vadd.f32 %v11283_v42, %v1998_v35  ;;  %v11637_v2 = vpop.eup %7994  ;;  %8002 = vpow2.f32 %v5079_v38  ;;  %v4931_v46 = vmul.f32 1.442695, %v4738_v60 }
 0x3bb   :  { %v5241_v17 = vmul.f32 %v7993_v39, %v4521_v50  ;;  %v4164_v27 = vmul.f32 %v11571_v8, %v4020_v7  ;;  %v3516_v12 = vadd.f32 -1.4531521, %v3372_v48  ;;  %v3298_v23 = vmul.f32 1.0614054, %v11637_v2 }
 0x3bc   :  { %v11642_v49 = vmul.f32 0.5, %v11567_v36  ;;  %v2943_v11 = vadd.f32 1.0, %v2799_v15  ;;  %v11646_v10 = vadd.f32 %v11283_v42, %v2070_v28  ;;  %vm5460_vm4 = vcmp.ge.f32.partialorder %v11494_v63, 0.0  ;;  %v2001_v63 = vld [vmem:[#allocation2 + $0x1b8] sm:$0xff] }
 0x3bd   :  { %v5385_v53 = vsub.f32 1.0, %v5241_v17  ;;  %v4308_v51 = vadd.f32 0.2548296, %v4164_v27  ;;  %v3660_v52 = vmul.f32 %v11617_v43, %v3516_v12  ;;  %v7997_v40 = vpop.eup %7996  ;;  %v3442_v19 = vadd.f32 -1.4531521, %v3298_v23 }
 0x3be   :  { %v5075_v62 = vmul.f32 1.442695, %v4810_v34  ;;  %8004 = vrcp.f32 %v2943_v11  ;;  %v11650_v3 = vmul.f32 0.70710677, %v11635_v29  ;;  %v4599_v58 = vsub.f32 0.0, %v11602_v59 }
 0x3bf   :  { %v5673_v44 = vsub.f32 0.0, %v5385_v53  ;;  %v4452_v36 = vmul.f32 %v11571_v8, %v4308_v51  ;;  %v3804_v0 = vadd.f32 1.4214138, %v3660_v52  ;;  %v3586_v41 = vmul.f32 %v11637_v2, %v3442_v19 }
 0x3c0   :  { %8006 = vpow2.f32 %v4931_v46  ;;  %v4671_v42 = vsub.f32 0.0, %v2655_v57  ;;  %v11656_v54 = vand.u32 2147483647, %v11650_v3  ;;  %v11662_v6 = vmul.f32 0.70710677, %v11646_v10 }
 0x3c1   :  { %v5817_v31 = vsel %vm5529_vm3, %v5385_v53, %v5673_v44  ;;  %v5172_v26 = vmul.f32 %v7997_v40, %v4452_v36  ;;  %v3948_v55 = vmul.f32 %v11617_v43, %v3804_v0  ;;  %v3730_v13 = vadd.f32 1.4214138, %v3586_v41 }
 0x3c2   :  { %v5961_v8 = vadd.f32 1.0, %v5817_v31  ;;  %8008 = vpow2.f32 %v5075_v62  ;;  %v2725_v1 = vmul.f32 0.3275911, %v11656_v54  ;;  %v4743_v18 = vmul.f32 %v4599_v58, %v11602_v59 }
 0x3c3   :  { %v11665_v9 = vpop.eup %7998  ;;  %v5316_v24 = vsub.f32 1.0, %v5172_v26  ;;  %v4092_v38 = vadd.f32 -0.28449672, %v3948_v55  ;;  %v11669_v5 = vand.u32 2147483647, %v11662_v6  ;;  %v3874_v33 = vmul.f32 %v11637_v2, %v3730_v13  ;;  %v2073_v26 = vld [vmem:[#allocation2 + $0x3f8] sm:$0xff] }
 0x3c4   :  { %v6105_v30 = vmul.f32 %v5961_v8, %v11605_v4  ;;  %v3370_v22 = vmul.f32 1.0614054, %v11665_v9  ;;  %v2869_v16 = vadd.f32 1.0, %v2725_v1  ;;  %v4815_v50 = vmul.f32 %v4671_v42, %v2655_v57 }
 0x3c5   :  { %v5604_v35 = vsub.f32 0.0, %v5316_v24  ;;  %v4236_v60 = vmul.f32 %v11617_v43, %v4092_v38  ;;  %v2797_v7 = vmul.f32 0.3275911, %v11669_v5  ;;  %v11676_v48 = vpop.eup %8000  ;;  %v4018_v59 = vadd.f32 -0.28449672, %v3874_v33 }
 0x3c6   :  { %v7265_v39 = vpack.c.bf16 %v6105_v30, %v6105_v30  ;;  %v3514_v34 = vadd.f32 -1.4531521, %v3370_v22  ;;  %8010 = vrcp.f32 %v2869_v16  ;;  %v3303_v28 = vmul.f32 1.0614054, %v11676_v48 }
 0x3c7   :  { %v5748_v4 = vsel %vm5460_vm4, %v5316_v24, %v5604_v35  ;;  %v4380_v15 = vadd.f32 0.2548296, %v4236_v60  ;;  %v4941_v17 = vmul.f32 1.442695, %v4743_v18  ;;  %v8003_v27 = vpop.eup %8002  ;;  %vm5532_vm6 = vcmp.ge.f32.partialorder %v11535_v32, 0.0 }
 0x3c8   :  { %6826 = vst.msk [vmem:[%s12756_s3 + $0x1e0] sm:$0xf] %vm6705_vm5, %v7265_v39  ;;  %v5892_v57 = vadd.f32 1.0, %v5748_v4  ;;  %v4162_v12 = vmul.f32 %v11637_v2, %v4018_v59  ;;  %v3658_v23 = vmul.f32 %v11665_v9, %v3514_v34  ;;  %v2941_v46 = vadd.f32 1.0, %v2797_v7 }
 0x3c9   :  { %v4524_v11 = vmul.f32 %v11617_v43, %v4380_v15  ;;  %v3447_v53 = vadd.f32 -1.4531521, %v3303_v28  ;;  %v5085_v51 = vmul.f32 1.442695, %v4815_v50  ;;  %v4597_v52 = vsub.f32 0.0, %v11656_v54 }
 0x3ca   :  { %v6036_v40 = vmul.f32 %v5892_v57, %v11608_v37  ;;  %v4306_v19 = vadd.f32 0.2548296, %v4162_v12  ;;  %v3802_v62 = vadd.f32 1.4214138, %v3658_v23  ;;  %8012 = vrcp.f32 %v2941_v46  ;;  %v11698_v43 = vld [vmem:[%s12755_s2] ss:$0 sm:$0xff] }
 0x3cb   :  { %v11691_v44 = vpop.eup %8004  ;;  %v5244_v36 = vmul.f32 %v8003_v27, %v4524_v11  ;;  %vm5458_vm7 = vcmp.ge.f32.partialorder %v11548_v45, 0.0  ;;  %v3591_v0 = vmul.f32 %v11676_v48, %v3447_v53  ;;  %8014 = vpow2.f32 %v4941_v17 }
 0x3cc   :  { %v11701_v58 = vadd.f32 %v11698_v43, %v2001_v63  ;;  %v7196_v37 = vpack.c.bf16 %v6036_v40, %v6036_v40  ;;  %v4450_v41 = vmul.f32 %v11637_v2, %v4306_v19  ;;  %v3946_v42 = vmul.f32 %v11665_v9, %v3802_v62 }
 0x3cd   :  { %v3375_v31 = vmul.f32 1.0614054, %v11691_v44  ;;  %v8007_v55 = vpop.eup %8006  ;;  %v5388_v8 = vsub.f32 1.0, %v5244_v36  ;;  %v3735_v13 = vadd.f32 1.4214138, %v3591_v0  ;;  %8016 = vpow2.f32 %v5085_v51 }
 0x3ce   :  { %v4741_v1 = vmul.f32 %v4597_v52, %v11656_v54  ;;  %6757 = vst.msk [vmem:[%s12756_s3 + $0xcc] sm:$0xf] %vm6705_vm5, %v7196_v37  ;;  %v5170_v24 = vmul.f32 %v8007_v55, %v4450_v41  ;;  %v4090_v38 = vadd.f32 -0.28449672, %v3946_v42  ;;  %v11712_v2 = vmul.f32 0.70710677, %v11701_v58 }
 0x3cf   :  { %v3519_v18 = vadd.f32 -1.4531521, %v3375_v31  ;;  %v8009_v30 = vpop.eup %8008  ;;  %v5676_v33 = vsub.f32 0.0, %v5388_v8  ;;  %v3879_v22 = vmul.f32 %v11676_v48, %v3735_v13  ;;  %v4669_v16 = vsub.f32 0.0, %v11669_v5 }
 0x3d0   :  { %v11717_v35 = vadd.f32 %v11698_v43, %v2073_v26  ;;  %v5314_v54 = vsub.f32 1.0, %v5170_v24  ;;  %v4234_v60 = vmul.f32 %v11665_v9, %v4090_v38  ;;  %v11722_v7 = vand.u32 2147483647, %v11712_v2  ;;  %v1999_v24 = vld [vmem:[#allocation2 + $0x1a8] sm:$0xff] }
 0x3d1   :  { %v3663_v50 = vmul.f32 %v11691_v44, %v3519_v18  ;;  %v5820_v39 = vsel %vm5532_vm6, %v5388_v8, %v5676_v33  ;;  %v11727_v59 = vmul.f32 0.5, %v11583_v56  ;;  %v4023_v34 = vadd.f32 -0.28449672, %v3879_v22 }
 0x3d2   :  { %v4937_v4 = vmul.f32 1.442695, %v4741_v1  ;;  %v5964_v15 = vadd.f32 1.0, %v5820_v39  ;;  %v5602_v28 = vsub.f32 0.0, %v5314_v54  ;;  %v4378_v17 = vadd.f32 0.2548296, %v4234_v60 }
 0x3d3   :  { %v3807_v27 = vadd.f32 1.4214138, %v3663_v50  ;;  %v11729_v57 = vpop.eup %8010  ;;  %vm5530_vm8 = vcmp.ge.f32.partialorder %v11579_v14, 0.0  ;;  %v4167_v12 = vmul.f32 %v11676_v48, %v4023_v34  ;;  %v4813_v23 = vmul.f32 %v4669_v16, %v11669_v5  ;;  %v11744_v5 = vpop.f32.mrf.mxu1 }
 0x3d4   :  { %v2728_v32 = vmul.f32 0.3275911, %v11722_v7  ;;  %v11736_v46 = vmul.f32 0.70710677, %v11717_v35  ;;  %v6108_v56 = vmul.f32 %v5964_v15, %v11621_v61  ;;  %v5746_v63 = vsel %vm5458_vm7, %v5314_v54, %v5602_v28  ;;  %v11747_v61 = vpop.f32.mrf.mxu0 }
 0x3d5   :  { %v4522_v11 = vmul.f32 %v11665_v9, %v4378_v17  ;;  %v3951_v53 = vmul.f32 %v11691_v44, %v3807_v27  ;;  %v5890_v51 = vadd.f32 1.0, %v5746_v63  ;;  %v4311_v52 = vadd.f32 0.2548296, %v4167_v12  ;;  %v11763_v38 = vpop.f32.mrf.mxu1 }
 0x3d6   :  { %v3301_v40 = vmul.f32 1.0614054, %v11729_v57  ;;  %v2872_v19 = vadd.f32 1.0, %v2728_v32  ;;  %v7268_v62 = vpack.c.bf16 %v6108_v56, %v6108_v56  ;;  %vm5463_vm9 = vcmp.ge.f32.partialorder %v11594_v20, 0.0  ;;  %v11766_v54 = vpop.f32.mrf.mxu0 }
 0x3d7   :  { %v5242_v36 = vmul.f32 %v8009_v30, %v4522_v11  ;;  %v4095_v0 = vadd.f32 -0.28449672, %v3951_v53  ;;  %8018 = vpow2.f32 %v4937_v4  ;;  %v11749_v45 = vpop.eup %8012  ;;  %v6034_v9 = vmul.f32 %v5890_v51, %v11632_v25  ;;  %v11779_v32 = vpop.f32.mrf.mxu1 }
 0x3d8   :  { %v4455_v37 = vmul.f32 %v11676_v48, %v4311_v52  ;;  %v3445_v41 = vadd.f32 -1.4531521, %v3301_v40  ;;  %8020 = vrcp.f32 %v2872_v19  ;;  %v8015_v42 = vpop.eup %8014  ;;  %6829 = vst.msk [vmem:[%s12756_s3 + $0x1ec] sm:$0xf] %vm6705_vm5, %v7268_v62  ;;  %v3373_v55 = vmul.f32 1.0614054, %v11749_v45  ;;  %v11785_v14 = vpop.f32.mrf.mxu0 }
 0x3d9   :  { %v5386_v31 = vsub.f32 1.0, %v5242_v36  ;;  %v4239_v26 = vmul.f32 %v11691_v44, %v4095_v0  ;;  %v5081_v8 = vmul.f32 1.442695, %v4813_v23  ;;  %v7194_v13 = vpack.c.bf16 %v6034_v9, %v6034_v9  ;;  %v2071_v62 = vld [vmem:[#allocation2 + $0x3e8] sm:$0xff]  ;;  %v11799_v20 = vpop.f32.mrf.mxu1 }
 0x3da   :  { %v5175_v1 = vmul.f32 %v8015_v42, %v4455_v37  ;;  %v3589_v25 = vmul.f32 %v11729_v57, %v3445_v41  ;;  %v11761_v48 = vand.u32 2147483647, %v11736_v46  ;;  %v8017_v18 = vpop.eup %8016  ;;  %v3517_v22 = vadd.f32 -1.4531521, %v3373_v55 }
 0x3db   :  { %v5674_v30 = vsub.f32 0.0, %v5386_v31  ;;  %v4383_v33 = vadd.f32 0.2548296, %v4239_v26  ;;  %v4600_v16 = vsub.f32 0.0, %v11722_v7  ;;  %6755 = vst.msk [vmem:[%s12756_s3 + $0xc4] sm:$0xf] %vm6705_vm5, %v7194_v13  ;;  %8022 = vpow2.f32 %v5081_v8  ;;  %v11805_v26 = vpop.f32.mrf.mxu0 }
 0x3dc   :  { %v5319_v60 = vsub.f32 1.0, %v5175_v1  ;;  %v2367_v50 = vmul.f32 0.5, %v11598_v47  ;;  %v3733_v39 = vadd.f32 1.4214138, %v3589_v25  ;;  %v2800_v34 = vmul.f32 0.3275911, %v11761_v48 }
 0x3dd   :  { %v5818_v4 = vsel %vm5530_vm8, %v5386_v31, %v5674_v30  ;;  %v4527_v15 = vmul.f32 %v11691_v44, %v4383_v33  ;;  %v3661_v28 = vmul.f32 %v11749_v45, %v3517_v22  ;;  %v4744_v63 = vmul.f32 %v4600_v16, %v11722_v7  ;;  %v2004_v31 = vld [vmem:[#allocation2 + $0x1d0] sm:$0xff] }
 0x3de   :  { %v5962_v17 = vadd.f32 1.0, %v5818_v4  ;;  %v5607_v27 = vsub.f32 0.0, %v5319_v60  ;;  %v3877_v12 = vmul.f32 %v11729_v57, %v3733_v39  ;;  %v2944_v23 = vadd.f32 1.0, %v2800_v34 }
 0x3df   :  { %v5247_v56 = vmul.f32 %v8017_v18, %v4527_v15  ;;  %v3805_v47 = vadd.f32 1.4214138, %v3661_v28  ;;  %v11783_v11 = vadd.f32 %v11698_v43, %v1999_v24  ;;  %vm5535_vm10 = vcmp.ge.f32.partialorder %v11614_v21, 0.0  ;;  %v11835_v15 = vpop.f32.mrf.mxu0 }
 0x3e0   :  { %v6106_v44 = vmul.f32 %v5962_v17, %v11642_v49  ;;  %v5751_v53 = vsel %vm5463_vm9, %v5319_v60, %v5607_v27  ;;  %v4021_v51 = vadd.f32 -0.28449672, %v3877_v12  ;;  %8024 = vrcp.f32 %v2944_v23  ;;  %v11823_v60 = vpop.f32.mrf.mxu1 }
 0x3e1   :  { %v5895_v52 = vadd.f32 1.0, %v5751_v53  ;;  %v5391_v40 = vsub.f32 1.0, %v5247_v56  ;;  %v3949_v19 = vmul.f32 %v11749_v45, %v3805_v47  ;;  %v11793_v36 = vmul.f32 0.5, %v11635_v29 }
 0x3e2   :  { %v7266_v7 = vpack.c.bf16 %v6106_v44, %v6106_v44  ;;  %v4165_v0 = vmul.f32 %v11729_v57, %v4021_v51  ;;  %v11797_v49 = vmul.f32 0.70710677, %v11783_v11  ;;  %v11803_v41 = vmul.f32 0.5, %v11646_v10  ;;  %v11841_v51 = vpop.f32.mrf.mxu1 }
 0x3e3   :  { %v6039_v9 = vmul.f32 %v5895_v52, %v11727_v59  ;;  %v5679_v37 = vsub.f32 0.0, %v5391_v40  ;;  %v4093_v42 = vadd.f32 -0.28449672, %v3949_v19  ;;  %v4943_v8 = vmul.f32 1.442695, %v4744_v63  ;;  %v11844_v19 = vpop.f32.mrf.mxu0 }
 0x3e4   :  { %v8019_v55 = vpop.eup %8018  ;;  %6827 = vst.msk [vmem:[%s12756_s3 + $0x1e4] sm:$0xf] %vm6705_vm5, %v7266_v7  ;;  %v4309_v29 = vadd.f32 0.2548296, %v4165_v0  ;;  %v2582_v13 = vand.u32 2147483647, %v11797_v49  ;;  %v11813_v59 = vadd.f32 %v11698_v43, %v2071_v62  ;;  %v11833_v4 = vadd.f32 %v11698_v43, %v2004_v31 }
 0x3e5   :  { %v11815_v1 = vpop.eup %8020  ;;  %v7199_v10 = vpack.c.bf16 %v6039_v9, %v6039_v9  ;;  %v5823_v25 = vsel %vm5535_vm10, %v5391_v40, %v5679_v37  ;;  %v4237_v24 = vmul.f32 %v11749_v45, %v4093_v42  ;;  %v4672_v18 = vsub.f32 0.0, %v11761_v48  ;;  %v294_v31 = vld [vmem:[#allocation2 + $0x410] sm:$0xff] }
 0x3e6   :  { %v5967_v30 = vadd.f32 1.0, %v5823_v25  ;;  %v4453_v33 = vmul.f32 %v11729_v57, %v4309_v29  ;;  %v3304_v22 = vmul.f32 1.0614054, %v11815_v1  ;;  %v2726_v16 = vmul.f32 0.3275911, %v2582_v13 }
 0x3e7   :  { %6760 = vst.msk [vmem:[%s12756_s3 + $0xd8] sm:$0xf] %vm6705_vm5, %v7199_v10  ;;  %v4381_v39 = vadd.f32 0.2548296, %v4237_v24  ;;  %v4598_v21 = vsub.f32 0.0, %v2582_v13  ;;  %8026 = vpow2.f32 %v4943_v8  ;;  %v4816_v23 = vmul.f32 %v4672_v18, %v11761_v48  ;;  %v11861_v10 = vpop.f32.mrf.mxu1 }
 0x3e8   :  { %v11830_v34 = vmul.f32 0.70710677, %v11813_v59  ;;  %v6111_v57 = vmul.f32 %v5967_v30, %v2367_v50  ;;  %v5173_v28 = vmul.f32 %v8019_v55, %v4453_v33  ;;  %v3448_v17 = vadd.f32 -1.4531521, %v3304_v22  ;;  %v8023_v47 = vpop.eup %8022  ;;  %v220_v30 = vld [vmem:[#allocation2 + $0x1c0] sm:$0xff]  ;;  %v11863_v33 = vpop.f32.mrf.mxu0 }
 0x3e9   :  { %v2870_v27 = vadd.f32 1.0, %v2726_v16  ;;  %v4525_v12 = vmul.f32 %v11749_v45, %v4381_v39  ;;  %vm5461_vm11 = vcmp.ge.f32.partialorder %v11650_v3, 0.0  ;;  %v4742_v52 = vmul.f32 %v4598_v21, %v2582_v13 }
 0x3ea   :  { %v2654_v56 = vand.u32 2147483647, %v11830_v34  ;;  %v7271_v63 = vpack.c.bf16 %v6111_v57, %v6111_v57  ;;  %v5317_v44 = vsub.f32 1.0, %v5173_v28  ;;  %v3592_v53 = vmul.f32 %v11815_v1, %v3448_v17 }
 0x3eb   :  { %8028 = vrcp.f32 %v2870_v27  ;;  %v5245_v50 = vmul.f32 %v8023_v47, %v4525_v12  ;;  %vm5533_vm12 = vcmp.ge.f32.partialorder %v11662_v6, 0.0  ;;  %v11852_v62 = vmul.f32 0.70710677, %v11833_v4  ;;  %v292_v47 = vld [vmem:[#allocation2 + $0x400] sm:$0xff] }
 0x3ec   :  { %v2798_v40 = vmul.f32 0.3275911, %v2654_v56  ;;  %6832 = vst.msk [vmem:[%s12756_s3 + $0x1f8] sm:$0xf] %vm6705_vm5, %v7271_v63  ;;  %v5605_v45 = vsub.f32 0.0, %v5317_v44  ;;  %v4670_v42 = vsub.f32 0.0, %v2654_v56  ;;  %v1784_v3 = vadd.f32 %v11744_v5, %v294_v31 }
 0x3ed   :  { %v3736_v48 = vadd.f32 1.4214138, %v3592_v53  ;;  %v11854_v7 = vpop.eup %8024  ;;  %v5389_v0 = vsub.f32 1.0, %v5245_v50  ;;  %v5087_v9 = vmul.f32 1.442695, %v4816_v23  ;;  %v223_v63 = vld [vmem:[#allocation2 + $0x1d8] sm:$0xff]  ;;  %v11872_v53 = vpop.f32.mrf.mxu1  ;;  %v1710_v6 = vadd.f32 %v11747_v61, %v220_v30 }
 0x3ee   :  { %v2942_v37 = vadd.f32 1.0, %v2798_v40  ;;  %v5749_v55 = vsel %vm5461_vm11, %v5317_v44, %v5605_v45  ;;  %v3376_v8 = vmul.f32 1.0614054, %v11854_v7  ;;  %v2587_v13 = vand.u32 2147483647, %v11852_v62  ;;  %1929 = vst.msk [vmem:[#allocation2 + $0x410] sm:$0xff] %vm19_vm1, %v1784_v3 }
 0x3ef   :  { %v3880_v29 = vmul.f32 %v11815_v1, %v3736_v48  ;;  %v5893_v25 = vadd.f32 1.0, %v5749_v55  ;;  %v5677_v24 = vsub.f32 0.0, %v5389_v0  ;;  %v4939_v18 = vmul.f32 1.442695, %v4742_v52  ;;  %v295_v44 = vld [vmem:[#allocation2 + $0x418] sm:$0xff]  ;;  %v221_v50 = vld [vmem:[#allocation2 + $0x1c8] sm:$0xff]  ;;  %v11875_v52 = vpop.f32.mrf.mxu0 }
 0x3f0   :  { %8030 = vrcp.f32 %v2942_v37  ;;  %v3520_v16 = vadd.f32 -1.4531521, %v3376_v8  ;;  %v2731_v39 = vmul.f32 0.3275911, %v2587_v13  ;;  %v4814_v28 = vmul.f32 %v4670_v42, %v2654_v56  ;;  %v293_v56 = vld [vmem:[#allocation2 + $0x408] sm:$0xff]  ;;  %1855 = vst.msk [vmem:[#allocation2 + $0x1c0] sm:$0xff] %vm19_vm1, %v1710_v6 }
 0x3f1   :  { %v4024_v22 = vadd.f32 -0.28449672, %v3880_v29  ;;  %v6037_v21 = vmul.f32 %v5893_v25, %v11793_v36  ;;  %v5821_v57 = vsel %vm5533_vm12, %v5389_v0, %v5677_v24  ;;  %8032 = vpow2.f32 %v5087_v9  ;;  %v226_v0 = vld [vmem:[#allocation2 + $0x1f0] sm:$0xff]  ;;  %v224_v31 = vld [vmem:[#allocation2 + $0x1e0] sm:$0xff]  ;;  %v227_v30 = vld [vmem:[#allocation2 + $0x1f8] sm:$0xff] }
 0x3f2   :  { %v5965_v17 = vadd.f32 1.0, %v5821_v57  ;;  %v3664_v12 = vmul.f32 %v11854_v7, %v3520_v16  ;;  %v2875_v23 = vadd.f32 1.0, %v2731_v39  ;;  %8034 = vpow2.f32 %v4939_v18  ;;  %v298_v9 = vld [vmem:[#allocation2 + $0x430] sm:$0xff]  ;;  %v296_v55 = vld [vmem:[#allocation2 + $0x420] sm:$0xff]  ;;  %v225_v16 = vld [vmem:[#allocation2 + $0x1e8] sm:$0xff]  ;;  %v7505_v39 = vpop.f32.mrf.mxu1  ;;  %v1335_v57 = vpop.f32.mrf.mxu0 }
 0x3f3   :  { %v4168_v27 = vmul.f32 %v11815_v1, %v4024_v22  ;;  %v7197_v5 = vpack.c.bf16 %v6037_v21, %v6037_v21  ;;  %v4603_v36 = vsub.f32 0.0, %v2587_v13  ;;  %vm5464_vm13 = vcmp.ge.f32.partialorder %v11712_v2, 0.0  ;;  %v299_v22 = vld [vmem:[#allocation2 + $0x438] sm:$0xff]  ;;  %v230_v21 = vld [vmem:[#allocation2 + $0x210] sm:$0xff]  ;;  %v300_v6 = vld [vmem:[#allocation2 + $0x440] sm:$0xff] }
 0x3f4   :  { %v6109_v40 = vmul.f32 %v5965_v17, %v11803_v41  ;;  %v3808_v48 = vadd.f32 1.4214138, %v3664_v12  ;;  %8036 = vrcp.f32 %v2875_v23  ;;  %v11883_v37 = vmul.f32 1.442695, %v4814_v28  ;;  %v8027_v29 = vpop.eup %8026 }
 0x3f5   :  { %v4312_v45 = vadd.f32 0.2548296, %v4168_v27  ;;  %6758 = vst.msk [vmem:[%s12756_s3 + $0xd0] sm:$0xf] %vm6705_vm5, %v7197_v5  ;;  %v1782_v61 = vadd.f32 %v11763_v38, %v292_v47  ;;  %v1713_v41 = vadd.f32 %v11766_v54, %v223_v63  ;;  %v1785_v42 = vadd.f32 %v11779_v32, %v295_v44  ;;  %v302_v27 = vld [vmem:[#allocation2 + $0x450] sm:$0xff] }
 0x3f6   :  { %v7269_v8 = vpack.c.bf16 %v6109_v40, %v6109_v40  ;;  %v3952_v24 = vmul.f32 %v11854_v7, %v3808_v48  ;;  %v1711_v18 = vadd.f32 %v11785_v14, %v221_v50  ;;  %v4747_v38 = vmul.f32 %v4603_v36, %v2587_v13  ;;  %v297_v14 = vld [vmem:[#allocation2 + $0x428] sm:$0xff]  ;;  %v2076_v12 = vld [vmem:[#allocation2 + $0x410] sm:$0xff]  ;;  %v1623_v50 = vpop.f32.mrf.mxu1  ;;  %v7434_v40 = vpop.f32.mrf.mxu0 }
 0x3f7   :  { %v4456_v25 = vmul.f32 %v11815_v1, %v4312_v45  ;;  %1927 = vst.msk [vmem:[#allocation2 + $0x400] sm:$0xff] %vm19_vm1, %v1782_v61  ;;  %1858 = vst.msk [vmem:[#allocation2 + $0x1d8] sm:$0xff] %vm19_vm1, %v1713_v41  ;;  %v1783_v54 = vadd.f32 %v11799_v20, %v293_v56  ;;  %v1716_v32 = vadd.f32 %v11805_v26, %v226_v0  ;;  %v228_v26 = vld [vmem:[#allocation2 + $0x200] sm:$0xff]  ;;  %v231_v56 = vld [vmem:[#allocation2 + $0x218] sm:$0xff]  ;;  %8038 = vpow2.f32 %v11883_v37 }
 0x3f8   :  { %v11892_v3 = vpop.eup %8028  ;;  %1930 = vst.msk [vmem:[#allocation2 + $0x418] sm:$0xff] %vm19_vm1, %v1785_v42  ;;  %v1788_v1 = vadd.f32 %v11823_v60, %v298_v9  ;;  %v4096_v28 = vadd.f32 -0.28449672, %v3952_v24  ;;  %1856 = vst.msk [vmem:[#allocation2 + $0x1c8] sm:$0xff] %vm19_vm1, %v1711_v18  ;;  %v1714_v20 = vadd.f32 %v11835_v15, %v224_v31  ;;  %v1786_v60 = vadd.f32 %v11841_v51, %v296_v55  ;;  %v2002_v41 = vld [vmem:[#allocation2 + $0x1c0] sm:$0xff] }
 0x3f9   :  { %6830 = vst.msk [vmem:[%s12756_s3 + $0x1f0] sm:$0xf] %vm6705_vm5, %v7269_v8  ;;  %v5176_v13 = vmul.f32 %v8027_v29, %v4456_v25  ;;  %v3302_v17 = vmul.f32 1.0614054, %v11892_v3  ;;  %v1717_v23 = vadd.f32 %v11844_v19, %v227_v30  ;;  %v1789_v47 = vadd.f32 %v11861_v10, %v299_v22 }
 0x3fa   :  { %1928 = vst.msk [vmem:[#allocation2 + $0x408] sm:$0xff] %vm19_vm1, %v1783_v54  ;;  %1861 = vst.msk [vmem:[#allocation2 + $0x1f0] sm:$0xff] %vm19_vm1, %v1716_v32  ;;  %v1715_v63 = vadd.f32 %v11863_v33, %v225_v16  ;;  %v4240_v15 = vmul.f32 %v11854_v7, %v4096_v28  ;;  %v11916_v36 = vadd.f32 %v11698_v43, %v2076_v12  ;;  %v4949_v61 = vmul.f32 1.442695, %v4747_v38 }
 0x3fb   :  { %1933 = vst.msk [vmem:[#allocation2 + $0x430] sm:$0xff] %vm19_vm1, %v1788_v1  ;;  %v5320_v44 = vsub.f32 1.0, %v5176_v13  ;;  %v3446_v5 = vadd.f32 -1.4531521, %v3302_v17  ;;  %1859 = vst.msk [vmem:[#allocation2 + $0x1e0] sm:$0xff] %vm19_vm1, %v1714_v20  ;;  %v1787_v51 = vadd.f32 %v11872_v53, %v297_v14  ;;  %v1720_v19 = vadd.f32 %v11875_v52, %v230_v21 }
 0x3fc   :  { %1931 = vst.msk [vmem:[#allocation2 + $0x420] sm:$0xff] %vm19_vm1, %v1786_v60  ;;  %1862 = vst.msk [vmem:[#allocation2 + $0x1f8] sm:$0xff] %vm19_vm1, %v1717_v23  ;;  %v1792_v10 = vadd.f32 %v7505_v39, %v302_v27  ;;  %v1718_v33 = vadd.f32 %v1335_v57, %v228_v26  ;;  %v4384_v0 = vadd.f32 0.2548296, %v4240_v15  ;;  %v11930_v31 = vmul.f32 0.70710677, %v11916_v36 }
 0x3fd   :  { %1934 = vst.msk [vmem:[#allocation2 + $0x438] sm:$0xff] %vm19_vm1, %v1789_v47  ;;  %1860 = vst.msk [vmem:[#allocation2 + $0x1e8] sm:$0xff] %vm19_vm1, %v1715_v63  ;;  %v11925_v45 = vpop.eup %8030  ;;  %v5608_v48 = vsub.f32 0.0, %v5320_v44  ;;  %v3590_v9 = vmul.f32 %v11892_v3, %v3446_v5  ;;  %v11933_v53 = vadd.f32 %v11698_v43, %v2002_v41  ;;  %v1790_v52 = vadd.f32 %v1623_v50, %v300_v6 }
 0x3fe   :  { %v3374_v42 = vmul.f32 1.0614054, %v11925_v45  ;;  %1932 = vst.msk [vmem:[#allocation2 + $0x428] sm:$0xff] %vm19_vm1, %v1787_v51  ;;  %1865 = vst.msk [vmem:[#allocation2 + $0x210] sm:$0xff] %vm19_vm1, %v1720_v19  ;;  %v8033_v55 = vpop.eup %8032  ;;  %v4528_v8 = vmul.f32 %v11854_v7, %v4384_v0  ;;  %v1721_v24 = vadd.f32 %v7434_v40, %v231_v56  ;;  %v2296_v18 = vmul.f32 0.5, %v11701_v58  ;;  %v2074_v13 = vld [vmem:[#allocation2 + $0x400] sm:$0xff] }
 0x3ff   :  { %1937 = vst.msk [vmem:[#allocation2 + $0x450] sm:$0xff] %vm19_vm1, %v1792_v10  ;;  %1863 = vst.msk [vmem:[#allocation2 + $0x200] sm:$0xff] %vm19_vm1, %v1718_v33  ;;  %v5752_v29 = vsel %vm5464_vm13, %v5320_v44, %v5608_v48  ;;  %v3734_v25 = vadd.f32 1.4214138, %v3590_v9  ;;  %v11944_v16 = vand.u32 2147483647, %v11930_v31  ;;  %v8035_v39 = vpop.eup %8034  ;;  %8040 = vpow2.f32 %v4949_v61 }
 0x400   :  { %v5896_v30 = vadd.f32 1.0, %v5752_v29  ;;  %v3518_v22 = vadd.f32 -1.4531521, %v3374_v42  ;;  %1935 = vst.msk [vmem:[#allocation2 + $0x440] sm:$0xff] %vm19_vm1, %v1790_v52  ;;  %v5248_v38 = vmul.f32 %v8033_v55, %v4528_v8  ;;  %v11949_v2 = vmul.f32 0.70710677, %v11933_v53 }
 0x401   :  { %v3878_v54 = vmul.f32 %v11892_v3, %v3734_v25  ;;  %1866 = vst.msk [vmem:[#allocation2 + $0x218] sm:$0xff] %vm19_vm1, %v1721_v24  ;;  %v11952_v7 = vpop.eup %8036  ;;  %v2803_v1 = vmul.f32 0.3275911, %v11944_v16  ;;  %vm5536_vm14 = vcmp.ge.f32.partialorder %v11736_v46, 0.0  ;;  %v11969_v23 = vadd.f32 %v11698_v43, %v2074_v13  ;;  %v2005_v51 = vld [vmem:[#allocation2 + $0x1d8] sm:$0xff] }
 0x402   :  { %v6040_v32 = vmul.f32 %v5896_v30, %v2296_v18  ;;  %v3662_v58 = vmul.f32 %v11925_v45, %v3518_v22  ;;  %v5392_v14 = vsub.f32 1.0, %v5248_v38  ;;  %v3307_v57 = vmul.f32 1.0614054, %v11952_v7  ;;  %v2077_v24 = vld [vmem:[#allocation2 + $0x418] sm:$0xff] }
 0x403   :  { %v4022_v21 = vadd.f32 -0.28449672, %v3878_v54  ;;  %v2947_v20 = vadd.f32 1.0, %v2803_v1  ;;  %v11960_v60 = vand.u32 2147483647, %v11949_v2  ;;  %v2368_v5 = vmul.f32 0.5, %v11717_v35 }
 0x404   :  { %v7200_v28 = vpack.c.bf16 %v6040_v32, %v6040_v32  ;;  %v3806_v17 = vadd.f32 1.4214138, %v3662_v58  ;;  %v5680_v27 = vsub.f32 0.0, %v5392_v14  ;;  %v3451_v12 = vadd.f32 -1.4531521, %v3307_v57  ;;  %v8039_v18 = vpop.eup %8038 }
 0x405   :  { %v4166_v26 = vmul.f32 %v11892_v3, %v4022_v21  ;;  %8042 = vrcp.f32 %v2947_v20  ;;  %v2729_v15 = vmul.f32 0.3275911, %v11960_v60  ;;  %v4675_v40 = vsub.f32 0.0, %v11944_v16 }
 0x406   :  { %6761 = vst.msk [vmem:[%s12756_s3 + $0xdc] sm:$0xf] %vm6705_vm5, %v7200_v28  ;;  %v3950_v37 = vmul.f32 %v11925_v45, %v3806_v17  ;;  %v5824_v47 = vsel %vm5536_vm14, %v5392_v14, %v5680_v27  ;;  %v3595_v44 = vmul.f32 %v11952_v7, %v3451_v12  ;;  %v11978_v48 = vmul.f32 0.70710677, %v11969_v23  ;;  %v2003_v14 = vld [vmem:[#allocation2 + $0x1c8] sm:$0xff] }
 0x407   :  { %v4310_v63 = vadd.f32 0.2548296, %v4166_v26  ;;  %v5968_v6 = vadd.f32 1.0, %v5824_v47  ;;  %v2873_v10 = vadd.f32 1.0, %v2729_v15  ;;  %v11982_v35 = vadd.f32 %v11698_v43, %v2005_v51 }
 0x408   :  { %v4094_v50 = vadd.f32 -0.28449672, %v3950_v37  ;;  %v3739_v46 = vadd.f32 1.4214138, %v3595_v44  ;;  %v2294_v42 = vmul.f32 0.5, %v11783_v11  ;;  %vm5462_vm15 = vcmp.ge.f32.partialorder %v11797_v49, 0.0 }
 0x409   :  { %v4454_v19 = vmul.f32 %v11892_v3, %v4310_v63  ;;  %v6112_v33 = vmul.f32 %v5968_v6, %v2368_v5  ;;  %8044 = vrcp.f32 %v2873_v10  ;;  %v2657_v3 = vand.u32 2147483647, %v11978_v48 }
 0x40a   :  { %v4238_v56 = vmul.f32 %v11925_v45, %v4094_v50  ;;  %v3883_v9 = vmul.f32 %v11952_v7, %v3739_v46  ;;  %v2366_v29 = vmul.f32 0.5, %v11813_v59  ;;  %v4819_v11 = vmul.f32 %v4675_v40, %v11944_v16 }
 0x40b   :  { %v5174_v0 = vmul.f32 %v8035_v39, %v4454_v19  ;;  %v7272_v61 = vpack.c.bf16 %v6112_v33, %v6112_v33  ;;  %v2801_v25 = vmul.f32 0.3275911, %v2657_v3  ;;  %v11996_v39 = vmul.f32 0.70710677, %v11982_v35 }
 0x40c   :  { %v4382_v41 = vadd.f32 0.2548296, %v4238_v56  ;;  %v4027_v55 = vadd.f32 -0.28449672, %v3883_v9  ;;  %vm5534_vm0 = vcmp.ge.f32.partialorder %v11830_v34, 0.0  ;;  %v4601_v49 = vsub.f32 0.0, %v11960_v60  ;;  %v8041_v59 = vpop.eup %8040 }
 0x40d   :  { %v5318_v52 = vsub.f32 1.0, %v5174_v0  ;;  %6833 = vst.msk [vmem:[%s12756_s3 + $0x1fc] sm:$0xf] %vm6705_vm5, %v7272_v61  ;;  %v2945_v54 = vadd.f32 1.0, %v2801_v25  ;;  %v12001_v58 = vand.u32 2147483647, %v11996_v39  ;;  %v12004_v1 = vadd.f32 %v11698_v43, %v2077_v24 }
 0x40e   :  { %v4526_v8 = vmul.f32 %v11925_v45, %v4382_v41  ;;  %v4171_v22 = vmul.f32 %v11952_v7, %v4027_v55  ;;  %v2299_v57 = vmul.f32 0.5, %v11833_v4  ;;  %vm5467_vm2 = vcmp.ge.f32.partialorder %v11852_v62, 0.0 }
 0x40f   :  { %v5606_v30 = vsub.f32 0.0, %v5318_v52  ;;  %8046 = vrcp.f32 %v2945_v54  ;;  %v5093_v17 = vmul.f32 1.442695, %v4819_v11  ;;  %v2732_v20 = vmul.f32 0.3275911, %v12001_v58 }
 0x410   :  { %v5246_v38 = vmul.f32 %v8039_v18, %v4526_v8  ;;  %v4315_v45 = vadd.f32 0.2548296, %v4171_v22  ;;  %v12014_v37 = vadd.f32 %v11698_v43, %v2003_v14  ;;  %v4745_v4 = vmul.f32 %v4601_v49, %v11960_v60  ;;  %v2008_v14 = vld [vmem:[#allocation2 + $0x1f0] sm:$0xff] }
 0x411   :  { %v5750_v32 = vsel %vm5462_vm15, %v5318_v52, %v5606_v30  ;;  %v2876_v63 = vadd.f32 1.0, %v2732_v20  ;;  %v12018_v44 = vmul.f32 0.70710677, %v12004_v1  ;;  %v4673_v6 = vsub.f32 0.0, %v2657_v3 }
 0x412   :  { %v5894_v16 = vadd.f32 1.0, %v5750_v32  ;;  %v5390_v21 = vsub.f32 1.0, %v5246_v38  ;;  %v12007_v13 = vpop.eup %8042  ;;  %v4459_v28 = vmul.f32 %v11952_v7, %v4315_v45  ;;  %v12023_v19 = vmul.f32 0.5, %v11916_v36 }
 0x413   :  { %v3379_v12 = vmul.f32 1.0614054, %v12007_v13  ;;  %8048 = vrcp.f32 %v2876_v63  ;;  %v2660_v34 = vand.u32 2147483647, %v12018_v44  ;;  %v12034_v10 = vmul.f32 0.70710677, %v12014_v37 }
 0x414   :  { %v6038_v27 = vmul.f32 %v5894_v16, %v2294_v42  ;;  %v5678_v26 = vsub.f32 0.0, %v5390_v21  ;;  %v5179_v47 = vmul.f32 %v8041_v59, %v4459_v28  ;;  %8050 = vpow2.f32 %v5093_v17  ;;  %v2075_v42 = vld [vmem:[#allocation2 + $0x408] sm:$0xff] }
 0x415   :  { %v3523_v5 = vadd.f32 -1.4531521, %v3379_v12  ;;  %v4945_v40 = vmul.f32 1.442695, %v4745_v4  ;;  %v4817_v9 = vmul.f32 %v4673_v6, %v2657_v3  ;;  %v4604_v61 = vsub.f32 0.0, %v12001_v58 }
 0x416   :  { %v7198_v7 = vpack.c.bf16 %v6038_v27, %v6038_v27  ;;  %v5822_v15 = vsel %vm5534_vm0, %v5390_v21, %v5678_v26  ;;  %v5323_v51 = vsub.f32 1.0, %v5179_v47  ;;  %v12025_v46 = vpop.eup %8044  ;;  %v2804_v41 = vmul.f32 0.3275911, %v2660_v34 }
 0x417   :  { %v5966_v50 = vadd.f32 1.0, %v5822_v15  ;;  %v3667_v60 = vmul.f32 %v12007_v13, %v3523_v5  ;;  %v3305_v36 = vmul.f32 1.0614054, %v12025_v46  ;;  %v2586_v25 = vand.u32 2147483647, %v12034_v10 }
 0x418   :  { %6759 = vst.msk [vmem:[%s12756_s3 + $0xd4] sm:$0xf] %vm6705_vm5, %v7198_v7  ;;  %v5611_v56 = vsub.f32 0.0, %v5323_v51  ;;  %v12043_v18 = vmul.f32 0.5, %v11933_v53  ;;  %v2948_v30 = vadd.f32 1.0, %v2804_v41  ;;  %8052 = vpow2.f32 %v4945_v40 }
 0x419   :  { %v6110_v33 = vmul.f32 %v5966_v50, %v2366_v29  ;;  %v3811_v0 = vadd.f32 1.4214138, %v3667_v60  ;;  %v3449_v8 = vadd.f32 -1.4531521, %v3305_v36  ;;  %v2730_v62 = vmul.f32 0.3275911, %v2586_v25 }
 0x41a   :  { %v5755_v55 = vsel %vm5467_vm2, %v5323_v51, %v5611_v56  ;;  %v12051_v22 = vadd.f32 %v11698_v43, %v2075_v42  ;;  %8054 = vrcp.f32 %v2948_v30  ;;  %v4676_v49 = vsub.f32 0.0, %v2660_v34  ;;  %v2080_v36 = vld [vmem:[#allocation2 + $0x430] sm:$0xff] }
 0x41b   :  { %v7270_v52 = vpack.c.bf16 %v6110_v33, %v6110_v33  ;;  %v5899_v24 = vadd.f32 1.0, %v5755_v55  ;;  %v3955_v29 = vmul.f32 %v12007_v13, %v3811_v0  ;;  %v3593_v3 = vmul.f32 %v12025_v46, %v3449_v8 }
 0x41c   :  { %v12053_v54 = vpop.eup %8046  ;;  %v5089_v59 = vmul.f32 1.442695, %v4817_v9  ;;  %v4748_v32 = vmul.f32 %v4604_v61, %v12001_v58  ;;  %v2874_v45 = vadd.f32 1.0, %v2730_v62  ;;  %v4602_v17 = vsub.f32 0.0, %v2586_v25 }
 0x41d   :  { %6831 = vst.msk [vmem:[%s12756_s3 + $0x1f4] sm:$0xf] %vm6705_vm5, %v7270_v52  ;;  %v6043_v11 = vmul.f32 %v5899_v24, %v2299_v57  ;;  %v4099_v38 = vadd.f32 -0.28449672, %v3955_v29  ;;  %v3737_v53 = vadd.f32 1.4214138, %v3593_v3  ;;  %v4820_v12 = vmul.f32 %v4676_v49, %v2660_v34 }
 0x41e   :  { %v3377_v28 = vmul.f32 1.0614054, %v12053_v54  ;;  %v12060_v57 = vmul.f32 0.5, %v11969_v23  ;;  %8056 = vrcp.f32 %v2874_v45  ;;  %v12063_v27 = vmul.f32 0.70710677, %v12051_v22 }
 0x41f   :  { %v7203_v16 = vpack.c.bf16 %v6043_v11, %v6043_v11  ;;  %v4243_v21 = vmul.f32 %v12007_v13, %v4099_v38  ;;  %v3881_v20 = vmul.f32 %v12025_v46, %v3737_v53  ;;  %v12070_v47 = vadd.f32 %v11698_v43, %v2008_v14 }
 0x420   :  { %v3521_v26 = vadd.f32 -1.4531521, %v3377_v28  ;;  %vm5539_vm3 = vcmp.ge.f32.partialorder %v11930_v31, 0.0  ;;  %8058 = vpow2.f32 %v5089_v59  ;;  %v4951_v23 = vmul.f32 1.442695, %v4748_v32  ;;  %v12074_v7 = vpop.eup %8048 }
 0x421   :  { %6764 = vst.msk [vmem:[%s12756_s3 + $0xe8] sm:$0xf] %vm6705_vm5, %v7203_v16  ;;  %v4387_v58 = vadd.f32 0.2548296, %v4243_v21  ;;  %v4025_v4 = vadd.f32 -0.28449672, %v3881_v20  ;;  %v4746_v6 = vmul.f32 %v4602_v17, %v2586_v25  ;;  %v8051_v51 = vpop.eup %8050  ;;  %v12092_v29 = vadd.f32 %v11698_v43, %v2080_v36 }
 0x422   :  { %v2658_v63 = vand.u32 2147483647, %v12063_v27  ;;  %v3665_v5 = vmul.f32 %v12053_v54, %v3521_v26  ;;  %v12079_v50 = vmul.f32 0.70710677, %v12070_v47  ;;  %v12083_v34 = vmul.f32 0.5, %v11982_v35 }
 0x423   :  { %v4531_v15 = vmul.f32 %v12007_v13, %v4387_v58  ;;  %v4169_v60 = vmul.f32 %v12025_v46, %v4025_v4  ;;  %v3308_v33 = vmul.f32 1.0614054, %v12074_v7  ;;  %v5095_v9 = vmul.f32 1.442695, %v4820_v12 }
 0x424   :  { %v2802_v56 = vmul.f32 0.3275911, %v2658_v63  ;;  %v3809_v0 = vadd.f32 1.4214138, %v3665_v5  ;;  %v2591_v13 = vand.u32 2147483647, %v12079_v50  ;;  %8060 = vpow2.f32 %v4951_v23 }
 0x425   :  { %v5251_v40 = vmul.f32 %v8051_v51, %v4531_v15  ;;  %v4313_v61 = vadd.f32 0.2548296, %v4169_v60  ;;  %v3452_v41 = vadd.f32 -1.4531521, %v3308_v33  ;;  %vm5465_vm4 = vcmp.ge.f32.partialorder %v11949_v2, 0.0  ;;  %v8053_v30 = vpop.eup %8052 }
 0x426   :  { %v2946_v42 = vadd.f32 1.0, %v2802_v56  ;;  %v3953_v55 = vmul.f32 %v12053_v54, %v3809_v0  ;;  %v4947_v35 = vmul.f32 1.442695, %v4746_v6  ;;  %v2735_v8 = vmul.f32 0.3275911, %v2591_v13 }
 0x427   :  { %v5395_v52 = vsub.f32 1.0, %v5251_v40  ;;  %v4457_v25 = vmul.f32 %v12025_v46, %v4313_v61  ;;  %v3596_v24 = vmul.f32 %v12074_v7, %v3452_v41  ;;  %v4674_v11 = vsub.f32 0.0, %v2658_v63  ;;  %v12094_v49 = vpop.eup %8054  ;;  %v12126_v2 = vld [vmem:[%s12755_s2] ss:$0 sm:$0xff] }
 0x428   :  { %8062 = vrcp.f32 %v2946_v42  ;;  %v4097_v62 = vadd.f32 -0.28449672, %v3953_v55  ;;  %v2879_v38 = vadd.f32 1.0, %v2735_v8  ;;  %v4607_v32 = vsub.f32 0.0, %v2591_v13 }
 0x429   :  { %v5683_v3 = vsub.f32 0.0, %v5395_v52  ;;  %v5177_v53 = vmul.f32 %v8053_v30, %v4457_v25  ;;  %v3740_v59 = vadd.f32 1.4214138, %v3596_v24  ;;  %8064 = vpow2.f32 %v5095_v9 }
 0x42a   :  { %v4241_v45 = vmul.f32 %v12053_v54, %v4097_v62  ;;  %v3380_v14 = vmul.f32 1.0614054, %v12094_v49  ;;  %8066 = vrcp.f32 %v2879_v38  ;;  %v4818_v58 = vmul.f32 %v4674_v11, %v2658_v63  ;;  %v2006_v63 = vld [vmem:[#allocation2 + $0x1e0] sm:$0xff] }
 0x42b   :  { %v5827_v46 = vsel %vm5539_vm3, %v5395_v52, %v5683_v3  ;;  %v5321_v16 = vsub.f32 1.0, %v5177_v53  ;;  %v3884_v21 = vmul.f32 %v12074_v7, %v3740_v59  ;;  %8068 = vpow2.f32 %v4947_v35  ;;  %v12101_v28 = vpop.eup %8056 }
 0x42c   :  { %v5971_v43 = vadd.f32 1.0, %v5827_v46  ;;  %v4385_v17 = vadd.f32 0.2548296, %v4241_v45  ;;  %v3524_v20 = vadd.f32 -1.4531521, %v3380_v14  ;;  %vm5537_vm6 = vcmp.ge.f32.partialorder %v11978_v48, 0.0 }
 0x42d   :  { %v12104_v26 = vmul.f32 0.70710677, %v12092_v29  ;;  %v5609_v12 = vsub.f32 0.0, %v5321_v16  ;;  %v4028_v4 = vadd.f32 -0.28449672, %v3884_v21  ;;  %v8059_v15 = vpop.eup %8058  ;;  %v4751_v51 = vmul.f32 %v4607_v32, %v2591_v13 }
 0x42e   :  { %v6115_v31 = vmul.f32 %v5971_v43, %v12023_v19  ;;  %v3306_v23 = vmul.f32 1.0614054, %v12101_v28  ;;  %v4529_v5 = vmul.f32 %v12053_v54, %v4385_v17  ;;  %v3668_v6 = vmul.f32 %v12094_v49, %v3524_v20 }
 0x42f   :  { %v12112_v60 = vand.u32 2147483647, %v12104_v26  ;;  %v5753_v19 = vsel %vm5465_vm4, %v5321_v16, %v5609_v12  ;;  %v4172_v56 = vmul.f32 %v12074_v7, %v4028_v4  ;;  %v5091_v41 = vmul.f32 1.442695, %v4818_v58  ;;  %v2078_v16 = vld [vmem:[#allocation2 + $0x420] sm:$0xff] }
 0x430   :  { %v7275_v33 = vpack.c.bf16 %v6115_v31, %v6115_v31  ;;  %v3450_v36 = vadd.f32 -1.4531521, %v3306_v23  ;;  %v5897_v40 = vadd.f32 1.0, %v5753_v19  ;;  %v5249_v0 = vmul.f32 %v8059_v15, %v4529_v5 }
 0x431   :  { %v3812_v9 = vadd.f32 1.4214138, %v3668_v6  ;;  %v2807_v61 = vmul.f32 0.3275911, %v12112_v60  ;;  %v4316_v54 = vadd.f32 0.2548296, %v4172_v56  ;;  %v12129_v42 = vadd.f32 %v12126_v2, %v2006_v63  ;;  %v8061_v52 = vpop.eup %8060 }
 0x432   :  { %6836 = vst.msk [vmem:[%s12756_s3 + $0x208] sm:$0xf] %vm6705_vm5, %v7275_v33  ;;  %v3594_v13 = vmul.f32 %v12101_v28, %v3450_v36  ;;  %v6041_v55 = vmul.f32 %v5897_v40, %v12043_v18  ;;  %v5393_v35 = vsub.f32 1.0, %v5249_v0  ;;  %vm5468_vm7 = vcmp.ge.f32.partialorder %v11996_v39, 0.0 }
 0x433   :  { %v3956_v8 = vmul.f32 %v12094_v49, %v3812_v9  ;;  %v2951_v25 = vadd.f32 1.0, %v2807_v61  ;;  %v4460_v24 = vmul.f32 %v12074_v7, %v4316_v54  ;;  %v12136_v30 = vmul.f32 0.5, %v12004_v1 }
 0x434   :  { %v3738_v3 = vadd.f32 1.4214138, %v3594_v13  ;;  %v4957_v62 = vmul.f32 1.442695, %v4751_v51  ;;  %v7201_v38 = vpack.c.bf16 %v6041_v55, %v6041_v55  ;;  %v5681_v53 = vsub.f32 0.0, %v5393_v35 }
 0x435   :  { %v12138_v11 = vpop.eup %8062  ;;  %v4100_v59 = vadd.f32 -0.28449672, %v3956_v8  ;;  %8070 = vrcp.f32 %v2951_v25  ;;  %v5180_v18 = vmul.f32 %v8061_v52, %v4460_v24  ;;  %v4679_v14 = vsub.f32 0.0, %v12112_v60 }
 0x436   :  { %v3882_v32 = vmul.f32 %v12101_v28, %v3738_v3  ;;  %v3378_v46 = vmul.f32 1.0614054, %v12138_v11  ;;  %8072 = vpow2.f32 %v5091_v41  ;;  %v8065_v45 = vpop.eup %8064  ;;  %6762 = vst.msk [vmem:[%s12756_s3 + $0xe0] sm:$0xf] %vm6705_vm5, %v7201_v38  ;;  %v5825_v1 = vsel %vm5537_vm6, %v5393_v35, %v5681_v53 }
 0x437   :  { %v4244_v7 = vmul.f32 %v12094_v49, %v4100_v59  ;;  %v12151_v43 = vmul.f32 0.70710677, %v12129_v42  ;;  %v12153_v21 = vpop.eup %8066  ;;  %v5969_v17 = vadd.f32 1.0, %v5825_v1  ;;  %v5324_v20 = vsub.f32 1.0, %v5180_v18 }
 0x438   :  { %v4026_v58 = vadd.f32 -0.28449672, %v3882_v32  ;;  %v3522_v31 = vadd.f32 -1.4531521, %v3378_v46  ;;  %v8069_v12 = vpop.eup %8068  ;;  %v3311_v23 = vmul.f32 1.0614054, %v12153_v21  ;;  %8074 = vpow2.f32 %v4957_v62 }
 0x439   :  { %v4388_v4 = vadd.f32 0.2548296, %v4244_v7  ;;  %v2589_v48 = vand.u32 2147483647, %v12151_v43  ;;  %v6113_v15 = vmul.f32 %v5969_v17, %v12060_v57  ;;  %v5612_v5 = vsub.f32 0.0, %v5324_v20 }
 0x43a   :  { %v4170_v6 = vmul.f32 %v12101_v28, %v4026_v58  ;;  %v3666_v51 = vmul.f32 %v12138_v11, %v3522_v31  ;;  %v3455_v33 = vadd.f32 -1.4531521, %v3311_v23  ;;  %v12162_v56 = vadd.f32 %v12126_v2, %v2078_v16 }
 0x43b   :  { %v4532_v63 = vmul.f32 %v12094_v49, %v4388_v4  ;;  %v2733_v19 = vmul.f32 0.3275911, %v2589_v48  ;;  %v7273_v36 = vpack.c.bf16 %v6113_v15, %v6113_v15  ;;  %v5756_v40 = vsel %vm5468_vm7, %v5324_v20, %v5612_v5 }
 0x43c   :  { %v4314_v0 = vadd.f32 0.2548296, %v4170_v6  ;;  %v3810_v9 = vadd.f32 1.4214138, %v3666_v51  ;;  %v5900_v61 = vadd.f32 1.0, %v5756_v40  ;;  %v3599_v54 = vmul.f32 %v12153_v21, %v3455_v33  ;;  %v2081_v40 = vld [vmem:[#allocation2 + $0x438] sm:$0xff] }
 0x43d   :  { %v5252_v57 = vmul.f32 %v8065_v45, %v4532_v63  ;;  %v2877_v13 = vadd.f32 1.0, %v2733_v19  ;;  %6834 = vst.msk [vmem:[%s12756_s3 + $0x200] sm:$0xf] %vm6705_vm5, %v7273_v36  ;;  %v4823_v52 = vmul.f32 %v4679_v14, %v12112_v60  ;;  %v4605_v39 = vsub.f32 0.0, %v2589_v48  ;;  %v2009_v60 = vld [vmem:[#allocation2 + $0x1f8] sm:$0xff] }
 0x43e   :  { %v4458_v49 = vmul.f32 %v12101_v28, %v4314_v0  ;;  %v3954_v41 = vmul.f32 %v12138_v11, %v3810_v9  ;;  %v6044_v55 = vmul.f32 %v5900_v61, %v12083_v34  ;;  %v3743_v8 = vadd.f32 1.4214138, %v3599_v54 }
 0x43f   :  { %v5396_v35 = vsub.f32 1.0, %v5252_v57  ;;  %8076 = vrcp.f32 %v2877_v13  ;;  %vm5540_vm8 = vcmp.ge.f32.partialorder %v12018_v44, 0.0  ;;  %v2298_v25 = vmul.f32 0.5, %v12014_v37 }
 0x440   :  { %v5178_v24 = vmul.f32 %v8069_v12, %v4458_v49  ;;  %v4098_v3 = vadd.f32 -0.28449672, %v3954_v41  ;;  %v7204_v62 = vpack.c.bf16 %v6044_v55, %v6044_v55  ;;  %v3887_v28 = vmul.f32 %v12153_v21, %v3743_v8 }
 0x441   :  { %v5684_v38 = vsub.f32 0.0, %v5396_v35  ;;  %v12179_v53 = vmul.f32 0.70710677, %v12162_v56  ;;  %v5101_v32 = vmul.f32 1.442695, %v4823_v52  ;;  %v4749_v46 = vmul.f32 %v4605_v39, %v2589_v48 }
 0x442   :  { %v12181_v59 = vpop.eup %8070  ;;  %v5322_v34 = vsub.f32 1.0, %v5178_v24  ;;  %v4242_v18 = vmul.f32 %v12138_v11, %v4098_v3  ;;  %6765 = vst.msk [vmem:[%s12756_s3 + $0xec] sm:$0xf] %vm6705_vm5, %v7204_v62  ;;  %v4031_v1 = vadd.f32 -0.28449672, %v3887_v28  ;;  %v12195_v58 = vadd.f32 %v12126_v2, %v2009_v60 }
 0x443   :  { %v8073_v45 = vpop.eup %8072  ;;  %v5828_v37 = vsel %vm5540_vm8, %v5396_v35, %v5684_v38  ;;  %v3383_v7 = vmul.f32 1.0614054, %v12181_v59  ;;  %v12192_v14 = vand.u32 2147483647, %v12179_v53  ;;  %vm5466_vm9 = vcmp.ge.f32.partialorder %v12034_v10, 0.0 }
 0x444   :  { %v5972_v16 = vadd.f32 1.0, %v5828_v37  ;;  %v5610_v17 = vsub.f32 0.0, %v5322_v34  ;;  %v4386_v20 = vadd.f32 0.2548296, %v4242_v18  ;;  %v4175_v31 = vmul.f32 %v12153_v21, %v4031_v1  ;;  %v2079_v37 = vld [vmem:[#allocation2 + $0x428] sm:$0xff] }
 0x445   :  { %v3527_v12 = vadd.f32 -1.4531521, %v3383_v7  ;;  %v2805_v44 = vmul.f32 0.3275911, %v12192_v14  ;;  %v8075_v4 = vpop.eup %8074  ;;  %8078 = vpow2.f32 %v5101_v32  ;;  %v4953_v10 = vmul.f32 1.442695, %v4749_v46 }
 0x446   :  { %v6116_v23 = vmul.f32 %v5972_v16, %v12136_v30  ;;  %v5754_v48 = vsel %vm5466_vm9, %v5322_v34, %v5610_v17  ;;  %v4530_v15 = vmul.f32 %v12138_v11, %v4386_v20  ;;  %v4319_v6 = vadd.f32 0.2548296, %v4175_v31  ;;  %v2007_v34 = vld [vmem:[#allocation2 + $0x1e8] sm:$0xff] }
 0x447   :  { %v5898_v5 = vadd.f32 1.0, %v5754_v48  ;;  %v3671_v51 = vmul.f32 %v12181_v59, %v3527_v12  ;;  %v2949_v63 = vadd.f32 1.0, %v2805_v44  ;;  %v12204_v36 = vmul.f32 0.70710677, %v12195_v58 }
 0x448   :  { %v7276_v33 = vpack.c.bf16 %v6116_v23, %v6116_v23  ;;  %v5250_v19 = vmul.f32 %v8073_v45, %v4530_v15  ;;  %v4463_v9 = vmul.f32 %v12153_v21, %v4319_v6  ;;  %v12214_v49 = vadd.f32 %v12126_v2, %v2081_v40 }
 0x449   :  { %v6042_v0 = vmul.f32 %v5898_v5, %v2298_v25  ;;  %v3815_v30 = vadd.f32 1.4214138, %v3671_v51  ;;  %8080 = vrcp.f32 %v2949_v63  ;;  %v2592_v61 = vand.u32 2147483647, %v12204_v36  ;;  %v2012_v63 = vld [vmem:[#allocation2 + $0x210] sm:$0xff] }
 0x44a   :  { %6837 = vst.msk [vmem:[%s12756_s3 + $0x20c] sm:$0xf] %vm6705_vm5, %v7276_v33  ;;  %v5394_v11 = vsub.f32 1.0, %v5250_v19  ;;  %v5183_v54 = vmul.f32 %v8075_v4, %v4463_v9  ;;  %v2370_v21 = vmul.f32 0.5, %v12051_v22  ;;  %vm5538_vm10 = vcmp.ge.f32.partialorder %v12063_v27, 0.0 }
 0x44b   :  { %v7202_v57 = vpack.c.bf16 %v6042_v0, %v6042_v0  ;;  %v3959_v13 = vmul.f32 %v12181_v59, %v3815_v30  ;;  %v2736_v39 = vmul.f32 0.3275911, %v2592_v61  ;;  %8082 = vpow2.f32 %v4953_v10 }
 0x44c   :  { %v12216_v41 = vpop.eup %8076  ;;  %v5682_v52 = vsub.f32 0.0, %v5394_v11  ;;  %v5327_v55 = vsub.f32 1.0, %v5183_v54  ;;  %v4677_v24 = vsub.f32 0.0, %v12192_v14  ;;  %v12227_v22 = vmul.f32 0.70710677, %v12214_v49 }
 0x44d   :  { %6763 = vst.msk [vmem:[%s12756_s3 + $0xe4] sm:$0xf] %vm6705_vm5, %v7202_v57  ;;  %v4103_v35 = vadd.f32 -0.28449672, %v3959_v13  ;;  %v3309_v8 = vmul.f32 1.0614054, %v12216_v41  ;;  %v12240_v44 = vadd.f32 %v12126_v2, %v2007_v34  ;;  %v12243_v15 = vadd.f32 %v12126_v2, %v2079_v37 }
 0x44e   :  { %v5826_v25 = vsel %vm5538_vm10, %v5394_v11, %v5682_v52  ;;  %v2880_v3 = vadd.f32 1.0, %v2736_v39  ;;  %v5615_v62 = vsub.f32 0.0, %v5327_v55  ;;  %vm5471_vm11 = vcmp.ge.f32.partialorder %v12079_v50, 0.0 }
 0x44f   :  { %v5970_v27 = vadd.f32 1.0, %v5826_v25  ;;  %v4247_v38 = vmul.f32 %v12181_v59, %v4103_v35  ;;  %v3453_v28 = vadd.f32 -1.4531521, %v3309_v8  ;;  %v12232_v60 = vand.u32 2147483647, %v12227_v22 }
 0x450   :  { %8084 = vrcp.f32 %v2880_v3  ;;  %v5759_v32 = vsel %vm5471_vm11, %v5327_v55, %v5615_v62  ;;  %v2303_v1 = vmul.f32 0.5, %v12070_v47  ;;  %v4821_v16 = vmul.f32 %v4677_v24, %v12192_v14 }
 0x451   :  { %v6114_v18 = vmul.f32 %v5970_v27, %v2370_v21  ;;  %v4391_v46 = vadd.f32 0.2548296, %v4247_v38  ;;  %v3597_v45 = vmul.f32 %v12216_v41, %v3453_v28  ;;  %v5903_v7 = vadd.f32 1.0, %v5759_v32 }
 0x452   :  { %v2808_v17 = vmul.f32 0.3275911, %v12232_v60  ;;  %v8079_v20 = vpop.eup %8078  ;;  %v4608_v23 = vsub.f32 0.0, %v2592_v61  ;;  %v5097_v51 = vmul.f32 1.442695, %v4821_v16  ;;  %v2375_v33 = vmul.f32 0.5, %v12092_v29 }
 0x453   :  { %v7274_v50 = vpack.c.bf16 %v6114_v18, %v6114_v18  ;;  %v4535_v31 = vmul.f32 %v12181_v59, %v4391_v46  ;;  %v3741_v12 = vadd.f32 1.4214138, %v3597_v45  ;;  %v6047_v4 = vmul.f32 %v5903_v7, %v2303_v1 }
 0x454   :  { %v2952_v48 = vadd.f32 1.0, %v2808_v17  ;;  %v12251_v59 = vmul.f32 0.70710677, %v12240_v44  ;;  %vm5543_vm12 = vcmp.ge.f32.partialorder %v12104_v26, 0.0  ;;  %v4752_v0 = vmul.f32 %v4608_v23, %v2592_v61 }
 0x455   :  { %6835 = vst.msk [vmem:[%s12756_s3 + $0x204] sm:$0xf] %vm6705_vm5, %v7274_v50  ;;  %v5255_v47 = vmul.f32 %v8079_v20, %v4535_v31  ;;  %v3885_v14 = vmul.f32 %v12216_v41, %v3741_v12  ;;  %v7207_v6 = vpack.c.bf16 %v6047_v4, %v6047_v4  ;;  %v12264_v30 = vmul.f32 0.70710677, %v12243_v15  ;;  %v2010_v4 = vld [vmem:[#allocation2 + $0x200] sm:$0xff] }
 0x456   :  { %v12253_v5 = vpop.eup %8080  ;;  %8086 = vrcp.f32 %v2952_v48  ;;  %v2590_v9 = vand.u32 2147483647, %v12251_v59  ;;  %v12268_v54 = vadd.f32 %v12126_v2, %v2012_v63  ;;  %v12271_v21 = vmul.f32 0.5, %v12129_v42 }
 0x457   :  { %v5399_v19 = vsub.f32 1.0, %v5255_v47  ;;  %v4029_v10 = vadd.f32 -0.28449672, %v3885_v14  ;;  %v3381_v40 = vmul.f32 1.0614054, %v12253_v5  ;;  %v4680_v52 = vsub.f32 0.0, %v12232_v60 }
 0x458   :  { %6768 = vst.msk [vmem:[%s12756_s3 + $0xf8] sm:$0xf] %vm6705_vm5, %v7207_v6  ;;  %v8083_v13 = vpop.eup %8082  ;;  %v2734_v26 = vmul.f32 0.3275911, %v2590_v9  ;;  %v12275_v61 = vand.u32 2147483647, %v12264_v30  ;;  %8088 = vpow2.f32 %v5097_v51 }
 0x459   :  { %v5687_v11 = vsub.f32 0.0, %v5399_v19  ;;  %v4173_v29 = vmul.f32 %v12216_v41, %v4029_v10  ;;  %v3525_v57 = vadd.f32 -1.4531521, %v3381_v40  ;;  %vm5469_vm13 = vcmp.ge.f32.partialorder %v12151_v43, 0.0 }
 0x45a   :  { %v12280_v25 = vmul.f32 0.5, %v12162_v56  ;;  %v2878_v24 = vadd.f32 1.0, %v2734_v26  ;;  %v2806_v42 = vmul.f32 0.3275911, %v12275_v61  ;;  %v4959_v38 = vmul.f32 1.442695, %v4752_v0 }
 0x45b   :  { %v5831_v39 = vsel %vm5543_vm12, %v5399_v19, %v5687_v11  ;;  %v4317_v55 = vadd.f32 0.2548296, %v4173_v29  ;;  %v3669_v35 = vmul.f32 %v12253_v5, %v3525_v57  ;;  %v12287_v28 = vmul.f32 0.70710677, %v12268_v54  ;;  %v2084_v56 = vld [vmem:[#allocation2 + $0x450] sm:$0xff] }
 0x45c   :  { %v5975_v8 = vadd.f32 1.0, %v5831_v39  ;;  %v4824_v32 = vmul.f32 %v4680_v52, %v12232_v60  ;;  %8090 = vrcp.f32 %v2878_v24  ;;  %v4606_v37 = vsub.f32 0.0, %v2590_v9 }
 0x45d   :  { %v12283_v3 = vpop.eup %8084  ;;  %v4461_v27 = vmul.f32 %v12216_v41, %v4317_v55  ;;  %v3813_v62 = vadd.f32 1.4214138, %v3669_v35  ;;  %v2950_v1 = vadd.f32 1.0, %v2806_v42  ;;  %v12293_v41 = vmul.f32 0.5, %v12195_v58 }
 0x45e   :  { %v6119_v34 = vmul.f32 %v5975_v8, %v2375_v33  ;;  %v3312_v18 = vmul.f32 1.0614054, %v12283_v3  ;;  %v12296_v17 = vand.u32 2147483647, %v12287_v28  ;;  %v12299_v60 = vadd.f32 %v12126_v2, %v2084_v56 }
 0x45f   :  { %v5181_v46 = vmul.f32 %v8083_v13, %v4461_v27  ;;  %v3957_v45 = vmul.f32 %v12253_v5, %v3813_v62  ;;  %8092 = vrcp.f32 %v2950_v1  ;;  %v12307_v58 = vmul.f32 0.5, %v12214_v49 }
 0x460   :  { %v7279_v7 = vpack.c.bf16 %v6119_v34, %v6119_v34  ;;  %v3456_v16 = vadd.f32 -1.4531521, %v3312_v18  ;;  %8094 = vpow2.f32 %v4959_v38  ;;  %v2739_v12 = vmul.f32 0.3275911, %v12296_v17 }
 0x461   :  { %v5325_v20 = vsub.f32 1.0, %v5181_v46  ;;  %v4101_v50 = vadd.f32 -0.28449672, %v3957_v45  ;;  %v5103_v14 = vmul.f32 1.442695, %v4824_v32  ;;  %v4750_v6 = vmul.f32 %v4606_v37, %v2590_v9 }
 0x462   :  { %6840 = vst.msk [vmem:[%s12756_s3 + $0x218] sm:$0xf] %vm6705_vm5, %v7279_v7  ;;  %v3600_v31 = vmul.f32 %v12283_v3, %v3456_v16  ;;  %v4678_v33 = vsub.f32 0.0, %v12275_v61  ;;  %v2883_v19 = vadd.f32 1.0, %v2739_v12  ;;  %v12318_v40 = vmul.f32 0.70710677, %v12299_v60 }
 0x463   :  { %v12310_v23 = vpop.eup %8086  ;;  %v5613_v48 = vsub.f32 0.0, %v5325_v20  ;;  %v4245_v47 = vmul.f32 %v12253_v5, %v4101_v50  ;;  %v12321_v0 = vadd.f32 %v12126_v2, %v2010_v4  ;;  %vm5541_vm14 = vcmp.ge.f32.partialorder %v12179_v53, 0.0 }
 0x464   :  { %v3744_v51 = vadd.f32 1.4214138, %v3600_v31  ;;  %v3384_v63 = vmul.f32 1.0614054, %v12310_v23  ;;  %8096 = vrcp.f32 %v2883_v19  ;;  %v12327_v13 = vmul.f32 0.5, %v12240_v44 }
 0x465   :  { %v5757_v49 = vsel %vm5469_vm13, %v5325_v20, %v5613_v48  ;;  %v4389_v10 = vadd.f32 0.2548296, %v4245_v47  ;;  %v4955_v43 = vmul.f32 1.442695, %v4750_v6  ;;  %v12330_v52 = vand.u32 2147483647, %v12318_v40  ;;  %v8089_v26 = vpop.eup %8088 }
 0x466   :  { %v5901_v11 = vadd.f32 1.0, %v5757_v49  ;;  %v3888_v9 = vmul.f32 %v12283_v3, %v3744_v51  ;;  %v3528_v29 = vadd.f32 -1.4531521, %v3384_v63  ;;  %8098 = vpow2.f32 %v5103_v14 }
 0x467   :  { %v4533_v57 = vmul.f32 %v12253_v5, %v4389_v10  ;;  %v12335_v24 = vmul.f32 0.5, %v12243_v15  ;;  %v4822_v5 = vmul.f32 %v4678_v33, %v12275_v61  ;;  %v2811_v44 = vmul.f32 0.3275911, %v12330_v52  ;;  %v2082_v15 = vld [vmem:[#allocation2 + $0x440] sm:$0xff] }
 0x468   :  { %v6045_v39 = vmul.f32 %v5901_v11, %v12271_v21  ;;  %v4032_v55 = vadd.f32 -0.28449672, %v3888_v9  ;;  %v3672_v35 = vmul.f32 %v12310_v23, %v3528_v29  ;;  %v12341_v38 = vmul.f32 0.70710677, %v12321_v0 }
 0x469   :  { %v5253_v8 = vmul.f32 %v8089_v26, %v4533_v57  ;;  %v12343_v21 = vpop.eup %8090  ;;  %8100 = vpow2.f32 %v4955_v43  ;;  %v4611_v18 = vsub.f32 0.0, %v12296_v17  ;;  %v2955_v32 = vadd.f32 1.0, %v2811_v44 }
 0x46a   :  { %v7205_v42 = vpack.c.bf16 %v6045_v39, %v6045_v39  ;;  %v4176_v27 = vmul.f32 %v12283_v3, %v4032_v55  ;;  %v3816_v62 = vadd.f32 1.4214138, %v3672_v35  ;;  %v3310_v46 = vmul.f32 1.0614054, %v12343_v21 }
 0x46b   :  { %v5397_v34 = vsub.f32 1.0, %v5253_v8  ;;  %v12353_v45 = vand.u32 2147483647, %v12341_v38  ;;  %vm5472_vm15 = vcmp.ge.f32.partialorder %v12204_v36, 0.0  ;;  %v5099_v1 = vmul.f32 1.442695, %v4822_v5 }
 0x46c   :  { %6766 = vst.msk [vmem:[%s12756_s3 + $0xf0] sm:$0xf] %vm6705_vm5, %v7205_v42  ;;  %v4320_v61 = vadd.f32 0.2548296, %v4176_v27  ;;  %v3960_v56 = vmul.f32 %v12310_v23, %v3816_v62  ;;  %v12357_v7 = vmul.f32 0.5, %v12268_v54  ;;  %8102 = vrcp.f32 %v2955_v32  ;;  %v12359_v16 = vpop.eup %8092 }
 0x46d   :  { %v5685_v37 = vsub.f32 0.0, %v5397_v34  ;;  %v3454_v31 = vadd.f32 -1.4531521, %v3310_v46  ;;  %v2737_v12 = vmul.f32 0.3275911, %v12353_v45  ;;  %v8095_v4 = vpop.eup %8094  ;;  %v4755_v14 = vmul.f32 %v4611_v18, %v12296_v17 }
 0x46e   :  { %v4464_v20 = vmul.f32 %v12283_v3, %v4320_v61  ;;  %v4104_v50 = vadd.f32 -0.28449672, %v3960_v56  ;;  %v3382_v47 = vmul.f32 1.0614054, %v12359_v16  ;;  %v12368_v54 = vadd.f32 %v12126_v2, %v2082_v15  ;;  %v2013_v61 = vld [vmem:[#allocation2 + $0x218] sm:$0xff] }
 0x46f   :  { %v5829_v48 = vsel %vm5541_vm14, %v5397_v34, %v5685_v37  ;;  %v3598_v3 = vmul.f32 %v12343_v21, %v3454_v31  ;;  %8104 = vpow2.f32 %v5099_v1  ;;  %v4683_v19 = vsub.f32 0.0, %v12330_v52 }
 0x470   :  { %v5973_v6 = vadd.f32 1.0, %v5829_v48  ;;  %v5184_v51 = vmul.f32 %v8095_v4, %v4464_v20  ;;  %v4248_v63 = vmul.f32 %v12310_v23, %v4104_v50  ;;  %v3526_v33 = vadd.f32 -1.4531521, %v3382_v47 }
 0x471   :  { %v2881_v49 = vadd.f32 1.0, %v2737_v12  ;;  %v3742_v9 = vadd.f32 1.4214138, %v3598_v3  ;;  %v12374_v17 = vpop.eup %8096  ;;  %vm5544_vm0 = vcmp.ge.f32.partialorder %v12227_v22, 0.0  ;;  %v4965_v57 = vmul.f32 1.442695, %v4755_v14  ;;  %v7506_v3 = vpop.f32.mrf.mxu1 }
 0x472   :  { %v6117_v53 = vmul.f32 %v5973_v6, %v12280_v25  ;;  %v5328_v10 = vsub.f32 1.0, %v5184_v51  ;;  %v4392_v11 = vadd.f32 0.2548296, %v4248_v63  ;;  %v3670_v29 = vmul.f32 %v12359_v16, %v3526_v33  ;;  %v303_v63 = vld [vmem:[#allocation2 + $0x458] sm:$0xff] }
 0x473   :  { %8106 = vrcp.f32 %v2881_v49  ;;  %v12379_v43 = vmul.f32 0.70710677, %v12368_v54  ;;  %v3886_v25 = vmul.f32 %v12343_v21, %v3742_v9  ;;  %v8099_v35 = vpop.eup %8098  ;;  %v3315_v5 = vmul.f32 1.0614054, %v12374_v17 }
 0x474   :  { %v7277_v26 = vpack.c.bf16 %v6117_v53, %v6117_v53  ;;  %v5616_v39 = vsub.f32 0.0, %v5328_v10  ;;  %v4536_v55 = vmul.f32 %v12310_v23, %v4392_v11  ;;  %v3814_v8 = vadd.f32 1.4214138, %v3670_v29  ;;  %v229_v29 = vld [vmem:[#allocation2 + $0x208] sm:$0xff] }
 0x475   :  { %v12385_v44 = vand.u32 2147483647, %v12379_v43  ;;  %v4030_v62 = vadd.f32 -0.28449672, %v3886_v25  ;;  %v4827_v23 = vmul.f32 %v4683_v19, %v12330_v52  ;;  %v3459_v32 = vadd.f32 -1.4531521, %v3315_v5 }
 0x476   :  { %6838 = vst.msk [vmem:[%s12756_s3 + $0x210] sm:$0xf] %vm6705_vm5, %v7277_v26  ;;  %v5760_v42 = vsel %vm5472_vm15, %v5328_v10, %v5616_v39  ;;  %v5256_v27 = vmul.f32 %v8099_v35, %v4536_v55  ;;  %v3958_v18 = vmul.f32 %v12359_v16, %v3814_v8  ;;  %v8101_v56 = vpop.eup %8100  ;;  %8108 = vpow2.f32 %v4965_v57  ;;  %v1338_v57 = vpop.f32.mrf.mxu0 }
 0x477   :  { %v5904_v34 = vadd.f32 1.0, %v5760_v42  ;;  %v2809_v15 = vmul.f32 0.3275911, %v12385_v44  ;;  %v4174_v37 = vmul.f32 %v12343_v21, %v4030_v62  ;;  %v4609_v1 = vsub.f32 0.0, %v12353_v45 }
 0x478   :  { %v5400_v46 = vsub.f32 1.0, %v5256_v27  ;;  %v4102_v20 = vadd.f32 -0.28449672, %v3958_v18  ;;  %v3603_v50 = vmul.f32 %v12374_v17, %v3459_v32  ;;  %v5109_v48 = vmul.f32 1.442695, %v4827_v23  ;;  %v301_v23 = vld [vmem:[#allocation2 + $0x448] sm:$0xff] }
 0x479   :  { %v6048_v36 = vmul.f32 %v5904_v34, %v12293_v41  ;;  %v2953_v52 = vadd.f32 1.0, %v2809_v15  ;;  %v12400_v31 = vpop.eup %8102  ;;  %v4318_v4 = vadd.f32 0.2548296, %v4174_v37  ;;  %v12403_v47 = vadd.f32 %v12126_v2, %v2013_v61  ;;  %v1626_v34 = vpop.f32.mrf.mxu1 }
 0x47a   :  { %v5688_v12 = vsub.f32 0.0, %v5400_v46  ;;  %vm5470_vm2 = vcmp.ge.f32.partialorder %v12251_v59, 0.0  ;;  %v4246_v6 = vmul.f32 %v12359_v16, %v4102_v20  ;;  %v3747_v51 = vadd.f32 1.4214138, %v3603_v50  ;;  %v234_v50 = vld [vmem:[#allocation2 + $0x230] sm:$0xff] }
 0x47b   :  { %v7208_v14 = vpack.c.bf16 %v6048_v36, %v6048_v36  ;;  %v3387_v41 = vmul.f32 1.0614054, %v12400_v31  ;;  %v4462_v19 = vmul.f32 %v12343_v21, %v4318_v4  ;;  %v4753_v49 = vmul.f32 %v4609_v1, %v12353_v45 }
 0x47c   :  { %v5832_v33 = vsel %vm5544_vm0, %v5400_v46, %v5688_v12  ;;  %8110 = vrcp.f32 %v2953_v52  ;;  %v4390_v10 = vadd.f32 0.2548296, %v4246_v6  ;;  %v3891_v11 = vmul.f32 %v12374_v17, %v3747_v51  ;;  %v8105_v26 = vpop.eup %8104  ;;  %v7437_v52 = vpop.f32.mrf.mxu0 }
 0x47d   :  { %6769 = vst.msk [vmem:[%s12756_s3 + $0xfc] sm:$0xf] %vm6705_vm5, %v7208_v14  ;;  %v5976_v53 = vadd.f32 1.0, %v5832_v33  ;;  %v3531_v9 = vadd.f32 -1.4531521, %v3387_v41  ;;  %v5182_v22 = vmul.f32 %v8101_v56, %v4462_v19  ;;  %vm5542_vm3 = vcmp.ge.f32.partialorder %v12264_v30, 0.0 }
 0x47e   :  { %8112 = vpow2.f32 %v5109_v48  ;;  %v12419_v21 = vmul.f32 0.70710677, %v12403_v47  ;;  %v1793_v45 = vadd.f32 %v7506_v3, %v303_v63  ;;  %v4534_v55 = vmul.f32 %v12359_v16, %v4390_v10  ;;  %v306_v19 = vld [vmem:[#allocation2 + $0x470] sm:$0xff] }
 0x47f   :  { %v6120_v39 = vmul.f32 %v5976_v53, %v12307_v58  ;;  %v4035_v25 = vadd.f32 -0.28449672, %v3891_v11  ;;  %v3675_v35 = vmul.f32 %v12400_v31, %v3531_v9  ;;  %v5326_v5 = vsub.f32 1.0, %v5182_v22 }
 0x480   :  { %v12424_v8 = vpop.eup %8106  ;;  %v4961_v42 = vmul.f32 1.442695, %v4753_v49  ;;  %v12427_v27 = vand.u32 2147483647, %v12419_v21  ;;  %1938 = vst.msk [vmem:[#allocation2 + $0x458] sm:$0xff] %vm19_vm1, %v1793_v45  ;;  %v1719_v62 = vadd.f32 %v1338_v57, %v229_v29  ;;  %v5254_v32 = vmul.f32 %v8105_v26, %v4534_v55  ;;  %v7509_v49 = vpop.f32.mrf.mxu1 }
 0x481   :  { %v7280_v18 = vpack.c.bf16 %v6120_v39, %v6120_v39  ;;  %v4179_v58 = vmul.f32 %v12374_v17, %v4035_v25  ;;  %v3819_v16 = vadd.f32 1.4214138, %v3675_v35  ;;  %v5614_v15 = vsub.f32 0.0, %v5326_v5  ;;  %v232_v25 = vld [vmem:[#allocation2 + $0x220] sm:$0xff]  ;;  %v1351_v35 = vpop.f32.mrf.mxu0 }
 0x482   :  { %v3313_v61 = vmul.f32 1.0614054, %v12424_v8  ;;  %v4681_v56 = vsub.f32 0.0, %v12385_v44  ;;  %v2740_v46 = vmul.f32 0.3275911, %v12427_v27  ;;  %1864 = vst.msk [vmem:[#allocation2 + $0x208] sm:$0xff] %vm19_vm1, %v1719_v62  ;;  %v1791_v20 = vadd.f32 %v1626_v34, %v301_v23 }
 0x483   :  { %6841 = vst.msk [vmem:[%s12756_s3 + $0x21c] sm:$0xf] %vm6705_vm5, %v7280_v18  ;;  %v5398_v37 = vsub.f32 1.0, %v5254_v32  ;;  %v4323_v1 = vadd.f32 0.2548296, %v4179_v58  ;;  %v3963_v36 = vmul.f32 %v12400_v31, %v3819_v16  ;;  %v5758_v12 = vsel %vm5470_vm2, %v5326_v5, %v5614_v15  ;;  %v8109_v14 = vpop.eup %8108 }
 0x484   :  { %vm5475_vm4 = vcmp.ge.f32.partialorder %v12287_v28, 0.0  ;;  %v3457_v4 = vadd.f32 -1.4531521, %v3313_v61  ;;  %8114 = vpow2.f32 %v4961_v42  ;;  %v2884_v48 = vadd.f32 1.0, %v2740_v46  ;;  %1936 = vst.msk [vmem:[#allocation2 + $0x448] sm:$0xff] %vm19_vm1, %v1791_v20 }
 0x485   :  { %v5902_v6 = vadd.f32 1.0, %v5758_v12  ;;  %v5686_v51 = vsub.f32 0.0, %v5398_v37  ;;  %v4467_v41 = vmul.f32 %v12374_v17, %v4323_v1  ;;  %v4107_v63 = vadd.f32 -0.28449672, %v3963_v36 }
 0x486   :  { %v3601_v3 = vmul.f32 %v12424_v8, %v3457_v4  ;;  %v4825_v33 = vmul.f32 %v4681_v56, %v12385_v44  ;;  %8116 = vrcp.f32 %v2884_v48  ;;  %v1724_v59 = vadd.f32 %v7437_v52, %v234_v50 }
 0x487   :  { %v6046_v53 = vmul.f32 %v5902_v6, %v12327_v13  ;;  %v5830_v10 = vsel %vm5542_vm3, %v5398_v37, %v5686_v51  ;;  %v5187_v11 = vmul.f32 %v8109_v14, %v4467_v41  ;;  %v4251_v9 = vmul.f32 %v12400_v31, %v4107_v63  ;;  %v2085_v17 = vld [vmem:[#allocation2 + $0x458] sm:$0xff] }
 0x488   :  { %v5974_v29 = vadd.f32 1.0, %v5830_v10  ;;  %v3745_v57 = vadd.f32 1.4214138, %v3601_v3  ;;  %v4612_v26 = vsub.f32 0.0, %v12427_v27  ;;  %v12453_v22 = vadd.f32 %v12126_v2, %v2085_v17  ;;  %1869 = vst.msk [vmem:[#allocation2 + $0x230] sm:$0xff] %vm19_vm1, %v1724_v59 }
 0x489   :  { %v12456_v44 = vpop.eup %8110  ;;  %v7206_v45 = vpack.c.bf16 %v6046_v53, %v6046_v53  ;;  %v5331_v13 = vsub.f32 1.0, %v5187_v11  ;;  %v4395_v39 = vadd.f32 0.2548296, %v4251_v9  ;;  %v2011_v30 = vld [vmem:[#allocation2 + $0x208] sm:$0xff]  ;;  %v1796_v55 = vadd.f32 %v7509_v49, %v306_v19 }
 0x48a   :  { %v6118_v5 = vmul.f32 %v5974_v29, %v12335_v24  ;;  %v3889_v42 = vmul.f32 %v12424_v8, %v3745_v57  ;;  %v3385_v62 = vmul.f32 1.0614054, %v12456_v44  ;;  %v5105_v23 = vmul.f32 1.442695, %v4825_v33 }
 0x48b   :  { %v8113_v34 = vpop.eup %8112  ;;  %6767 = vst.msk [vmem:[%s12756_s3 + $0xf4] sm:$0xf] %vm6705_vm5, %v7206_v45  ;;  %v5619_v18 = vsub.f32 0.0, %v5331_v13  ;;  %v4539_v32 = vmul.f32 %v12400_v31, %v4395_v39  ;;  %v12467_v58 = vmul.f32 0.70710677, %v12453_v22  ;;  %v12470_v16 = vadd.f32 %v12126_v2, %v2011_v30  ;;  %v2083_v6 = vld [vmem:[#allocation2 + $0x448] sm:$0xff] }
 0x48c   :  { %1941 = vst.msk [vmem:[#allocation2 + $0x470] sm:$0xff] %vm19_vm1, %v1796_v55  ;;  %v7278_v24 = vpack.c.bf16 %v6118_v5, %v6118_v5  ;;  %v4033_v15 = vadd.f32 -0.28449672, %v3889_v42  ;;  %v3529_v61 = vadd.f32 -1.4531521, %v3385_v62  ;;  %v1722_v56 = vadd.f32 %v1351_v35, %v232_v25 }
 0x48d   :  { %v5763_v46 = vsel %vm5475_vm4, %v5331_v13, %v5619_v18  ;;  %v5259_v37 = vmul.f32 %v8113_v34, %v4539_v32  ;;  %v4756_v1 = vmul.f32 %v4612_v26, %v12427_v27  ;;  %v12477_v31 = vand.u32 2147483647, %v12467_v58 }
 0x48e   :  { %6839 = vst.msk [vmem:[%s12756_s3 + $0x214] sm:$0xf] %vm6705_vm5, %v7278_v24  ;;  %v5907_v36 = vadd.f32 1.0, %v5763_v46  ;;  %v4177_v20 = vmul.f32 %v12424_v8, %v4033_v15  ;;  %v3673_v50 = vmul.f32 %v12456_v44, %v3529_v61  ;;  %8118 = vpow2.f32 %v5105_v23 }
 0x48f   :  { %1867 = vst.msk [vmem:[#allocation2 + $0x220] sm:$0xff] %vm19_vm1, %v1722_v56  ;;  %v5403_v28 = vsub.f32 1.0, %v5259_v37  ;;  %v2812_v52 = vmul.f32 0.3275911, %v12477_v31  ;;  %v12488_v27 = vmul.f32 0.70710677, %v12470_v16  ;;  %v12499_v10 = vadd.f32 %v12126_v2, %v2083_v6 }
 0x490   :  { %v6051_v12 = vmul.f32 %v5907_v36, %v12357_v7  ;;  %v2379_v4 = vmul.f32 0.5, %v12299_v60  ;;  %v4321_v48 = vadd.f32 0.2548296, %v4177_v20  ;;  %v3817_v14 = vadd.f32 1.4214138, %v3673_v50  ;;  %v2016_v17 = vld [vmem:[#allocation2 + $0x230] sm:$0xff] }
 0x491   :  { %v8115_v51 = vpop.eup %8114  ;;  %v5691_v41 = vsub.f32 0.0, %v5403_v28  ;;  %v4967_v63 = vmul.f32 1.442695, %v4756_v1  ;;  %v2956_v3 = vadd.f32 1.0, %v2812_v52  ;;  %v2594_v33 = vand.u32 2147483647, %v12488_v27 }
 0x492   :  { %v7211_v59 = vpack.c.bf16 %v6051_v12, %v6051_v12  ;;  %vm5547_vm6 = vcmp.ge.f32.partialorder %v12318_v40, 0.0  ;;  %v4465_v19 = vmul.f32 %v12424_v8, %v4321_v48  ;;  %v3961_v49 = vmul.f32 %v12456_v44, %v3817_v14 }
 0x493   :  { %v12496_v53 = vpop.eup %8116  ;;  %v5835_v7 = vsel %vm5547_vm6, %v5403_v28, %v5691_v41  ;;  %8120 = vrcp.f32 %v2956_v3  ;;  %v2738_v60 = vmul.f32 0.3275911, %v2594_v33  ;;  %v4684_v39 = vsub.f32 0.0, %v12477_v31  ;;  %v2088_v15 = vld [vmem:[#allocation2 + $0x470] sm:$0xff] }
 0x494   :  { %6772 = vst.msk [vmem:[%s12756_s3 + $0x108] sm:$0xf] %vm6705_vm5, %v7211_v59  ;;  %v5979_v11 = vadd.f32 1.0, %v5835_v7  ;;  %v5185_v9 = vmul.f32 %v8115_v51, %v4465_v19  ;;  %v4105_v40 = vadd.f32 -0.28449672, %v3961_v49  ;;  %8122 = vpow2.f32 %v4967_v63 }
 0x495   :  { %v3316_v8 = vmul.f32 1.0614054, %v12496_v53  ;;  %v2882_v29 = vadd.f32 1.0, %v2738_v60  ;;  %v12509_v30 = vmul.f32 0.70710677, %v12499_v10  ;;  %v12512_v55 = vadd.f32 %v12126_v2, %v2016_v17 }
 0x496   :  { %v6123_v57 = vmul.f32 %v5979_v11, %v2379_v4  ;;  %v5329_v26 = vsub.f32 1.0, %v5185_v9  ;;  %v4249_v45 = vmul.f32 %v12456_v44, %v4105_v40  ;;  %vm5473_vm7 = vcmp.ge.f32.partialorder %v12341_v38, 0.0  ;;  %v2014_v48 = vld [vmem:[#allocation2 + $0x220] sm:$0xff] }
 0x497   :  { %v3460_v13 = vadd.f32 -1.4531521, %v3316_v8  ;;  %8124 = vrcp.f32 %v2882_v29  ;;  %v4610_v62 = vsub.f32 0.0, %v2594_v33  ;;  %v12517_v23 = vand.u32 2147483647, %v12509_v30  ;;  %v1639_v8 = vpop.f32.mrf.mxu1 }
 0x498   :  { %v7283_v25 = vpack.c.bf16 %v6123_v57, %v6123_v57  ;;  %v5617_v35 = vsub.f32 0.0, %v5329_v26  ;;  %v4393_v5 = vadd.f32 0.2548296, %v4249_v45  ;;  %v12525_v24 = vmul.f32 0.70710677, %v12512_v55 }
 0x499   :  { %v3604_v42 = vmul.f32 %v12496_v53, %v3460_v13  ;;  %v2305_v38 = vmul.f32 0.5, %v12321_v0  ;;  %v2810_v46 = vmul.f32 0.3275911, %v12517_v23  ;;  %v4828_v36 = vmul.f32 %v4684_v39, %v12477_v31 }
 0x49a   :  { %6844 = vst.msk [vmem:[%s12756_s3 + $0x228] sm:$0xf] %vm6705_vm5, %v7283_v25  ;;  %v5761_v34 = vsel %vm5473_vm7, %v5329_v26, %v5617_v35  ;;  %v4537_v18 = vmul.f32 %v12456_v44, %v4393_v5  ;;  %v12532_v20 = vand.u32 2147483647, %v12525_v24  ;;  %v12535_v28 = vadd.f32 %v12126_v2, %v2088_v15  ;;  %v7438_v25 = vpop.f32.mrf.mxu0 }
 0x49b   :  { %v3748_v32 = vadd.f32 1.4214138, %v3604_v42  ;;  %v8119_v61 = vpop.eup %8118  ;;  %v5905_v56 = vadd.f32 1.0, %v5761_v34  ;;  %v2954_v50 = vadd.f32 1.0, %v2810_v46  ;;  %v4754_v4 = vmul.f32 %v4610_v62, %v2594_v33  ;;  %v12553_v33 = vld [vmem:[%s12755_s2] ss:$0 sm:$0xff] }
 0x49c   :  { %v5257_v37 = vmul.f32 %v8119_v61, %v4537_v18  ;;  %v2743_v0 = vmul.f32 0.3275911, %v12532_v20  ;;  %v5111_v41 = vmul.f32 1.442695, %v4828_v36  ;;  %vm5545_vm8 = vcmp.ge.f32.partialorder %v12379_v43, 0.0  ;;  %v235_v46 = vld [vmem:[#allocation2 + $0x238] sm:$0xff] }
 0x49d   :  { %v3892_v1 = vmul.f32 %v12496_v53, %v3748_v32  ;;  %v6049_v44 = vmul.f32 %v5905_v56, %v2305_v38  ;;  %8126 = vrcp.f32 %v2954_v50  ;;  %v12548_v3 = vmul.f32 0.70710677, %v12535_v28  ;;  %v7510_v32 = vpop.f32.mrf.mxu1  ;;  %v233_v50 = vld [vmem:[#allocation2 + $0x228] sm:$0xff] }
 0x49e   :  { %v5401_v52 = vsub.f32 1.0, %v5257_v37  ;;  %v2887_v63 = vadd.f32 1.0, %v2743_v0  ;;  %v12556_v59 = vadd.f32 %v12553_v33, %v2014_v48  ;;  %v4963_v60 = vmul.f32 1.442695, %v4754_v4  ;;  %v307_v37 = vld [vmem:[#allocation2 + $0x478] sm:$0xff] }
 0x49f   :  { %v4036_v12 = vadd.f32 -0.28449672, %v3892_v1  ;;  %v7209_v14 = vpack.c.bf16 %v6049_v44, %v6049_v44  ;;  %v2377_v43 = vmul.f32 0.5, %v12368_v54  ;;  %v12560_v40 = vand.u32 2147483647, %v12548_v3 }
 0x4a0   :  { %v12538_v6 = vpop.eup %8120  ;;  %v5689_v51 = vsub.f32 0.0, %v5401_v52  ;;  %8128 = vrcp.f32 %v2887_v63  ;;  %v4682_v57 = vsub.f32 0.0, %v12517_v23  ;;  %v12567_v26 = vmul.f32 0.70710677, %v12556_v59 }
 0x4a1   :  { %v4180_v31 = vmul.f32 %v12496_v53, %v4036_v12  ;;  %6770 = vst.msk [vmem:[%s12756_s3 + $0x100] sm:$0xf] %vm6705_vm5, %v7209_v14  ;;  %v3388_v2 = vmul.f32 1.0614054, %v12538_v6  ;;  %v8123_v19 = vpop.eup %8122  ;;  %8130 = vpow2.f32 %v5111_v41  ;;  %v2815_v39 = vmul.f32 0.3275911, %v12560_v40  ;;  %v1642_v41 = vpop.f32.mrf.mxu1 }
 0x4a2   :  { %v5833_v49 = vsel %vm5545_vm8, %v5401_v52, %v5689_v51  ;;  %8132 = vpow2.f32 %v4963_v60  ;;  %v12573_v5 = vand.u32 2147483647, %v12567_v26  ;;  %v4826_v61 = vmul.f32 %v4682_v57, %v12517_v23  ;;  %v1354_v52 = vpop.f32.mrf.mxu0 }
 0x4a3   :  { %v4324_v7 = vadd.f32 0.2548296, %v4180_v31  ;;  %v5977_v11 = vadd.f32 1.0, %v5833_v49  ;;  %v3532_v9 = vadd.f32 -1.4531521, %v3388_v2  ;;  %v2959_v18 = vadd.f32 1.0, %v2815_v39 }
 0x4a4   :  { %v12562_v17 = vpop.eup %8124  ;;  %v4615_v38 = vsub.f32 0.0, %v12532_v20  ;;  %v2741_v56 = vmul.f32 0.3275911, %v12573_v5  ;;  %v2308_v23 = vmul.f32 0.5, %v12403_v47  ;;  %vm5476_vm9 = vcmp.ge.f32.partialorder %v12419_v21, 0.0  ;;  %v305_v31 = vld [vmem:[#allocation2 + $0x468] sm:$0xff] }
 0x4a5   :  { %v4468_v29 = vmul.f32 %v12496_v53, %v4324_v7  ;;  %v6121_v45 = vmul.f32 %v5977_v11, %v2377_v43  ;;  %v3676_v13 = vmul.f32 %v12538_v6, %v3532_v9  ;;  %v3314_v54 = vmul.f32 1.0614054, %v12562_v17  ;;  %v304_v53 = vld [vmem:[#allocation2 + $0x460] sm:$0xff] }
 0x4a6   :  { %8134 = vrcp.f32 %v2959_v18  ;;  %v1794_v44 = vadd.f32 %v1639_v8, %v304_v53  ;;  %v2885_v4 = vadd.f32 1.0, %v2741_v56  ;;  %v1725_v14 = vadd.f32 %v7438_v25, %v235_v46 }
 0x4a7   :  { %v5188_v35 = vmul.f32 %v8123_v19, %v4468_v29  ;;  %v7281_v42 = vpack.c.bf16 %v6121_v45, %v6121_v45  ;;  %v3820_v62 = vadd.f32 1.4214138, %v3676_v13  ;;  %v3458_v34 = vadd.f32 -1.4531521, %v3314_v54 }
 0x4a8   :  { %1939 = vst.msk [vmem:[#allocation2 + $0x460] sm:$0xff] %vm19_vm1, %v1794_v44  ;;  %v1797_v51 = vadd.f32 %v7510_v32, %v307_v37  ;;  %v5107_v19 = vmul.f32 1.442695, %v4826_v61  ;;  %v4759_v49 = vmul.f32 %v4615_v38, %v12532_v20  ;;  %v1723_v7 = vadd.f32 %v1354_v52, %v233_v50  ;;  %1870 = vst.msk [vmem:[#allocation2 + $0x238] sm:$0xff] %vm19_vm1, %v1725_v14 }
 0x4a9   :  { %v5332_v15 = vsub.f32 1.0, %v5188_v35  ;;  %6842 = vst.msk [vmem:[%s12756_s3 + $0x220] sm:$0xf] %vm6705_vm5, %v7281_v42  ;;  %v3964_v1 = vmul.f32 %v12538_v6, %v3820_v62  ;;  %v3602_v36 = vmul.f32 %v12562_v17, %v3458_v34  ;;  %v4687_v11 = vsub.f32 0.0, %v12560_v40 }
 0x4aa   :  { %v12587_v63 = vpop.eup %8126  ;;  %1942 = vst.msk [vmem:[#allocation2 + $0x478] sm:$0xff] %vm19_vm1, %v1797_v51  ;;  %8136 = vrcp.f32 %v2885_v4  ;;  %1868 = vst.msk [vmem:[#allocation2 + $0x228] sm:$0xff] %vm19_vm1, %v1723_v7  ;;  %v1795_v9 = vadd.f32 %v1642_v41, %v305_v31  ;;  %v4973_v54 = vmul.f32 1.442695, %v4759_v49  ;;  %v4613_v39 = vsub.f32 0.0, %v12573_v5 }
 0x4ab   :  { %v5620_v12 = vsub.f32 0.0, %v5332_v15  ;;  %v4108_v0 = vadd.f32 -0.28449672, %v3964_v1  ;;  %v3746_v48 = vadd.f32 1.4214138, %v3602_v36  ;;  %8138 = vpow2.f32 %v5107_v19 }
 0x4ac   :  { %v3386_v43 = vmul.f32 1.0614054, %v12587_v63  ;;  %1940 = vst.msk [vmem:[#allocation2 + $0x468] sm:$0xff] %vm19_vm1, %v1795_v9  ;;  %v2380_v34 = vmul.f32 0.5, %v12453_v22  ;;  %v4831_v32 = vmul.f32 %v4687_v11, %v12560_v40  ;;  %vm5548_vm1 = vcmp.ge.f32.partialorder %v12467_v58, 0.0 }
 0x4ad   :  { %v5764_v2 = vsel %vm5476_vm9, %v5332_v15, %v5620_v12  ;;  %v4252_v21 = vmul.f32 %v12538_v6, %v4108_v0  ;;  %v3890_v60 = vmul.f32 %v12562_v17, %v3746_v48  ;;  %v12597_v8 = vpop.eup %8128  ;;  %8140 = vpow2.f32 %v4973_v54 }
 0x4ae   :  { %v5908_v47 = vadd.f32 1.0, %v5764_v2  ;;  %v3530_v45 = vadd.f32 -1.4531521, %v3386_v43  ;;  %v3319_v13 = vmul.f32 1.0614054, %v12597_v8  ;;  %v8131_v25 = vpop.eup %8130  ;;  %v4757_v40 = vmul.f32 %v4613_v39, %v12573_v5 }
 0x4af   :  { %v4396_v29 = vadd.f32 0.2548296, %v4252_v21  ;;  %v4034_v57 = vadd.f32 -0.28449672, %v3890_v60  ;;  %v2086_v15 = vld [vmem:[#allocation2 + $0x460] sm:$0xff]  ;;  %v8133_v61 = vpop.eup %8132  ;;  %v2017_v37 = vld [vmem:[#allocation2 + $0x238] sm:$0xff] }
 0x4b0   :  { %v6052_v20 = vmul.f32 %v5908_v47, %v2308_v23  ;;  %v3674_v62 = vmul.f32 %v12587_v63, %v3530_v45  ;;  %v3463_v18 = vadd.f32 -1.4531521, %v3319_v13  ;;  %v2306_v36 = vmul.f32 0.5, %v12470_v16 }
 0x4b1   :  { %v4540_v53 = vmul.f32 %v12538_v6, %v4396_v29  ;;  %v4178_v42 = vmul.f32 %v12562_v17, %v4034_v57  ;;  %v12612_v6 = vadd.f32 %v12553_v33, %v2086_v15  ;;  %v5117_v12 = vmul.f32 1.442695, %v4831_v32  ;;  %v2089_v13 = vld [vmem:[#allocation2 + $0x478] sm:$0xff] }
 0x4b2   :  { %v7212_v35 = vpack.c.bf16 %v6052_v20, %v6052_v20  ;;  %v3818_v46 = vadd.f32 1.4214138, %v3674_v62  ;;  %v3607_v22 = vmul.f32 %v12597_v8, %v3463_v18  ;;  %v12626_v0 = vadd.f32 %v12553_v33, %v2017_v37 }
 0x4b3   :  { %v5260_v38 = vmul.f32 %v8131_v25, %v4540_v53  ;;  %v4322_v56 = vadd.f32 0.2548296, %v4178_v42  ;;  %v12620_v52 = vpop.eup %8134  ;;  %v12623_v4 = vmul.f32 0.70710677, %v12612_v6  ;;  %vm5474_vm10 = vcmp.ge.f32.partialorder %v12488_v27, 0.0 }
 0x4b4   :  { %6773 = vst.msk [vmem:[%s12756_s3 + $0x10c] sm:$0xf] %vm6705_vm5, %v7212_v35  ;;  %v3962_v50 = vmul.f32 %v12587_v63, %v3818_v46  ;;  %v3751_v23 = vadd.f32 1.4214138, %v3607_v22  ;;  %v3391_v51 = vmul.f32 1.0614054, %v12620_v52  ;;  %8142 = vpow2.f32 %v5117_v12 }
 0x4b5   :  { %v5404_v1 = vsub.f32 1.0, %v5260_v38  ;;  %v4466_v44 = vmul.f32 %v12562_v17, %v4322_v56  ;;  %v4969_v17 = vmul.f32 1.442695, %v4757_v40  ;;  %v12632_v31 = vand.u32 2147483647, %v12623_v4 }
 0x4b6   :  { %v4106_v14 = vadd.f32 -0.28449672, %v3962_v50  ;;  %v3895_v16 = vmul.f32 %v12597_v8, %v3751_v23  ;;  %v3535_v49 = vadd.f32 -1.4531521, %v3391_v51  ;;  %v12642_v20 = vmul.f32 0.70710677, %v12626_v0 }
 0x4b7   :  { %v5692_v48 = vsub.f32 0.0, %v5404_v1  ;;  %v5186_v5 = vmul.f32 %v8133_v61, %v4466_v44  ;;  %v2813_v21 = vmul.f32 0.3275911, %v12632_v31  ;;  %v12638_v60 = vpop.eup %8136  ;;  %8144 = vpow2.f32 %v4969_v17  ;;  %v2015_v50 = vld [vmem:[#allocation2 + $0x228] sm:$0xff] }
 0x4b8   :  { %v4250_v19 = vmul.f32 %v12587_v63, %v4106_v14  ;;  %v4039_v47 = vadd.f32 -0.28449672, %v3895_v16  ;;  %v3679_v9 = vmul.f32 %v12620_v52, %v3535_v49  ;;  %v3317_v57 = vmul.f32 1.0614054, %v12638_v60  ;;  %v8139_v54 = vpop.eup %8138 }
 0x4b9   :  { %v5836_v41 = vsel %vm5548_vm1, %v5404_v1, %v5692_v48  ;;  %v5330_v2 = vsub.f32 1.0, %v5186_v5  ;;  %v2957_v45 = vadd.f32 1.0, %v2813_v21  ;;  %v12651_v15 = vadd.f32 %v12553_v33, %v2089_v13 }
 0x4ba   :  { %v5980_v7 = vadd.f32 1.0, %v5836_v41  ;;  %v4394_v11 = vadd.f32 0.2548296, %v4250_v19  ;;  %v4183_v29 = vmul.f32 %v12597_v8, %v4039_v47  ;;  %v3823_v35 = vadd.f32 1.4214138, %v3679_v9  ;;  %v8141_v56 = vpop.eup %8140  ;;  %v2087_v9 = vld [vmem:[#allocation2 + $0x468] sm:$0xff] }
 0x4bb   :  { %v5618_v43 = vsub.f32 0.0, %v5330_v2  ;;  %v3461_v18 = vadd.f32 -1.4531521, %v3317_v57  ;;  %8146 = vrcp.f32 %v2957_v45  ;;  %v12660_v38 = vand.u32 2147483647, %v12642_v20 }
 0x4bc   :  { %v6124_v58 = vmul.f32 %v5980_v7, %v2380_v34  ;;  %v4538_v25 = vmul.f32 %v12587_v63, %v4394_v11  ;;  %v4327_v62 = vadd.f32 0.2548296, %v4183_v29  ;;  %v3967_v34 = vmul.f32 %v12620_v52, %v3823_v35 }
 0x4bd   :  { %v5762_v39 = vsel %vm5474_vm10, %v5330_v2, %v5618_v43  ;;  %v3605_v61 = vmul.f32 %v12638_v60, %v3461_v18  ;;  %v2744_v44 = vmul.f32 0.3275911, %v12660_v38  ;;  %vm5546_vm11 = vcmp.ge.f32.partialorder %v12509_v30, 0.0 }
 0x4be   :  { %v7284_v53 = vpack.c.bf16 %v6124_v58, %v6124_v58  ;;  %v5906_v42 = vadd.f32 1.0, %v5762_v39  ;;  %v5258_v32 = vmul.f32 %v8139_v54, %v4538_v25  ;;  %v4471_v63 = vmul.f32 %v12597_v8, %v4327_v62 }
 0x4bf   :  { %v4111_v22 = vadd.f32 -0.28449672, %v3967_v34  ;;  %v3749_v1 = vadd.f32 1.4214138, %v3605_v61  ;;  %v4685_v8 = vsub.f32 0.0, %v12632_v31  ;;  %v2888_v5 = vadd.f32 1.0, %v2744_v44 }
 0x4c0   :  { %6845 = vst.msk [vmem:[%s12756_s3 + $0x22c] sm:$0xf] %vm6705_vm5, %v7284_v53  ;;  %v6050_v27 = vmul.f32 %v5906_v42, %v2306_v36  ;;  %v5402_v46 = vsub.f32 1.0, %v5258_v32  ;;  %v5191_v37 = vmul.f32 %v8141_v56, %v4471_v63  ;;  %v12672_v14 = vmul.f32 0.70710677, %v12651_v15 }
 0x4c1   :  { %v4255_v36 = vmul.f32 %v12620_v52, %v4111_v22  ;;  %v3893_v48 = vmul.f32 %v12638_v60, %v3749_v1  ;;  %v2378_v51 = vmul.f32 0.5, %v12499_v10  ;;  %v12676_v17 = vadd.f32 %v12553_v33, %v2015_v50  ;;  %v8143_v49 = vpop.eup %8142 }
 0x4c2   :  { %v7210_v40 = vpack.c.bf16 %v6050_v27, %v6050_v27  ;;  %v5690_v23 = vsub.f32 0.0, %v5402_v46  ;;  %v5335_v12 = vsub.f32 1.0, %v5191_v37  ;;  %8148 = vrcp.f32 %v2888_v5 }
 0x4c3   :  { %v4399_v16 = vadd.f32 0.2548296, %v4255_v36  ;;  %v4037_v19 = vadd.f32 -0.28449672, %v3893_v48  ;;  %vm5479_vm12 = vcmp.ge.f32.partialorder %v12525_v24, 0.0  ;;  %v4829_v11 = vmul.f32 %v4685_v8, %v12632_v31 }
 0x4c4   :  { %6771 = vst.msk [vmem:[%s12756_s3 + $0x104] sm:$0xf] %vm6705_vm5, %v7210_v40  ;;  %v5834_v30 = vsel %vm5546_vm11, %v5402_v46, %v5690_v23  ;;  %v5623_v2 = vsub.f32 0.0, %v5335_v12  ;;  %v12681_v47 = vand.u32 2147483647, %v12672_v14  ;;  %v2311_v58 = vmul.f32 0.5, %v12512_v55  ;;  %v8145_v13 = vpop.eup %8144 }
 0x4c5   :  { %v5978_v41 = vadd.f32 1.0, %v5834_v30  ;;  %v4543_v7 = vmul.f32 %v12620_v52, %v4399_v16  ;;  %v4181_v10 = vmul.f32 %v12638_v60, %v4037_v19  ;;  %v12688_v52 = vmul.f32 0.70710677, %v12676_v17 }
 0x4c6   :  { %v5767_v43 = vsel %vm5479_vm12, %v5335_v12, %v5623_v2  ;;  %v2816_v45 = vmul.f32 0.3275911, %v12681_v47  ;;  %v12691_v53 = vadd.f32 %v12553_v33, %v2087_v9  ;;  %v5113_v42 = vmul.f32 1.442695, %v4829_v11 }
 0x4c7   :  { %v6122_v21 = vmul.f32 %v5978_v41, %v2378_v51  ;;  %v5911_v29 = vadd.f32 1.0, %v5767_v43  ;;  %v5263_v57 = vmul.f32 %v8143_v49, %v4543_v7  ;;  %v4325_v54 = vadd.f32 0.2548296, %v4181_v10 }
 0x4c8   :  { %v2960_v35 = vadd.f32 1.0, %v2816_v45  ;;  %v8147_v31 = vpop.eup %8146  ;;  %v4616_v62 = vsub.f32 0.0, %v12660_v38  ;;  %v2598_v18 = vand.u32 2147483647, %v12688_v52  ;;  %vm5551_vm13 = vcmp.ge.f32.partialorder %v12548_v3, 0.0 }
 0x4c9   :  { %v7282_v24 = vpack.c.bf16 %v6122_v21, %v6122_v21  ;;  %v6055_v39 = vmul.f32 %v5911_v29, %v2311_v58  ;;  %v5407_v25 = vsub.f32 1.0, %v5263_v57  ;;  %v4469_v55 = vmul.f32 %v12638_v60, %v4325_v54 }
 0x4ca   :  { %v3389_v27 = vmul.f32 1.0614054, %v8147_v31  ;;  %8150 = vrcp.f32 %v2960_v35  ;;  %v2742_v63 = vmul.f32 0.3275911, %v2598_v18  ;;  %v2383_v60 = vmul.f32 0.5, %v12535_v28 }
 0x4cb   :  { %6843 = vst.msk [vmem:[%s12756_s3 + $0x224] sm:$0xf] %vm6705_vm5, %v7282_v24  ;;  %v7215_v32 = vpack.c.bf16 %v6055_v39, %v6055_v39  ;;  %v5695_v34 = vsub.f32 0.0, %v5407_v25  ;;  %v5189_v33 = vmul.f32 %v8145_v13, %v4469_v55  ;;  %v12707_v46 = vmul.f32 0.70710677, %v12691_v53 }
 0x4cc   :  { %v3533_v56 = vadd.f32 -1.4531521, %v3389_v27  ;;  %v4760_v37 = vmul.f32 %v4616_v62, %v12660_v38  ;;  %v2886_v1 = vadd.f32 1.0, %v2742_v63  ;;  %8152 = vpow2.f32 %v5113_v42 }
 0x4cd   :  { %6776 = vst.msk [vmem:[%s12756_s3 + $0x118] sm:$0xf] %vm6705_vm5, %v7215_v32  ;;  %v5839_v61 = vsel %vm5551_vm13, %v5407_v25, %v5695_v34  ;;  %v5333_v40 = vsub.f32 1.0, %v5189_v33  ;;  %v2670_v44 = vand.u32 2147483647, %v12707_v46  ;;  %vm5477_vm14 = vcmp.ge.f32.partialorder %v12567_v26, 0.0 }
 0x4ce   :  { %v5983_v22 = vadd.f32 1.0, %v5839_v61  ;;  %v3677_v3 = vmul.f32 %v8147_v31, %v3533_v56  ;;  %8154 = vrcp.f32 %v2886_v1  ;;  %v4688_v8 = vsub.f32 0.0, %v12681_v47 }
 0x4cf   :  { %v5621_v23 = vsub.f32 0.0, %v5333_v40  ;;  %v8149_v36 = vpop.eup %8148  ;;  %v2814_v12 = vmul.f32 0.3275911, %v2670_v44  ;;  %v4975_v30 = vmul.f32 1.442695, %v4760_v37  ;;  %v2309_v38 = vmul.f32 0.5, %v12556_v59 }
 0x4d0   :  { %v6127_v50 = vmul.f32 %v5983_v22, %v2383_v60  ;;  %v3821_v28 = vadd.f32 1.4214138, %v3677_v3  ;;  %v3320_v51 = vmul.f32 1.0614054, %v8149_v36  ;;  %v4832_v7 = vmul.f32 %v4688_v8, %v12681_v47 }
 0x4d1   :  { %v5765_v5 = vsel %vm5477_vm14, %v5333_v40, %v5621_v23  ;;  %v2958_v2 = vadd.f32 1.0, %v2814_v12  ;;  %v4614_v43 = vsub.f32 0.0, %v2598_v18  ;;  %v4686_v54 = vsub.f32 0.0, %v2670_v44 }
 0x4d2   :  { %v7287_v48 = vpack.c.bf16 %v6127_v50, %v6127_v50  ;;  %v5909_v16 = vadd.f32 1.0, %v5765_v5  ;;  %v3965_v41 = vmul.f32 %v8147_v31, %v3821_v28  ;;  %v3464_v19 = vadd.f32 -1.4531521, %v3320_v51 }
 0x4d3   :  { %8156 = vrcp.f32 %v2958_v2  ;;  %v5119_v57 = vmul.f32 1.442695, %v4832_v7  ;;  %v4758_v13 = vmul.f32 %v4614_v43, %v2598_v18  ;;  %v4830_v63 = vmul.f32 %v4686_v54, %v2670_v44 }
 0x4d4   :  { %6848 = vst.msk [vmem:[%s12756_s3 + $0x238] sm:$0xf] %vm6705_vm5, %v7287_v48  ;;  %v6053_v26 = vmul.f32 %v5909_v16, %v2309_v38  ;;  %v4109_v49 = vadd.f32 -0.28449672, %v3965_v41  ;;  %v3608_v21 = vmul.f32 %v8149_v36, %v3464_v19  ;;  %8158 = vpow2.f32 %v4975_v30 }
 0x4d5   :  { %8160 = vpow2.f32 %v5119_v57  ;;  %v4971_v34 = vmul.f32 1.442695, %v4758_v13  ;;  %vm5549_vm15 = vcmp.ge.f32.partialorder %v12623_v4, 0.0  ;;  %v5115_v23 = vmul.f32 1.442695, %v4830_v63 }
 0x4d6   :  { %v7213_v10 = vpack.c.bf16 %v6053_v26, %v6053_v26  ;;  %v4253_v11 = vmul.f32 %v8147_v31, %v4109_v49  ;;  %v3752_v9 = vadd.f32 1.4214138, %v3608_v21  ;;  %v2381_v28 = vmul.f32 0.5, %v12612_v6 }
 0x4d7   :  { %v8151_v59 = vpop.eup %8150  ;;  %8162 = vpow2.f32 %v4971_v34  ;;  %vm5480_vm0 = vcmp.ge.f32.partialorder %v12642_v20, 0.0  ;;  %v2312_v21 = vmul.f32 0.5, %v12626_v0  ;;  %vm5552_vm2 = vcmp.ge.f32.partialorder %v12672_v14, 0.0 }
 0x4d8   :  { %6774 = vst.msk [vmem:[%s12756_s3 + $0x110] sm:$0xf] %vm6705_vm5, %v7213_v10  ;;  %v4397_v58 = vadd.f32 0.2548296, %v4253_v11  ;;  %v3392_v29 = vmul.f32 1.0614054, %v8151_v59  ;;  %v3896_v45 = vmul.f32 %v8149_v36, %v3752_v9  ;;  %8164 = vpow2.f32 %v5115_v23 }
 0x4d9   :  { %v8153_v39 = vpop.eup %8152  ;;  %vm5478_vm3 = vcmp.ge.f32.partialorder %v12688_v52, 0.0  ;;  %vm5550_vm4 = vcmp.ge.f32.partialorder %v12707_v46, 0.0  ;;  %v2382_v52 = vmul.f32 0.5, %v12691_v53 }
 0x4da   :  { %v4541_v24 = vmul.f32 %v8147_v31, %v4397_v58  ;;  %v3536_v47 = vadd.f32 -1.4531521, %v3392_v29  ;;  %v4040_v25 = vadd.f32 -0.28449672, %v3896_v45 }
 0x4db   :  { %v8155_v35 = vpop.eup %8154 }
 0x4dc   :  { %v5261_v55 = vmul.f32 %v8153_v39, %v4541_v24  ;;  %v3680_v42 = vmul.f32 %v8151_v59, %v3536_v47  ;;  %v4184_v62 = vmul.f32 %v8149_v36, %v4040_v25  ;;  %v3318_v32 = vmul.f32 1.0614054, %v8155_v35 }
 0x4dd   :  { %v2384_v39 = vmul.f32 0.5, %v12651_v15 }
 0x4de   :  { %v5405_v27 = vsub.f32 1.0, %v5261_v55  ;;  %v3824_v33 = vadd.f32 1.4214138, %v3680_v42  ;;  %v4328_v60 = vadd.f32 0.2548296, %v4184_v62 }
 0x4df   :  { %v3462_v61 = vadd.f32 -1.4531521, %v3318_v32 }
 0x4e0   :  { %v5693_v56 = vsub.f32 0.0, %v5405_v27  ;;  %v3968_v22 = vmul.f32 %v8151_v59, %v3824_v33  ;;  %v8157_v18 = vpop.eup %8156  ;;  %v4472_v31 = vmul.f32 %v8149_v36, %v4328_v60  ;;  %v2310_v33 = vmul.f32 0.5, %v12676_v17 }
 0x4e1   :  { %v3606_v40 = vmul.f32 %v8155_v35, %v3462_v61  ;;  %v8159_v37 = vpop.eup %8158  ;;  %v3390_v50 = vmul.f32 1.0614054, %v8157_v18 }
 0x4e2   :  { %v5837_v1 = vsel %vm5549_vm15, %v5405_v27, %v5693_v56  ;;  %v4112_v3 = vadd.f32 -0.28449672, %v3968_v22  ;;  %v5192_v12 = vmul.f32 %v8159_v37, %v4472_v31  ;;  %v8161_v49 = vpop.eup %8160 }
 0x4e3   :  { %v5981_v8 = vadd.f32 1.0, %v5837_v1  ;;  %v3750_v44 = vadd.f32 1.4214138, %v3606_v40  ;;  %v3534_v5 = vadd.f32 -1.4531521, %v3390_v50 }
 0x4e4   :  { %v4256_v48 = vmul.f32 %v8151_v59, %v4112_v3  ;;  %v5336_v30 = vsub.f32 1.0, %v5192_v12 }
 0x4e5   :  { %v6125_v51 = vmul.f32 %v5981_v8, %v2381_v28  ;;  %v3894_v38 = vmul.f32 %v8155_v35, %v3750_v44  ;;  %v3678_v4 = vmul.f32 %v8157_v18, %v3534_v5 }
 0x4e6   :  { %v4400_v16 = vadd.f32 0.2548296, %v4256_v48  ;;  %v5624_v41 = vsub.f32 0.0, %v5336_v30 }
 0x4e7   :  { %v7285_v36 = vpack.c.bf16 %v6125_v51, %v6125_v51  ;;  %v4038_v2 = vadd.f32 -0.28449672, %v3894_v38  ;;  %v3822_v26 = vadd.f32 1.4214138, %v3678_v4 }
 0x4e8   :  { %v4544_v19 = vmul.f32 %v8151_v59, %v4400_v16  ;;  %v5768_v6 = vsel %vm5480_vm0, %v5336_v30, %v5624_v41  ;;  %v8163_v59 = vpop.eup %8162 }
 0x4e9   :  { %6846 = vst.msk [vmem:[%s12756_s3 + $0x230] sm:$0xf] %vm6705_vm5, %v7285_v36  ;;  %v4182_v7 = vmul.f32 %v8155_v35, %v4038_v2  ;;  %v5912_v43 = vadd.f32 1.0, %v5768_v6  ;;  %v3966_v11 = vmul.f32 %v8157_v18, %v3822_v26 }
 0x4ea   :  { %v5264_v10 = vmul.f32 %v8161_v49, %v4544_v19 }
 0x4eb   :  { %v4326_v9 = vadd.f32 0.2548296, %v4182_v7  ;;  %v6056_v58 = vmul.f32 %v5912_v43, %v2312_v21  ;;  %v4110_v57 = vadd.f32 -0.28449672, %v3966_v11 }
 0x4ec   :  { %v5408_v29 = vsub.f32 1.0, %v5264_v10 }
 0x4ed   :  { %v4470_v20 = vmul.f32 %v8155_v35, %v4326_v9  ;;  %v7216_v45 = vpack.c.bf16 %v6056_v58, %v6056_v58  ;;  %v4254_v24 = vmul.f32 %v8157_v18, %v4110_v57  ;;  %v8165_v35 = vpop.eup %8164 }
 0x4ee   :  { %v5696_v13 = vsub.f32 0.0, %v5408_v29 }
 0x4ef   :  { %v5190_v47 = vmul.f32 %v8163_v59, %v4470_v20  ;;  %6777 = vst.msk [vmem:[%s12756_s3 + $0x11c] sm:$0xf] %vm6705_vm5, %v7216_v45  ;;  %v4398_v54 = vadd.f32 0.2548296, %v4254_v24 }
 0x4f0   :  { %v5840_v0 = vsel %vm5552_vm2, %v5408_v29, %v5696_v13 }
 0x4f1   :  { %v5984_v25 = vadd.f32 1.0, %v5840_v0  ;;  %v5334_v55 = vsub.f32 1.0, %v5190_v47  ;;  %v4542_v42 = vmul.f32 %v8157_v18, %v4398_v54 }
 0x4f3   :  { %v6128_v62 = vmul.f32 %v5984_v25, %v2384_v39  ;;  %v5622_v32 = vsub.f32 0.0, %v5334_v55  ;;  %v5262_v34 = vmul.f32 %v8165_v35, %v4542_v42 }
 0x4f5   :  { %v7288_v14 = vpack.c.bf16 %v6128_v62, %v6128_v62  ;;  %v5766_v27 = vsel %vm5478_vm3, %v5334_v55, %v5622_v32  ;;  %v5406_v60 = vsub.f32 1.0, %v5262_v34 }
 0x4f6   :  { %v5910_v63 = vadd.f32 1.0, %v5766_v27 }
 0x4f7   :  { %6849 = vst.msk [vmem:[%s12756_s3 + $0x23c] sm:$0xf] %vm6705_vm5, %v7288_v14  ;;  %v5694_v61 = vsub.f32 0.0, %v5406_v60 }
 0x4f8   :  { %v6054_v15 = vmul.f32 %v5910_v63, %v2310_v33 }
 0x4f9   :  { %v5838_v22 = vsel %vm5550_vm4, %v5406_v60, %v5694_v61 }
 0x4fa   :  { %v7214_v56 = vpack.c.bf16 %v6054_v15, %v6054_v15  ;;  %v5982_v18 = vadd.f32 1.0, %v5838_v22 }
 0x4fc   :  { %6775 = vst.msk [vmem:[%s12756_s3 + $0x114] sm:$0xf] %vm6705_vm5, %v7214_v56  ;;  %v6126_v17 = vmul.f32 %v5982_v18, %v2382_v52 }
 0x4fe   :  { %v7286_v31 = vpack.c.bf16 %v6126_v17, %v6126_v17 }
 0x500   :  { %6847 = vst.msk [vmem:[%s12756_s3 + $0x234] sm:$0xf] %vm6705_vm5, %v7286_v31 }

</bundles_post_ra>
